<compile_context>
chip_gen: v6e
topology: v6e:2x2x1
jax: 0.10.0
libtpu: 0.0.40
codegen_flags: <defaults>
</compile_context>

<pallas_src>
import functools

import jax
import jax.numpy as jnp
from jax.experimental import pallas as pl
from jax.experimental.pallas import tpu as pltpu


def _round_up(x, m):
    return ((x + m - 1) // m) * m


# ----------------------------- static network dims -----------------------------
K = 5                    # conv kernel size
CIN = 3                  # input channels
C1 = 64                  # conv1 out channels
C2 = 64                  # conv2 out channels
HIN = 32                 # input height/width
OH1 = HIN - K + 1        # 28  conv1 output h/w
PH1 = OH1 // 2           # 14  pooled1 h/w
OH2 = PH1 - K + 1        # 10  conv2 output h/w
PH2 = OH2 // 2           # 5   pooled2 h/w
M1 = OH1 * OH1           # 784 conv1 output rows, row = oh*28 + ow
N1 = PH1 * PH1           # 196 pooled1 rows, row = h*14 + w
M2 = OH2 * PH1           # 140 conv2 shift-trick rows, row = oh2*14 + w' (w' in [0,14))
FCIN = PH2 * PH2 * C2    # 1600
FC1 = 384
FC2 = 192
KKC = K * K * CIN        # 75  conv1 contraction depth
KKCP = _round_up(KKC, 8)  # 80 (zero padded)

# Pooling never reads out-of-range / garbage rows only because OH1 and OH2 are even.
assert OH1 % 2 == 0 and OH2 % 2 == 0
# pool1 max source row, conv2 max LHS row, pool2 max source row (all in-bounds):
assert 2 * (PH1 - 1) * OH1 + (OH1 + 1) + 2 * (PH1 - 1) == M1 - 1
assert (K - 1) * PH1 + (K - 1) + M2 - 1 == N1 + K - 2
assert 2 * (PH2 - 1) * PH1 + (PH1 + 1) + 2 * (PH2 - 1) <= M2 - 1


# ------------------------------ fused LeNet kernel ------------------------------

def _lenet_kernel(p1_ref, c1w_ref, c1b_ref, c2w_ref, c2b_ref,
                  f1w_ref, f1b_ref, f2w_ref, f2b_ref, f3w_ref, f3b_ref,
                  out_ref,
                  y1_ref, a1_ref, y2_ref, p2_ref, xfc_ref):
    """One image per grid step.

    p1_ref : (1, M1, KKCP) bf16  conv1 im2col patches, row = (oh, ow)
    c1w    : (KKCP, C1) bf16, c1b: (1, C1) f32
    c2w    : (K*K, C1, C2) bf16 (index dh*K+dw), c2b: (1, C2) f32
    f1w    : (FCIN, FC1) bf16 (rows in (h, w, c) order), f1b: (1, FC1) f32
    f2w/f3w, f2b/f3b : fc2 / fc3 (classes padded to a multiple of 128)
    out_ref: (1, 1, NCP) f32 logits (lane dense)
    scratch: y1 (M1, C1) f32, a1 (N1+K-1, C1) bf16, y2 (M2, C2) f32,
             p2 (PH2*PH2, C2) bf16, xfc (1, FCIN) bf16
    """
    # ---- conv1: a single deep MXU dot + bias + ReLU (f32 accum) ----
    y1 = jnp.dot(p1_ref[0], c1w_ref[...], preferred_element_type=jnp.float32)
    y1_ref[...] = jnp.maximum(y1 + c1b_ref[...], 0.0)

    # ---- pool1: 2x2/2 max pool via stride-2 sublane reads, pooled rows only ----
    # pooled (ph, pw) = max of y1 rows 2*ph*OH1 + 2*pw + {0, 1, OH1, OH1+1}
    for ph in range(PH1):
        base = 2 * ph * OH1
        m = jnp.maximum(
            jnp.maximum(y1_ref[pl.ds(base, PH1, stride=2), :],
                        y1_ref[pl.ds(base + 1, PH1, stride=2), :]),
            jnp.maximum(y1_ref[pl.ds(base + OH1, PH1, stride=2), :],
                        y1_ref[pl.ds(base + OH1 + 1, PH1, stride=2), :]))
        a1_ref[pl.ds(ph * PH1, PH1), :] = m.astype(jnp.bfloat16)
    # K-1 tail rows are only ever multiplied into the discarded (w' > OW2-1)
    # shift-trick columns of conv2; keep them deterministic (zero).
    a1_ref[pl.ds(N1, K - 1), :] = jnp.zeros((K - 1, C1), jnp.bfloat16)

    # ---- conv2: shift-and-matmul, 25 dots of depth C1, register accumulation ----
    # a1 rows are (h*PH1 + w); output row r2 = oh2*PH1 + w' equals the conv output
    # at (oh2, w') for w' <= OW2-1; w' in [OW2, PH1) is wrap garbage that pool2
    # never reads.
    acc = None
    for dh in range(K):
        for dw in range(K):
            lhs = a1_ref[pl.ds(dh * PH1 + dw, M2), :]
            d = jnp.dot(lhs, c2w_ref[dh * K + dw],
                        preferred_element_type=jnp.float32)
            acc = d if acc is None else acc + d
    y2_ref[...] = jnp.maximum(acc + c2b_ref[...], 0.0)

    # ---- pool2 (stride-2 reads) + flatten to (1, FCIN) in (h, w, c) order ----
    for ph in range(PH2):
        base = 2 * ph * PH1
        m = jnp.maximum(
            jnp.maximum(y2_ref[pl.ds(base, PH2, stride=2), :],
                        y2_ref[pl.ds(base + 1, PH2, stride=2), :]),
            jnp.maximum(y2_ref[pl.ds(base + PH1, PH2, stride=2), :],
                        y2_ref[pl.ds(base + PH1 + 1, PH2, stride=2), :]))
        p2_ref[pl.ds(ph * PH2, PH2), :] = m.astype(jnp.bfloat16)
    for r in range(PH2 * PH2):                       # row -> lane-block copy
        xfc_ref[:, pl.ds(r * C2, C2)] = p2_ref[pl.ds(r, 1), :]

    # ---- fc1 + ReLU + fc2 + ReLU + fc3 (weights VMEM-resident) ----
    h = jnp.dot(xfc_ref[...], f1w_ref[...], preferred_element_type=jnp.float32)
    h = jnp.maximum(h + f1b_ref[...], 0.0).astype(jnp.bfloat16)
    h = jnp.dot(h, f2w_ref[...], preferred_element_type=jnp.float32)
    h = jnp.maximum(h + f2b_ref[...], 0.0).astype(jnp.bfloat16)
    o = jnp.dot(h, f3w_ref[...], preferred_element_type=jnp.float32) + f3b_ref[...]
    out_ref[0] = o


def _resident(*shape):
    """BlockSpec for a weight that stays VMEM-resident across all grid steps."""
    return pl.BlockSpec(shape, lambda i: (0,) * len(shape))


def lenet_forward(p, x_nchw, *, num_classes=100):
    """x_nchw: (B, 3, 32, 32) f32 (torch layout). Returns (B, num_classes) f32."""
    B, cin, h, w = x_nchw.shape
    assert (cin, h, w) == (CIN, HIN, HIN)
    ncp = p["fc3_w"].shape[1]

    # NCHW -> NHWC bf16, then the only pre-kernel glue: conv1 im2col
    # (B, M1, KKCP), column = (dh*K + dw)*CIN + ci, zero-padded KKC -> KKCP.
    x = jnp.transpose(x_nchw, (0, 2, 3, 1)).astype(jnp.bfloat16)
    patches = jnp.concatenate(
        [x[:, dh:dh + OH1, dw:dw + OH1, :] for dh in range(K) for dw in range(K)],
        axis=-1)
    patches = jnp.pad(patches, ((0, 0), (0, 0), (0, 0), (0, KKCP - KKC)))
    patches = patches.reshape(B, M1, KKCP)

    out = pl.pallas_call(
        _lenet_kernel,
        out_shape=jax.ShapeDtypeStruct((B, 1, ncp), jnp.float32),
        grid=(B,),
        in_specs=[
            pl.BlockSpec((1, M1, KKCP), lambda i: (i, 0, 0)),
            _resident(KKCP, C1), _resident(1, C1),
            _resident(K * K, C1, C2), _resident(1, C2),
            _resident(FCIN, FC1), _resident(1, FC1),
            _resident(FC1, FC2), _resident(1, FC2),
            _resident(FC2, ncp), _resident(1, ncp),
        ],
        out_specs=pl.BlockSpec((1, 1, ncp), lambda i: (i, 0, 0)),
        scratch_shapes=[
            pltpu.VMEM((M1, C1), jnp.float32),          # conv1 + ReLU (pre-pool)
            pltpu.VMEM((N1 + K - 1, C1), jnp.bfloat16),  # pooled1 (+ shift tail)
            pltpu.VMEM((M2, C2), jnp.float32),           # conv2 + ReLU (pre-pool)
            pltpu.VMEM((PH2 * PH2, C2), jnp.bfloat16),   # pooled2
            pltpu.VMEM((1, FCIN), jnp.bfloat16),         # flattened FC input
        ],
        compiler_params=pltpu.CompilerParams(
            dimension_semantics=("parallel",)),
    )(patches, p["c1_w"], p["c1_b"], p["c2_w"], p["c2_b"],
      p["fc1_w"], p["fc1_b"], p["fc2_w"], p["fc2_b"], p["fc3_w"], p["fc3_b"])

    return out.reshape(B, ncp)[:, :num_classes]


# ------------------------------- params / layout --------------------------------

def init_params(key, num_classes=100):
    ks = jax.random.split(key, 10)

    def winit(k, shape, fan_in):
        return jax.random.normal(k, shape, jnp.float32) / jnp.sqrt(fan_in)

    def binit(k, n):
        return 0.1 * jax.random.normal(k, (n,), jnp.float32)

    return {
        "w1": winit(ks[0], (K, K, CIN, C1), K * K * CIN),
        "b1": binit(ks[1], C1),
        "w2": winit(ks[2], (K, K, C1, C2), K * K * C1),
        "b2": binit(ks[3], C2),
        # fc1 rows follow torch's NCHW .view(B, -1) flatten order: (c, h, w)
        "fc1_w": winit(ks[4], (FCIN, FC1), FCIN),
        "fc1_b": binit(ks[5], FC1),
        "fc2_w": winit(ks[6], (FC1, FC2), FC1),
        "fc2_b": binit(ks[7], FC2),
        "fc3_w": winit(ks[8], (FC2, num_classes), FC2),
        "fc3_b": binit(ks[9], num_classes),
    }


def prepare_params(params, num_classes=100):
    """One-time conversion to the kernel layout (bf16 weights, padded / permuted)."""
    ncp = _round_up(num_classes, 128)
    c1_w = jnp.pad(params["w1"].reshape(KKC, C1), ((0, KKCP - KKC), (0, 0)))
    c2_w = params["w2"].reshape(K * K, C1, C2)
    # torch (c, h, w) row order -> kernel (h, w, c) row order
    fc1_w = jnp.transpose(params["fc1_w"].reshape(C2, PH2, PH2, FC1),
                          (1, 2, 0, 3)).reshape(FCIN, FC1)
    fc3_w = jnp.pad(params["fc3_w"], ((0, 0), (0, ncp - num_classes)))
    fc3_b = jnp.pad(params["fc3_b"], ((0, ncp - num_classes),))
    return {
        "c1_w": c1_w.astype(jnp.bfloat16),
        "c1_b": params["b1"].reshape(1, -1),
        "c2_w": c2_w.astype(jnp.bfloat16),
        "c2_b": params["b2"].reshape(1, -1),
        "fc1_w": fc1_w.astype(jnp.bfloat16),
        "fc1_b": params["fc1_b"].reshape(1, -1),
        "fc2_w": params["fc2_w"].astype(jnp.bfloat16),
        "fc2_b": params["fc2_b"].reshape(1, -1),
        "fc3_w": fc3_w.astype(jnp.bfloat16),
        "fc3_b": fc3_b.reshape(1, -1),
    }


# ------------------------------- pure-JAX reference ------------------------------

def lenet_reference(params, x_nchw):
    """Reference with the same bf16-operand / f32-accumulate precision as the kernel."""
    f32, bf16 = jnp.float32, jnp.bfloat16
    x = jnp.transpose(x_nchw, (0, 2, 3, 1)).astype(bf16)

    def conv_relu(v, w, b):
        y = jax.lax.conv_general_dilated(
            v.astype(f32), w.astype(bf16).astype(f32), (1, 1), "VALID",
            dimension_numbers=("NHWC", "HWIO", "NHWC"))
        return jnp.maximum(y + b, 0.0)

    def pool(v):
        b, h, w, c = v.shape
        return v.reshape(b, h // 2, 2, w // 2, 2, c).max(axis=(2, 4))

    y = pool(conv_relu(x, params["w1"], params["b1"])).astype(bf16)
    y = pool(conv_relu(y, params["w2"], params["b2"])).astype(bf16)
    flat = jnp.transpose(y, (0, 3, 1, 2)).reshape(y.shape[0], -1)  # torch (c,h,w)

    def dense(v, w, b):
        return jnp.dot(v.astype(f32), w.astype(bf16).astype(f32)) + b

    h = jnp.maximum(dense(flat, params["fc1_w"], params["fc1_b"]), 0.0).astype(bf16)
    h = jnp.maximum(dense(h, params["fc2_w"], params["fc2_b"]), 0.0).astype(bf16)
    return dense(h, params["fc3_w"], params["fc3_b"])


# --------------------------------------- main ------------------------------------

if __name__ == "__main__":
    key = jax.random.PRNGKey(0)
    k_params, k_x = jax.random.split(key)

    NUM_CLASSES = 100   # BaseConfig.NUM_CLASSES
    BATCH = 2
    raw_params = init_params(k_params, NUM_CLASSES)
    params = prepare_params(raw_params, NUM_CLASSES)
    x = jax.random.normal(k_x, (BATCH, CIN, HIN, HIN), jnp.float32)  # NCHW like torch

    fwd = jax.jit(functools.partial(lenet_forward, num_classes=NUM_CLASSES))
    out = jax.block_until_ready(fwd(params, x))
    assert out.shape == (BATCH, NUM_CLASSES), out.shape
    assert out.dtype == jnp.float32

    ref = jax.block_until_ready(jax.jit(lenet_reference)(raw_params, x))
    err = float(jnp.max(jnp.abs(out - ref.astype(jnp.float32))))
    assert err < 5e-2, f"kernel vs reference mismatch: max |diff| = {err}"
    print("KERNEL_OK")
</pallas_src>

<mosaic_0001>
module attributes {stable_mosaic.version = 11 : i64} {
  func.func @_lenet_kernel(%arg0: i32, %arg1: memref<1x784x80xbf16, #tpu.memory_space<vmem>>, %arg2: memref<80x64xbf16, #tpu.memory_space<vmem>>, %arg3: memref<1x64xf32, #tpu.memory_space<vmem>>, %arg4: memref<25x64x64xbf16, #tpu.memory_space<vmem>>, %arg5: memref<1x64xf32, #tpu.memory_space<vmem>>, %arg6: memref<1600x384xbf16, #tpu.memory_space<vmem>>, %arg7: memref<1x384xf32, #tpu.memory_space<vmem>>, %arg8: memref<384x192xbf16, #tpu.memory_space<vmem>>, %arg9: memref<1x192xf32, #tpu.memory_space<vmem>>, %arg10: memref<192x128xbf16, #tpu.memory_space<vmem>>, %arg11: memref<1x128xf32, #tpu.memory_space<vmem>>, %arg12: memref<1x1x128xf32, #tpu.memory_space<vmem>>, %arg13: memref<784x64xf32, #tpu.memory_space<vmem>>, %arg14: memref<200x64xbf16, #tpu.memory_space<vmem>>, %arg15: memref<140x64xf32, #tpu.memory_space<vmem>>, %arg16: memref<25x64xbf16, #tpu.memory_space<vmem>>, %arg17: memref<1x1600xbf16, #tpu.memory_space<vmem>>) attributes {dimension_semantics = [#tpu.dimension_semantics<parallel>], iteration_bounds = array<i64: 2>, scalar_prefetch = 0 : i64, scratch_operands = 5 : i64, tpu.core_type = #tpu.core_type<tc>, window_params = [{transform_indices = @transform_0, window_bounds = array<i64: 1, 784, 80>}, {pipeline_mode = #tpu.pipeline_mode<synchronous>, transform_indices = @transform_1, window_bounds = array<i64: 80, 64>}, {pipeline_mode = #tpu.pipeline_mode<synchronous>, transform_indices = @transform_2, window_bounds = array<i64: 1, 64>}, {pipeline_mode = #tpu.pipeline_mode<synchronous>, transform_indices = @transform_3, window_bounds = array<i64: 25, 64, 64>}, {pipeline_mode = #tpu.pipeline_mode<synchronous>, transform_indices = @transform_4, window_bounds = array<i64: 1, 64>}, {pipeline_mode = #tpu.pipeline_mode<synchronous>, transform_indices = @transform_5, window_bounds = array<i64: 1600, 384>}, {pipeline_mode = #tpu.pipeline_mode<synchronous>, transform_indices = @transform_6, window_bounds = array<i64: 1, 384>}, {pipeline_mode = #tpu.pipeline_mode<synchronous>, transform_indices = @transform_7, window_bounds = array<i64: 384, 192>}, {pipeline_mode = #tpu.pipeline_mode<synchronous>, transform_indices = @transform_8, window_bounds = array<i64: 1, 192>}, {pipeline_mode = #tpu.pipeline_mode<synchronous>, transform_indices = @transform_9, window_bounds = array<i64: 192, 128>}, {pipeline_mode = #tpu.pipeline_mode<synchronous>, transform_indices = @transform_10, window_bounds = array<i64: 1, 128>}, {transform_indices = @transform_11, window_bounds = array<i64: 1, 1, 128>}]} {
    %c0 = arith.constant 0 : index
    %c0_0 = arith.constant 0 : index
    %c0_1 = arith.constant 0 : index
    %0 = vector.load %arg1[%c0, %c0_0, %c0_1] : memref<1x784x80xbf16, #tpu.memory_space<vmem>>, vector<1x784x80xbf16>
    %1 = vector.shape_cast %0 : vector<1x784x80xbf16> to vector<784x80xbf16>
    %c0_2 = arith.constant 0 : index
    %c0_3 = arith.constant 0 : index
    %2 = vector.load %arg2[%c0_2, %c0_3] : memref<80x64xbf16, #tpu.memory_space<vmem>>, vector<80x64xbf16>
    %cst = arith.constant dense<0.000000e+00> : vector<784x64xf32>
    %3 = tpu.matmul %1, %2, %cst {dimension_numbers = #tpu.dot_dimension_numbers<[1], [0], [0], [1], [0, 0, 1, 1], [], []>} : vector<784x80xbf16>, vector<80x64xbf16>, vector<784x64xf32> -> vector<784x64xf32>
    %c0_4 = arith.constant 0 : index
    %c0_5 = arith.constant 0 : index
    %4 = vector.load %arg3[%c0_4, %c0_5] : memref<1x64xf32, #tpu.memory_space<vmem>>, vector<1x64xf32>
    %5 = vector.broadcast %4 : vector<1x64xf32> to vector<784x64xf32>
    %6 = arith.addf %3, %5 : vector<784x64xf32>
    %cst_6 = arith.constant 0.000000e+00 : f32
    %7 = vector.broadcast %cst_6 : f32 to vector<784x64xf32>
    %8 = arith.maximumf %6, %7 : vector<784x64xf32>
    %c0_7 = arith.constant 0 : index
    %c0_8 = arith.constant 0 : index
    %9 = vector.load %arg13[%c0_7, %c0_8] : memref<784x64xf32, #tpu.memory_space<vmem>>, vector<784x64xf32>
    tpu.vector_store %arg13[%c0_7, %c0_8], %8 {strides = array<i32>} : memref<784x64xf32, #tpu.memory_space<vmem>>, vector<784x64xf32>,
    %c0_9 = arith.constant 0 : index
    %c0_10 = arith.constant 0 : index
    %10 = tpu.strided_load %arg13[%c0_9, %c0_10] {strides = array<i32: 2, 1>} : memref<784x64xf32, #tpu.memory_space<vmem>>, vector<14x64xf32>
    %c1 = arith.constant 1 : index
    %c0_11 = arith.constant 0 : index
    %11 = tpu.strided_load %arg13[%c1, %c0_11] {strides = array<i32: 2, 1>} : memref<784x64xf32, #tpu.memory_space<vmem>>, vector<14x64xf32>
    %12 = arith.maximumf %10, %11 : vector<14x64xf32>
    %c28 = arith.constant 28 : index
    %c0_12 = arith.constant 0 : index
    %13 = tpu.strided_load %arg13[%c28, %c0_12] {strides = array<i32: 2, 1>} : memref<784x64xf32, #tpu.memory_space<vmem>>, vector<14x64xf32>
    %c29 = arith.constant 29 : index
    %c0_13 = arith.constant 0 : index
    %14 = tpu.strided_load %arg13[%c29, %c0_13] {strides = array<i32: 2, 1>} : memref<784x64xf32, #tpu.memory_space<vmem>>, vector<14x64xf32>
    %15 = arith.maximumf %13, %14 : vector<14x64xf32>
    %16 = arith.maximumf %12, %15 : vector<14x64xf32>
    %17 = arith.truncf %16 : vector<14x64xf32> to vector<14x64xbf16>
    %c0_14 = arith.constant 0 : index
    %c0_15 = arith.constant 0 : index
    %18 = vector.load %arg14[%c0_14, %c0_15] : memref<200x64xbf16, #tpu.memory_space<vmem>>, vector<14x64xbf16>
    tpu.vector_store %arg14[%c0_14, %c0_15], %17 {strides = array<i32>} : memref<200x64xbf16, #tpu.memory_space<vmem>>, vector<14x64xbf16>,
    %c56 = arith.constant 56 : index
    %c0_16 = arith.constant 0 : index
    %19 = tpu.strided_load %arg13[%c56, %c0_16] {strides = array<i32: 2, 1>} : memref<784x64xf32, #tpu.memory_space<vmem>>, vector<14x64xf32>
    %c57 = arith.constant 57 : index
    %c0_17 = arith.constant 0 : index
    %20 = tpu.strided_load %arg13[%c57, %c0_17] {strides = array<i32: 2, 1>} : memref<784x64xf32, #tpu.memory_space<vmem>>, vector<14x64xf32>
    %21 = arith.maximumf %19, %20 : vector<14x64xf32>
    %c84 = arith.constant 84 : index
    %c0_18 = arith.constant 0 : index
    %22 = tpu.strided_load %arg13[%c84, %c0_18] {strides = array<i32: 2, 1>} : memref<784x64xf32, #tpu.memory_space<vmem>>, vector<14x64xf32>
    %c85 = arith.constant 85 : index
    %c0_19 = arith.constant 0 : index
    %23 = tpu.strided_load %arg13[%c85, %c0_19] {strides = array<i32: 2, 1>} : memref<784x64xf32, #tpu.memory_space<vmem>>, vector<14x64xf32>
    %24 = arith.maximumf %22, %23 : vector<14x64xf32>
    %25 = arith.maximumf %21, %24 : vector<14x64xf32>
    %26 = arith.truncf %25 : vector<14x64xf32> to vector<14x64xbf16>
    %c14 = arith.constant 14 : index
    %c0_20 = arith.constant 0 : index
    %27 = vector.load %arg14[%c14, %c0_20] : memref<200x64xbf16, #tpu.memory_space<vmem>>, vector<14x64xbf16>
    tpu.vector_store %arg14[%c14, %c0_20], %26 {strides = array<i32>} : memref<200x64xbf16, #tpu.memory_space<vmem>>, vector<14x64xbf16>,
    %c112 = arith.constant 112 : index
    %c0_21 = arith.constant 0 : index
    %28 = tpu.strided_load %arg13[%c112, %c0_21] {strides = array<i32: 2, 1>} : memref<784x64xf32, #tpu.memory_space<vmem>>, vector<14x64xf32>
    %c113 = arith.constant 113 : index
    %c0_22 = arith.constant 0 : index
    %29 = tpu.strided_load %arg13[%c113, %c0_22] {strides = array<i32: 2, 1>} : memref<784x64xf32, #tpu.memory_space<vmem>>, vector<14x64xf32>
    %30 = arith.maximumf %28, %29 : vector<14x64xf32>
    %c140 = arith.constant 140 : index
    %c0_23 = arith.constant 0 : index
    %31 = tpu.strided_load %arg13[%c140, %c0_23] {strides = array<i32: 2, 1>} : memref<784x64xf32, #tpu.memory_space<vmem>>, vector<14x64xf32>
    %c141 = arith.constant 141 : index
    %c0_24 = arith.constant 0 : index
    %32 = tpu.strided_load %arg13[%c141, %c0_24] {strides = array<i32: 2, 1>} : memref<784x64xf32, #tpu.memory_space<vmem>>, vector<14x64xf32>
    %33 = arith.maximumf %31, %32 : vector<14x64xf32>
    %34 = arith.maximumf %30, %33 : vector<14x64xf32>
    %35 = arith.truncf %34 : vector<14x64xf32> to vector<14x64xbf16>
    %c28_25 = arith.constant 28 : index
    %c0_26 = arith.constant 0 : index
    %36 = vector.load %arg14[%c28_25, %c0_26] : memref<200x64xbf16, #tpu.memory_space<vmem>>, vector<14x64xbf16>
    tpu.vector_store %arg14[%c28_25, %c0_26], %35 {strides = array<i32>} : memref<200x64xbf16, #tpu.memory_space<vmem>>, vector<14x64xbf16>,
    %c168 = arith.constant 168 : index
    %c0_27 = arith.constant 0 : index
    %37 = tpu.strided_load %arg13[%c168, %c0_27] {strides = array<i32: 2, 1>} : memref<784x64xf32, #tpu.memory_space<vmem>>, vector<14x64xf32>
    %c169 = arith.constant 169 : index
    %c0_28 = arith.constant 0 : index
    %38 = tpu.strided_load %arg13[%c169, %c0_28] {strides = array<i32: 2, 1>} : memref<784x64xf32, #tpu.memory_space<vmem>>, vector<14x64xf32>
    %39 = arith.maximumf %37, %38 : vector<14x64xf32>
    %c196 = arith.constant 196 : index
    %c0_29 = arith.constant 0 : index
    %40 = tpu.strided_load %arg13[%c196, %c0_29] {strides = array<i32: 2, 1>} : memref<784x64xf32, #tpu.memory_space<vmem>>, vector<14x64xf32>
    %c197 = arith.constant 197 : index
    %c0_30 = arith.constant 0 : index
    %41 = tpu.strided_load %arg13[%c197, %c0_30] {strides = array<i32: 2, 1>} : memref<784x64xf32, #tpu.memory_space<vmem>>, vector<14x64xf32>
    %42 = arith.maximumf %40, %41 : vector<14x64xf32>
    %43 = arith.maximumf %39, %42 : vector<14x64xf32>
    %44 = arith.truncf %43 : vector<14x64xf32> to vector<14x64xbf16>
    %c42 = arith.constant 42 : index
    %c0_31 = arith.constant 0 : index
    %45 = vector.load %arg14[%c42, %c0_31] : memref<200x64xbf16, #tpu.memory_space<vmem>>, vector<14x64xbf16>
    tpu.vector_store %arg14[%c42, %c0_31], %44 {strides = array<i32>} : memref<200x64xbf16, #tpu.memory_space<vmem>>, vector<14x64xbf16>,
    %c224 = arith.constant 224 : index
    %c0_32 = arith.constant 0 : index
    %46 = tpu.strided_load %arg13[%c224, %c0_32] {strides = array<i32: 2, 1>} : memref<784x64xf32, #tpu.memory_space<vmem>>, vector<14x64xf32>
    %c225 = arith.constant 225 : index
    %c0_33 = arith.constant 0 : index
    %47 = tpu.strided_load %arg13[%c225, %c0_33] {strides = array<i32: 2, 1>} : memref<784x64xf32, #tpu.memory_space<vmem>>, vector<14x64xf32>
    %48 = arith.maximumf %46, %47 : vector<14x64xf32>
    %c252 = arith.constant 252 : index
    %c0_34 = arith.constant 0 : index
    %49 = tpu.strided_load %arg13[%c252, %c0_34] {strides = array<i32: 2, 1>} : memref<784x64xf32, #tpu.memory_space<vmem>>, vector<14x64xf32>
    %c253 = arith.constant 253 : index
    %c0_35 = arith.constant 0 : index
    %50 = tpu.strided_load %arg13[%c253, %c0_35] {strides = array<i32: 2, 1>} : memref<784x64xf32, #tpu.memory_space<vmem>>, vector<14x64xf32>
    %51 = arith.maximumf %49, %50 : vector<14x64xf32>
    %52 = arith.maximumf %48, %51 : vector<14x64xf32>
    %53 = arith.truncf %52 : vector<14x64xf32> to vector<14x64xbf16>
    %c56_36 = arith.constant 56 : index
    %c0_37 = arith.constant 0 : index
    %54 = vector.load %arg14[%c56_36, %c0_37] : memref<200x64xbf16, #tpu.memory_space<vmem>>, vector<14x64xbf16>
    tpu.vector_store %arg14[%c56_36, %c0_37], %53 {strides = array<i32>} : memref<200x64xbf16, #tpu.memory_space<vmem>>, vector<14x64xbf16>,
    %c280 = arith.constant 280 : index
    %c0_38 = arith.constant 0 : index
    %55 = tpu.strided_load %arg13[%c280, %c0_38] {strides = array<i32: 2, 1>} : memref<784x64xf32, #tpu.memory_space<vmem>>, vector<14x64xf32>
    %c281 = arith.constant 281 : index
    %c0_39 = arith.constant 0 : index
    %56 = tpu.strided_load %arg13[%c281, %c0_39] {strides = array<i32: 2, 1>} : memref<784x64xf32, #tpu.memory_space<vmem>>, vector<14x64xf32>
    %57 = arith.maximumf %55, %56 : vector<14x64xf32>
    %c308 = arith.constant 308 : index
    %c0_40 = arith.constant 0 : index
    %58 = tpu.strided_load %arg13[%c308, %c0_40] {strides = array<i32: 2, 1>} : memref<784x64xf32, #tpu.memory_space<vmem>>, vector<14x64xf32>
    %c309 = arith.constant 309 : index
    %c0_41 = arith.constant 0 : index
    %59 = tpu.strided_load %arg13[%c309, %c0_41] {strides = array<i32: 2, 1>} : memref<784x64xf32, #tpu.memory_space<vmem>>, vector<14x64xf32>
    %60 = arith.maximumf %58, %59 : vector<14x64xf32>
    %61 = arith.maximumf %57, %60 : vector<14x64xf32>
    %62 = arith.truncf %61 : vector<14x64xf32> to vector<14x64xbf16>
    %c70 = arith.constant 70 : index
    %c0_42 = arith.constant 0 : index
    %63 = vector.load %arg14[%c70, %c0_42] : memref<200x64xbf16, #tpu.memory_space<vmem>>, vector<14x64xbf16>
    tpu.vector_store %arg14[%c70, %c0_42], %62 {strides = array<i32>} : memref<200x64xbf16, #tpu.memory_space<vmem>>, vector<14x64xbf16>,
    %c336 = arith.constant 336 : index
    %c0_43 = arith.constant 0 : index
    %64 = tpu.strided_load %arg13[%c336, %c0_43] {strides = array<i32: 2, 1>} : memref<784x64xf32, #tpu.memory_space<vmem>>, vector<14x64xf32>
    %c337 = arith.constant 337 : index
    %c0_44 = arith.constant 0 : index
    %65 = tpu.strided_load %arg13[%c337, %c0_44] {strides = array<i32: 2, 1>} : memref<784x64xf32, #tpu.memory_space<vmem>>, vector<14x64xf32>
    %66 = arith.maximumf %64, %65 : vector<14x64xf32>
    %c364 = arith.constant 364 : index
    %c0_45 = arith.constant 0 : index
    %67 = tpu.strided_load %arg13[%c364, %c0_45] {strides = array<i32: 2, 1>} : memref<784x64xf32, #tpu.memory_space<vmem>>, vector<14x64xf32>
    %c365 = arith.constant 365 : index
    %c0_46 = arith.constant 0 : index
    %68 = tpu.strided_load %arg13[%c365, %c0_46] {strides = array<i32: 2, 1>} : memref<784x64xf32, #tpu.memory_space<vmem>>, vector<14x64xf32>
    %69 = arith.maximumf %67, %68 : vector<14x64xf32>
    %70 = arith.maximumf %66, %69 : vector<14x64xf32>
    %71 = arith.truncf %70 : vector<14x64xf32> to vector<14x64xbf16>
    %c84_47 = arith.constant 84 : index
    %c0_48 = arith.constant 0 : index
    %72 = vector.load %arg14[%c84_47, %c0_48] : memref<200x64xbf16, #tpu.memory_space<vmem>>, vector<14x64xbf16>
    tpu.vector_store %arg14[%c84_47, %c0_48], %71 {strides = array<i32>} : memref<200x64xbf16, #tpu.memory_space<vmem>>, vector<14x64xbf16>,
    %c392 = arith.constant 392 : index
    %c0_49 = arith.constant 0 : index
    %73 = tpu.strided_load %arg13[%c392, %c0_49] {strides = array<i32: 2, 1>} : memref<784x64xf32, #tpu.memory_space<vmem>>, vector<14x64xf32>
    %c393 = arith.constant 393 : index
    %c0_50 = arith.constant 0 : index
    %74 = tpu.strided_load %arg13[%c393, %c0_50] {strides = array<i32: 2, 1>} : memref<784x64xf32, #tpu.memory_space<vmem>>, vector<14x64xf32>
    %75 = arith.maximumf %73, %74 : vector<14x64xf32>
    %c420 = arith.constant 420 : index
    %c0_51 = arith.constant 0 : index
    %76 = tpu.strided_load %arg13[%c420, %c0_51] {strides = array<i32: 2, 1>} : memref<784x64xf32, #tpu.memory_space<vmem>>, vector<14x64xf32>
    %c421 = arith.constant 421 : index
    %c0_52 = arith.constant 0 : index
    %77 = tpu.strided_load %arg13[%c421, %c0_52] {strides = array<i32: 2, 1>} : memref<784x64xf32, #tpu.memory_space<vmem>>, vector<14x64xf32>
    %78 = arith.maximumf %76, %77 : vector<14x64xf32>
    %79 = arith.maximumf %75, %78 : vector<14x64xf32>
    %80 = arith.truncf %79 : vector<14x64xf32> to vector<14x64xbf16>
    %c98 = arith.constant 98 : index
    %c0_53 = arith.constant 0 : index
    %81 = vector.load %arg14[%c98, %c0_53] : memref<200x64xbf16, #tpu.memory_space<vmem>>, vector<14x64xbf16>
    tpu.vector_store %arg14[%c98, %c0_53], %80 {strides = array<i32>} : memref<200x64xbf16, #tpu.memory_space<vmem>>, vector<14x64xbf16>,
    %c448 = arith.constant 448 : index
    %c0_54 = arith.constant 0 : index
    %82 = tpu.strided_load %arg13[%c448, %c0_54] {strides = array<i32: 2, 1>} : memref<784x64xf32, #tpu.memory_space<vmem>>, vector<14x64xf32>
    %c449 = arith.constant 449 : index
    %c0_55 = arith.constant 0 : index
    %83 = tpu.strided_load %arg13[%c449, %c0_55] {strides = array<i32: 2, 1>} : memref<784x64xf32, #tpu.memory_space<vmem>>, vector<14x64xf32>
    %84 = arith.maximumf %82, %83 : vector<14x64xf32>
    %c476 = arith.constant 476 : index
    %c0_56 = arith.constant 0 : index
    %85 = tpu.strided_load %arg13[%c476, %c0_56] {strides = array<i32: 2, 1>} : memref<784x64xf32, #tpu.memory_space<vmem>>, vector<14x64xf32>
    %c477 = arith.constant 477 : index
    %c0_57 = arith.constant 0 : index
    %86 = tpu.strided_load %arg13[%c477, %c0_57] {strides = array<i32: 2, 1>} : memref<784x64xf32, #tpu.memory_space<vmem>>, vector<14x64xf32>
    %87 = arith.maximumf %85, %86 : vector<14x64xf32>
    %88 = arith.maximumf %84, %87 : vector<14x64xf32>
    %89 = arith.truncf %88 : vector<14x64xf32> to vector<14x64xbf16>
    %c112_58 = arith.constant 112 : index
    %c0_59 = arith.constant 0 : index
    %90 = vector.load %arg14[%c112_58, %c0_59] : memref<200x64xbf16, #tpu.memory_space<vmem>>, vector<14x64xbf16>
    tpu.vector_store %arg14[%c112_58, %c0_59], %89 {strides = array<i32>} : memref<200x64xbf16, #tpu.memory_space<vmem>>, vector<14x64xbf16>,
    %c504 = arith.constant 504 : index
    %c0_60 = arith.constant 0 : index
    %91 = tpu.strided_load %arg13[%c504, %c0_60] {strides = array<i32: 2, 1>} : memref<784x64xf32, #tpu.memory_space<vmem>>, vector<14x64xf32>
    %c505 = arith.constant 505 : index
    %c0_61 = arith.constant 0 : index
    %92 = tpu.strided_load %arg13[%c505, %c0_61] {strides = array<i32: 2, 1>} : memref<784x64xf32, #tpu.memory_space<vmem>>, vector<14x64xf32>
    %93 = arith.maximumf %91, %92 : vector<14x64xf32>
    %c532 = arith.constant 532 : index
    %c0_62 = arith.constant 0 : index
    %94 = tpu.strided_load %arg13[%c532, %c0_62] {strides = array<i32: 2, 1>} : memref<784x64xf32, #tpu.memory_space<vmem>>, vector<14x64xf32>
    %c533 = arith.constant 533 : index
    %c0_63 = arith.constant 0 : index
    %95 = tpu.strided_load %arg13[%c533, %c0_63] {strides = array<i32: 2, 1>} : memref<784x64xf32, #tpu.memory_space<vmem>>, vector<14x64xf32>
    %96 = arith.maximumf %94, %95 : vector<14x64xf32>
    %97 = arith.maximumf %93, %96 : vector<14x64xf32>
    %98 = arith.truncf %97 : vector<14x64xf32> to vector<14x64xbf16>
    %c126 = arith.constant 126 : index
    %c0_64 = arith.constant 0 : index
    %99 = vector.load %arg14[%c126, %c0_64] : memref<200x64xbf16, #tpu.memory_space<vmem>>, vector<14x64xbf16>
    tpu.vector_store %arg14[%c126, %c0_64], %98 {strides = array<i32>} : memref<200x64xbf16, #tpu.memory_space<vmem>>, vector<14x64xbf16>,
    %c560 = arith.constant 560 : index
    %c0_65 = arith.constant 0 : index
    %100 = tpu.strided_load %arg13[%c560, %c0_65] {strides = array<i32: 2, 1>} : memref<784x64xf32, #tpu.memory_space<vmem>>, vector<14x64xf32>
    %c561 = arith.constant 561 : index
    %c0_66 = arith.constant 0 : index
    %101 = tpu.strided_load %arg13[%c561, %c0_66] {strides = array<i32: 2, 1>} : memref<784x64xf32, #tpu.memory_space<vmem>>, vector<14x64xf32>
    %102 = arith.maximumf %100, %101 : vector<14x64xf32>
    %c588 = arith.constant 588 : index
    %c0_67 = arith.constant 0 : index
    %103 = tpu.strided_load %arg13[%c588, %c0_67] {strides = array<i32: 2, 1>} : memref<784x64xf32, #tpu.memory_space<vmem>>, vector<14x64xf32>
    %c589 = arith.constant 589 : index
    %c0_68 = arith.constant 0 : index
    %104 = tpu.strided_load %arg13[%c589, %c0_68] {strides = array<i32: 2, 1>} : memref<784x64xf32, #tpu.memory_space<vmem>>, vector<14x64xf32>
    %105 = arith.maximumf %103, %104 : vector<14x64xf32>
    %106 = arith.maximumf %102, %105 : vector<14x64xf32>
    %107 = arith.truncf %106 : vector<14x64xf32> to vector<14x64xbf16>
    %c140_69 = arith.constant 140 : index
    %c0_70 = arith.constant 0 : index
    %108 = vector.load %arg14[%c140_69, %c0_70] : memref<200x64xbf16, #tpu.memory_space<vmem>>, vector<14x64xbf16>
    tpu.vector_store %arg14[%c140_69, %c0_70], %107 {strides = array<i32>} : memref<200x64xbf16, #tpu.memory_space<vmem>>, vector<14x64xbf16>,
    %c616 = arith.constant 616 : index
    %c0_71 = arith.constant 0 : index
    %109 = tpu.strided_load %arg13[%c616, %c0_71] {strides = array<i32: 2, 1>} : memref<784x64xf32, #tpu.memory_space<vmem>>, vector<14x64xf32>
    %c617 = arith.constant 617 : index
    %c0_72 = arith.constant 0 : index
    %110 = tpu.strided_load %arg13[%c617, %c0_72] {strides = array<i32: 2, 1>} : memref<784x64xf32, #tpu.memory_space<vmem>>, vector<14x64xf32>
    %111 = arith.maximumf %109, %110 : vector<14x64xf32>
    %c644 = arith.constant 644 : index
    %c0_73 = arith.constant 0 : index
    %112 = tpu.strided_load %arg13[%c644, %c0_73] {strides = array<i32: 2, 1>} : memref<784x64xf32, #tpu.memory_space<vmem>>, vector<14x64xf32>
    %c645 = arith.constant 645 : index
    %c0_74 = arith.constant 0 : index
    %113 = tpu.strided_load %arg13[%c645, %c0_74] {strides = array<i32: 2, 1>} : memref<784x64xf32, #tpu.memory_space<vmem>>, vector<14x64xf32>
    %114 = arith.maximumf %112, %113 : vector<14x64xf32>
    %115 = arith.maximumf %111, %114 : vector<14x64xf32>
    %116 = arith.truncf %115 : vector<14x64xf32> to vector<14x64xbf16>
    %c154 = arith.constant 154 : index
    %c0_75 = arith.constant 0 : index
    %117 = vector.load %arg14[%c154, %c0_75] : memref<200x64xbf16, #tpu.memory_space<vmem>>, vector<14x64xbf16>
    tpu.vector_store %arg14[%c154, %c0_75], %116 {strides = array<i32>} : memref<200x64xbf16, #tpu.memory_space<vmem>>, vector<14x64xbf16>,
    %c672 = arith.constant 672 : index
    %c0_76 = arith.constant 0 : index
    %118 = tpu.strided_load %arg13[%c672, %c0_76] {strides = array<i32: 2, 1>} : memref<784x64xf32, #tpu.memory_space<vmem>>, vector<14x64xf32>
    %c673 = arith.constant 673 : index
    %c0_77 = arith.constant 0 : index
    %119 = tpu.strided_load %arg13[%c673, %c0_77] {strides = array<i32: 2, 1>} : memref<784x64xf32, #tpu.memory_space<vmem>>, vector<14x64xf32>
    %120 = arith.maximumf %118, %119 : vector<14x64xf32>
    %c700 = arith.constant 700 : index
    %c0_78 = arith.constant 0 : index
    %121 = tpu.strided_load %arg13[%c700, %c0_78] {strides = array<i32: 2, 1>} : memref<784x64xf32, #tpu.memory_space<vmem>>, vector<14x64xf32>
    %c701 = arith.constant 701 : index
    %c0_79 = arith.constant 0 : index
    %122 = tpu.strided_load %arg13[%c701, %c0_79] {strides = array<i32: 2, 1>} : memref<784x64xf32, #tpu.memory_space<vmem>>, vector<14x64xf32>
    %123 = arith.maximumf %121, %122 : vector<14x64xf32>
    %124 = arith.maximumf %120, %123 : vector<14x64xf32>
    %125 = arith.truncf %124 : vector<14x64xf32> to vector<14x64xbf16>
    %c168_80 = arith.constant 168 : index
    %c0_81 = arith.constant 0 : index
    %126 = vector.load %arg14[%c168_80, %c0_81] : memref<200x64xbf16, #tpu.memory_space<vmem>>, vector<14x64xbf16>
    tpu.vector_store %arg14[%c168_80, %c0_81], %125 {strides = array<i32>} : memref<200x64xbf16, #tpu.memory_space<vmem>>, vector<14x64xbf16>,
    %c728 = arith.constant 728 : index
    %c0_82 = arith.constant 0 : index
    %127 = tpu.strided_load %arg13[%c728, %c0_82] {strides = array<i32: 2, 1>} : memref<784x64xf32, #tpu.memory_space<vmem>>, vector<14x64xf32>
    %c729 = arith.constant 729 : index
    %c0_83 = arith.constant 0 : index
    %128 = tpu.strided_load %arg13[%c729, %c0_83] {strides = array<i32: 2, 1>} : memref<784x64xf32, #tpu.memory_space<vmem>>, vector<14x64xf32>
    %129 = arith.maximumf %127, %128 : vector<14x64xf32>
    %c756 = arith.constant 756 : index
    %c0_84 = arith.constant 0 : index
    %130 = tpu.strided_load %arg13[%c756, %c0_84] {strides = array<i32: 2, 1>} : memref<784x64xf32, #tpu.memory_space<vmem>>, vector<14x64xf32>
    %c757 = arith.constant 757 : index
    %c0_85 = arith.constant 0 : index
    %131 = tpu.strided_load %arg13[%c757, %c0_85] {strides = array<i32: 2, 1>} : memref<784x64xf32, #tpu.memory_space<vmem>>, vector<14x64xf32>
    %132 = arith.maximumf %130, %131 : vector<14x64xf32>
    %133 = arith.maximumf %129, %132 : vector<14x64xf32>
    %134 = arith.truncf %133 : vector<14x64xf32> to vector<14x64xbf16>
    %c182 = arith.constant 182 : index
    %c0_86 = arith.constant 0 : index
    %135 = vector.load %arg14[%c182, %c0_86] : memref<200x64xbf16, #tpu.memory_space<vmem>>, vector<14x64xbf16>
    tpu.vector_store %arg14[%c182, %c0_86], %134 {strides = array<i32>} : memref<200x64xbf16, #tpu.memory_space<vmem>>, vector<14x64xbf16>,
    %cst_87 = arith.constant 0.000000e+00 : bf16
    %136 = vector.broadcast %cst_87 : bf16 to vector<4x64xbf16>
    %c196_88 = arith.constant 196 : index
    %c0_89 = arith.constant 0 : index
    %137 = vector.load %arg14[%c196_88, %c0_89] : memref<200x64xbf16, #tpu.memory_space<vmem>>, vector<4x64xbf16>
    tpu.vector_store %arg14[%c196_88, %c0_89], %136 {strides = array<i32>} : memref<200x64xbf16, #tpu.memory_space<vmem>>, vector<4x64xbf16>,
    %c0_90 = arith.constant 0 : index
    %c0_91 = arith.constant 0 : index
    %138 = vector.load %arg14[%c0_90, %c0_91] : memref<200x64xbf16, #tpu.memory_space<vmem>>, vector<140x64xbf16>
    %c0_92 = arith.constant 0 : index
    %c0_93 = arith.constant 0 : index
    %c0_94 = arith.constant 0 : index
    %139 = vector.load %arg4[%c0_92, %c0_93, %c0_94] : memref<25x64x64xbf16, #tpu.memory_space<vmem>>, vector<1x64x64xbf16>
    %140 = vector.shape_cast %139 : vector<1x64x64xbf16> to vector<64x64xbf16>
    %cst_95 = arith.constant dense<0.000000e+00> : vector<140x64xf32>
    %141 = tpu.matmul %138, %140, %cst_95 {dimension_numbers = #tpu.dot_dimension_numbers<[1], [0], [0], [1], [0, 0, 1, 1], [], []>} : vector<140x64xbf16>, vector<64x64xbf16>, vector<140x64xf32> -> vector<140x64xf32>
    %c1_96 = arith.constant 1 : index
    %c0_97 = arith.constant 0 : index
    %142 = vector.load %arg14[%c1_96, %c0_97] : memref<200x64xbf16, #tpu.memory_space<vmem>>, vector<140x64xbf16>
    %c1_98 = arith.constant 1 : index
    %c0_99 = arith.constant 0 : index
    %c0_100 = arith.constant 0 : index
    %143 = vector.load %arg4[%c1_98, %c0_99, %c0_100] : memref<25x64x64xbf16, #tpu.memory_space<vmem>>, vector<1x64x64xbf16>
    %144 = vector.shape_cast %143 : vector<1x64x64xbf16> to vector<64x64xbf16>
    %cst_101 = arith.constant dense<0.000000e+00> : vector<140x64xf32>
    %145 = tpu.matmul %142, %144, %cst_101 {dimension_numbers = #tpu.dot_dimension_numbers<[1], [0], [0], [1], [0, 0, 1, 1], [], []>} : vector<140x64xbf16>, vector<64x64xbf16>, vector<140x64xf32> -> vector<140x64xf32>
    %146 = arith.addf %141, %145 : vector<140x64xf32>
    %c2 = arith.constant 2 : index
    %c0_102 = arith.constant 0 : index
    %147 = vector.load %arg14[%c2, %c0_102] : memref<200x64xbf16, #tpu.memory_space<vmem>>, vector<140x64xbf16>
    %c2_103 = arith.constant 2 : index
    %c0_104 = arith.constant 0 : index
    %c0_105 = arith.constant 0 : index
    %148 = vector.load %arg4[%c2_103, %c0_104, %c0_105] : memref<25x64x64xbf16, #tpu.memory_space<vmem>>, vector<1x64x64xbf16>
    %149 = vector.shape_cast %148 : vector<1x64x64xbf16> to vector<64x64xbf16>
    %cst_106 = arith.constant dense<0.000000e+00> : vector<140x64xf32>
    %150 = tpu.matmul %147, %149, %cst_106 {dimension_numbers = #tpu.dot_dimension_numbers<[1], [0], [0], [1], [0, 0, 1, 1], [], []>} : vector<140x64xbf16>, vector<64x64xbf16>, vector<140x64xf32> -> vector<140x64xf32>
    %151 = arith.addf %146, %150 : vector<140x64xf32>
    %c3 = arith.constant 3 : index
    %c0_107 = arith.constant 0 : index
    %152 = vector.load %arg14[%c3, %c0_107] : memref<200x64xbf16, #tpu.memory_space<vmem>>, vector<140x64xbf16>
    %c3_108 = arith.constant 3 : index
    %c0_109 = arith.constant 0 : index
    %c0_110 = arith.constant 0 : index
    %153 = vector.load %arg4[%c3_108, %c0_109, %c0_110] : memref<25x64x64xbf16, #tpu.memory_space<vmem>>, vector<1x64x64xbf16>
    %154 = vector.shape_cast %153 : vector<1x64x64xbf16> to vector<64x64xbf16>
    %cst_111 = arith.constant dense<0.000000e+00> : vector<140x64xf32>
    %155 = tpu.matmul %152, %154, %cst_111 {dimension_numbers = #tpu.dot_dimension_numbers<[1], [0], [0], [1], [0, 0, 1, 1], [], []>} : vector<140x64xbf16>, vector<64x64xbf16>, vector<140x64xf32> -> vector<140x64xf32>
    %156 = arith.addf %151, %155 : vector<140x64xf32>
    %c4 = arith.constant 4 : index
    %c0_112 = arith.constant 0 : index
    %157 = vector.load %arg14[%c4, %c0_112] : memref<200x64xbf16, #tpu.memory_space<vmem>>, vector<140x64xbf16>
    %c4_113 = arith.constant 4 : index
    %c0_114 = arith.constant 0 : index
    %c0_115 = arith.constant 0 : index
    %158 = vector.load %arg4[%c4_113, %c0_114, %c0_115] : memref<25x64x64xbf16, #tpu.memory_space<vmem>>, vector<1x64x64xbf16>
    %159 = vector.shape_cast %158 : vector<1x64x64xbf16> to vector<64x64xbf16>
    %cst_116 = arith.constant dense<0.000000e+00> : vector<140x64xf32>
    %160 = tpu.matmul %157, %159, %cst_116 {dimension_numbers = #tpu.dot_dimension_numbers<[1], [0], [0], [1], [0, 0, 1, 1], [], []>} : vector<140x64xbf16>, vector<64x64xbf16>, vector<140x64xf32> -> vector<140x64xf32>
    %161 = arith.addf %156, %160 : vector<140x64xf32>
    %c14_117 = arith.constant 14 : index
    %c0_118 = arith.constant 0 : index
    %162 = vector.load %arg14[%c14_117, %c0_118] : memref<200x64xbf16, #tpu.memory_space<vmem>>, vector<140x64xbf16>
    %c5 = arith.constant 5 : index
    %c0_119 = arith.constant 0 : index
    %c0_120 = arith.constant 0 : index
    %163 = vector.load %arg4[%c5, %c0_119, %c0_120] : memref<25x64x64xbf16, #tpu.memory_space<vmem>>, vector<1x64x64xbf16>
    %164 = vector.shape_cast %163 : vector<1x64x64xbf16> to vector<64x64xbf16>
    %cst_121 = arith.constant dense<0.000000e+00> : vector<140x64xf32>
    %165 = tpu.matmul %162, %164, %cst_121 {dimension_numbers = #tpu.dot_dimension_numbers<[1], [0], [0], [1], [0, 0, 1, 1], [], []>} : vector<140x64xbf16>, vector<64x64xbf16>, vector<140x64xf32> -> vector<140x64xf32>
    %166 = arith.addf %161, %165 : vector<140x64xf32>
    %c15 = arith.constant 15 : index
    %c0_122 = arith.constant 0 : index
    %167 = vector.load %arg14[%c15, %c0_122] : memref<200x64xbf16, #tpu.memory_space<vmem>>, vector<140x64xbf16>
    %c6 = arith.constant 6 : index
    %c0_123 = arith.constant 0 : index
    %c0_124 = arith.constant 0 : index
    %168 = vector.load %arg4[%c6, %c0_123, %c0_124] : memref<25x64x64xbf16, #tpu.memory_space<vmem>>, vector<1x64x64xbf16>
    %169 = vector.shape_cast %168 : vector<1x64x64xbf16> to vector<64x64xbf16>
    %cst_125 = arith.constant dense<0.000000e+00> : vector<140x64xf32>
    %170 = tpu.matmul %167, %169, %cst_125 {dimension_numbers = #tpu.dot_dimension_numbers<[1], [0], [0], [1], [0, 0, 1, 1], [], []>} : vector<140x64xbf16>, vector<64x64xbf16>, vector<140x64xf32> -> vector<140x64xf32>
    %171 = arith.addf %166, %170 : vector<140x64xf32>
    %c16 = arith.constant 16 : index
    %c0_126 = arith.constant 0 : index
    %172 = vector.load %arg14[%c16, %c0_126] : memref<200x64xbf16, #tpu.memory_space<vmem>>, vector<140x64xbf16>
    %c7 = arith.constant 7 : index
    %c0_127 = arith.constant 0 : index
    %c0_128 = arith.constant 0 : index
    %173 = vector.load %arg4[%c7, %c0_127, %c0_128] : memref<25x64x64xbf16, #tpu.memory_space<vmem>>, vector<1x64x64xbf16>
    %174 = vector.shape_cast %173 : vector<1x64x64xbf16> to vector<64x64xbf16>
    %cst_129 = arith.constant dense<0.000000e+00> : vector<140x64xf32>
    %175 = tpu.matmul %172, %174, %cst_129 {dimension_numbers = #tpu.dot_dimension_numbers<[1], [0], [0], [1], [0, 0, 1, 1], [], []>} : vector<140x64xbf16>, vector<64x64xbf16>, vector<140x64xf32> -> vector<140x64xf32>
    %176 = arith.addf %171, %175 : vector<140x64xf32>
    %c17 = arith.constant 17 : index
    %c0_130 = arith.constant 0 : index
    %177 = vector.load %arg14[%c17, %c0_130] : memref<200x64xbf16, #tpu.memory_space<vmem>>, vector<140x64xbf16>
    %c8 = arith.constant 8 : index
    %c0_131 = arith.constant 0 : index
    %c0_132 = arith.constant 0 : index
    %178 = vector.load %arg4[%c8, %c0_131, %c0_132] : memref<25x64x64xbf16, #tpu.memory_space<vmem>>, vector<1x64x64xbf16>
    %179 = vector.shape_cast %178 : vector<1x64x64xbf16> to vector<64x64xbf16>
    %cst_133 = arith.constant dense<0.000000e+00> : vector<140x64xf32>
    %180 = tpu.matmul %177, %179, %cst_133 {dimension_numbers = #tpu.dot_dimension_numbers<[1], [0], [0], [1], [0, 0, 1, 1], [], []>} : vector<140x64xbf16>, vector<64x64xbf16>, vector<140x64xf32> -> vector<140x64xf32>
    %181 = arith.addf %176, %180 : vector<140x64xf32>
    %c18 = arith.constant 18 : index
    %c0_134 = arith.constant 0 : index
    %182 = vector.load %arg14[%c18, %c0_134] : memref<200x64xbf16, #tpu.memory_space<vmem>>, vector<140x64xbf16>
    %c9 = arith.constant 9 : index
    %c0_135 = arith.constant 0 : index
    %c0_136 = arith.constant 0 : index
    %183 = vector.load %arg4[%c9, %c0_135, %c0_136] : memref<25x64x64xbf16, #tpu.memory_space<vmem>>, vector<1x64x64xbf16>
    %184 = vector.shape_cast %183 : vector<1x64x64xbf16> to vector<64x64xbf16>
    %cst_137 = arith.constant dense<0.000000e+00> : vector<140x64xf32>
    %185 = tpu.matmul %182, %184, %cst_137 {dimension_numbers = #tpu.dot_dimension_numbers<[1], [0], [0], [1], [0, 0, 1, 1], [], []>} : vector<140x64xbf16>, vector<64x64xbf16>, vector<140x64xf32> -> vector<140x64xf32>
    %186 = arith.addf %181, %185 : vector<140x64xf32>
    %c28_138 = arith.constant 28 : index
    %c0_139 = arith.constant 0 : index
    %187 = vector.load %arg14[%c28_138, %c0_139] : memref<200x64xbf16, #tpu.memory_space<vmem>>, vector<140x64xbf16>
    %c10 = arith.constant 10 : index
    %c0_140 = arith.constant 0 : index
    %c0_141 = arith.constant 0 : index
    %188 = vector.load %arg4[%c10, %c0_140, %c0_141] : memref<25x64x64xbf16, #tpu.memory_space<vmem>>, vector<1x64x64xbf16>
    %189 = vector.shape_cast %188 : vector<1x64x64xbf16> to vector<64x64xbf16>
    %cst_142 = arith.constant dense<0.000000e+00> : vector<140x64xf32>
    %190 = tpu.matmul %187, %189, %cst_142 {dimension_numbers = #tpu.dot_dimension_numbers<[1], [0], [0], [1], [0, 0, 1, 1], [], []>} : vector<140x64xbf16>, vector<64x64xbf16>, vector<140x64xf32> -> vector<140x64xf32>
    %191 = arith.addf %186, %190 : vector<140x64xf32>
    %c29_143 = arith.constant 29 : index
    %c0_144 = arith.constant 0 : index
    %192 = vector.load %arg14[%c29_143, %c0_144] : memref<200x64xbf16, #tpu.memory_space<vmem>>, vector<140x64xbf16>
    %c11 = arith.constant 11 : index
    %c0_145 = arith.constant 0 : index
    %c0_146 = arith.constant 0 : index
    %193 = vector.load %arg4[%c11, %c0_145, %c0_146] : memref<25x64x64xbf16, #tpu.memory_space<vmem>>, vector<1x64x64xbf16>
    %194 = vector.shape_cast %193 : vector<1x64x64xbf16> to vector<64x64xbf16>
    %cst_147 = arith.constant dense<0.000000e+00> : vector<140x64xf32>
    %195 = tpu.matmul %192, %194, %cst_147 {dimension_numbers = #tpu.dot_dimension_numbers<[1], [0], [0], [1], [0, 0, 1, 1], [], []>} : vector<140x64xbf16>, vector<64x64xbf16>, vector<140x64xf32> -> vector<140x64xf32>
    %196 = arith.addf %191, %195 : vector<140x64xf32>
    %c30 = arith.constant 30 : index
    %c0_148 = arith.constant 0 : index
    %197 = vector.load %arg14[%c30, %c0_148] : memref<200x64xbf16, #tpu.memory_space<vmem>>, vector<140x64xbf16>
    %c12 = arith.constant 12 : index
    %c0_149 = arith.constant 0 : index
    %c0_150 = arith.constant 0 : index
    %198 = vector.load %arg4[%c12, %c0_149, %c0_150] : memref<25x64x64xbf16, #tpu.memory_space<vmem>>, vector<1x64x64xbf16>
    %199 = vector.shape_cast %198 : vector<1x64x64xbf16> to vector<64x64xbf16>
    %cst_151 = arith.constant dense<0.000000e+00> : vector<140x64xf32>
    %200 = tpu.matmul %197, %199, %cst_151 {dimension_numbers = #tpu.dot_dimension_numbers<[1], [0], [0], [1], [0, 0, 1, 1], [], []>} : vector<140x64xbf16>, vector<64x64xbf16>, vector<140x64xf32> -> vector<140x64xf32>
    %201 = arith.addf %196, %200 : vector<140x64xf32>
    %c31 = arith.constant 31 : index
    %c0_152 = arith.constant 0 : index
    %202 = vector.load %arg14[%c31, %c0_152] : memref<200x64xbf16, #tpu.memory_space<vmem>>, vector<140x64xbf16>
    %c13 = arith.constant 13 : index
    %c0_153 = arith.constant 0 : index
    %c0_154 = arith.constant 0 : index
    %203 = vector.load %arg4[%c13, %c0_153, %c0_154] : memref<25x64x64xbf16, #tpu.memory_space<vmem>>, vector<1x64x64xbf16>
    %204 = vector.shape_cast %203 : vector<1x64x64xbf16> to vector<64x64xbf16>
    %cst_155 = arith.constant dense<0.000000e+00> : vector<140x64xf32>
    %205 = tpu.matmul %202, %204, %cst_155 {dimension_numbers = #tpu.dot_dimension_numbers<[1], [0], [0], [1], [0, 0, 1, 1], [], []>} : vector<140x64xbf16>, vector<64x64xbf16>, vector<140x64xf32> -> vector<140x64xf32>
    %206 = arith.addf %201, %205 : vector<140x64xf32>
    %c32 = arith.constant 32 : index
    %c0_156 = arith.constant 0 : index
    %207 = vector.load %arg14[%c32, %c0_156] : memref<200x64xbf16, #tpu.memory_space<vmem>>, vector<140x64xbf16>
    %c14_157 = arith.constant 14 : index
    %c0_158 = arith.constant 0 : index
    %c0_159 = arith.constant 0 : index
    %208 = vector.load %arg4[%c14_157, %c0_158, %c0_159] : memref<25x64x64xbf16, #tpu.memory_space<vmem>>, vector<1x64x64xbf16>
    %209 = vector.shape_cast %208 : vector<1x64x64xbf16> to vector<64x64xbf16>
    %cst_160 = arith.constant dense<0.000000e+00> : vector<140x64xf32>
    %210 = tpu.matmul %207, %209, %cst_160 {dimension_numbers = #tpu.dot_dimension_numbers<[1], [0], [0], [1], [0, 0, 1, 1], [], []>} : vector<140x64xbf16>, vector<64x64xbf16>, vector<140x64xf32> -> vector<140x64xf32>
    %211 = arith.addf %206, %210 : vector<140x64xf32>
    %c42_161 = arith.constant 42 : index
    %c0_162 = arith.constant 0 : index
    %212 = vector.load %arg14[%c42_161, %c0_162] : memref<200x64xbf16, #tpu.memory_space<vmem>>, vector<140x64xbf16>
    %c15_163 = arith.constant 15 : index
    %c0_164 = arith.constant 0 : index
    %c0_165 = arith.constant 0 : index
    %213 = vector.load %arg4[%c15_163, %c0_164, %c0_165] : memref<25x64x64xbf16, #tpu.memory_space<vmem>>, vector<1x64x64xbf16>
    %214 = vector.shape_cast %213 : vector<1x64x64xbf16> to vector<64x64xbf16>
    %cst_166 = arith.constant dense<0.000000e+00> : vector<140x64xf32>
    %215 = tpu.matmul %212, %214, %cst_166 {dimension_numbers = #tpu.dot_dimension_numbers<[1], [0], [0], [1], [0, 0, 1, 1], [], []>} : vector<140x64xbf16>, vector<64x64xbf16>, vector<140x64xf32> -> vector<140x64xf32>
    %216 = arith.addf %211, %215 : vector<140x64xf32>
    %c43 = arith.constant 43 : index
    %c0_167 = arith.constant 0 : index
    %217 = vector.load %arg14[%c43, %c0_167] : memref<200x64xbf16, #tpu.memory_space<vmem>>, vector<140x64xbf16>
    %c16_168 = arith.constant 16 : index
    %c0_169 = arith.constant 0 : index
    %c0_170 = arith.constant 0 : index
    %218 = vector.load %arg4[%c16_168, %c0_169, %c0_170] : memref<25x64x64xbf16, #tpu.memory_space<vmem>>, vector<1x64x64xbf16>
    %219 = vector.shape_cast %218 : vector<1x64x64xbf16> to vector<64x64xbf16>
    %cst_171 = arith.constant dense<0.000000e+00> : vector<140x64xf32>
    %220 = tpu.matmul %217, %219, %cst_171 {dimension_numbers = #tpu.dot_dimension_numbers<[1], [0], [0], [1], [0, 0, 1, 1], [], []>} : vector<140x64xbf16>, vector<64x64xbf16>, vector<140x64xf32> -> vector<140x64xf32>
    %221 = arith.addf %216, %220 : vector<140x64xf32>
    %c44 = arith.constant 44 : index
    %c0_172 = arith.constant 0 : index
    %222 = vector.load %arg14[%c44, %c0_172] : memref<200x64xbf16, #tpu.memory_space<vmem>>, vector<140x64xbf16>
    %c17_173 = arith.constant 17 : index
    %c0_174 = arith.constant 0 : index
    %c0_175 = arith.constant 0 : index
    %223 = vector.load %arg4[%c17_173, %c0_174, %c0_175] : memref<25x64x64xbf16, #tpu.memory_space<vmem>>, vector<1x64x64xbf16>
    %224 = vector.shape_cast %223 : vector<1x64x64xbf16> to vector<64x64xbf16>
    %cst_176 = arith.constant dense<0.000000e+00> : vector<140x64xf32>
    %225 = tpu.matmul %222, %224, %cst_176 {dimension_numbers = #tpu.dot_dimension_numbers<[1], [0], [0], [1], [0, 0, 1, 1], [], []>} : vector<140x64xbf16>, vector<64x64xbf16>, vector<140x64xf32> -> vector<140x64xf32>
    %226 = arith.addf %221, %225 : vector<140x64xf32>
    %c45 = arith.constant 45 : index
    %c0_177 = arith.constant 0 : index
    %227 = vector.load %arg14[%c45, %c0_177] : memref<200x64xbf16, #tpu.memory_space<vmem>>, vector<140x64xbf16>
    %c18_178 = arith.constant 18 : index
    %c0_179 = arith.constant 0 : index
    %c0_180 = arith.constant 0 : index
    %228 = vector.load %arg4[%c18_178, %c0_179, %c0_180] : memref<25x64x64xbf16, #tpu.memory_space<vmem>>, vector<1x64x64xbf16>
    %229 = vector.shape_cast %228 : vector<1x64x64xbf16> to vector<64x64xbf16>
    %cst_181 = arith.constant dense<0.000000e+00> : vector<140x64xf32>
    %230 = tpu.matmul %227, %229, %cst_181 {dimension_numbers = #tpu.dot_dimension_numbers<[1], [0], [0], [1], [0, 0, 1, 1], [], []>} : vector<140x64xbf16>, vector<64x64xbf16>, vector<140x64xf32> -> vector<140x64xf32>
    %231 = arith.addf %226, %230 : vector<140x64xf32>
    %c46 = arith.constant 46 : index
    %c0_182 = arith.constant 0 : index
    %232 = vector.load %arg14[%c46, %c0_182] : memref<200x64xbf16, #tpu.memory_space<vmem>>, vector<140x64xbf16>
    %c19 = arith.constant 19 : index
    %c0_183 = arith.constant 0 : index
    %c0_184 = arith.constant 0 : index
    %233 = vector.load %arg4[%c19, %c0_183, %c0_184] : memref<25x64x64xbf16, #tpu.memory_space<vmem>>, vector<1x64x64xbf16>
    %234 = vector.shape_cast %233 : vector<1x64x64xbf16> to vector<64x64xbf16>
    %cst_185 = arith.constant dense<0.000000e+00> : vector<140x64xf32>
    %235 = tpu.matmul %232, %234, %cst_185 {dimension_numbers = #tpu.dot_dimension_numbers<[1], [0], [0], [1], [0, 0, 1, 1], [], []>} : vector<140x64xbf16>, vector<64x64xbf16>, vector<140x64xf32> -> vector<140x64xf32>
    %236 = arith.addf %231, %235 : vector<140x64xf32>
    %c56_186 = arith.constant 56 : index
    %c0_187 = arith.constant 0 : index
    %237 = vector.load %arg14[%c56_186, %c0_187] : memref<200x64xbf16, #tpu.memory_space<vmem>>, vector<140x64xbf16>
    %c20 = arith.constant 20 : index
    %c0_188 = arith.constant 0 : index
    %c0_189 = arith.constant 0 : index
    %238 = vector.load %arg4[%c20, %c0_188, %c0_189] : memref<25x64x64xbf16, #tpu.memory_space<vmem>>, vector<1x64x64xbf16>
    %239 = vector.shape_cast %238 : vector<1x64x64xbf16> to vector<64x64xbf16>
    %cst_190 = arith.constant dense<0.000000e+00> : vector<140x64xf32>
    %240 = tpu.matmul %237, %239, %cst_190 {dimension_numbers = #tpu.dot_dimension_numbers<[1], [0], [0], [1], [0, 0, 1, 1], [], []>} : vector<140x64xbf16>, vector<64x64xbf16>, vector<140x64xf32> -> vector<140x64xf32>
    %241 = arith.addf %236, %240 : vector<140x64xf32>
    %c57_191 = arith.constant 57 : index
    %c0_192 = arith.constant 0 : index
    %242 = vector.load %arg14[%c57_191, %c0_192] : memref<200x64xbf16, #tpu.memory_space<vmem>>, vector<140x64xbf16>
    %c21 = arith.constant 21 : index
    %c0_193 = arith.constant 0 : index
    %c0_194 = arith.constant 0 : index
    %243 = vector.load %arg4[%c21, %c0_193, %c0_194] : memref<25x64x64xbf16, #tpu.memory_space<vmem>>, vector<1x64x64xbf16>
    %244 = vector.shape_cast %243 : vector<1x64x64xbf16> to vector<64x64xbf16>
    %cst_195 = arith.constant dense<0.000000e+00> : vector<140x64xf32>
    %245 = tpu.matmul %242, %244, %cst_195 {dimension_numbers = #tpu.dot_dimension_numbers<[1], [0], [0], [1], [0, 0, 1, 1], [], []>} : vector<140x64xbf16>, vector<64x64xbf16>, vector<140x64xf32> -> vector<140x64xf32>
    %246 = arith.addf %241, %245 : vector<140x64xf32>
    %c58 = arith.constant 58 : index
    %c0_196 = arith.constant 0 : index
    %247 = vector.load %arg14[%c58, %c0_196] : memref<200x64xbf16, #tpu.memory_space<vmem>>, vector<140x64xbf16>
    %c22 = arith.constant 22 : index
    %c0_197 = arith.constant 0 : index
    %c0_198 = arith.constant 0 : index
    %248 = vector.load %arg4[%c22, %c0_197, %c0_198] : memref<25x64x64xbf16, #tpu.memory_space<vmem>>, vector<1x64x64xbf16>
    %249 = vector.shape_cast %248 : vector<1x64x64xbf16> to vector<64x64xbf16>
    %cst_199 = arith.constant dense<0.000000e+00> : vector<140x64xf32>
    %250 = tpu.matmul %247, %249, %cst_199 {dimension_numbers = #tpu.dot_dimension_numbers<[1], [0], [0], [1], [0, 0, 1, 1], [], []>} : vector<140x64xbf16>, vector<64x64xbf16>, vector<140x64xf32> -> vector<140x64xf32>
    %251 = arith.addf %246, %250 : vector<140x64xf32>
    %c59 = arith.constant 59 : index
    %c0_200 = arith.constant 0 : index
    %252 = vector.load %arg14[%c59, %c0_200] : memref<200x64xbf16, #tpu.memory_space<vmem>>, vector<140x64xbf16>
    %c23 = arith.constant 23 : index
    %c0_201 = arith.constant 0 : index
    %c0_202 = arith.constant 0 : index
    %253 = vector.load %arg4[%c23, %c0_201, %c0_202] : memref<25x64x64xbf16, #tpu.memory_space<vmem>>, vector<1x64x64xbf16>
    %254 = vector.shape_cast %253 : vector<1x64x64xbf16> to vector<64x64xbf16>
    %cst_203 = arith.constant dense<0.000000e+00> : vector<140x64xf32>
    %255 = tpu.matmul %252, %254, %cst_203 {dimension_numbers = #tpu.dot_dimension_numbers<[1], [0], [0], [1], [0, 0, 1, 1], [], []>} : vector<140x64xbf16>, vector<64x64xbf16>, vector<140x64xf32> -> vector<140x64xf32>
    %256 = arith.addf %251, %255 : vector<140x64xf32>
    %c60 = arith.constant 60 : index
    %c0_204 = arith.constant 0 : index
    %257 = vector.load %arg14[%c60, %c0_204] : memref<200x64xbf16, #tpu.memory_space<vmem>>, vector<140x64xbf16>
    %c24 = arith.constant 24 : index
    %c0_205 = arith.constant 0 : index
    %c0_206 = arith.constant 0 : index
    %258 = vector.load %arg4[%c24, %c0_205, %c0_206] : memref<25x64x64xbf16, #tpu.memory_space<vmem>>, vector<1x64x64xbf16>
    %259 = vector.shape_cast %258 : vector<1x64x64xbf16> to vector<64x64xbf16>
    %cst_207 = arith.constant dense<0.000000e+00> : vector<140x64xf32>
    %260 = tpu.matmul %257, %259, %cst_207 {dimension_numbers = #tpu.dot_dimension_numbers<[1], [0], [0], [1], [0, 0, 1, 1], [], []>} : vector<140x64xbf16>, vector<64x64xbf16>, vector<140x64xf32> -> vector<140x64xf32>
    %261 = arith.addf %256, %260 : vector<140x64xf32>
    %c0_208 = arith.constant 0 : index
    %c0_209 = arith.constant 0 : index
    %262 = vector.load %arg5[%c0_208, %c0_209] : memref<1x64xf32, #tpu.memory_space<vmem>>, vector<1x64xf32>
    %263 = vector.broadcast %262 : vector<1x64xf32> to vector<140x64xf32>
    %264 = arith.addf %261, %263 : vector<140x64xf32>
    %cst_210 = arith.constant 0.000000e+00 : f32
    %265 = vector.broadcast %cst_210 : f32 to vector<140x64xf32>
    %266 = arith.maximumf %264, %265 : vector<140x64xf32>
    %c0_211 = arith.constant 0 : index
    %c0_212 = arith.constant 0 : index
    %267 = vector.load %arg15[%c0_211, %c0_212] : memref<140x64xf32, #tpu.memory_space<vmem>>, vector<140x64xf32>
    tpu.vector_store %arg15[%c0_211, %c0_212], %266 {strides = array<i32>} : memref<140x64xf32, #tpu.memory_space<vmem>>, vector<140x64xf32>,
    %c0_213 = arith.constant 0 : index
    %c0_214 = arith.constant 0 : index
    %268 = tpu.strided_load %arg15[%c0_213, %c0_214] {strides = array<i32: 2, 1>} : memref<140x64xf32, #tpu.memory_space<vmem>>, vector<5x64xf32>
    %c1_215 = arith.constant 1 : index
    %c0_216 = arith.constant 0 : index
    %269 = tpu.strided_load %arg15[%c1_215, %c0_216] {strides = array<i32: 2, 1>} : memref<140x64xf32, #tpu.memory_space<vmem>>, vector<5x64xf32>
    %270 = arith.maximumf %268, %269 : vector<5x64xf32>
    %c14_217 = arith.constant 14 : index
    %c0_218 = arith.constant 0 : index
    %271 = tpu.strided_load %arg15[%c14_217, %c0_218] {strides = array<i32: 2, 1>} : memref<140x64xf32, #tpu.memory_space<vmem>>, vector<5x64xf32>
    %c15_219 = arith.constant 15 : index
    %c0_220 = arith.constant 0 : index
    %272 = tpu.strided_load %arg15[%c15_219, %c0_220] {strides = array<i32: 2, 1>} : memref<140x64xf32, #tpu.memory_space<vmem>>, vector<5x64xf32>
    %273 = arith.maximumf %271, %272 : vector<5x64xf32>
    %274 = arith.maximumf %270, %273 : vector<5x64xf32>
    %275 = arith.truncf %274 : vector<5x64xf32> to vector<5x64xbf16>
    %c0_221 = arith.constant 0 : index
    %c0_222 = arith.constant 0 : index
    %276 = vector.load %arg16[%c0_221, %c0_222] : memref<25x64xbf16, #tpu.memory_space<vmem>>, vector<5x64xbf16>
    tpu.vector_store %arg16[%c0_221, %c0_222], %275 {strides = array<i32>} : memref<25x64xbf16, #tpu.memory_space<vmem>>, vector<5x64xbf16>,
    %c28_223 = arith.constant 28 : index
    %c0_224 = arith.constant 0 : index
    %277 = tpu.strided_load %arg15[%c28_223, %c0_224] {strides = array<i32: 2, 1>} : memref<140x64xf32, #tpu.memory_space<vmem>>, vector<5x64xf32>
    %c29_225 = arith.constant 29 : index
    %c0_226 = arith.constant 0 : index
    %278 = tpu.strided_load %arg15[%c29_225, %c0_226] {strides = array<i32: 2, 1>} : memref<140x64xf32, #tpu.memory_space<vmem>>, vector<5x64xf32>
    %279 = arith.maximumf %277, %278 : vector<5x64xf32>
    %c42_227 = arith.constant 42 : index
    %c0_228 = arith.constant 0 : index
    %280 = tpu.strided_load %arg15[%c42_227, %c0_228] {strides = array<i32: 2, 1>} : memref<140x64xf32, #tpu.memory_space<vmem>>, vector<5x64xf32>
    %c43_229 = arith.constant 43 : index
    %c0_230 = arith.constant 0 : index
    %281 = tpu.strided_load %arg15[%c43_229, %c0_230] {strides = array<i32: 2, 1>} : memref<140x64xf32, #tpu.memory_space<vmem>>, vector<5x64xf32>
    %282 = arith.maximumf %280, %281 : vector<5x64xf32>
    %283 = arith.maximumf %279, %282 : vector<5x64xf32>
    %284 = arith.truncf %283 : vector<5x64xf32> to vector<5x64xbf16>
    %c5_231 = arith.constant 5 : index
    %c0_232 = arith.constant 0 : index
    %285 = vector.load %arg16[%c5_231, %c0_232] : memref<25x64xbf16, #tpu.memory_space<vmem>>, vector<5x64xbf16>
    tpu.vector_store %arg16[%c5_231, %c0_232], %284 {strides = array<i32>} : memref<25x64xbf16, #tpu.memory_space<vmem>>, vector<5x64xbf16>,
    %c56_233 = arith.constant 56 : index
    %c0_234 = arith.constant 0 : index
    %286 = tpu.strided_load %arg15[%c56_233, %c0_234] {strides = array<i32: 2, 1>} : memref<140x64xf32, #tpu.memory_space<vmem>>, vector<5x64xf32>
    %c57_235 = arith.constant 57 : index
    %c0_236 = arith.constant 0 : index
    %287 = tpu.strided_load %arg15[%c57_235, %c0_236] {strides = array<i32: 2, 1>} : memref<140x64xf32, #tpu.memory_space<vmem>>, vector<5x64xf32>
    %288 = arith.maximumf %286, %287 : vector<5x64xf32>
    %c70_237 = arith.constant 70 : index
    %c0_238 = arith.constant 0 : index
    %289 = tpu.strided_load %arg15[%c70_237, %c0_238] {strides = array<i32: 2, 1>} : memref<140x64xf32, #tpu.memory_space<vmem>>, vector<5x64xf32>
    %c71 = arith.constant 71 : index
    %c0_239 = arith.constant 0 : index
    %290 = tpu.strided_load %arg15[%c71, %c0_239] {strides = array<i32: 2, 1>} : memref<140x64xf32, #tpu.memory_space<vmem>>, vector<5x64xf32>
    %291 = arith.maximumf %289, %290 : vector<5x64xf32>
    %292 = arith.maximumf %288, %291 : vector<5x64xf32>
    %293 = arith.truncf %292 : vector<5x64xf32> to vector<5x64xbf16>
    %c10_240 = arith.constant 10 : index
    %c0_241 = arith.constant 0 : index
    %294 = vector.load %arg16[%c10_240, %c0_241] : memref<25x64xbf16, #tpu.memory_space<vmem>>, vector<5x64xbf16>
    tpu.vector_store %arg16[%c10_240, %c0_241], %293 {strides = array<i32>} : memref<25x64xbf16, #tpu.memory_space<vmem>>, vector<5x64xbf16>,
    %c84_242 = arith.constant 84 : index
    %c0_243 = arith.constant 0 : index
    %295 = tpu.strided_load %arg15[%c84_242, %c0_243] {strides = array<i32: 2, 1>} : memref<140x64xf32, #tpu.memory_space<vmem>>, vector<5x64xf32>
    %c85_244 = arith.constant 85 : index
    %c0_245 = arith.constant 0 : index
    %296 = tpu.strided_load %arg15[%c85_244, %c0_245] {strides = array<i32: 2, 1>} : memref<140x64xf32, #tpu.memory_space<vmem>>, vector<5x64xf32>
    %297 = arith.maximumf %295, %296 : vector<5x64xf32>
    %c98_246 = arith.constant 98 : index
    %c0_247 = arith.constant 0 : index
    %298 = tpu.strided_load %arg15[%c98_246, %c0_247] {strides = array<i32: 2, 1>} : memref<140x64xf32, #tpu.memory_space<vmem>>, vector<5x64xf32>
    %c99 = arith.constant 99 : index
    %c0_248 = arith.constant 0 : index
    %299 = tpu.strided_load %arg15[%c99, %c0_248] {strides = array<i32: 2, 1>} : memref<140x64xf32, #tpu.memory_space<vmem>>, vector<5x64xf32>
    %300 = arith.maximumf %298, %299 : vector<5x64xf32>
    %301 = arith.maximumf %297, %300 : vector<5x64xf32>
    %302 = arith.truncf %301 : vector<5x64xf32> to vector<5x64xbf16>
    %c15_249 = arith.constant 15 : index
    %c0_250 = arith.constant 0 : index
    %303 = vector.load %arg16[%c15_249, %c0_250] : memref<25x64xbf16, #tpu.memory_space<vmem>>, vector<5x64xbf16>
    tpu.vector_store %arg16[%c15_249, %c0_250], %302 {strides = array<i32>} : memref<25x64xbf16, #tpu.memory_space<vmem>>, vector<5x64xbf16>,
    %c112_251 = arith.constant 112 : index
    %c0_252 = arith.constant 0 : index
    %304 = tpu.strided_load %arg15[%c112_251, %c0_252] {strides = array<i32: 2, 1>} : memref<140x64xf32, #tpu.memory_space<vmem>>, vector<5x64xf32>
    %c113_253 = arith.constant 113 : index
    %c0_254 = arith.constant 0 : index
    %305 = tpu.strided_load %arg15[%c113_253, %c0_254] {strides = array<i32: 2, 1>} : memref<140x64xf32, #tpu.memory_space<vmem>>, vector<5x64xf32>
    %306 = arith.maximumf %304, %305 : vector<5x64xf32>
    %c126_255 = arith.constant 126 : index
    %c0_256 = arith.constant 0 : index
    %307 = tpu.strided_load %arg15[%c126_255, %c0_256] {strides = array<i32: 2, 1>} : memref<140x64xf32, #tpu.memory_space<vmem>>, vector<5x64xf32>
    %c127 = arith.constant 127 : index
    %c0_257 = arith.constant 0 : index
    %308 = tpu.strided_load %arg15[%c127, %c0_257] {strides = array<i32: 2, 1>} : memref<140x64xf32, #tpu.memory_space<vmem>>, vector<5x64xf32>
    %309 = arith.maximumf %307, %308 : vector<5x64xf32>
    %310 = arith.maximumf %306, %309 : vector<5x64xf32>
    %311 = arith.truncf %310 : vector<5x64xf32> to vector<5x64xbf16>
    %c20_258 = arith.constant 20 : index
    %c0_259 = arith.constant 0 : index
    %312 = vector.load %arg16[%c20_258, %c0_259] : memref<25x64xbf16, #tpu.memory_space<vmem>>, vector<5x64xbf16>
    tpu.vector_store %arg16[%c20_258, %c0_259], %311 {strides = array<i32>} : memref<25x64xbf16, #tpu.memory_space<vmem>>, vector<5x64xbf16>,
    %c0_260 = arith.constant 0 : index
    %c0_261 = arith.constant 0 : index
    %313 = vector.load %arg16[%c0_260, %c0_261] : memref<25x64xbf16, #tpu.memory_space<vmem>>, vector<1x64xbf16>
    %c0_262 = arith.constant 0 : index
    %c0_263 = arith.constant 0 : index
    %314 = vector.load %arg17[%c0_262, %c0_263] : memref<1x1600xbf16, #tpu.memory_space<vmem>>, vector<1x64xbf16>
    tpu.vector_store %arg17[%c0_262, %c0_263], %313 {strides = array<i32>} : memref<1x1600xbf16, #tpu.memory_space<vmem>>, vector<1x64xbf16>,
    %c1_264 = arith.constant 1 : index
    %c0_265 = arith.constant 0 : index
    %315 = vector.load %arg16[%c1_264, %c0_265] : memref<25x64xbf16, #tpu.memory_space<vmem>>, vector<1x64xbf16>
    %c0_266 = arith.constant 0 : index
    %c64 = arith.constant 64 : index
    %316 = vector.load %arg17[%c0_266, %c64] : memref<1x1600xbf16, #tpu.memory_space<vmem>>, vector<1x64xbf16>
    tpu.vector_store %arg17[%c0_266, %c64], %315 {strides = array<i32>} : memref<1x1600xbf16, #tpu.memory_space<vmem>>, vector<1x64xbf16>,
    %c2_267 = arith.constant 2 : index
    %c0_268 = arith.constant 0 : index
    %317 = vector.load %arg16[%c2_267, %c0_268] : memref<25x64xbf16, #tpu.memory_space<vmem>>, vector<1x64xbf16>
    %c0_269 = arith.constant 0 : index
    %c128 = arith.constant 128 : index
    %318 = vector.load %arg17[%c0_269, %c128] : memref<1x1600xbf16, #tpu.memory_space<vmem>>, vector<1x64xbf16>
    tpu.vector_store %arg17[%c0_269, %c128], %317 {strides = array<i32>} : memref<1x1600xbf16, #tpu.memory_space<vmem>>, vector<1x64xbf16>,
    %c3_270 = arith.constant 3 : index
    %c0_271 = arith.constant 0 : index
    %319 = vector.load %arg16[%c3_270, %c0_271] : memref<25x64xbf16, #tpu.memory_space<vmem>>, vector<1x64xbf16>
    %c0_272 = arith.constant 0 : index
    %c192 = arith.constant 192 : index
    %320 = vector.load %arg17[%c0_272, %c192] : memref<1x1600xbf16, #tpu.memory_space<vmem>>, vector<1x64xbf16>
    tpu.vector_store %arg17[%c0_272, %c192], %319 {strides = array<i32>} : memref<1x1600xbf16, #tpu.memory_space<vmem>>, vector<1x64xbf16>,
    %c4_273 = arith.constant 4 : index
    %c0_274 = arith.constant 0 : index
    %321 = vector.load %arg16[%c4_273, %c0_274] : memref<25x64xbf16, #tpu.memory_space<vmem>>, vector<1x64xbf16>
    %c0_275 = arith.constant 0 : index
    %c256 = arith.constant 256 : index
    %322 = vector.load %arg17[%c0_275, %c256] : memref<1x1600xbf16, #tpu.memory_space<vmem>>, vector<1x64xbf16>
    tpu.vector_store %arg17[%c0_275, %c256], %321 {strides = array<i32>} : memref<1x1600xbf16, #tpu.memory_space<vmem>>, vector<1x64xbf16>,
    %c5_276 = arith.constant 5 : index
    %c0_277 = arith.constant 0 : index
    %323 = vector.load %arg16[%c5_276, %c0_277] : memref<25x64xbf16, #tpu.memory_space<vmem>>, vector<1x64xbf16>
    %c0_278 = arith.constant 0 : index
    %c320 = arith.constant 320 : index
    %324 = vector.load %arg17[%c0_278, %c320] : memref<1x1600xbf16, #tpu.memory_space<vmem>>, vector<1x64xbf16>
    tpu.vector_store %arg17[%c0_278, %c320], %323 {strides = array<i32>} : memref<1x1600xbf16, #tpu.memory_space<vmem>>, vector<1x64xbf16>,
    %c6_279 = arith.constant 6 : index
    %c0_280 = arith.constant 0 : index
    %325 = vector.load %arg16[%c6_279, %c0_280] : memref<25x64xbf16, #tpu.memory_space<vmem>>, vector<1x64xbf16>
    %c0_281 = arith.constant 0 : index
    %c384 = arith.constant 384 : index
    %326 = vector.load %arg17[%c0_281, %c384] : memref<1x1600xbf16, #tpu.memory_space<vmem>>, vector<1x64xbf16>
    tpu.vector_store %arg17[%c0_281, %c384], %325 {strides = array<i32>} : memref<1x1600xbf16, #tpu.memory_space<vmem>>, vector<1x64xbf16>,
    %c7_282 = arith.constant 7 : index
    %c0_283 = arith.constant 0 : index
    %327 = vector.load %arg16[%c7_282, %c0_283] : memref<25x64xbf16, #tpu.memory_space<vmem>>, vector<1x64xbf16>
    %c0_284 = arith.constant 0 : index
    %c448_285 = arith.constant 448 : index
    %328 = vector.load %arg17[%c0_284, %c448_285] : memref<1x1600xbf16, #tpu.memory_space<vmem>>, vector<1x64xbf16>
    tpu.vector_store %arg17[%c0_284, %c448_285], %327 {strides = array<i32>} : memref<1x1600xbf16, #tpu.memory_space<vmem>>, vector<1x64xbf16>,
    %c8_286 = arith.constant 8 : index
    %c0_287 = arith.constant 0 : index
    %329 = vector.load %arg16[%c8_286, %c0_287] : memref<25x64xbf16, #tpu.memory_space<vmem>>, vector<1x64xbf16>
    %c0_288 = arith.constant 0 : index
    %c512 = arith.constant 512 : index
    %330 = vector.load %arg17[%c0_288, %c512] : memref<1x1600xbf16, #tpu.memory_space<vmem>>, vector<1x64xbf16>
    tpu.vector_store %arg17[%c0_288, %c512], %329 {strides = array<i32>} : memref<1x1600xbf16, #tpu.memory_space<vmem>>, vector<1x64xbf16>,
    %c9_289 = arith.constant 9 : index
    %c0_290 = arith.constant 0 : index
    %331 = vector.load %arg16[%c9_289, %c0_290] : memref<25x64xbf16, #tpu.memory_space<vmem>>, vector<1x64xbf16>
    %c0_291 = arith.constant 0 : index
    %c576 = arith.constant 576 : index
    %332 = vector.load %arg17[%c0_291, %c576] : memref<1x1600xbf16, #tpu.memory_space<vmem>>, vector<1x64xbf16>
    tpu.vector_store %arg17[%c0_291, %c576], %331 {strides = array<i32>} : memref<1x1600xbf16, #tpu.memory_space<vmem>>, vector<1x64xbf16>,
    %c10_292 = arith.constant 10 : index
    %c0_293 = arith.constant 0 : index
    %333 = vector.load %arg16[%c10_292, %c0_293] : memref<25x64xbf16, #tpu.memory_space<vmem>>, vector<1x64xbf16>
    %c0_294 = arith.constant 0 : index
    %c640 = arith.constant 640 : index
    %334 = vector.load %arg17[%c0_294, %c640] : memref<1x1600xbf16, #tpu.memory_space<vmem>>, vector<1x64xbf16>
    tpu.vector_store %arg17[%c0_294, %c640], %333 {strides = array<i32>} : memref<1x1600xbf16, #tpu.memory_space<vmem>>, vector<1x64xbf16>,
    %c11_295 = arith.constant 11 : index
    %c0_296 = arith.constant 0 : index
    %335 = vector.load %arg16[%c11_295, %c0_296] : memref<25x64xbf16, #tpu.memory_space<vmem>>, vector<1x64xbf16>
    %c0_297 = arith.constant 0 : index
    %c704 = arith.constant 704 : index
    %336 = vector.load %arg17[%c0_297, %c704] : memref<1x1600xbf16, #tpu.memory_space<vmem>>, vector<1x64xbf16>
    tpu.vector_store %arg17[%c0_297, %c704], %335 {strides = array<i32>} : memref<1x1600xbf16, #tpu.memory_space<vmem>>, vector<1x64xbf16>,
    %c12_298 = arith.constant 12 : index
    %c0_299 = arith.constant 0 : index
    %337 = vector.load %arg16[%c12_298, %c0_299] : memref<25x64xbf16, #tpu.memory_space<vmem>>, vector<1x64xbf16>
    %c0_300 = arith.constant 0 : index
    %c768 = arith.constant 768 : index
    %338 = vector.load %arg17[%c0_300, %c768] : memref<1x1600xbf16, #tpu.memory_space<vmem>>, vector<1x64xbf16>
    tpu.vector_store %arg17[%c0_300, %c768], %337 {strides = array<i32>} : memref<1x1600xbf16, #tpu.memory_space<vmem>>, vector<1x64xbf16>,
    %c13_301 = arith.constant 13 : index
    %c0_302 = arith.constant 0 : index
    %339 = vector.load %arg16[%c13_301, %c0_302] : memref<25x64xbf16, #tpu.memory_space<vmem>>, vector<1x64xbf16>
    %c0_303 = arith.constant 0 : index
    %c832 = arith.constant 832 : index
    %340 = vector.load %arg17[%c0_303, %c832] : memref<1x1600xbf16, #tpu.memory_space<vmem>>, vector<1x64xbf16>
    tpu.vector_store %arg17[%c0_303, %c832], %339 {strides = array<i32>} : memref<1x1600xbf16, #tpu.memory_space<vmem>>, vector<1x64xbf16>,
    %c14_304 = arith.constant 14 : index
    %c0_305 = arith.constant 0 : index
    %341 = vector.load %arg16[%c14_304, %c0_305] : memref<25x64xbf16, #tpu.memory_space<vmem>>, vector<1x64xbf16>
    %c0_306 = arith.constant 0 : index
    %c896 = arith.constant 896 : index
    %342 = vector.load %arg17[%c0_306, %c896] : memref<1x1600xbf16, #tpu.memory_space<vmem>>, vector<1x64xbf16>
    tpu.vector_store %arg17[%c0_306, %c896], %341 {strides = array<i32>} : memref<1x1600xbf16, #tpu.memory_space<vmem>>, vector<1x64xbf16>,
    %c15_307 = arith.constant 15 : index
    %c0_308 = arith.constant 0 : index
    %343 = vector.load %arg16[%c15_307, %c0_308] : memref<25x64xbf16, #tpu.memory_space<vmem>>, vector<1x64xbf16>
    %c0_309 = arith.constant 0 : index
    %c960 = arith.constant 960 : index
    %344 = vector.load %arg17[%c0_309, %c960] : memref<1x1600xbf16, #tpu.memory_space<vmem>>, vector<1x64xbf16>
    tpu.vector_store %arg17[%c0_309, %c960], %343 {strides = array<i32>} : memref<1x1600xbf16, #tpu.memory_space<vmem>>, vector<1x64xbf16>,
    %c16_310 = arith.constant 16 : index
    %c0_311 = arith.constant 0 : index
    %345 = vector.load %arg16[%c16_310, %c0_311] : memref<25x64xbf16, #tpu.memory_space<vmem>>, vector<1x64xbf16>
    %c0_312 = arith.constant 0 : index
    %c1024 = arith.constant 1024 : index
    %346 = vector.load %arg17[%c0_312, %c1024] : memref<1x1600xbf16, #tpu.memory_space<vmem>>, vector<1x64xbf16>
    tpu.vector_store %arg17[%c0_312, %c1024], %345 {strides = array<i32>} : memref<1x1600xbf16, #tpu.memory_space<vmem>>, vector<1x64xbf16>,
    %c17_313 = arith.constant 17 : index
    %c0_314 = arith.constant 0 : index
    %347 = vector.load %arg16[%c17_313, %c0_314] : memref<25x64xbf16, #tpu.memory_space<vmem>>, vector<1x64xbf16>
    %c0_315 = arith.constant 0 : index
    %c1088 = arith.constant 1088 : index
    %348 = vector.load %arg17[%c0_315, %c1088] : memref<1x1600xbf16, #tpu.memory_space<vmem>>, vector<1x64xbf16>
    tpu.vector_store %arg17[%c0_315, %c1088], %347 {strides = array<i32>} : memref<1x1600xbf16, #tpu.memory_space<vmem>>, vector<1x64xbf16>,
    %c18_316 = arith.constant 18 : index
    %c0_317 = arith.constant 0 : index
    %349 = vector.load %arg16[%c18_316, %c0_317] : memref<25x64xbf16, #tpu.memory_space<vmem>>, vector<1x64xbf16>
    %c0_318 = arith.constant 0 : index
    %c1152 = arith.constant 1152 : index
    %350 = vector.load %arg17[%c0_318, %c1152] : memref<1x1600xbf16, #tpu.memory_space<vmem>>, vector<1x64xbf16>
    tpu.vector_store %arg17[%c0_318, %c1152], %349 {strides = array<i32>} : memref<1x1600xbf16, #tpu.memory_space<vmem>>, vector<1x64xbf16>,
    %c19_319 = arith.constant 19 : index
    %c0_320 = arith.constant 0 : index
    %351 = vector.load %arg16[%c19_319, %c0_320] : memref<25x64xbf16, #tpu.memory_space<vmem>>, vector<1x64xbf16>
    %c0_321 = arith.constant 0 : index
    %c1216 = arith.constant 1216 : index
    %352 = vector.load %arg17[%c0_321, %c1216] : memref<1x1600xbf16, #tpu.memory_space<vmem>>, vector<1x64xbf16>
    tpu.vector_store %arg17[%c0_321, %c1216], %351 {strides = array<i32>} : memref<1x1600xbf16, #tpu.memory_space<vmem>>, vector<1x64xbf16>,
    %c20_322 = arith.constant 20 : index
    %c0_323 = arith.constant 0 : index
    %353 = vector.load %arg16[%c20_322, %c0_323] : memref<25x64xbf16, #tpu.memory_space<vmem>>, vector<1x64xbf16>
    %c0_324 = arith.constant 0 : index
    %c1280 = arith.constant 1280 : index
    %354 = vector.load %arg17[%c0_324, %c1280] : memref<1x1600xbf16, #tpu.memory_space<vmem>>, vector<1x64xbf16>
    tpu.vector_store %arg17[%c0_324, %c1280], %353 {strides = array<i32>} : memref<1x1600xbf16, #tpu.memory_space<vmem>>, vector<1x64xbf16>,
    %c21_325 = arith.constant 21 : index
    %c0_326 = arith.constant 0 : index
    %355 = vector.load %arg16[%c21_325, %c0_326] : memref<25x64xbf16, #tpu.memory_space<vmem>>, vector<1x64xbf16>
    %c0_327 = arith.constant 0 : index
    %c1344 = arith.constant 1344 : index
    %356 = vector.load %arg17[%c0_327, %c1344] : memref<1x1600xbf16, #tpu.memory_space<vmem>>, vector<1x64xbf16>
    tpu.vector_store %arg17[%c0_327, %c1344], %355 {strides = array<i32>} : memref<1x1600xbf16, #tpu.memory_space<vmem>>, vector<1x64xbf16>,
    %c22_328 = arith.constant 22 : index
    %c0_329 = arith.constant 0 : index
    %357 = vector.load %arg16[%c22_328, %c0_329] : memref<25x64xbf16, #tpu.memory_space<vmem>>, vector<1x64xbf16>
    %c0_330 = arith.constant 0 : index
    %c1408 = arith.constant 1408 : index
    %358 = vector.load %arg17[%c0_330, %c1408] : memref<1x1600xbf16, #tpu.memory_space<vmem>>, vector<1x64xbf16>
    tpu.vector_store %arg17[%c0_330, %c1408], %357 {strides = array<i32>} : memref<1x1600xbf16, #tpu.memory_space<vmem>>, vector<1x64xbf16>,
    %c23_331 = arith.constant 23 : index
    %c0_332 = arith.constant 0 : index
    %359 = vector.load %arg16[%c23_331, %c0_332] : memref<25x64xbf16, #tpu.memory_space<vmem>>, vector<1x64xbf16>
    %c0_333 = arith.constant 0 : index
    %c1472 = arith.constant 1472 : index
    %360 = vector.load %arg17[%c0_333, %c1472] : memref<1x1600xbf16, #tpu.memory_space<vmem>>, vector<1x64xbf16>
    tpu.vector_store %arg17[%c0_333, %c1472], %359 {strides = array<i32>} : memref<1x1600xbf16, #tpu.memory_space<vmem>>, vector<1x64xbf16>,
    %c24_334 = arith.constant 24 : index
    %c0_335 = arith.constant 0 : index
    %361 = vector.load %arg16[%c24_334, %c0_335] : memref<25x64xbf16, #tpu.memory_space<vmem>>, vector<1x64xbf16>
    %c0_336 = arith.constant 0 : index
    %c1536 = arith.constant 1536 : index
    %362 = vector.load %arg17[%c0_336, %c1536] : memref<1x1600xbf16, #tpu.memory_space<vmem>>, vector<1x64xbf16>
    tpu.vector_store %arg17[%c0_336, %c1536], %361 {strides = array<i32>} : memref<1x1600xbf16, #tpu.memory_space<vmem>>, vector<1x64xbf16>,
    %c0_337 = arith.constant 0 : index
    %c0_338 = arith.constant 0 : index
    %363 = vector.load %arg17[%c0_337, %c0_338] : memref<1x1600xbf16, #tpu.memory_space<vmem>>, vector<1x1600xbf16>
    %c0_339 = arith.constant 0 : index
    %c0_340 = arith.constant 0 : index
    %364 = vector.load %arg6[%c0_339, %c0_340] : memref<1600x384xbf16, #tpu.memory_space<vmem>>, vector<1600x384xbf16>
    %cst_341 = arith.constant dense<0.000000e+00> : vector<1x384xf32>
    %365 = tpu.matmul %363, %364, %cst_341 {dimension_numbers = #tpu.dot_dimension_numbers<[1], [0], [0], [1], [0, 0, 1, 1], [], []>} : vector<1x1600xbf16>, vector<1600x384xbf16>, vector<1x384xf32> -> vector<1x384xf32>
    %c0_342 = arith.constant 0 : index
    %c0_343 = arith.constant 0 : index
    %366 = vector.load %arg7[%c0_342, %c0_343] : memref<1x384xf32, #tpu.memory_space<vmem>>, vector<1x384xf32>
    %367 = arith.addf %365, %366 : vector<1x384xf32>
    %cst_344 = arith.constant 0.000000e+00 : f32
    %368 = vector.broadcast %cst_344 : f32 to vector<1x384xf32>
    %369 = arith.maximumf %367, %368 : vector<1x384xf32>
    %370 = arith.truncf %369 : vector<1x384xf32> to vector<1x384xbf16>
    %c0_345 = arith.constant 0 : index
    %c0_346 = arith.constant 0 : index
    %371 = vector.load %arg8[%c0_345, %c0_346] : memref<384x192xbf16, #tpu.memory_space<vmem>>, vector<384x192xbf16>
    %cst_347 = arith.constant dense<0.000000e+00> : vector<1x192xf32>
    %372 = tpu.matmul %370, %371, %cst_347 {dimension_numbers = #tpu.dot_dimension_numbers<[1], [0], [0], [1], [0, 0, 1, 1], [], []>} : vector<1x384xbf16>, vector<384x192xbf16>, vector<1x192xf32> -> vector<1x192xf32>
    %c0_348 = arith.constant 0 : index
    %c0_349 = arith.constant 0 : index
    %373 = vector.load %arg9[%c0_348, %c0_349] : memref<1x192xf32, #tpu.memory_space<vmem>>, vector<1x192xf32>
    %374 = arith.addf %372, %373 : vector<1x192xf32>
    %cst_350 = arith.constant 0.000000e+00 : f32
    %375 = vector.broadcast %cst_350 : f32 to vector<1x192xf32>
    %376 = arith.maximumf %374, %375 : vector<1x192xf32>
    %377 = arith.truncf %376 : vector<1x192xf32> to vector<1x192xbf16>
    %c0_351 = arith.constant 0 : index
    %c0_352 = arith.constant 0 : index
    %378 = vector.load %arg10[%c0_351, %c0_352] : memref<192x128xbf16, #tpu.memory_space<vmem>>, vector<192x128xbf16>
    %cst_353 = arith.constant dense<0.000000e+00> : vector<1x128xf32>
    %379 = tpu.matmul %377, %378, %cst_353 {dimension_numbers = #tpu.dot_dimension_numbers<[1], [0], [0], [1], [0, 0, 1, 1], [], []>} : vector<1x192xbf16>, vector<192x128xbf16>, vector<1x128xf32> -> vector<1x128xf32>
    %c0_354 = arith.constant 0 : index
    %c0_355 = arith.constant 0 : index
    %380 = vector.load %arg11[%c0_354, %c0_355] : memref<1x128xf32, #tpu.memory_space<vmem>>, vector<1x128xf32>
    %381 = arith.addf %379, %380 : vector<1x128xf32>
    %c0_356 = arith.constant 0 : index
    %c0_357 = arith.constant 0 : index
    %c0_358 = arith.constant 0 : index
    %382 = vector.load %arg12[%c0_356, %c0_357, %c0_358] : memref<1x1x128xf32, #tpu.memory_space<vmem>>, vector<1x1x128xf32>
    %383 = vector.shape_cast %382 : vector<1x1x128xf32> to vector<1x128xf32>
    %384 = vector.shape_cast %381 : vector<1x128xf32> to vector<1x1x128xf32>
    tpu.vector_store %arg12[%c0_356, %c0_357, %c0_358], %384 {strides = array<i32>} : memref<1x1x128xf32, #tpu.memory_space<vmem>>, vector<1x1x128xf32>,
    return
  }
  func.func @transform_0(%arg0: i32) -> (i32, i32, i32) {
    %c0_i32 = arith.constant 0 : i32
    %c0_i32_0 = arith.constant 0 : i32
    %c0_i32_1 = arith.constant 0 : i32
    return %arg0, %c0_i32, %c0_i32_0 : i32, i32, i32
  }
  func.func @transform_1(%arg0: i32) -> (i32, i32) {
    %c0_i32 = arith.constant 0 : i32
    %c0_i32_0 = arith.constant 0 : i32
    %c0_i32_1 = arith.constant 0 : i32
    return %c0_i32, %c0_i32_0 : i32, i32
  }
  func.func @transform_2(%arg0: i32) -> (i32, i32) {
    %c0_i32 = arith.constant 0 : i32
    %c0_i32_0 = arith.constant 0 : i32
    %c0_i32_1 = arith.constant 0 : i32
    return %c0_i32, %c0_i32_0 : i32, i32
  }
  func.func @transform_3(%arg0: i32) -> (i32, i32, i32) {
    %c0_i32 = arith.constant 0 : i32
    %c0_i32_0 = arith.constant 0 : i32
    %c0_i32_1 = arith.constant 0 : i32
    %c0_i32_2 = arith.constant 0 : i32
    return %c0_i32, %c0_i32_0, %c0_i32_1 : i32, i32, i32
  }
  func.func @transform_4(%arg0: i32) -> (i32, i32) {
    %c0_i32 = arith.constant 0 : i32
    %c0_i32_0 = arith.constant 0 : i32
    %c0_i32_1 = arith.constant 0 : i32
    return %c0_i32, %c0_i32_0 : i32, i32
  }
  func.func @transform_5(%arg0: i32) -> (i32, i32) {
    %c0_i32 = arith.constant 0 : i32
    %c0_i32_0 = arith.constant 0 : i32
    %c0_i32_1 = arith.constant 0 : i32
    return %c0_i32, %c0_i32_0 : i32, i32
  }
  func.func @transform_6(%arg0: i32) -> (i32, i32) {
    %c0_i32 = arith.constant 0 : i32
    %c0_i32_0 = arith.constant 0 : i32
    %c0_i32_1 = arith.constant 0 : i32
    return %c0_i32, %c0_i32_0 : i32, i32
  }
  func.func @transform_7(%arg0: i32) -> (i32, i32) {
    %c0_i32 = arith.constant 0 : i32
    %c0_i32_0 = arith.constant 0 : i32
    %c0_i32_1 = arith.constant 0 : i32
    return %c0_i32, %c0_i32_0 : i32, i32
  }
  func.func @transform_8(%arg0: i32) -> (i32, i32) {
    %c0_i32 = arith.constant 0 : i32
    %c0_i32_0 = arith.constant 0 : i32
    %c0_i32_1 = arith.constant 0 : i32
    return %c0_i32, %c0_i32_0 : i32, i32
  }
  func.func @transform_9(%arg0: i32) -> (i32, i32) {
    %c0_i32 = arith.constant 0 : i32
    %c0_i32_0 = arith.constant 0 : i32
    %c0_i32_1 = arith.constant 0 : i32
    return %c0_i32, %c0_i32_0 : i32, i32
  }
  func.func @transform_10(%arg0: i32) -> (i32, i32) {
    %c0_i32 = arith.constant 0 : i32
    %c0_i32_0 = arith.constant 0 : i32
    %c0_i32_1 = arith.constant 0 : i32
    return %c0_i32, %c0_i32_0 : i32, i32
  }
  func.func @transform_11(%arg0: i32) -> (i32, i32, i32) {
    %c0_i32 = arith.constant 0 : i32
    %c0_i32_0 = arith.constant 0 : i32
    %c0_i32_1 = arith.constant 0 : i32
    return %arg0, %c0_i32, %c0_i32_0 : i32, i32, i32
  }
}

</mosaic_0001>

<bundles_post_ra>
// kernel: lenet_forward.1
= control target key start
LH: loop header
LB: loop body
LE: loop exit
PB: predicated region body
PF: predicated region fallthrough
CT: control target
= control target key end

     0   :  { %s21571_s0 = inlined_call_operand.vmem [shape: bf16[2,784,80], index: 0, kind: input, shape index: {}]   ;;  %s21572_s1 = inlined_call_operand.vmem [shape: bf16[80,64], index: 1, kind: input, shape index: {}]   ;;  %s21573_s2 = inlined_call_operand.vmem [shape: f32[1,64], index: 2, kind: input, shape index: {}]   ;;  %s21574_s3 = inlined_call_operand.vmem [shape: bf16[25,64,64], index: 3, kind: input, shape index: {}]   ;;  %s21575_s4 = inlined_call_operand.vmem [shape: f32[1,64], index: 4, kind: input, shape index: {}]   ;;  %s21576_s5 = inlined_call_operand.vmem [shape: bf16[1600,384], index: 5, kind: input, shape index: {}]   ;;  %s21577_s6 = inlined_call_operand.vmem [shape: f32[1,384], index: 6, kind: input, shape index: {}]   ;;  %s21578_s7 = inlined_call_operand.vmem [shape: bf16[384,192], index: 7, kind: input, shape index: {}]   ;;  %s21579_s8 = inlined_call_operand.vmem [shape: f32[1,192], index: 8, kind: input, shape index: {}]   ;;  %s21580_s9 = inlined_call_operand.vmem [shape: bf16[192,128], index: 9, kind: input, shape index: {}]   ;;  %s21581_s10 = inlined_call_operand.vmem [shape: f32[1,128], index: 10, kind: input, shape index: {}]   ;;  %s21582_s11 = inlined_call_operand.hbm [shape: f32[2,1,128], index: 11, kind: output, shape index: {}]  }
   0x1   :  { %21678 = sst [smem:[#allocation138_spill]] %s21571_s0 }
   0x2   :  { %16 = vsyncpa [#allocation8], 0 }
   0x3   :  { %18 = vsyncpa [#allocation8 + $0x1], 0  ;;  %s15995_s17 = smov 0   ;;  %s15997_s18 = smov 0  }
   0x4   :  { %s15999_s19 = smov 0   ;;  %s16001_s20 = smov 0  }
   0x5 LB: > { %s16016_s21 = sadd.s32 4294967295, %s15927_s20   ;;  %s12041_s22 = sadd.s32 4294967294, %s15927_s20   ;;  %s15927_s20 = sphi %s16001_s20, %s22219_s20   ;;  %s15923_s19 = sphi %s15999_s19, %s22218_s19   ;;  %s15919_s18 = sphi %s15997_s18, %s22217_s18   ;;  %s15915_s17 = sphi %s15995_s17, %s22216_s17  }
   0x6   : > { %s16020_s23 = sadd.s32 1, %s15927_s20   ;;  %s267_s24 = sadd.s32 1, %s15923_s19 }
   0x7   : > { %s264_s25 = ssub.s32 %s15927_s20, %s16020_s23  ;;  %p277_p0 = scmp.ne.s32.totalorder %s15923_s19, %s15919_s18 }
   0x8   : > { %p265_p1 = scmp.eq.s32.totalorder %s264_s25, 0  ;;  %p278_p2 = scmp.eq.s32.totalorder %s16016_s21, 1 }
   0x9   : > { %p283_p3 = scmp.ne.s32.totalorder %s15919_s18, %s15915_s17  ;;  %p284_p4 = scmp.eq.s32.totalorder %s12041_s22, 1 }
   0xa   : > { %s16031_s26 = scalar_select %p265_p1, %s15923_s19, %s267_s24  }
   0xb   : > { %p16033_p5 = por %p278_p2, %p277_p0  ;;  %p16037_p6 = por %p284_p4, %p283_p3 }
   0xc   : > { %p12044_p7 = scmp.ge.s32.totalorder %s15927_s20, 1  ;;  %p340_p8 = scmp.lt.s32.totalorder %s15927_s20, 3 }
   0xe   : > { %p341_p9 = pnand %p12044_p7, %p340_p8 }
  0x10   : > { %344 = sbr.rel (%p341_p9) target bundleno = 2808 (0xaf8), region = 64 }
  0x15   : > { %v15110_v0 = vld [vmem:[%s21572_s1 + $0x20] sm:$0xff]   ;;  %v21588_v1 = vmov 0.0   ;;  %v15111_v2 = vld [vmem:[%s21572_s1 + $0x18] sm:$0xff]   ;;  %vm15930_vm0 = vmmov 0   ;;  %p379_p10 = scmp.lt.s32.totalorder %s16016_s21, 1  ;;  %v15112_v3 = vld [vmem:[%s21572_s1 + $0x10] sm:$0xff]  }
  0x16   : > { %13747 = vmatprep.subr.bf16.mxu0 %v21588_v1  ;;  %13953 = vmatprep.subr.bf16.mxu1 %v21588_v1  ;;  %s21681_s0 = sld [smem:[#allocation138_spill]]  ;;  %v15113_v4 = vld [vmem:[%s21572_s1 + $0x8] sm:$0xff]   ;;  %v15114_v5 = vld [vmem:[%s21572_s1] sm:$0xff]   ;;  %vm775_vm1 = vcmask 654336   ;;  %v15152_v27 = vld [vmem:[%s21574_s3 + $0x38] sm:$0xff]   ;;  %vm1446_vm2 = vcmask 523264  }
  0x17   : > { %13748 = vmatpush3.bf16.msra.mxu0 %v15110_v0  ;;  %13757 = vmatprep.mubr.msk.bf16.mxu0 %vm15930_vm0, %v21588_v1  ;;  %s380_s16 = scalar_select %p379_p10, %s16016_s21, 1  ;;  %v15153_v29 = vld [vmem:[%s21574_s3 + $0x30] sm:$0xff]   ;;  %v15155_v30 = vld [vmem:[%s21574_s3 + $0x28] sm:$0xff]   ;;  %v15156_v32 = vld [vmem:[%s21574_s3 + $0x20] sm:$0xff]   ;;  %vm1574_vm3 = vcmask 519168   ;;  %vm1576_vm4 = vcmask 518144  }
  0x18   : > { %13749 = vmatprep.subr.bf16.mxu0 %v21588_v1  ;;  %13961 = vmatprep.mubr.msk.bf16.mxu1 %vm15930_vm0, %v21588_v1  ;;  %v16192_v35 = vld [vmem:[%s21573_s2] ss:$0 sm:$0xff]  ;;  %vm1606_vm5 = vcmask 1042432   ;;  %vm1607_vm6 = vcmask 1046532   ;;  %vm21590_vm8 = vcmask 519171   ;;  %vm21585_vm9 = vcmask 517120  }
  0x19   : > { %s15065_s22 = smul.u32 392, %s380_s16  ;;  %13954 = vmatpush3.bf16.msra.mxu1 %v15152_v27  ;;  %vm16268_vm7 = vmor %vm1606_vm5, %vm1607_vm6  ;;  %vm21584_vm10 = vcmask 519170   ;;  %vm1650_vm11 = vcmask 1041408   ;;  %vm1651_vm12 = vcmask 1045508   ;;  %vm21583_vm14 = vcmask 516096   ;;  %s21676_s15 = smov 64  }
  0x1a   : > { %13955 = vmatprep.subr.bf16.mxu1 %v21588_v1  ;;  %vm16325_vm13 = vmor %vm1650_vm11, %vm1651_vm12  ;;  %vm2151_vm15 = vsmask.f32 7424  ;;  %vm2748_vm5 = vsmask.f32 6400  ;;  %vm3249_vm6 = vcmask 1044480   ;;  %vm1703_vm11 = vcmask 519169  }
  0x1b   : > { %13750 = vmatpush3.bf16.msra.mxu0 %v15111_v2  ;;  %vm1694_vm12 = vcmask 1040384   ;;  %s22212_s13 = smov 64   ;;  %s377_s30 = sand.u32 1, %s15919_s18  }
  0x1c   : > { %13751 = vmatprep.subr.bf16.mxu0 %v21588_v1  ;;  %s16065_s29 = scalar_lea.vmem %s21681_s0, %s15065_s22  ;;  %s13196_s14 = sshll.u32 %s16016_s21, 4 }
  0x1d   : > { %v15115_v6 = vld [vmem:[%s16065_s29] sm:$0xff]   ;;  %v15116_v7 = vld [vmem:[%s16065_s29 + $0x8] sm:$0xff]   ;;  %v15117_v8 = vld [vmem:[%s16065_s29 + $0x10] sm:$0xff]   ;;  %13956 = vmatpush3.bf16.msra.mxu1 %v15153_v29  ;;  %s378_s16 = scalar_lea.vmem [#allocation7], %s377_s30  ;;  %s11974_s25 = scalar_lea.sflag [#allocation8], %s377_s30 }
  0x1e   : > { %v15118_v9 = vld [vmem:[%s16065_s29 + $0x18] sm:$0xff]   ;;  %v15119_v10 = vld [vmem:[%s16065_s29 + $0x20] sm:$0xff]   ;;  %v15120_v11 = vld [vmem:[%s16065_s29 + $0x28] sm:$0xff]   ;;  %13957 = vmatprep.subr.bf16.mxu1 %v21588_v1  ;;  %s11986_s22 = sshll.u32 %s378_s16, 4  ;;  %s15934_s21 = smov [#allocation7]   ;;  %s21532_s22 = int_to_ptr.vmem [resolvable:$true] %s11986_s22 }
  0x1f   : > { %13752 = vmatpush3.bf16.msra.mxu0 %v15112_v3  ;;  %v15121_v12 = vld [vmem:[%s16065_s29 + $0x30] sm:$0xff]   ;;  %v15122_v13 = vld [vmem:[%s16065_s29 + $0x38] sm:$0xff]   ;;  %v15123_v14 = vld [vmem:[%s16065_s29 + $0x40] sm:$0xff]   ;;  %s15871_s12 = sshll.u32 %s15934_s21, 4  ;;  %s15872_s12 = int_to_ptr.vmem [resolvable:$false] %s15871_s12 }
  0x20   : > { %13753 = vmatprep.subr.bf16.mxu0 %v21588_v1  ;;  %v15124_v15 = vld [vmem:[%s16065_s29 + $0x48] sm:$0xff]   ;;  %v15125_v16 = vld [vmem:[%s16065_s29 + $0x50] sm:$0xff]   ;;  %v15126_v17 = vld [vmem:[%s16065_s29 + $0x58] sm:$0xff]   ;;  %p15874_p0 = scmp.lt.s32.totalorder %s21532_s22, %s15872_s12 }
  0x21   : > { %v15127_v18 = vld [vmem:[%s16065_s29 + $0x60] sm:$0xff]   ;;  %v15128_v19 = vld [vmem:[%s16065_s29 + $0x68] sm:$0xff]   ;;  %v15129_v20 = vld [vmem:[%s16065_s29 + $0x70] sm:$0xff]   ;;  %13958 = vmatpush3.bf16.msra.mxu1 %v15155_v30 }
  0x22   : > { %v15130_v21 = vld [vmem:[%s16065_s29 + $0x78] sm:$0xff]   ;;  %v15131_v22 = vld [vmem:[%s16065_s29 + $0x80] sm:$0xff]   ;;  %v15132_v23 = vld [vmem:[%s16065_s29 + $0x88] sm:$0xff]   ;;  %13959 = vmatprep.subr.bf16.mxu1 %v21588_v1 }
  0x23   : > { %13754 = vmatpush3.bf16.msra.mxu0 %v15113_v4  ;;  %v15133_v24 = vld [vmem:[%s16065_s29 + $0x90] sm:$0xff]   ;;  %v15134_v25 = vld [vmem:[%s16065_s29 + $0x98] sm:$0xff]   ;;  %v15135_v26 = vld [vmem:[%s16065_s29 + $0xa0] sm:$0xff]  }
  0x24   : > { %13755 = vmatprep.subr.bf16.mxu0 %v21588_v1  ;;  %v15136_v28 = vld [vmem:[%s16065_s29 + $0xa8] sm:$0xff]   ;;  %v15137_v31 = vld [vmem:[%s16065_s29 + $0xb0] sm:$0xff]   ;;  %v15138_v33 = vld [vmem:[%s16065_s29 + $0xb8] sm:$0xff]  }
  0x25   : > { %13960 = vmatpush3.bf16.msra.mxu1 %v15156_v32  ;;  %v15139_v34 = vld [vmem:[%s16065_s29 + $0xc0] sm:$0xff]   ;;  %v15140_v39 = vld [vmem:[%s16065_s29 + $0xc8] sm:$0xff]   ;;  %v15141_v48 = vld [vmem:[%s16065_s29 + $0xd0] sm:$0xff]  }
  0x26   : > { %13997 = vmatprep.subr.bf16.mxu1 %v21588_v1  ;;  %v15142_v57 = vld [vmem:[%s16065_s29 + $0xd8] sm:$0xff]   ;;  %v15143_v3 = vld [vmem:[%s16065_s29 + $0xe0] sm:$0xff]  }
  0x27   : > { %13756 = vmatpush3.bf16.msra.mxu0 %v15114_v5 }
  0x28   : > { %14217 = vmatprep.subr.bf16.mxu0 %v21588_v1 }
  0x2a   : > { %13758 = vmatmul.mubr.msk.bf16.vlgmr.msra.gmra.mxu0 %vm775_vm1, %v15115_v6 }
  0x2b   : > { %13761 = vmatprep.mubr.msk.bf16.mxu0 %vm15930_vm0, %v21588_v1 }
  0x32   : > { %13762 = vmatmul.mubr.msk.bf16.gmra.mxu0 %vm775_vm1, %v15116_v7 }
  0x33   : > { %13765 = vmatprep.mubr.msk.bf16.mxu0 %vm15930_vm0, %v21588_v1 }
  0x3a   : > { %13766 = vmatmul.mubr.msk.bf16.gmra.mxu0 %vm775_vm1, %v15117_v8 }
  0x3b   : > { %13769 = vmatprep.mubr.msk.bf16.mxu0 %vm15930_vm0, %v21588_v1 }
  0x42   : > { %13770 = vmatmul.mubr.msk.bf16.gmra.mxu0 %vm775_vm1, %v15118_v9 }
  0x43   : > { %13773 = vmatprep.mubr.msk.bf16.mxu0 %vm15930_vm0, %v21588_v1 }
  0x4a   : > { %13774 = vmatmul.mubr.msk.bf16.gmra.mxu0 %vm775_vm1, %v15119_v10 }
  0x4b   : > { %13777 = vmatprep.mubr.msk.bf16.mxu0 %vm15930_vm0, %v21588_v1 }
  0x52   : > { %13778 = vmatmul.mubr.msk.bf16.gmra.mxu0 %vm775_vm1, %v15120_v11 }
  0x53   : > { %13781 = vmatprep.mubr.msk.bf16.mxu0 %vm15930_vm0, %v21588_v1 }
  0x5a   : > { %13782 = vmatmul.mubr.msk.bf16.gmra.mxu0 %vm775_vm1, %v15121_v12 }
  0x5b   : > { %13785 = vmatprep.mubr.msk.bf16.mxu0 %vm15930_vm0, %v21588_v1 }
  0x62   : > { %13786 = vmatmul.mubr.msk.bf16.gmra.mxu0 %vm775_vm1, %v15122_v13 }
  0x63   : > { %13789 = vmatprep.mubr.msk.bf16.mxu0 %vm15930_vm0, %v21588_v1 }
  0x6a   : > { %13790 = vmatmul.mubr.msk.bf16.gmra.mxu0 %vm775_vm1, %v15123_v14 }
  0x6b   : > { %13793 = vmatprep.mubr.msk.bf16.mxu0 %vm15930_vm0, %v21588_v1 }
  0x72   : > { %13794 = vmatmul.mubr.msk.bf16.gmra.mxu0 %vm775_vm1, %v15124_v15 }
  0x73   : > { %13797 = vmatprep.mubr.msk.bf16.mxu0 %vm15930_vm0, %v21588_v1 }
  0x7a   : > { %13798 = vmatmul.mubr.msk.bf16.gmra.mxu0 %vm775_vm1, %v15125_v16 }
  0x7b   : > { %13801 = vmatprep.mubr.msk.bf16.mxu0 %vm15930_vm0, %v21588_v1 }
  0x82   : > { %13802 = vmatmul.mubr.msk.bf16.gmra.mxu0 %vm775_vm1, %v15126_v17 }
  0x83   : > { %13805 = vmatprep.mubr.msk.bf16.mxu0 %vm15930_vm0, %v21588_v1 }
  0x8a   : > { %13806 = vmatmul.mubr.msk.bf16.gmra.mxu0 %vm775_vm1, %v15127_v18 }
  0x8b   : > { %13809 = vmatprep.mubr.msk.bf16.mxu0 %vm15930_vm0, %v21588_v1 }
  0x92   : > { %13810 = vmatmul.mubr.msk.bf16.gmra.mxu0 %vm775_vm1, %v15128_v19 }
  0x93   : > { %13813 = vmatprep.mubr.msk.bf16.mxu0 %vm15930_vm0, %v21588_v1 }
  0x9a   : > { %13814 = vmatmul.mubr.msk.bf16.gmra.mxu0 %vm775_vm1, %v15129_v20  ;;  %v15144_v20 = vld [vmem:[%s16065_s29 + $0xe8] sm:$0xff]  }
  0x9b   : > { %13817 = vmatprep.mubr.msk.bf16.mxu0 %vm15930_vm0, %v21588_v1 }
  0xa2   : > { %13818 = vmatmul.mubr.msk.bf16.gmra.mxu0 %vm775_vm1, %v15130_v21 }
  0xa3   : > { %13821 = vmatprep.mubr.msk.bf16.mxu0 %vm15930_vm0, %v21588_v1 }
  0xaa   : > { %13822 = vmatmul.mubr.msk.bf16.gmra.mxu0 %vm775_vm1, %v15131_v22 }
  0xab   : > { %13825 = vmatprep.mubr.msk.bf16.mxu0 %vm15930_vm0, %v21588_v1 }
  0xb2   : > { %13826 = vmatmul.mubr.msk.bf16.gmra.mxu0 %vm775_vm1, %v15132_v23 }
  0xb3   : > { %13829 = vmatprep.mubr.msk.bf16.mxu0 %vm15930_vm0, %v21588_v1 }
  0xba   : > { %13830 = vmatmul.mubr.msk.bf16.gmra.mxu0 %vm775_vm1, %v15133_v24 }
  0xbb   : > { %13833 = vmatprep.mubr.msk.bf16.mxu0 %vm15930_vm0, %v21588_v1 }
  0xc2   : > { %13834 = vmatmul.mubr.msk.bf16.gmra.mxu0 %vm775_vm1, %v15134_v25 }
  0xc3   : > { %13837 = vmatprep.mubr.msk.bf16.mxu0 %vm15930_vm0, %v21588_v1 }
  0xca   : > { %13838 = vmatmul.mubr.msk.bf16.gmra.mxu0 %vm775_vm1, %v15135_v26 }
  0xcb   : > { %13841 = vmatprep.mubr.msk.bf16.mxu0 %vm15930_vm0, %v21588_v1 }
  0xd2   : > { %13842 = vmatmul.mubr.msk.bf16.gmra.mxu0 %vm775_vm1, %v15136_v28 }
  0xd3   : > { %13845 = vmatprep.mubr.msk.bf16.mxu0 %vm15930_vm0, %v21588_v1 }
  0xda   : > { %13846 = vmatmul.mubr.msk.bf16.gmra.mxu0 %vm775_vm1, %v15137_v31 }
  0xdb   : > { %13849 = vmatprep.mubr.msk.bf16.mxu0 %vm15930_vm0, %v21588_v1 }
  0xe2   : > { %13850 = vmatmul.mubr.msk.bf16.gmra.mxu0 %vm775_vm1, %v15138_v33 }
  0xe3   : > { %13853 = vmatprep.mubr.msk.bf16.mxu0 %vm15930_vm0, %v21588_v1 }
  0xea   : > { %v957_v36 = vpop.f32.mrf.mxu0  ;;  %13854 = vmatmul.mubr.msk.bf16.gmra.mxu0 %vm775_vm1, %v15139_v34 }
  0xeb   : > { %v958_v37 = vadd.f32 %v16192_v35, %v957_v36  ;;  %13857 = vmatprep.mubr.msk.bf16.mxu0 %vm15930_vm0, %v21588_v1 }
  0xec   : > { %v13759_v38 = vpop.f32.mrf.mxu0 }
  0xed   : > { %v1348_v40 = vmax.f32 %v958_v37, 0.0 }
  0xee   : > { %v960_v41 = vpop.f32.mrf.mxu0 }
  0xef   : > { %1447 = vst.msk [vmem:[#allocation2] sm:$0xff] %vm1446_vm2, %v1348_v40  ;;  %v961_v42 = vadd.f32 %v16192_v35, %v960_v41  ;;  %v15145_v40 = vld [vmem:[%s16065_s29 + $0xf0] sm:$0xff]  }
  0xf0   : > { %v13760_v43 = vpop.f32.mrf.mxu0 }
  0xf1   : > { %v1349_v44 = vmax.f32 %v961_v42, 0.0 }
  0xf2   : > { %v965_v45 = vpop.f32.mrf.mxu0  ;;  %13858 = vmatmul.mubr.msk.bf16.gmra.mxu0 %vm775_vm1, %v15140_v39 }
  0xf3   : > { %1448 = vst.msk [vmem:[#allocation2 + $0x8] sm:$0xff] %vm1446_vm2, %v1349_v44  ;;  %v966_v46 = vadd.f32 %v16192_v35, %v965_v45  ;;  %13861 = vmatprep.mubr.msk.bf16.mxu0 %vm15930_vm0, %v21588_v1 }
  0xf4   : > { %v13763_v47 = vpop.f32.mrf.mxu0 }
  0xf5   : > { %v1350_v49 = vmax.f32 %v966_v46, 0.0 }
  0xf6   : > { %v968_v50 = vpop.f32.mrf.mxu0 }
  0xf7   : > { %1449 = vst.msk [vmem:[#allocation2 + $0x10] sm:$0xff] %vm1446_vm2, %v1350_v49  ;;  %v969_v51 = vadd.f32 %v16192_v35, %v968_v50  ;;  %v15146_v49 = vld [vmem:[%s16065_s29 + $0xf8] sm:$0xff]  }
  0xf8   : > { %v13764_v52 = vpop.f32.mrf.mxu0 }
  0xf9   : > { %v1351_v53 = vmax.f32 %v969_v51, 0.0 }
  0xfa   : > { %v973_v54 = vpop.f32.mrf.mxu0  ;;  %13862 = vmatmul.mubr.msk.bf16.gmra.mxu0 %vm775_vm1, %v15141_v48  ;;  %v1545_v5 = vld [vmem:[#allocation2] ss:$2 sm:$0xff]  ;;  %v1549_v6 = vld [vmem:[#allocation2 + $0x1] ss:$2 sm:$0xff] }
  0xfb   : > { %1450 = vst.msk [vmem:[#allocation2 + $0x18] sm:$0xff] %vm1446_vm2, %v1351_v53  ;;  %v974_v55 = vadd.f32 %v16192_v35, %v973_v54  ;;  %13865 = vmatprep.mubr.msk.bf16.mxu0 %vm15930_vm0, %v21588_v1  ;;  %v1552_v16 = vmax.f32 %v1545_v5, %v1549_v6  ;;  %v15172_v6 = vld [vmem:[%s21574_s3 + $0xd0] sm:$0xff]  }
  0xfc   : > { %v13767_v56 = vpop.f32.mrf.mxu0 }
  0xfd   : > { %v1352_v58 = vmax.f32 %v974_v55, 0.0 }
  0xfe   : > { %v976_v59 = vpop.f32.mrf.mxu0 }
  0xff   : > { %1451 = vst.msk [vmem:[#allocation2 + $0x20] sm:$0xff] %vm1446_vm2, %v1352_v58  ;;  %v977_v60 = vadd.f32 %v16192_v35, %v976_v59  ;;  %v15147_v59 = vld [vmem:[%s16065_s29 + $0x100] sm:$0xff]  }
 0x100   : > { %v13768_v61 = vpop.f32.mrf.mxu0 }
 0x101   : > { %v1353_v62 = vmax.f32 %v977_v60, 0.0 }
 0x102   : > { %v981_v63 = vpop.f32.mrf.mxu0  ;;  %13866 = vmatmul.mubr.msk.bf16.gmra.mxu0 %vm775_vm1, %v15142_v57  ;;  %v1547_v11 = vld [vmem:[#allocation2 + $0x10] ss:$2 sm:$0x3f]  ;;  %v1551_v12 = vld [vmem:[#allocation2 + $0x11] ss:$2 sm:$0x3f] }
 0x103   : > { %1452 = vst.msk [vmem:[#allocation2 + $0x28] sm:$0xff] %vm1446_vm2, %v1353_v62  ;;  %v982_v0 = vadd.f32 %v16192_v35, %v981_v63  ;;  %13869 = vmatprep.mubr.msk.bf16.mxu0 %vm15930_vm0, %v21588_v1  ;;  %v1553_v26 = vmax.f32 %v1547_v11, %v1551_v12  ;;  %v15171_v57 = vld [vmem:[%s21574_s3 + $0xd8] sm:$0xff]  }
 0x104   : > { %v13771_v2 = vpop.f32.mrf.mxu0  ;;  %14218 = vmatpush3.bf16.msra.mxu0 %v15171_v57 }
 0x105   : > { %v1354_v4 = vmax.f32 %v982_v0, 0.0  ;;  %14219 = vmatprep.subr.bf16.mxu0 %v21588_v1 }
 0x106   : > { %v984_v7 = vpop.f32.mrf.mxu0 }
 0x107   : > { %1453 = vst.msk [vmem:[#allocation2 + $0x30] sm:$0xff] %vm1446_vm2, %v1354_v4  ;;  %v985_v8 = vadd.f32 %v16192_v35, %v984_v7 }
 0x108   : > { %v13772_v9 = vpop.f32.mrf.mxu0  ;;  %14220 = vmatpush3.bf16.msra.mxu0 %v15172_v6 }
 0x109   : > { %v1355_v10 = vmax.f32 %v985_v8, 0.0  ;;  %14221 = vmatprep.subr.bf16.mxu0 %v21588_v1 }
 0x10a   : > { %v1555_v13 = vld [vmem:[#allocation2 + $0x1c] ss:$2 sm:$0xff]  ;;  %v1559_v14 = vld [vmem:[#allocation2 + $0x1d] ss:$2 sm:$0xff]  ;;  %v989_v15 = vpop.f32.mrf.mxu0  ;;  %13870 = vmatmul.mubr.msk.bf16.gmra.mxu0 %vm775_vm1, %v15143_v3 }
 0x10b   : > { %v1562_v17 = vmax.f32 %v1555_v13, %v1559_v14  ;;  %1454 = vst.msk [vmem:[#allocation2 + $0x38] sm:$0xff] %vm1446_vm2, %v1355_v10  ;;  %v990_v18 = vadd.f32 %v16192_v35, %v989_v15  ;;  %13873 = vmatprep.mubr.msk.bf16.mxu0 %vm15930_vm0, %v21588_v1 }
 0x10c   : > { %v13775_v19 = vpop.f32.mrf.mxu0 }
 0x10d   : > { %v1564_v21 = vmax.f32 %v1552_v16, %v1562_v17  ;;  %v1356_v22 = vmax.f32 %v990_v18, 0.0  ;;  %v15174_v18 = vld [vmem:[%s21574_s3 + $0xc8] sm:$0xff]  }
 0x10e   : > { %v1557_v23 = vld [vmem:[#allocation2 + $0x2c] ss:$2 sm:$0x3f]  ;;  %v1561_v24 = vld [vmem:[#allocation2 + $0x2d] ss:$2 sm:$0x3f]  ;;  %v992_v25 = vpop.f32.mrf.mxu0  ;;  %14222 = vmatpush3.bf16.msra.mxu0 %v15174_v18 }
 0x10f   : > { %v13199_v27 = vpack.c.bf16 %v1564_v21, %v1564_v21  ;;  %v1563_v28 = vmax.f32 %v1557_v23, %v1561_v24  ;;  %1455 = vst.msk [vmem:[#allocation2 + $0x40] sm:$0xff] %vm1446_vm2, %v1356_v22  ;;  %v993_v29 = vadd.f32 %v16192_v35, %v992_v25  ;;  %14223 = vmatprep.subr.bf16.mxu0 %v21588_v1 }
 0x110   : > { %v13776_v30 = vpop.f32.mrf.mxu0 }
 0x111   : > { %1575 = vst.msk [vmem:[#allocation3] sm:$0xf] %vm1574_vm3, %v13199_v27  ;;  %v1565_v31 = vmax.f32 %v1553_v26, %v1563_v28  ;;  %v1357_v32 = vmax.f32 %v993_v29, 0.0  ;;  %v15175_v28 = vld [vmem:[%s21574_s3 + $0xc0] sm:$0xff]  }
 0x112   : > { %v997_v33 = vpop.f32.mrf.mxu0  ;;  %13874 = vmatmul.mubr.msk.bf16.gmra.mxu0 %vm775_vm1, %v15144_v20  ;;  %v15148_v20 = vld [vmem:[%s16065_s29 + $0x108] sm:$0xff]  }
 0x113   : > { %v13200_v34 = vpack.c.bf16 %v1565_v31, %v1565_v31  ;;  %1456 = vst.msk [vmem:[#allocation2 + $0x48] sm:$0xff] %vm1446_vm2, %v1357_v32  ;;  %v998_v36 = vadd.f32 %v16192_v35, %v997_v33  ;;  %13877 = vmatprep.mubr.msk.bf16.mxu0 %vm15930_vm0, %v21588_v1  ;;  %14224 = vmatpush3.bf16.msra.mxu0 %v15175_v28 }
 0x114   : > { %v13779_v37 = vpop.f32.mrf.mxu0  ;;  %14305 = vmatprep.subr.bf16.mxu0 %v21588_v1 }
 0x115   : > { %1577 = vst.msk [vmem:[#allocation3 + $0x4] sm:$0x7] %vm1576_vm4, %v13200_v34  ;;  %v1358_v38 = vmax.f32 %v998_v36, 0.0 }
 0x116   : > { %v1000_v39 = vpop.f32.mrf.mxu0  ;;  %v1579_v53 = vld [vmem:[#allocation2 + $0x38] ss:$2 sm:$0xff]  ;;  %v1583_v54 = vld [vmem:[#allocation2 + $0x39] ss:$2 sm:$0xff] }
 0x117   : > { %1457 = vst.msk [vmem:[#allocation2 + $0x50] sm:$0xff] %vm1446_vm2, %v1358_v38  ;;  %v1001_v41 = vadd.f32 %v16192_v35, %v1000_v39  ;;  %v1586_v3 = vmax.f32 %v1579_v53, %v1583_v54 }
 0x118   : > { %v13780_v42 = vpop.f32.mrf.mxu0  ;;  %v2070_v18 = vld [vmem:[#allocation3] sm:$0xf] }
 0x119   : > { %v1359_v43 = vmax.f32 %v1001_v41, 0.0 }
 0x11a   : > { %v1005_v44 = vpop.f32.mrf.mxu0  ;;  %13878 = vmatmul.mubr.msk.bf16.gmra.mxu0 %vm775_vm1, %v15145_v40  ;;  %v15149_v40 = vld [vmem:[%s16065_s29 + $0x110] sm:$0xff]  }
 0x11b   : > { %1458 = vst.msk [vmem:[#allocation2 + $0x58] sm:$0xff] %vm1446_vm2, %v1359_v43  ;;  %v1006_v45 = vadd.f32 %v16192_v35, %v1005_v44  ;;  %13881 = vmatprep.mubr.msk.bf16.mxu0 %vm15930_vm0, %v21588_v1 }
 0x11c   : > { %v13783_v46 = vpop.f32.mrf.mxu0 }
 0x11d   : > { %v1360_v47 = vmax.f32 %v1006_v45, 0.0 }
 0x11e   : > { %v1008_v48 = vpop.f32.mrf.mxu0  ;;  %v1581_v61 = vld [vmem:[#allocation2 + $0x48] ss:$2 sm:$0x3f]  ;;  %v1585_v62 = vld [vmem:[#allocation2 + $0x49] ss:$2 sm:$0x3f] }
 0x11f   : > { %1459 = vst.msk [vmem:[#allocation2 + $0x60] sm:$0xff] %vm1446_vm2, %v1360_v47  ;;  %v1009_v50 = vadd.f32 %v16192_v35, %v1008_v48  ;;  %v1587_v13 = vmax.f32 %v1581_v61, %v1585_v62 }
 0x120   : > { %v13784_v51 = vpop.f32.mrf.mxu0 }
 0x121   : > { %v1361_v52 = vmax.f32 %v1009_v50, 0.0 }
 0x122   : > { %v1013_v55 = vpop.f32.mrf.mxu0  ;;  %13882 = vmatmul.mubr.msk.bf16.gmra.mxu0 %vm775_vm1, %v15146_v49  ;;  %v15150_v49 = vld [vmem:[%s16065_s29 + $0x118] sm:$0xff]  }
 0x123   : > { %1460 = vst.msk [vmem:[#allocation2 + $0x68] sm:$0xff] %vm1446_vm2, %v1361_v52  ;;  %v1014_v56 = vadd.f32 %v16192_v35, %v1013_v55  ;;  %13885 = vmatprep.mubr.msk.bf16.mxu0 %vm15930_vm0, %v21588_v1 }
 0x124   : > { %v13787_v58 = vpop.f32.mrf.mxu0 }
 0x125   : > { %v1362_v60 = vmax.f32 %v1014_v56, 0.0 }
 0x126   : > { %v1589_v63 = vld [vmem:[#allocation2 + $0x54] ss:$2 sm:$0xff]  ;;  %v1593_v0 = vld [vmem:[#allocation2 + $0x55] ss:$2 sm:$0xff]  ;;  %v1016_v2 = vpop.f32.mrf.mxu0 }
 0x127   : > { %v1596_v4 = vmax.f32 %v1589_v63, %v1593_v0  ;;  %1461 = vst.msk [vmem:[#allocation2 + $0x70] sm:$0xff] %vm1446_vm2, %v1362_v60  ;;  %v1017_v5 = vadd.f32 %v16192_v35, %v1016_v2 }
 0x128   : > { %v13788_v7 = vpop.f32.mrf.mxu0 }
 0x129   : > { %v1598_v8 = vmax.f32 %v1586_v3, %v1596_v4  ;;  %v1363_v9 = vmax.f32 %v1017_v5, 0.0  ;;  %v15151_v3 = vld [vmem:[%s16065_s29 + $0x120] sm:$0xff]  }
 0x12a   : > { %v1591_v10 = vld [vmem:[#allocation2 + $0x64] ss:$2 sm:$0x3f]  ;;  %v1595_v11 = vld [vmem:[#allocation2 + $0x65] ss:$2 sm:$0x3f]  ;;  %v1021_v12 = vpop.f32.mrf.mxu0  ;;  %13886 = vmatmul.mubr.msk.bf16.gmra.mxu0 %vm775_vm1, %v15147_v59 }
 0x12b   : > { %v13201_v14 = vpack.c.bf16 %v1598_v8, %v1598_v8  ;;  %v1597_v15 = vmax.f32 %v1591_v10, %v1595_v11  ;;  %1462 = vst.msk [vmem:[#allocation2 + $0x78] sm:$0xff] %vm1446_vm2, %v1363_v9  ;;  %v1022_v17 = vadd.f32 %v16192_v35, %v1021_v12  ;;  %13889 = vmatprep.mubr.msk.bf16.mxu0 %vm15930_vm0, %v21588_v1 }
 0x12c   : > { %v13791_v19 = vpop.f32.mrf.mxu0 }
 0x12d   : > { %v1609_v21 = vrot.slane %v13201_v14, 5  ;;  %v1599_v22 = vmax.f32 %v1587_v13, %v1597_v15  ;;  %v1364_v23 = vmax.f32 %v1022_v17, 0.0 }
 0x12e   : > { %v1024_v24 = vpop.f32.mrf.mxu0 }
 0x12f   : > { %v1610_v25 = vrot.slane %v1609_v21, 4  ;;  %1618 = vst.msk [vmem:[#allocation3 + $0x4] sm:$0x8] %vm21590_vm8, %v1609_v21  ;;  %v13202_v26 = vpack.c.bf16 %v1599_v22, %v1599_v22  ;;  %v1025_v27 = vadd.f32 %v16192_v35, %v1024_v24  ;;  %v2530_v24 = vld [vmem:[#allocation3] sm:$0xe] }
 0x130   : > { %1463 = vst.msk [vmem:[#allocation2 + $0x80] sm:$0xff] %vm1446_vm2, %v1364_v23  ;;  %v13792_v29 = vpop.f32.mrf.mxu0 }
 0x131   : > { %v1611_v30 = vrot.slane %v13202_v26, 5  ;;  %v1365_v31 = vmax.f32 %v1025_v27, 0.0 }
 0x132   : > { %v1029_v32 = vpop.f32.mrf.mxu0  ;;  %13890 = vmatmul.mubr.msk.bf16.gmra.mxu0 %vm775_vm1, %v15148_v20  ;;  %v1623_v51 = vld [vmem:[#allocation2 + $0x70] ss:$2 sm:$0xff]  ;;  %v1627_v52 = vld [vmem:[#allocation2 + $0x71] ss:$2 sm:$0xff] }
 0x133   : > { %v1612_v33 = vsel %vm16268_vm7, %v1610_v25, %v1611_v30  ;;  %v1613_v34 = vrot.slane %v1611_v30, 4  ;;  %1464 = vst.msk [vmem:[#allocation2 + $0x88] sm:$0xff] %vm1446_vm2, %v1365_v31  ;;  %v1030_v36 = vadd.f32 %v16192_v35, %v1029_v32  ;;  %13893 = vmatprep.mubr.msk.bf16.mxu0 %vm15930_vm0, %v21588_v1  ;;  %v1630_v58 = vmax.f32 %v1623_v51, %v1627_v52  ;;  %v15154_v30 = vld [vmem:[%s16065_s29 + $0x128] sm:$0xff]  }
 0x134   : > { %1619 = vst.msk [vmem:[#allocation3 + $0x8] sm:$0xf] %vm1574_vm3, %v1612_v33  ;;  %v13795_v37 = vpop.f32.mrf.mxu0 }
 0x135   : > { %1621 = vst.msk [vmem:[#allocation3 + $0xc] sm:$0x3] %vm21585_vm9, %v1613_v34  ;;  %v1366_v38 = vmax.f32 %v1030_v36, 0.0 }
 0x136   : > { %v1032_v39 = vpop.f32.mrf.mxu0  ;;  %v2071_v12 = vld [vmem:[#allocation3 + $0x4] sm:$0xf] }
 0x137   : > { %1465 = vst.msk [vmem:[#allocation2 + $0x90] sm:$0xff] %vm1446_vm2, %v1366_v38  ;;  %v1033_v41 = vadd.f32 %v16192_v35, %v1032_v39  ;;  %v16322_v21 = vcombine.low %v2070_v18, %v2071_v12  ;;  %v16329_v28 = vcombine.low %v2530_v24, %v2071_v12  ;;  %v3173_v52 = vld [vmem:[#allocation3 + $0x4] sm:$0x8] }
 0x138   : > { %v13796_v42 = vpop.f32.mrf.mxu0 }
 0x139   : > { %v1367_v43 = vmax.f32 %v1033_v41, 0.0  ;;  %v2155_v34 = vshll.u32 %v16322_v21, 16  ;;  %v2750_v39 = vshrl.u32 %v16329_v28, 16  ;;  %v2153_v51 = vshrl.u32 %v16322_v21, 16 }
 0x13a   : > { %v1037_v44 = vpop.f32.mrf.mxu0  ;;  %13894 = vmatmul.mubr.msk.bf16.gmra.mxu0 %vm775_vm1, %v15149_v40  ;;  %v1625_v61 = vld [vmem:[#allocation2 + $0x80] ss:$2 sm:$0x3f]  ;;  %v1629_v62 = vld [vmem:[#allocation2 + $0x81] ss:$2 sm:$0x3f] }
 0x13b   : > { %1466 = vst.msk [vmem:[#allocation2 + $0x98] sm:$0xff] %vm1446_vm2, %v1367_v43  ;;  %v1038_v45 = vadd.f32 %v16192_v35, %v1037_v44  ;;  %13897 = vmatprep.mubr.msk.bf16.mxu0 %vm15930_vm0, %v21588_v1  ;;  %v1631_v7 = vmax.f32 %v1625_v61, %v1629_v62  ;;  %v3174_v38 = vld [vmem:[#allocation3 + $0x8] sm:$0xf]  ;;  %v2753_v43 = vshll.u32 %v16329_v28, 16 }
 0x13c   : > { %v13799_v46 = vpop.f32.mrf.mxu0 }
 0x13d   : > { %v1368_v47 = vmax.f32 %v1038_v45, 0.0  ;;  %v2157_v45 = vrot.slane %v2155_v34, 1 }
 0x13e   : > { %v1040_v48 = vpop.f32.mrf.mxu0 }
 0x13f   : > { %1467 = vst.msk [vmem:[#allocation2 + $0xa0] sm:$0xff] %vm1446_vm2, %v1368_v47  ;;  %v1041_v50 = vadd.f32 %v16192_v35, %v1040_v48 }
 0x140   : > { %v13800_v53 = vpop.f32.mrf.mxu0 }
 0x141   : > { %v1369_v54 = vmax.f32 %v1041_v50, 0.0 }
 0x142   : > { %v1633_v55 = vld [vmem:[#allocation2 + $0x8c] ss:$2 sm:$0xff]  ;;  %v1637_v56 = vld [vmem:[#allocation2 + $0x8d] ss:$2 sm:$0xff]  ;;  %v1045_v57 = vpop.f32.mrf.mxu0  ;;  %13898 = vmatmul.mubr.msk.bf16.gmra.mxu0 %vm775_vm1, %v15150_v49 }
 0x143   : > { %v1640_v59 = vmax.f32 %v1633_v55, %v1637_v56  ;;  %1468 = vst.msk [vmem:[#allocation2 + $0xa8] sm:$0xff] %vm1446_vm2, %v1369_v54  ;;  %v1046_v60 = vadd.f32 %v16192_v35, %v1045_v57  ;;  %13901 = vmatprep.mubr.msk.bf16.mxu0 %vm15930_vm0, %v21588_v1  ;;  %v15157_v54 = vld [vmem:[%s16065_s29 + $0x130] sm:$0xff]   ;;  %v16354_v55 = vcombine.low %v3173_v52, %v3174_v38  ;;  %v2752_v56 = vrot.slane %v2750_v39, 1 }
 0x144   : > { %v13803_v63 = vpop.f32.mrf.mxu0  ;;  %v2755_v57 = vrot.slane %v2753_v43, 2 }
 0x145   : > { %v1642_v0 = vmax.f32 %v1630_v58, %v1640_v59  ;;  %v1370_v2 = vmax.f32 %v1046_v60, 0.0  ;;  %v2158_v59 = vor.u32 %v2157_v45, %v2153_v51 }
 0x146   : > { %v1635_v4 = vld [vmem:[#allocation2 + $0x9c] ss:$2 sm:$0x3f]  ;;  %v1639_v5 = vld [vmem:[#allocation2 + $0x9d] ss:$2 sm:$0x3f]  ;;  %v1048_v6 = vpop.f32.mrf.mxu0 }
 0x147   : > { %v13203_v8 = vpack.c.bf16 %v1642_v0, %v1642_v0  ;;  %v1641_v9 = vmax.f32 %v1635_v4, %v1639_v5  ;;  %1469 = vst.msk [vmem:[#allocation2 + $0xb0] sm:$0xff] %vm1446_vm2, %v1370_v2  ;;  %v1049_v10 = vadd.f32 %v16192_v35, %v1048_v6  ;;  %v16376_v6 = vld [vmem:[%s21573_s2] ss:$0 sm:$0xff] }
 0x148   : > { %v13804_v11 = vpop.f32.mrf.mxu0 }
 0x149   : > { %v1653_v13 = vrot.slane %v13203_v8, 6  ;;  %v1643_v14 = vmax.f32 %v1631_v7, %v1641_v9  ;;  %v1371_v15 = vmax.f32 %v1049_v10, 0.0  ;;  %v2756_v8 = vor.u32 %v2755_v57, %v2752_v56 }
 0x14a   : > { %v1053_v17 = vpop.f32.mrf.mxu0  ;;  %13902 = vmatmul.mubr.msk.bf16.gmra.mxu0 %vm775_vm1, %v15151_v3 }
 0x14b   : > { %1662 = vst.msk [vmem:[#allocation3 + $0xc] sm:$0xc] %vm21584_vm10, %v1653_v13  ;;  %v13204_v19 = vpack.c.bf16 %v1643_v14, %v1643_v14  ;;  %v1054_v20 = vadd.f32 %v16192_v35, %v1053_v17  ;;  %13905 = vmatprep.mubr.msk.bf16.mxu0 %vm15930_vm0, %v21588_v1  ;;  %v1654_v25 = vrot.slane %v1653_v13, 4 }
 0x14c   : > { %1470 = vst.msk [vmem:[#allocation2 + $0xb8] sm:$0xff] %vm1446_vm2, %v1371_v15  ;;  %v13807_v23 = vpop.f32.mrf.mxu0 }
 0x14d   : > { %v1655_v26 = vrot.slane %v13204_v19, 6  ;;  %v1372_v27 = vmax.f32 %v1054_v20, 0.0  ;;  %v15160_v23 = vld [vmem:[%s16065_s29 + $0x138] sm:$0xff]  }
 0x14e   : > { %v1056_v29 = vpop.f32.mrf.mxu0  ;;  %v1667_v11 = vld [vmem:[#allocation2 + $0xa8] ss:$2 sm:$0xff]  ;;  %v1671_v12 = vld [vmem:[#allocation2 + $0xa9] ss:$2 sm:$0xff] }
 0x14f   : > { %v1656_v31 = vsel %vm16325_vm13, %v1654_v25, %v1655_v26  ;;  %v1657_v32 = vrot.slane %v1655_v26, 4  ;;  %1471 = vst.msk [vmem:[#allocation2 + $0xc0] sm:$0xff] %vm1446_vm2, %v1372_v27  ;;  %v1057_v33 = vadd.f32 %v16192_v35, %v1056_v29  ;;  %v1674_v24 = vmax.f32 %v1667_v11, %v1671_v12 }
 0x150   : > { %1663 = vst.msk [vmem:[#allocation3 + $0x10] sm:$0xf] %vm1574_vm3, %v1656_v31  ;;  %v13808_v36 = vpop.f32.mrf.mxu0 }
 0x151   : > { %1665 = vst.msk [vmem:[#allocation3 + $0x14] sm:$0x1] %vm21583_vm14, %v1657_v32  ;;  %v1373_v37 = vmax.f32 %v1057_v33, 0.0  ;;  %vm1695_vm14 = vcmask 1044484  }
 0x152   : > { %v1061_v40 = vpop.f32.mrf.mxu0  ;;  %13906 = vmatmul.mubr.msk.bf16.gmra.mxu0 %vm775_vm1, %v15154_v30  ;;  %v16341_v41 = vld [vmem:[#allocation3 + $0x8] sm:$0xff]   ;;  %vm16407_vm10 = vmor %vm1694_vm12, %vm1695_vm14  ;;  %vm4705_vm14 = vsmask.f32 5376  ;;  %vm3456_vm12 = vsmask.f32 4352 }
 0x153   : > { %v3175_v42 = vld [vmem:[#allocation3 + $0xc] sm:$0xf]  ;;  %1472 = vst.msk [vmem:[#allocation2 + $0xc8] sm:$0xff] %vm1446_vm2, %v1373_v37  ;;  %v1062_v44 = vadd.f32 %v16192_v35, %v1061_v40  ;;  %13909 = vmatprep.mubr.msk.bf16.mxu0 %vm15930_vm0, %v21588_v1  ;;  %v2160_v48 = vshll.u32 %v16341_v41, 16  ;;  %v2164_v49 = vshrl.u32 %v16341_v41, 16 }
 0x154   : > { %v16348_v46 = vcombine.low %v3174_v38, %v3175_v42  ;;  %v13811_v47 = vpop.f32.mrf.mxu0 }
 0x155   : > { %v1374_v50 = vmax.f32 %v1062_v44, 0.0  ;;  %v16358_v60 = vrot.slane %v2160_v48, 1  ;;  %v2758_v61 = vrot.slane %v2160_v48, 2  ;;  %v2757_v0 = vrot.slane %v2164_v49, 1  ;;  %v15161_v48 = vld [vmem:[%s16065_s29 + $0x140] sm:$0xff]  }
 0x156   : > { %21686 = vst [vmem:[#allocation10_spill] sm:$0xff] %v16348_v46  ;;  %v1064_v53 = vpop.f32.mrf.mxu0  ;;  %v1669_v27 = vld [vmem:[#allocation2 + $0xb8] ss:$2 sm:$0x3f] }
 0x157   : > { %1473 = vst.msk [vmem:[#allocation2 + $0xd0] sm:$0xff] %vm1446_vm2, %v1374_v50  ;;  %v1065_v58 = vadd.f32 %v16192_v35, %v1064_v53  ;;  %v16360_v62 = vld [vmem:[#allocation3 + $0x10] sm:$0xf]  ;;  %v2163_v4 = vsel %vm2151_vm15, %v2158_v59, %v16358_v60  ;;  %v3250_v35 = vrot.slane %v16354_v55, 3  ;;  %v16383_v9 = vor.u32 %v2758_v61, %v2757_v0 }
 0x158   : > { %v13812_v63 = vpop.f32.mrf.mxu0  ;;  %v16365_v2 = vcombine.low %v3175_v42, %v16360_v62  ;;  %13962 = vmatmul.mubr.msk.bf16.vlgmr.msra.gmra.mxu1 %vm1446_vm2, %v2163_v4  ;;  %v1673_v29 = vld [vmem:[#allocation2 + $0xb9] ss:$2 sm:$0x3f] }
 0x159   : > { %v1375_v3 = vmax.f32 %v1065_v58, 0.0  ;;  %13965 = vmatprep.mubr.msk.bf16.mxu1 %vm15930_vm0, %v21588_v1  ;;  %v16388_v15 = vsel %vm2748_vm5, %v2756_v8, %v16383_v9  ;;  %v1675_v37 = vmax.f32 %v1669_v27, %v1673_v29  ;;  %v16427_v11 = vld [vmem:[#allocation3 + $0x10] sm:$0xf] }
 0x15a   : > { %v1069_v5 = vpop.f32.mrf.mxu0  ;;  %13910 = vmatmul.mubr.msk.bf16.gmra.mxu0 %vm775_vm1, %v15157_v54  ;;  %v3251_v10 = vrot.slane %v16365_v2, 3  ;;  %21691 = vst [vmem:[#allocation13_spill] sm:$0xff] %v16427_v11 }
 0x15b   : > { %1474 = vst.msk [vmem:[#allocation2 + $0xd8] sm:$0xff] %vm1446_vm2, %v1375_v3  ;;  %v1070_v7 = vadd.f32 %v16376_v6, %v1069_v5  ;;  %13913 = vmatprep.mubr.msk.bf16.mxu0 %vm15930_vm0, %v21588_v1  ;;  %v15162_v3 = vld [vmem:[%s16065_s29 + $0x148] sm:$0xff]  }
 0x15c   : > { %v13815_v13 = vpop.f32.mrf.mxu0  ;;  %v16393_v17 = vsel %vm3249_vm6, %v3250_v35, %v3251_v10 }
 0x15d   : > { %v1376_v14 = vmax.f32 %v1070_v7, 0.0  ;;  %21687 = vst [vmem:[#allocation11_spill] sm:$0xff] %v16393_v17 }
 0x15e   : > { %v1677_v18 = vld [vmem:[#allocation2 + $0xc4] ss:$2 sm:$0xff]  ;;  %v1681_v19 = vld [vmem:[#allocation2 + $0xc5] ss:$2 sm:$0xff]  ;;  %v1072_v20 = vpop.f32.mrf.mxu0 }
 0x15f   : > { %v1684_v25 = vmax.f32 %v1677_v18, %v1681_v19  ;;  %1475 = vst.msk [vmem:[#allocation2 + $0xe0] sm:$0xff] %vm1446_vm2, %v1376_v14  ;;  %v1073_v26 = vadd.f32 %v16376_v6, %v1072_v20 }
 0x160   : > { %v13816_v30 = vpop.f32.mrf.mxu0 }
 0x161   : > { %v1686_v31 = vmax.f32 %v1674_v24, %v1684_v25  ;;  %v1377_v32 = vmax.f32 %v1073_v26, 0.0  ;;  %v2166_v24 = vor.u32 %v2164_v49, %v16358_v60  ;;  %v4629_v49 = vld [vmem:[#allocation3 + $0xc] sm:$0xc] }
 0x162   : > { %v1679_v33 = vld [vmem:[#allocation2 + $0xd4] ss:$2 sm:$0x3f]  ;;  %v1683_v34 = vld [vmem:[#allocation2 + $0xd5] ss:$2 sm:$0x3f]  ;;  %v1077_v36 = vpop.f32.mrf.mxu0  ;;  %13914 = vmatmul.mubr.msk.bf16.gmra.mxu0 %vm775_vm1, %v15160_v23 }
 0x163   : > { %v13205_v38 = vpack.c.bf16 %v1686_v31, %v1686_v31  ;;  %v1685_v39 = vmax.f32 %v1679_v33, %v1683_v34  ;;  %1476 = vst.msk [vmem:[#allocation2 + $0xe8] sm:$0xff] %vm1446_vm2, %v1377_v32  ;;  %v1078_v40 = vadd.f32 %v16376_v6, %v1077_v36  ;;  %13917 = vmatprep.mubr.msk.bf16.mxu0 %vm15930_vm0, %v21588_v1  ;;  %v15164_v33 = vld [vmem:[%s16065_s29 + $0x150] sm:$0xff]  }
 0x164   : > { %v13819_v42 = vpop.f32.mrf.mxu0  ;;  %v12453_v34 = vcombine.low %v4629_v49, %v16427_v11 }
 0x165   : > { %v1697_v43 = vrot.slane %v13205_v38, 7  ;;  %v1687_v44 = vmax.f32 %v1675_v37, %v1685_v39  ;;  %v1378_v45 = vmax.f32 %v1078_v40, 0.0  ;;  %v4965_v38 = vld [vmem:[#allocation3 + $0xc] sm:$0x8] }
 0x166   : > { %v1080_v47 = vpop.f32.mrf.mxu0 }
 0x167   : > { %1704 = vst.msk [vmem:[#allocation3 + $0x14] sm:$0xe] %vm1703_vm11, %v1697_v43  ;;  %v13206_v50 = vpack.c.bf16 %v1687_v44, %v1687_v44  ;;  %v1081_v51 = vadd.f32 %v16376_v6, %v1080_v47  ;;  %v1698_v54 = vrot.slane %v1697_v43, 4 }
 0x168   : > { %1477 = vst.msk [vmem:[#allocation2 + $0xf0] sm:$0xff] %vm1446_vm2, %v1378_v45  ;;  %v13820_v53 = vpop.f32.mrf.mxu0 }
 0x169   : > { %v1699_v56 = vrot.slane %v13206_v50, 7  ;;  %v1379_v57 = vmax.f32 %v1081_v51, 0.0 }
 0x16a   : > { %v1085_v58 = vpop.f32.mrf.mxu0  ;;  %13918 = vmatmul.mubr.msk.bf16.gmra.mxu0 %vm775_vm1, %v15161_v48  ;;  %v1707_v39 = vld [vmem:[#allocation2 + $0xe0] ss:$2 sm:$0xff]  ;;  %v1711_v40 = vld [vmem:[#allocation2 + $0xe1] ss:$2 sm:$0xff]  ;;  %v16472_v48 = vcombine.low %v4965_v38, %v16427_v11 }
 0x16b   : > { %v1700_v59 = vsel %vm16407_vm10, %v1698_v54, %v1699_v56  ;;  %1478 = vst.msk [vmem:[#allocation2 + $0xf8] sm:$0xff] %vm1446_vm2, %v1379_v57  ;;  %v1086_v61 = vadd.f32 %v16376_v6, %v1085_v58  ;;  %13921 = vmatprep.mubr.msk.bf16.mxu0 %vm15930_vm0, %v21588_v1  ;;  %v1714_v56 = vmax.f32 %v1707_v39, %v1711_v40 }
 0x16c   : > { %1705 = vst.msk [vmem:[#allocation3 + $0x18] sm:$0xf] %vm1574_vm3, %v1700_v59  ;;  %v13823_v63 = vpop.f32.mrf.mxu0  ;;  %v4710_v59 = vshll.u32 %v12453_v34, 16 }
 0x16d   : > { %v1380_v0 = vmax.f32 %v1086_v61, 0.0 }
 0x16e   : > { %v1088_v4 = vpop.f32.mrf.mxu0  ;;  %v16420_v5 = vld [vmem:[#allocation3 + $0x10] sm:$0xff]  }
 0x16f   : > { %v3177_v35 = vld [vmem:[#allocation3 + $0x14] sm:$0xf]  ;;  %1479 = vst.msk [vmem:[#allocation2 + $0x100] sm:$0xff] %vm1446_vm2, %v1380_v0  ;;  %v1089_v7 = vadd.f32 %v16376_v6, %v1088_v4  ;;  %v2168_v14 = vshll.u32 %v16420_v5, 16  ;;  %v2172_v18 = vshrl.u32 %v16420_v5, 16 }
 0x170   : > { %v16425_v8 = vcombine.low %v16360_v62, %v3177_v35  ;;  %v16429_v12 = vld [vmem:[#allocation3 + $0x14] sm:$0xf]  ;;  %v13824_v13 = vpop.f32.mrf.mxu0 }
 0x171   : > { %21692 = vst [vmem:[#allocation14_spill] sm:$0xff] %v16429_v12  ;;  %v1381_v20 = vmax.f32 %v1089_v7, 0.0  ;;  %v16441_v25 = vrot.slane %v2168_v14, 1  ;;  %v2762_v26 = vrot.slane %v2168_v14, 2  ;;  %v2761_v30 = vrot.slane %v2172_v18, 1 }
 0x172   : > { %21690 = vst [vmem:[#allocation12_spill] sm:$0xff] %v16425_v8  ;;  %v1093_v23 = vpop.f32.mrf.mxu0  ;;  %13922 = vmatmul.mubr.msk.bf16.gmra.mxu0 %vm775_vm1, %v15162_v3  ;;  %v1709_v61 = vld [vmem:[#allocation2 + $0xf0] ss:$2 sm:$0x3f]  ;;  %v5185_v7 = vshrl.u32 %v16472_v48, 16  ;;  %v5188_v13 = vshll.u32 %v16472_v48, 16 }
 0x173   : > { %1480 = vst.msk [vmem:[#allocation2 + $0x108] sm:$0xff] %vm1446_vm2, %v1381_v20  ;;  %v1094_v62 = vadd.f32 %v16376_v6, %v1093_v23  ;;  %13925 = vmatprep.mubr.msk.bf16.mxu0 %vm15930_vm0, %v21588_v1  ;;  %v16445_v27 = vld [vmem:[#allocation3 + $0x18] sm:$0xf]  ;;  %v2171_v41 = vsel %vm2151_vm15, %v2166_v24, %v16441_v25  ;;  %v16461_v37 = vor.u32 %v2762_v26, %v2761_v30  ;;  %v1713_v63 = vld [vmem:[#allocation2 + $0xf1] ss:$2 sm:$0x3f] }
 0x174   : > { %v13827_v29 = vpop.f32.mrf.mxu0  ;;  %v16450_v31 = vcombine.low %v3177_v35, %v16445_v27  ;;  %13966 = vmatmul.mubr.msk.bf16.gmra.mxu1 %vm1446_vm2, %v2171_v41  ;;  %v16469_v47 = vld [vmem:[#allocation3 + $0x18] sm:$0xf]  ;;  %v15165_v35 = vld [vmem:[%s16065_s29 + $0x158] sm:$0xff]   ;;  %v4712_v41 = vrot.slane %v4710_v59, 3  ;;  %v5190_v38 = vrot.slane %v5188_v13, 4 }
 0x175   : > { %v1382_v32 = vmax.f32 %v1094_v62, 0.0  ;;  %13969 = vmatprep.mubr.msk.bf16.mxu1 %vm15930_vm0, %v21588_v1  ;;  %v16467_v45 = vsel %vm2748_vm5, %v16383_v9, %v16461_v37  ;;  %21693 = vst [vmem:[#allocation15_spill] sm:$0xff] %v16469_v47  ;;  %v4707_v9 = vshrl.u32 %v12453_v34, 16  ;;  %v16488_v3 = vcombine.low %v16429_v12, %v16469_v47 }
 0x176   : > { %v1096_v60 = vpop.f32.mrf.mxu0  ;;  %v3253_v43 = vrot.slane %v16450_v31, 3  ;;  %v1715_v62 = vmax.f32 %v1709_v61, %v1713_v63 }
 0x177   : > { %1481 = vst.msk [vmem:[#allocation2 + $0x110] sm:$0xff] %vm1446_vm2, %v1382_v32  ;;  %v1097_v36 = vadd.f32 %v16376_v6, %v1096_v60  ;;  %v4709_v32 = vrot.slane %v4707_v9, 2  ;;  %v4715_v49 = vshrl.u32 %v16488_v3, 16  ;;  %v4718_v60 = vshll.u32 %v16488_v3, 16 }
 0x178   : > { %v13828_v42 = vpop.f32.mrf.mxu0  ;;  %v16480_v54 = vsel %vm3249_vm6, %v3251_v10, %v3253_v43 }
 0x179   : > { %v1383_v44 = vmax.f32 %v1097_v36, 0.0  ;;  %21694 = vst [vmem:[#allocation16_spill] sm:$0xff] %v16480_v54  ;;  %v5187_v36 = vrot.slane %v5185_v7, 3  ;;  %v4717_v40 = vrot.slane %v4715_v49, 2  ;;  %v4720_v42 = vrot.slane %v4718_v60, 3 }
 0x17a   : > { %v1717_v50 = vld [vmem:[#allocation2 + $0xfc] ss:$2 sm:$0xff]  ;;  %v1721_v51 = vld [vmem:[#allocation2 + $0xfd] ss:$2 sm:$0xff]  ;;  %v1101_v53 = vpop.f32.mrf.mxu0  ;;  %13926 = vmatmul.mubr.msk.bf16.gmra.mxu0 %vm775_vm1, %v15164_v33 }
 0x17b   : > { %v1724_v57 = vmax.f32 %v1717_v50, %v1721_v51  ;;  %1482 = vst.msk [vmem:[#allocation2 + $0x118] sm:$0xff] %vm1446_vm2, %v1383_v44  ;;  %v1102_v58 = vadd.f32 %v16376_v6, %v1101_v53  ;;  %13929 = vmatprep.mubr.msk.bf16.mxu0 %vm15930_vm0, %v21588_v1  ;;  %v5192_v44 = vrot.slane %v4715_v49, 3  ;;  %v5193_v53 = vrot.slane %v4718_v60, 4 }
 0x17c   : > { %v13831_v0 = vpop.f32.mrf.mxu0  ;;  %v5191_v59 = vor.u32 %v5190_v38, %v5187_v36 }
 0x17d   : > { %v1726_v10 = vmax.f32 %v1714_v56, %v1724_v57  ;;  %v1384_v4 = vmax.f32 %v1102_v58, 0.0  ;;  %v4713_v56 = vor.u32 %v4712_v41, %v4709_v32  ;;  %v16503_v57 = vor.u32 %v4720_v42, %v4717_v40  ;;  %v15166_v0 = vld [vmem:[%s16065_s29 + $0x160] sm:$0xff]  }
 0x17e   : > { %v1719_v14 = vld [vmem:[#allocation2 + $0x10c] ss:$2 sm:$0x3f]  ;;  %v1723_v20 = vld [vmem:[#allocation2 + $0x10d] ss:$2 sm:$0x3f]  ;;  %v1104_v23 = vpop.f32.mrf.mxu0  ;;  %v16506_v61 = vor.u32 %v5193_v53, %v5192_v44  ;;  %v2174_v41 = vor.u32 %v2172_v18, %v16441_v25 }
 0x17f   : > { %v13207_v24 = vpack.c.bf16 %v1726_v10, %v1726_v10  ;;  %v1725_v26 = vmax.f32 %v1719_v14, %v1723_v20  ;;  %1483 = vst.msk [vmem:[#allocation2 + $0x120] sm:$0xff] %vm1446_vm2, %v1384_v4  ;;  %v1105_v29 = vadd.f32 %v16376_v6, %v1104_v23  ;;  %v16511_v10 = vsel %vm4705_vm14, %v4713_v56, %v16503_v57 }
 0x180   : > { %v13832_v30 = vpop.f32.mrf.mxu0  ;;  %21695 = vst [vmem:[#allocation17_spill] sm:$0xff] %v16511_v10 }
 0x181   : > { %1736 = vst.msk [vmem:[#allocation3 + $0x1c] sm:$0xf] %vm1574_vm3, %v13207_v24  ;;  %v1727_v33 = vmax.f32 %v1715_v62, %v1725_v26  ;;  %v1385_v34 = vmax.f32 %v1105_v29, 0.0 }
 0x182   : > { %v1109_v39 = vpop.f32.mrf.mxu0  ;;  %13930 = vmatmul.mubr.msk.bf16.gmra.mxu0 %vm775_vm1, %v15165_v35  ;;  %v16517_v35 = vsel %vm3456_vm12, %v5191_v59, %v16506_v61 }
 0x183   : > { %v13208_v50 = vpack.c.bf16 %v1727_v33, %v1727_v33  ;;  %1484 = vst.msk [vmem:[#allocation2 + $0x128] sm:$0xff] %vm1446_vm2, %v1385_v34  ;;  %v1110_v51 = vadd.f32 %v16376_v6, %v1109_v39  ;;  %13933 = vmatprep.mubr.msk.bf16.mxu0 %vm15930_vm0, %v21588_v1  ;;  %21696 = vst [vmem:[#allocation18_spill] sm:$0xff] %v16517_v35  ;;  %v15168_v39 = vld [vmem:[%s16065_s29 + $0x168] sm:$0xff]  }
 0x184   : > { %v13835_v9 = vpop.f32.mrf.mxu0 }
 0x185   : > { %1737 = vst.msk [vmem:[#allocation3 + $0x20] sm:$0x7] %vm1576_vm4, %v13208_v50  ;;  %v1386_v58 = vmax.f32 %v1110_v51, 0.0 }
 0x186   : > { %v1112_v63 = vpop.f32.mrf.mxu0  ;;  %v1739_v51 = vld [vmem:[#allocation2 + $0x118] ss:$2 sm:$0xff]  ;;  %v1743_v53 = vld [vmem:[#allocation2 + $0x119] ss:$2 sm:$0xff] }
 0x187   : > { %1485 = vst.msk [vmem:[#allocation2 + $0x130] sm:$0xff] %vm1446_vm2, %v1386_v58  ;;  %v1113_v4 = vadd.f32 %v16376_v6, %v1112_v63 }
 0x188   : > { %v13836_v7 = vpop.f32.mrf.mxu0  ;;  %v16519_v13 = vld [vmem:[#allocation3 + $0x18] sm:$0xff]  }
 0x189   : > { %v16521_v14 = vld [vmem:[#allocation3 + $0x1c] sm:$0xf]  ;;  %v1387_v20 = vmax.f32 %v1113_v4, 0.0  ;;  %v2176_v26 = vshll.u32 %v16519_v13, 16  ;;  %v2180_v29 = vshrl.u32 %v16519_v13, 16  ;;  %v1746_v4 = vmax.f32 %v1739_v51, %v1743_v53 }
 0x18a   : > { %v16525_v23 = vcombine.low %v16445_v27, %v16521_v14  ;;  %v16527_v62 = vld [vmem:[#allocation3 + $0x1c] sm:$0xf]  ;;  %v1117_v24 = vpop.f32.mrf.mxu0  ;;  %13934 = vmatmul.mubr.msk.bf16.gmra.mxu0 %vm775_vm1, %v15166_v0  ;;  %v15169_v0 = vld [vmem:[%s16065_s29 + $0x170] sm:$0xff]  }
 0x18b   : > { %21697 = vst [vmem:[#allocation19_spill] sm:$0xff] %v16527_v62  ;;  %1486 = vst.msk [vmem:[#allocation2 + $0x138] sm:$0xff] %vm1446_vm2, %v1387_v20  ;;  %v1118_v30 = vadd.f32 %v16376_v6, %v1117_v24  ;;  %13937 = vmatprep.mubr.msk.bf16.mxu0 %vm15930_vm0, %v21588_v1  ;;  %v16541_v49 = vrot.slane %v2176_v26, 1  ;;  %v2766_v60 = vrot.slane %v2176_v26, 2  ;;  %v2765_v33 = vrot.slane %v2180_v29, 1 }
 0x18c   : > { %v13839_v32 = vpop.f32.mrf.mxu0 }
 0x18d   : > { %v1388_v34 = vmax.f32 %v1118_v30, 0.0  ;;  %v2179_v38 = vsel %vm2151_vm15, %v2174_v41, %v16541_v49  ;;  %v16548_v40 = vor.u32 %v2766_v60, %v2765_v33 }
 0x18e   : > { %v1120_v36 = vpop.f32.mrf.mxu0  ;;  %13970 = vmatmul.mubr.msk.bf16.gmra.mxu1 %vm1446_vm2, %v2179_v38  ;;  %v1741_v24 = vld [vmem:[#allocation2 + $0x128] ss:$2 sm:$0x3f]  ;;  %v1745_v26 = vld [vmem:[#allocation2 + $0x129] ss:$2 sm:$0x3f] }
 0x18f   : > { %1487 = vst.msk [vmem:[#allocation2 + $0x140] sm:$0xff] %vm1446_vm2, %v1388_v34  ;;  %v1121_v42 = vadd.f32 %v16376_v6, %v1120_v36  ;;  %13973 = vmatprep.mubr.msk.bf16.mxu1 %vm15930_vm0, %v21588_v1  ;;  %v16558_v18 = vsel %vm2748_vm5, %v16461_v37, %v16548_v40  ;;  %v15185_v37 = vld [vmem:[%s21574_s3 + $0x18] sm:$0xff]   ;;  %v1747_v36 = vmax.f32 %v1741_v24, %v1745_v26 }
 0x190   : > { %v13840_v5 = vpop.f32.mrf.mxu0  ;;  %13998 = vmatpush3.bf16.msra.mxu1 %v15185_v37 }
 0x191   : > { %v1389_v25 = vmax.f32 %v1121_v42, 0.0  ;;  %13999 = vmatprep.subr.bf16.mxu1 %v21588_v1  ;;  %v15187_v5 = vld [vmem:[%s21574_s3 + $0x10] sm:$0xff]  }
 0x192   : > { %v1125_v44 = vpop.f32.mrf.mxu0  ;;  %13938 = vmatmul.mubr.msk.bf16.gmra.mxu0 %vm775_vm1, %v15168_v39 }
 0x193   : > { %1488 = vst.msk [vmem:[#allocation2 + $0x148] sm:$0xff] %vm1446_vm2, %v1389_v25  ;;  %v1126_v50 = vadd.f32 %v16376_v6, %v1125_v44  ;;  %13941 = vmatprep.mubr.msk.bf16.mxu0 %vm15930_vm0, %v21588_v1 }
 0x194   : > { %v13843_v9 = vpop.f32.mrf.mxu0  ;;  %14000 = vmatpush3.bf16.msra.mxu1 %v15187_v5 }
 0x195   : > { %v1390_v56 = vmax.f32 %v1126_v50, 0.0  ;;  %v15170_v9 = vld [vmem:[%s16065_s29 + $0x178] sm:$0xff]   ;;  %14001 = vmatprep.subr.bf16.mxu1 %v21588_v1 }
 0x196   : > { %v1749_v58 = vld [vmem:[#allocation2 + $0x134] ss:$2 sm:$0xff]  ;;  %v1753_v59 = vld [vmem:[#allocation2 + $0x135] ss:$2 sm:$0xff]  ;;  %v1128_v63 = vpop.f32.mrf.mxu0 }
 0x197   : > { %v1756_v7 = vmax.f32 %v1749_v58, %v1753_v59  ;;  %1489 = vst.msk [vmem:[#allocation2 + $0x150] sm:$0xff] %vm1446_vm2, %v1390_v56  ;;  %v1129_v20 = vadd.f32 %v16376_v6, %v1128_v63 }
 0x198   : > { %v13844_v30 = vpop.f32.mrf.mxu0 }
 0x199   : > { %v1758_v32 = vmax.f32 %v1746_v4, %v1756_v7  ;;  %v1391_v41 = vmax.f32 %v1129_v20, 0.0  ;;  %v3466_v30 = vshrl.u32 %v16365_v2, 16 }
 0x19a   : > { %v1751_v60 = vld [vmem:[#allocation2 + $0x144] ss:$2 sm:$0x3f]  ;;  %v1755_v33 = vld [vmem:[#allocation2 + $0x145] ss:$2 sm:$0x3f]  ;;  %v1133_v34 = vpop.f32.mrf.mxu0  ;;  %13942 = vmatmul.mubr.msk.bf16.gmra.mxu0 %vm775_vm1, %v15169_v0 }
 0x19b   : > { %v13209_v38 = vpack.c.bf16 %v1758_v32, %v1758_v32  ;;  %v1757_v39 = vmax.f32 %v1751_v60, %v1755_v33  ;;  %1490 = vst.msk [vmem:[#allocation2 + $0x158] sm:$0xff] %vm1446_vm2, %v1391_v41  ;;  %v1134_v42 = vadd.f32 %v16376_v6, %v1133_v34  ;;  %13945 = vmatprep.mubr.msk.bf16.mxu0 %vm15930_vm0, %v21588_v1  ;;  %v3469_v32 = vshll.u32 %v16365_v2, 16  ;;  %v15173_v60 = vld [vmem:[%s16065_s29 + $0x180] sm:$0xff]   ;;  %s15867_s29 = scalar_lea.vmem %s21532_s22, 16 }
 0x19c   : > { %v13847_v25 = vpop.f32.mrf.mxu0  ;;  %v3458_v34 = vshrl.u32 %v16354_v55, 16  ;;  %v3468_v5 = vrot.slane %v3466_v30, 3  ;;  %p15868_p11 = scmp.ne.s32.totalorder %s21532_s22, %s15867_s29 }
 0x19d   : > { %v1766_v44 = vrot.slane %v13209_v38, 5  ;;  %v1759_v50 = vmax.f32 %v1747_v36, %v1757_v39  ;;  %v1392_v51 = vmax.f32 %v1134_v42, 0.0  ;;  %v3461_v36 = vshll.u32 %v16354_v55, 16 }
 0x19e   : > { %v1136_v53 = vpop.f32.mrf.mxu0  ;;  %v3471_v25 = vrot.slane %v3469_v32, 4  ;;  %v3460_v2 = vrot.slane %v3458_v34, 3  ;;  %p15869_p12 = pnand %p15868_p11, %p16033_p5 }
 0x19f   : > { %1774 = vst.msk [vmem:[#allocation3 + $0x20] sm:$0x8] %vm21590_vm8, %v1766_v44  ;;  %v13210_v56 = vpack.c.bf16 %v1759_v50, %v1759_v50  ;;  %v1137_v37 = vadd.f32 %v16376_v6, %v1136_v53  ;;  %v1767_v59 = vrot.slane %v1766_v44, 4  ;;  %vm21707_vm8 = vcmask 516096  }
 0x1a0   : > { %1491 = vst.msk [vmem:[#allocation2 + $0x160] sm:$0xff] %vm1446_vm2, %v1392_v51  ;;  %v13848_v58 = vpop.f32.mrf.mxu0  ;;  %v3463_v51 = vrot.slane %v3461_v36, 4  ;;  %p15870_p13 = pneg %p15869_p12 }
 0x1a1   : > { %v1768_v63 = vrot.slane %v13210_v56, 5  ;;  %v1393_v0 = vmax.f32 %v1137_v37, 0.0  ;;  %v3475_v56 = vshrl.u32 %v16450_v31, 16 }
 0x1a2   : > { %v1141_v4 = vpop.f32.mrf.mxu0  ;;  %13946 = vmatmul.mubr.msk.bf16.gmra.mxu0 %vm775_vm1, %v15170_v9  ;;  %v1778_v37 = vld [vmem:[#allocation2 + $0x150] ss:$2 sm:$0xff] }
 0x1a3   : > { %v1769_v7 = vsel %vm16268_vm7, %v1767_v59, %v1768_v63  ;;  %v1770_v20 = vrot.slane %v1768_v63, 4  ;;  %1492 = vst.msk [vmem:[#allocation2 + $0x168] sm:$0xff] %vm1446_vm2, %v1393_v0  ;;  %v1142_v24 = vadd.f32 %v16376_v6, %v1141_v4  ;;  %13949 = vmatprep.mubr.msk.bf16.mxu0 %vm15930_vm0, %v21588_v1  ;;  %v16612_v59 = vor.u32 %v3471_v25, %v3468_v5  ;;  %v1782_v0 = vld [vmem:[#allocation2 + $0x151] ss:$2 sm:$0xff] }
 0x1a4   : > { %1775 = vst.msk [vmem:[#allocation3 + $0x24] sm:$0xf] %vm1574_vm3, %v1769_v7  ;;  %v13851_v26 = vpop.f32.mrf.mxu0  ;;  %v3478_v7 = vshll.u32 %v16450_v31, 16  ;;  %v1785_v25 = vmax.f32 %v1778_v37, %v1782_v0 }
 0x1a5   : > { %1776 = vst.msk [vmem:[#allocation3 + $0x28] sm:$0x3] %vm21585_vm9, %v1770_v20  ;;  %v1394_v41 = vmax.f32 %v1142_v24, 0.0  ;;  %v3464_v26 = vor.u32 %v3463_v51, %v3460_v2  ;;  %vm21702_vm9 = vcmask 519170  }
 0x1a6   : > { %v1144_v33 = vpop.f32.mrf.mxu0  ;;  %v3180_v39 = vld [vmem:[#allocation3 + $0x20] sm:$0xf]  ;;  %v3480_v13 = vrot.slane %v3478_v7, 4 }
 0x1a7   : > { %1493 = vst.msk [vmem:[#allocation2 + $0x170] sm:$0xff] %vm1446_vm2, %v1394_v41  ;;  %v1145_v38 = vadd.f32 %v16376_v6, %v1144_v33  ;;  %v16603_v53 = vcombine.low %v16521_v14, %v3180_v39 }
 0x1a8   : > { %v13852_v42 = vpop.f32.mrf.mxu0 }
 0x1a9   : > { %v1395_v44 = vmax.f32 %v1145_v38, 0.0  ;;  %v21586_v32 = vrot.slane %v16603_v53, 3  ;;  %v3477_v42 = vrot.slane %v3475_v56, 3  ;;  %v3487_v7 = vshll.u32 %v16603_v53, 16 }
 0x1aa   : > { %v1149_v50 = vpop.f32.mrf.mxu0  ;;  %13950 = vmatmul.mubr.msk.bf16.gmra.mxu0 %vm775_vm1, %v15173_v60  ;;  %v2182_v60 = vor.u32 %v2180_v29, %v16541_v49  ;;  %v15190_v29 = vld [vmem:[%s21574_s3 + $0x8] sm:$0xff]   ;;  %v16641_v49 = vld [vmem:[#allocation3 + $0x20] sm:$0xf]  ;;  %vm2543_vm1 = vcmask 1046528  }
 0x1ab   : > { %1494 = vst.msk [vmem:[#allocation2 + $0x178] sm:$0xff] %vm1446_vm2, %v1395_v44  ;;  %v1150_v55 = vadd.f32 %v16376_v6, %v1149_v50  ;;  %14225 = vmatprep.mubr.msk.bf16.mxu0 %vm15930_vm0, %v21588_v1  ;;  %v16609_v9 = vld [vmem:[#allocation3 + $0x20] sm:$0xff]   ;;  %21699 = vst [vmem:[#allocation21_spill] sm:$0xff] %v16641_v49  ;;  %v1780_v31 = vld [vmem:[#allocation2 + $0x160] ss:$2 sm:$0x3f]  ;;  %14002 = vmatpush3.bf16.msra.mxu1 %v15190_v29 }
 0x1ac   : > { %v13855_v58 = vpop.f32.mrf.mxu0  ;;  %v16614_v63 = vld [vmem:[#allocation3 + $0x24] sm:$0xf]  ;;  %v2184_v4 = vshll.u32 %v16609_v9, 16  ;;  %v21587_v20 = vshrl.u32 %v16609_v9, 16  ;;  %14003 = vmatprep.subr.bf16.mxu1 %v21588_v1 }
 0x1ad   : > { %v1396_v14 = vmax.f32 %v1150_v55, 0.0  ;;  %v16620_v30 = vcombine.low %v3180_v39, %v16614_v63  ;;  %v16630_v36 = vld [vmem:[#allocation3 + $0x24] sm:$0xf]  ;;  %v3473_v39 = vsel %vm3456_vm12, %v3464_v26, %v16612_v59  ;;  %v16654_v58 = vsel %vm3249_vm6, %v3253_v43, %v21586_v32  ;;  %v1784_v26 = vld [vmem:[#allocation2 + $0x161] ss:$2 sm:$0x3f] }
 0x1ae   : > { %v1152_v24 = vpop.f32.mrf.mxu0  ;;  %v16628_v33 = vrot.slane %v2184_v4, 1  ;;  %v2770_v34 = vrot.slane %v2184_v4, 2  ;;  %21698 = vst [vmem:[#allocation20_spill] sm:$0xff] %v16630_v36  ;;  %v2769_v5 = vrot.slane %v21587_v20, 1  ;;  %21700 = vst [vmem:[#allocation22_spill] sm:$0xff] %v16654_v58  ;;  %v3484_v4 = vshrl.u32 %v16603_v53, 16 }
 0x1af   : > { %1495 = vst.msk [vmem:[#allocation2 + $0x180] sm:$0xff] %vm1446_vm2, %v1396_v14  ;;  %v1153_v41 = vadd.f32 %v16376_v6, %v1152_v24  ;;  %v5600_v24 = vld [vmem:[#allocation3 + $0x18] sm:$0xf] }
 0x1b0   : > { %v13856_v38 = vpop.f32.mrf.mxu0  ;;  %v2187_v50 = vsel %vm2151_vm15, %v2182_v60, %v16628_v33  ;;  %v16645_v56 = vor.u32 %v2770_v34, %v2769_v5  ;;  %v16671_v60 = vcombine.low %v16527_v62, %v16641_v49  ;;  %v5599_v5 = vld [vmem:[#allocation3 + $0x14] sm:$0xe] }
 0x1b1   : > { %v1397_v44 = vmax.f32 %v1153_v41, 0.0  ;;  %13974 = vmatmul.mubr.msk.bf16.gmra.mxu1 %vm1446_vm2, %v2187_v50  ;;  %v16676_v29 = vcombine.low %v5599_v5, %v5600_v24 }
 0x1b2   : > { %v1788_v2 = vld [vmem:[#allocation2 + $0x16c] ss:$2 sm:$0xff]  ;;  %v1792_v51 = vld [vmem:[#allocation2 + $0x16d] ss:$2 sm:$0xff]  ;;  %v1157_v55 = vpop.f32.mrf.mxu0  ;;  %14226 = vmatmul.mubr.msk.bf16.vlgmr.msra.gmra.mxu0 %vm1446_vm2, %v3473_v39  ;;  %13977 = vmatprep.mubr.msk.bf16.mxu1 %vm15930_vm0, %v21588_v1  ;;  %v16667_v41 = vsel %vm2748_vm5, %v16548_v40, %v16645_v56  ;;  %v16673_v39 = vor.u32 %v3480_v13, %v3477_v42  ;;  %v6334_v42 = vld [vmem:[#allocation3 + $0x18] sm:$0xf] }
 0x1b3   : > { %v1795_v0 = vmax.f32 %v1788_v2, %v1792_v51  ;;  %1496 = vst.msk [vmem:[#allocation2 + $0x188] sm:$0xff] %vm1446_vm2, %v1397_v44  ;;  %v1158_v14 = vadd.f32 %v16376_v6, %v1157_v55  ;;  %14229 = vmatprep.mubr.msk.bf16.mxu0 %vm15930_vm0, %v21588_v1  ;;  %21701 = vst [vmem:[#allocation23_spill] sm:$0xff] %v16676_v29  ;;  %v1786_v51 = vmax.f32 %v1780_v31, %v1784_v26  ;;  %v16684_v31 = vld [vmem:[#allocation3 + $0x1c] sm:$0xff]   ;;  %v6129_v26 = vld [vmem:[#allocation3 + $0x14] sm:$0xc] }
 0x1b4   : > { %v13859_v43 = vpop.f32.mrf.mxu0  ;;  %v4724_v13 = vshrl.u32 %v16671_v60, 16  ;;  %v3482_v5 = vsel %vm3456_vm12, %v16612_v59, %v16673_v39  ;;  %v5671_v59 = vrot.slane %v16676_v29, 1 }
 0x1b5   : > { %v1797_v34 = vmax.f32 %v1785_v25, %v1795_v0  ;;  %v1398_v38 = vmax.f32 %v1158_v14, 0.0  ;;  %v3486_v25 = vrot.slane %v3484_v4, 3  ;;  %v3489_v0 = vrot.slane %v3487_v7, 4 }
 0x1b6   : > { %v1790_v44 = vld [vmem:[#allocation2 + $0x17c] ss:$2 sm:$0x3f]  ;;  %v1794_v50 = vld [vmem:[#allocation2 + $0x17d] ss:$2 sm:$0x3f]  ;;  %v1160_v2 = vpop.f32.mrf.mxu0  ;;  %v12610_v7 = vcombine.low %v6129_v26, %v5600_v24 }
 0x1b7   : > { %v13211_v55 = vpack.c.bf16 %v1797_v34, %v1797_v34  ;;  %v1796_v40 = vmax.f32 %v1790_v44, %v1794_v50  ;;  %1497 = vst.msk [vmem:[#allocation2 + $0x190] sm:$0xff] %vm1446_vm2, %v1398_v38  ;;  %v1161_v43 = vadd.f32 %v16376_v6, %v1160_v2  ;;  %v4727_v4 = vshll.u32 %v16671_v60, 16  ;;  %v6668_v38 = vld [vmem:[#allocation3 + $0x14] sm:$0x8] }
 0x1b8   : > { %v13860_v37 = vpop.f32.mrf.mxu0  ;;  %v12663_v2 = vcombine.low %v6668_v38, %v6334_v42  ;;  %v6142_v35 = vrot.slane %v12610_v7, 2  ;;  %v21592_v42 = vrot.slane %v16684_v31, 2 }
 0x1b9   : > { %v1805_v14 = vrot.slane %v13211_v55, 6  ;;  %v1798_v27 = vmax.f32 %v1786_v51, %v1796_v40  ;;  %v1399_v19 = vmax.f32 %v1161_v43, 0.0  ;;  %v4726_v37 = vrot.slane %v4724_v13, 2 }
 0x1ba   : > { %v1165_v34 = vpop.f32.mrf.mxu0  ;;  %14230 = vmatmul.mubr.msk.bf16.gmra.mxu0 %vm1446_vm2, %v3482_v5  ;;  %v16694_v55 = vor.u32 %v3489_v0, %v3486_v25  ;;  %v4729_v40 = vrot.slane %v4727_v4, 3  ;;  %v5196_v43 = vrot.slane %v4724_v13, 3  ;;  %v5197_v24 = vrot.slane %v4727_v4, 4 }
 0x1bb   : > { %1813 = vst.msk [vmem:[#allocation3 + $0x28] sm:$0xc] %vm21702_vm9, %v1805_v14  ;;  %v13212_v44 = vpack.c.bf16 %v1798_v27, %v1798_v27  ;;  %v1166_v50 = vadd.f32 %v16376_v6, %v1165_v34  ;;  %14233 = vmatprep.mubr.msk.bf16.mxu0 %vm15930_vm0, %v21588_v1  ;;  %v1806_v5 = vrot.slane %v1805_v14, 4  ;;  %v16696_v27 = vld [vmem:[#allocation3 + $0x1c] sm:$0xff]   ;;  %vm2981_vm9 = vcmask 1045504  }
 0x1bc   : > { %1498 = vst.msk [vmem:[#allocation2 + $0x198] sm:$0xff] %vm1446_vm2, %v1399_v19  ;;  %v13863_v51 = vpop.f32.mrf.mxu0  ;;  %v21594_v19 = vrot.slane %v16684_v31, 1  ;;  %v16699_v20 = vor.u32 %v4729_v40, %v4726_v37  ;;  %v16701_v1 = vor.u32 %v5197_v24, %v5196_v43  ;;  %v16727_v7 = vsel %vm2981_vm9, %v6142_v35, %v21592_v42 }
 0x1bd   : > { %v1807_v26 = vrot.slane %v13212_v44, 6  ;;  %v1400_v32 = vmax.f32 %v1166_v50, 0.0  ;;  %21706 = vst [vmem:[#allocation27_spill] sm:$0xff] %v16727_v7  ;;  %v6681_v44 = vrot.slane %v12663_v2, 3  ;;  %v21708_v35 = vmov 0.0  }
 0x1be   : > { %v1168_v34 = vpop.f32.mrf.mxu0  ;;  %v16712_v37 = vsel %vm4705_vm14, %v16503_v57, %v16699_v20  ;;  %v16717_v4 = vsel %vm3456_vm12, %v16506_v61, %v16701_v1  ;;  %v3491_v57 = vsel %vm3456_vm12, %v16673_v39, %v16694_v55  ;;  %v21591_v61 = vrot.slane %v16696_v27, 3 }
 0x1bf   : > { %v1808_v25 = vsel %vm16325_vm13, %v1806_v5, %v1807_v26  ;;  %v1809_v0 = vrot.slane %v1807_v26, 4  ;;  %1499 = vst.msk [vmem:[#allocation2 + $0x1a0] sm:$0xff] %vm1446_vm2, %v1400_v32  ;;  %v1169_v13 = vadd.f32 %v16376_v6, %v1168_v34  ;;  %21703 = vst [vmem:[#allocation24_spill] sm:$0xff] %v16712_v37  ;;  %v16722_v32 = vsel %vm2543_vm1, %v5671_v59, %v21594_v19 }
 0x1c0   : > { %1814 = vst.msk [vmem:[#allocation3 + $0x2c] sm:$0xf] %vm1574_vm3, %v1808_v25  ;;  %v13864_v14 = vpop.f32.mrf.mxu0  ;;  %21704 = vst [vmem:[#allocation25_spill] sm:$0xff] %v16717_v4  ;;  %v16745_v39 = vsel %vm3249_vm6, %v6681_v44, %v21591_v61  ;;  %v15196_v4 = vld [vmem:[%s21574_s3 + $0x110] sm:$0xff]  }
 0x1c1   : > { %21705 = vst [vmem:[#allocation26_spill] sm:$0xff] %v16722_v32  ;;  %1815 = vst.msk [vmem:[#allocation3 + $0x30] sm:$0x1] %vm21707_vm8, %v1809_v0  ;;  %v1401_v38 = vmax.f32 %v1169_v13, 0.0  ;;  %v15191_v13 = vld [vmem:[%s21574_s3] sm:$0xff]   ;;  %vm21756_vm8 = vcmask 519171  }
 0x1c2   : > { %v1173_v50 = vpop.f32.mrf.mxu0  ;;  %14234 = vmatmul.mubr.msk.bf16.gmra.mxu0 %vm1446_vm2, %v3491_v57  ;;  %v3182_v59 = vld [vmem:[#allocation3 + $0x28] sm:$0xf]  ;;  %21709 = vst [vmem:[#allocation28_spill] sm:$0xff] %v16745_v39  ;;  %14004 = vmatpush3.bf16.msra.mxu1 %v15191_v13 }
 0x1c3   : > { %1500 = vst.msk [vmem:[#allocation2 + $0x1a8] sm:$0xff] %vm1446_vm2, %v1401_v38  ;;  %v1174_v51 = vadd.f32 %v16376_v6, %v1173_v50  ;;  %14237 = vmatprep.mubr.msk.bf16.mxu0 %vm15930_vm0, %v21708_v35  ;;  %v16740_v40 = vcombine.low %v16614_v63, %v3182_v59  ;;  %14041 = vmatprep.subr.bf16.mxu1 %v21708_v35 }
 0x1c4   : > { %v13867_v2 = vpop.f32.mrf.mxu0 }
 0x1c5   : > { %v1402_v43 = vmax.f32 %v1174_v51, 0.0  ;;  %v3493_v24 = vshrl.u32 %v16740_v40, 16  ;;  %v3496_v5 = vshll.u32 %v16740_v40, 16 }
 0x1c6   : > { %v1176_v26 = vpop.f32.mrf.mxu0 }
 0x1c7   : > { %1501 = vst.msk [vmem:[#allocation2 + $0x1b0] sm:$0xff] %vm1446_vm2, %v1402_v43  ;;  %v1177_v34 = vadd.f32 %v16376_v6, %v1176_v26  ;;  %v3495_v25 = vrot.slane %v3493_v24, 3  ;;  %v3498_v0 = vrot.slane %v3496_v5, 4  ;;  %v16751_v63 = vld [vmem:[#allocation3 + $0x28] sm:$0xff]   ;;  %v21710_v43 = vshrl.u32 %v16609_v9, 16 }
 0x1c8   : > { %v13868_v14 = vpop.f32.mrf.mxu0  ;;  %v16756_v38 = vld [vmem:[#allocation3 + $0x2c] sm:$0xf]  ;;  %v2192_v50 = vshll.u32 %v16751_v63, 16  ;;  %v21593_v51 = vshrl.u32 %v16751_v63, 16  ;;  %v21595_v26 = vrot.slane %v16740_v40, 3 }
 0x1c9   : > { %v1403_v57 = vmax.f32 %v1177_v34, 0.0  ;;  %v16758_v44 = vor.u32 %v3498_v0, %v3495_v25  ;;  %v2190_v24 = vor.u32 %v21710_v43, %v16628_v33  ;;  %v16767_v5 = vcombine.low %v3182_v59, %v16756_v38  ;;  %v16777_v9 = vld [vmem:[#allocation3 + $0x2c] sm:$0xf]  ;;  %v1817_v33 = vld [vmem:[#allocation2 + $0x188] ss:$2 sm:$0xff] }
 0x1ca   : > { %v1181_v2 = vpop.f32.mrf.mxu0  ;;  %v16775_v0 = vrot.slane %v2192_v50, 1  ;;  %v2774_v13 = vrot.slane %v2192_v50, 2  ;;  %21711 = vst [vmem:[#allocation29_spill] sm:$0xff] %v16777_v9  ;;  %v1821_v14 = vld [vmem:[#allocation2 + $0x189] ss:$2 sm:$0xff]  ;;  %v2773_v59 = vrot.slane %v21593_v51, 1 }
 0x1cb   : > { %1502 = vst.msk [vmem:[#allocation2 + $0x1b8] sm:$0xff] %vm1446_vm2, %v1403_v57  ;;  %v1182_v34 = vadd.f32 %v16376_v6, %v1181_v2  ;;  %v3500_v25 = vsel %vm3456_vm12, %v16694_v55, %v16758_v44  ;;  %v16786_v55 = vld [vmem:[#allocation3 + $0x28] sm:$0xf]  ;;  %v1824_v51 = vmax.f32 %v1817_v33, %v1821_v14 }
 0x1cc   : > { %v13871_v43 = vpop.f32.mrf.mxu0  ;;  %14238 = vmatmul.mubr.msk.bf16.gmra.mxu0 %vm1446_vm2, %v3500_v25  ;;  %v2195_v2 = vsel %vm2151_vm15, %v2190_v24, %v16775_v0  ;;  %21712 = vst [vmem:[#allocation30_spill] sm:$0xff] %v16786_v55 }
 0x1cd   : > { %v1404_v57 = vmax.f32 %v1182_v34, 0.0  ;;  %14241 = vmatprep.mubr.msk.bf16.mxu0 %vm15930_vm0, %v21708_v35  ;;  %13978 = vmatmul.mubr.msk.bf16.gmra.mxu1 %vm1446_vm2, %v2195_v2  ;;  %v16789_v43 = vor.u32 %v2774_v13, %v2773_v59  ;;  %v21713_v34 = vrot.slane %v16603_v53, 3  ;;  %v1819_v13 = vld [vmem:[#allocation2 + $0x198] ss:$2 sm:$0x3f]  ;;  %v16811_v53 = vcombine.low %v16630_v36, %v16786_v55 }
 0x1ce   : > { %v1827_v50 = vld [vmem:[#allocation2 + $0x1a4] ss:$2 sm:$0xff]  ;;  %v1831_v61 = vld [vmem:[#allocation2 + $0x1a5] ss:$2 sm:$0xff]  ;;  %v1184_v42 = vpop.f32.mrf.mxu0  ;;  %13981 = vmatprep.mubr.msk.bf16.mxu1 %vm15930_vm0, %v21708_v35 }
 0x1cf   : > { %v16798_v24 = vsel %vm3249_vm6, %v21713_v34, %v21595_v26  ;;  %v1834_v19 = vmax.f32 %v1827_v50, %v1831_v61  ;;  %1503 = vst.msk [vmem:[#allocation2 + $0x1c0] sm:$0xff] %vm1446_vm2, %v1404_v57  ;;  %v1185_v39 = vadd.f32 %v16376_v6, %v1184_v42  ;;  %v1823_v59 = vld [vmem:[#allocation2 + $0x199] ss:$2 sm:$0x3f]  ;;  %v16807_v25 = vsel %vm2748_vm5, %v16645_v56, %v16789_v43 }
 0x1d0   : > { %21714 = vst [vmem:[#allocation31_spill] sm:$0xff] %v16798_v24  ;;  %v13872_v2 = vpop.f32.mrf.mxu0  ;;  %v15195_v42 = vld [vmem:[%s21574_s3 + $0x118] sm:$0xff]   ;;  %v1825_v34 = vmax.f32 %v1819_v13, %v1823_v59 }
 0x1d1   : > { %v1836_v61 = vmax.f32 %v1824_v51, %v1834_v19  ;;  %v1405_v33 = vmax.f32 %v1185_v39, 0.0  ;;  %14306 = vmatpush3.bf16.msra.mxu0 %v15195_v42  ;;  %v4733_v19 = vshrl.u32 %v16811_v53, 16  ;;  %v16823_v59 = vld [vmem:[#allocation3 + $0x24] sm:$0xff]  }
 0x1d2   : > { %v1829_v14 = vld [vmem:[#allocation2 + $0x1b4] ss:$2 sm:$0x3f]  ;;  %v1833_v57 = vld [vmem:[#allocation2 + $0x1b5] ss:$2 sm:$0x3f]  ;;  %v1189_v50 = vpop.f32.mrf.mxu0  ;;  %14307 = vmatprep.subr.bf16.mxu0 %v21708_v35 }
 0x1d3   : > { %v13213_v2 = vpack.c.bf16 %v1836_v61, %v1836_v61  ;;  %v1835_v26 = vmax.f32 %v1829_v14, %v1833_v57  ;;  %1504 = vst.msk [vmem:[#allocation2 + $0x1c8] sm:$0xff] %vm1446_vm2, %v1405_v33  ;;  %v1190_v56 = vadd.f32 %v16376_v6, %v1189_v50  ;;  %v4735_v61 = vrot.slane %v4733_v19, 2 }
 0x1d4   : > { %v13875_v7 = vpop.f32.mrf.mxu0  ;;  %v4736_v33 = vshll.u32 %v16811_v53, 16  ;;  %v5200_v57 = vrot.slane %v4733_v19, 3 }
 0x1d5   : > { %v1844_v39 = vrot.slane %v13213_v2, 7  ;;  %v1837_v51 = vmax.f32 %v1825_v34, %v1835_v26  ;;  %v1406_v32 = vmax.f32 %v1190_v56, 0.0  ;;  %v16831_v7 = vld [vmem:[%s21573_s2] ss:$0 sm:$0xff]  ;;  %14308 = vmatpush3.bf16.msra.mxu0 %v15196_v4  ;;  %v21598_v4 = vrot.slane %v16823_v59, 1 }
 0x1d6   : > { %v1192_v13 = vpop.f32.mrf.mxu0  ;;  %14309 = vmatprep.subr.bf16.mxu0 %v21708_v35  ;;  %v4738_v14 = vrot.slane %v4736_v33, 3  ;;  %v5201_v50 = vrot.slane %v4736_v33, 4 }
 0x1d7   : > { %1850 = vst.msk [vmem:[#allocation3 + $0x30] sm:$0xe] %vm1703_vm11, %v1844_v39  ;;  %v13214_v6 = vpack.c.bf16 %v1837_v51, %v1837_v51  ;;  %v1193_v26 = vadd.f32 %v16831_v7, %v1192_v13  ;;  %v1845_v34 = vrot.slane %v1844_v39, 4  ;;  %v16838_v51 = vld [vmem:[#allocation3 + $0x24] sm:$0xff]  }
 0x1d8   : > { %1505 = vst.msk [vmem:[#allocation2 + $0x1d0] sm:$0xff] %vm1446_vm2, %v1406_v32  ;;  %v13876_v42 = vpop.f32.mrf.mxu0  ;;  %v15198_v32 = vld [vmem:[%s21574_s3 + $0x108] sm:$0xff]   ;;  %v16840_v10 = vor.u32 %v4738_v14, %v4735_v61  ;;  %v16842_v13 = vor.u32 %v5201_v50, %v5200_v57  ;;  %v21597_v57 = vrot.slane %v16838_v51, 3 }
 0x1d9   : > { %v1846_v2 = vrot.slane %v13214_v6, 7  ;;  %v1407_v56 = vmax.f32 %v1193_v26, 0.0  ;;  %14310 = vmatpush3.bf16.msra.mxu0 %v15198_v32  ;;  %v21596_v42 = vrot.slane %v16823_v59, 2 }
 0x1da   : > { %v1197_v37 = vpop.f32.mrf.mxu0  ;;  %14311 = vmatprep.subr.bf16.mxu0 %v21708_v35  ;;  %v16854_v61 = vsel %vm4705_vm14, %v16699_v20, %v16840_v10  ;;  %v16859_v6 = vsel %vm3456_vm12, %v16701_v1, %v16842_v13  ;;  %v15200_v20 = vld [vmem:[%s21574_s3 + $0x100] sm:$0xff]   ;;  %v21719_v1 = vrot.slane %v16684_v31, 2 }
 0x1db   : > { %v1847_v19 = vsel %vm16407_vm10, %v1845_v34, %v1846_v2  ;;  %1506 = vst.msk [vmem:[#allocation2 + $0x1d8] sm:$0xff] %vm1446_vm2, %v1407_v56  ;;  %v1198_v39 = vadd.f32 %v16831_v7, %v1197_v37  ;;  %21715 = vst [vmem:[#allocation32_spill] sm:$0xff] %v16854_v61  ;;  %v21717_v37 = vrot.slane %v16684_v31, 1 }
 0x1dc   : > { %1851 = vst.msk [vmem:[#allocation3 + $0x34] sm:$0xf] %vm1574_vm3, %v1847_v19  ;;  %v13879_v33 = vpop.f32.mrf.mxu0  ;;  %21716 = vst [vmem:[#allocation33_spill] sm:$0xff] %v16859_v6  ;;  %v16878_v2 = vsel %vm2981_vm9, %v21719_v1, %v21596_v42  ;;  %v21721_v19 = vrot.slane %v16696_v27, 3 }
 0x1dd   : > { %v16866_v26 = vsel %vm2543_vm1, %v21717_v37, %v21598_v4  ;;  %v1408_v14 = vmax.f32 %v1198_v39, 0.0  ;;  %21720 = vst [vmem:[#allocation35_spill] sm:$0xff] %v16878_v2  ;;  %14312 = vmatpush3.bf16.msra.mxu0 %v15200_v20 }
 0x1de   : > { %21718 = vst [vmem:[#allocation34_spill] sm:$0xff] %v16866_v26  ;;  %v1200_v50 = vpop.f32.mrf.mxu0  ;;  %v3184_v34 = vld [vmem:[#allocation3 + $0x30] sm:$0xf]  ;;  %v16890_v39 = vsel %vm3249_vm6, %v21721_v19, %v21597_v57  ;;  %14393 = vmatprep.subr.bf16.mxu0 %v21708_v35 }
 0x1df   : > { %1507 = vst.msk [vmem:[#allocation2 + $0x1e0] sm:$0xff] %vm1446_vm2, %v1408_v14  ;;  %v1201_v56 = vadd.f32 %v16831_v7, %v1200_v50  ;;  %v16883_v32 = vcombine.low %v16756_v38, %v3184_v34  ;;  %21722 = vst [vmem:[#allocation36_spill] sm:$0xff] %v16890_v39  ;;  %v16959_v54 = vld [vmem:[#allocation3 + $0x2c] sm:$0xff]  }
 0x1e0   : > { %v13880_v33 = vpop.f32.mrf.mxu0 }
 0x1e1   : > { %v1409_v31 = vmax.f32 %v1201_v56, 0.0  ;;  %v3502_v37 = vshrl.u32 %v16883_v32, 16  ;;  %v3505_v14 = vshll.u32 %v16883_v32, 16 }
 0x1e2   : > { %v1205_v50 = vpop.f32.mrf.mxu0 }
 0x1e3   : > { %1508 = vst.msk [vmem:[#allocation2 + $0x1e8] sm:$0xff] %vm1446_vm2, %v1409_v31  ;;  %v1206_v38 = vadd.f32 %v16831_v7, %v1205_v50  ;;  %v3504_v20 = vrot.slane %v3502_v37, 3  ;;  %v3507_v1 = vrot.slane %v3505_v14, 4  ;;  %v16897_v42 = vld [vmem:[#allocation3 + $0x30] sm:$0xff]   ;;  %v21723_v31 = vshrl.u32 %v16751_v63, 16 }
 0x1e4   : > { %v13883_v27 = vpop.f32.mrf.mxu0  ;;  %v16899_v19 = vld [vmem:[#allocation3 + $0x34] sm:$0xf]  ;;  %v2200_v56 = vshll.u32 %v16897_v42, 16  ;;  %v21599_v4 = vshrl.u32 %v16897_v42, 16 }
 0x1e5   : > { %v1410_v33 = vmax.f32 %v1206_v38, 0.0  ;;  %v16901_v57 = vor.u32 %v3507_v1, %v3504_v20  ;;  %v2198_v2 = vor.u32 %v21723_v31, %v16775_v0  ;;  %v16909_v37 = vcombine.low %v3184_v34, %v16899_v19  ;;  %v16919_v27 = vld [vmem:[#allocation3 + $0x34] sm:$0xf] }
 0x1e6   : > { %v1208_v39 = vpop.f32.mrf.mxu0  ;;  %v16917_v20 = vrot.slane %v2200_v56, 1  ;;  %v2778_v1 = vrot.slane %v2200_v56, 2  ;;  %21724 = vst [vmem:[#allocation37_spill] sm:$0xff] %v16919_v27  ;;  %v1853_v63 = vld [vmem:[#allocation2 + $0x1c0] ss:$2 sm:$0xff]  ;;  %v2777_v34 = vrot.slane %v21599_v4, 1 }
 0x1e7   : > { %1509 = vst.msk [vmem:[#allocation2 + $0x1f0] sm:$0xff] %vm1446_vm2, %v1410_v33  ;;  %v1209_v50 = vadd.f32 %v16831_v7, %v1208_v39  ;;  %v3509_v38 = vsel %vm3456_vm12, %v16758_v44, %v16901_v57  ;;  %v1857_v0 = vld [vmem:[#allocation2 + $0x1c1] ss:$2 sm:$0xff]  ;;  %v21727_v4 = vrot.slane %v16740_v40, 3 }
 0x1e8   : > { %v13884_v31 = vpop.f32.mrf.mxu0  ;;  %14242 = vmatmul.mubr.msk.bf16.gmra.mxu0 %vm1446_vm2, %v3509_v38  ;;  %v2203_v39 = vsel %vm2151_vm15, %v2198_v2, %v16917_v20  ;;  %v16928_v44 = vld [vmem:[#allocation3 + $0x30] sm:$0xf]  ;;  %v1860_v6 = vmax.f32 %v1853_v63, %v1857_v0 }
 0x1e9   : > { %v1411_v33 = vmax.f32 %v1209_v50, 0.0  ;;  %14245 = vmatprep.mubr.msk.bf16.mxu0 %vm15930_vm0, %v21708_v35  ;;  %21725 = vst [vmem:[#allocation38_spill] sm:$0xff] %v16928_v44  ;;  %13982 = vmatmul.mubr.msk.bf16.gmra.mxu1 %vm1446_vm2, %v2203_v39  ;;  %v16931_v31 = vor.u32 %v2778_v1, %v2777_v34  ;;  %v21726_v50 = vrot.slane %v16883_v32, 3  ;;  %v1855_v1 = vld [vmem:[#allocation2 + $0x1d0] ss:$2 sm:$0x3f]  ;;  %v16953_v40 = vcombine.low %v16777_v9, %v16928_v44 }
 0x1ea   : > { %v1863_v56 = vld [vmem:[#allocation2 + $0x1dc] ss:$2 sm:$0xff]  ;;  %v1867_v14 = vld [vmem:[#allocation2 + $0x1dd] ss:$2 sm:$0xff]  ;;  %v1213_v26 = vpop.f32.mrf.mxu0  ;;  %13985 = vmatprep.mubr.msk.bf16.mxu1 %vm15930_vm0, %v21708_v35 }
 0x1eb   : > { %v16940_v2 = vsel %vm3249_vm6, %v21727_v4, %v21726_v50  ;;  %v1870_v61 = vmax.f32 %v1863_v56, %v1867_v14  ;;  %1510 = vst.msk [vmem:[#allocation2 + $0x1f8] sm:$0xff] %vm1446_vm2, %v1411_v33  ;;  %v1214_v24 = vadd.f32 %v16831_v7, %v1213_v26  ;;  %v1859_v34 = vld [vmem:[#allocation2 + $0x1d1] ss:$2 sm:$0x3f]  ;;  %v16949_v38 = vsel %vm2748_vm5, %v16789_v43, %v16931_v31 }
 0x1ec   : > { %21728 = vst [vmem:[#allocation39_spill] sm:$0xff] %v16940_v2  ;;  %v13887_v39 = vpop.f32.mrf.mxu0  ;;  %v1861_v33 = vmax.f32 %v1855_v1, %v1859_v34  ;;  %v4742_v43 = vshrl.u32 %v16953_v40, 16 }
 0x1ed   : > { %v1872_v4 = vmax.f32 %v1860_v6, %v1870_v61  ;;  %v1412_v14 = vmax.f32 %v1214_v24, 0.0  ;;  %v4745_v24 = vshll.u32 %v16953_v40, 16  ;;  %v16962_v6 = vld [vmem:[#allocation3 + $0x2c] sm:$0xff]  }
 0x1ee   : > { %v1865_v63 = vld [vmem:[#allocation2 + $0x1ec] ss:$2 sm:$0x3f]  ;;  %v1869_v0 = vld [vmem:[#allocation2 + $0x1ed] ss:$2 sm:$0x3f]  ;;  %v1216_v26 = vpop.f32.mrf.mxu0 }
 0x1ef   : > { %v13215_v56 = vpack.c.bf16 %v1872_v4, %v1872_v4  ;;  %v1871_v50 = vmax.f32 %v1865_v63, %v1869_v0  ;;  %1511 = vst.msk [vmem:[#allocation2 + $0x200] sm:$0xff] %vm1446_vm2, %v1412_v14  ;;  %v1217_v39 = vadd.f32 %v16831_v7, %v1216_v26  ;;  %v4744_v1 = vrot.slane %v4742_v43, 2 }
 0x1f0   : > { %v13888_v2 = vpop.f32.mrf.mxu0  ;;  %v5204_v14 = vrot.slane %v4742_v43, 3  ;;  %v5205_v0 = vrot.slane %v4745_v24, 4 }
 0x1f1   : > { %1882 = vst.msk [vmem:[#allocation3 + $0x38] sm:$0xf] %vm1574_vm3, %v13215_v56  ;;  %v1873_v58 = vmax.f32 %v1861_v33, %v1871_v50  ;;  %v1413_v29 = vmax.f32 %v1217_v39, 0.0  ;;  %v4747_v2 = vrot.slane %v4745_v24, 3  ;;  %v21604_v56 = vrot.slane %v16959_v54, 1 }
 0x1f2   : > { %v1221_v61 = vpop.f32.mrf.mxu0  ;;  %v21603_v50 = vrot.slane %v16959_v54, 2  ;;  %v16971_v17 = vor.u32 %v5205_v0, %v5204_v14  ;;  %v21730_v24 = vrot.slane %v16823_v59, 1  ;;  %v21735_v14 = vrot.slane %v16838_v51, 3  ;;  %v6875_v51 = vld [vmem:[#allocation3 + $0x20] sm:$0xf] }
 0x1f3   : > { %v13216_v34 = vpack.c.bf16 %v1873_v58, %v1873_v58  ;;  %1512 = vst.msk [vmem:[#allocation2 + $0x208] sm:$0xff] %vm1446_vm2, %v1413_v29  ;;  %v1222_v4 = vadd.f32 %v16831_v7, %v1221_v61  ;;  %v16967_v33 = vor.u32 %v4747_v2, %v4744_v1  ;;  %v21602_v58 = vrot.slane %v16962_v6, 3 }
 0x1f4   : > { %v13891_v63 = vpop.f32.mrf.mxu0  ;;  %v16986_v61 = vsel %vm2543_vm1, %v21730_v24, %v21604_v56 }
 0x1f5   : > { %1883 = vst.msk [vmem:[#allocation3 + $0x3c] sm:$0x7] %vm1576_vm4, %v13216_v34  ;;  %v1414_v26 = vmax.f32 %v1222_v4, 0.0  ;;  %v16979_v43 = vsel %vm4705_vm14, %v16840_v10, %v16967_v33  ;;  %21731 = vst [vmem:[#allocation41_spill] sm:$0xff] %v16986_v61  ;;  %v16993_v4 = vsel %vm3456_vm12, %v16842_v13, %v16971_v17  ;;  %v21733_v10 = vrot.slane %v16823_v59, 2 }
 0x1f6   : > { %v1224_v39 = vpop.f32.mrf.mxu0  ;;  %21729 = vst [vmem:[#allocation40_spill] sm:$0xff] %v16979_v43  ;;  %21732 = vst [vmem:[#allocation42_spill] sm:$0xff] %v16993_v4  ;;  %v17007_v63 = vsel %vm3249_vm6, %v21735_v14, %v21602_v58  ;;  %v17024_v14 = vld [vmem:[#allocation3 + $0x24] sm:$0xff]  }
 0x1f7   : > { %1513 = vst.msk [vmem:[#allocation2 + $0x210] sm:$0xff] %vm1446_vm2, %v1414_v26  ;;  %v1225_v29 = vadd.f32 %v16831_v7, %v1224_v39  ;;  %v17000_v2 = vsel %vm2981_vm9, %v21733_v10, %v21603_v50  ;;  %21736 = vst [vmem:[#allocation44_spill] sm:$0xff] %v17007_v63  ;;  %v21744_v44 = vshrl.u32 %v17024_v14, 16 }
 0x1f8   : > { %v13892_v1 = vpop.f32.mrf.mxu0  ;;  %v16988_v34 = vld [vmem:[#allocation3 + $0x38] sm:$0xf]  ;;  %21734 = vst [vmem:[#allocation43_spill] sm:$0xff] %v17000_v2  ;;  %21739 = vst [vmem:[#allocation47_spill] sm:$0xff] %v17024_v14 }
 0x1f9   : > { %v1415_v0 = vmax.f32 %v1225_v29, 0.0  ;;  %v17011_v26 = vcombine.low %v16899_v19, %v16988_v34  ;;  %v17013_v13 = vld [vmem:[#allocation3 + $0x38] sm:$0xf]  ;;  %v7595_v9 = vrot.slane %v21744_v44, 1 }
 0x1fa   : > { %21737 = vst [vmem:[#allocation45_spill] sm:$0xff] %v17013_v13  ;;  %v1229_v39 = vpop.f32.mrf.mxu0  ;;  %v17021_v29 = vcombine.low %v16919_v27, %v17013_v13  ;;  %v17061_v49 = vld [vmem:[#allocation3 + $0x34] sm:$0xff]  }
 0x1fb   : > { %1514 = vst.msk [vmem:[#allocation2 + $0x218] sm:$0xff] %vm1446_vm2, %v1415_v0  ;;  %v1230_v59 = vadd.f32 %v16831_v7, %v1229_v39  ;;  %v3511_v24 = vshrl.u32 %v17011_v26, 16  ;;  %v3514_v1 = vshll.u32 %v17011_v26, 16  ;;  %v21605_v19 = vrot.slane %v17011_v26, 3  ;;  %v7370_v0 = vld [vmem:[#allocation3 + $0x1c] sm:$0xe] }
 0x1fc   : > { %v13895_v10 = vpop.f32.mrf.mxu0  ;;  %21738 = vst [vmem:[#allocation46_spill] sm:$0xff] %v17021_v29  ;;  %v21740_v39 = vrot.slane %v16883_v32, 3  ;;  %21745 = vst [vmem:[#allocation51_spill] sm:$0xff] %v17061_v49 }
 0x1fd   : > { %v1416_v58 = vmax.f32 %v1230_v59, 0.0  ;;  %v3513_v50 = vrot.slane %v3511_v24, 3  ;;  %v3516_v56 = vrot.slane %v3514_v1, 4  ;;  %v17033_v10 = vcombine.low %v7370_v0, %v6875_v51 }
 0x1fe   : > { %v1232_v63 = vpop.f32.mrf.mxu0  ;;  %v17031_v2 = vsel %vm3249_vm6, %v21740_v39, %v21605_v19  ;;  %v4751_v24 = vshrl.u32 %v17021_v29, 16  ;;  %v17044_v39 = vld [vmem:[#allocation3 + $0x34] sm:$0xff]   ;;  %v4754_v51 = vshll.u32 %v17021_v29, 16 }
 0x1ff   : > { %21741 = vst [vmem:[#allocation48_spill] sm:$0xff] %v17031_v2  ;;  %21742 = vst [vmem:[#allocation49_spill] sm:$0xff] %v17033_v10  ;;  %v1233_v61 = vadd.f32 %v16831_v7, %v1232_v63  ;;  %v17037_v4 = vor.u32 %v3516_v56, %v3513_v50  ;;  %v17050_v56 = vld [vmem:[#allocation3 + $0x2c] sm:$0xff]   ;;  %v7588_v63 = vshrl.u32 %v17033_v10, 16  ;;  %v7591_v55 = vshll.u32 %v17033_v10, 16 }
 0x200   : > { %1515 = vst.msk [vmem:[#allocation2 + $0x220] sm:$0xff] %vm1446_vm2, %v1416_v58  ;;  %v13896_v59 = vpop.f32.mrf.mxu0  ;;  %v17048_v58 = vld [vmem:[#allocation3 + $0x34] sm:$0xff]   ;;  %21743 = vst [vmem:[#allocation50_spill] sm:$0xff] %v17050_v56  ;;  %v4753_v50 = vrot.slane %v4751_v24, 2  ;;  %v4756_v19 = vrot.slane %v4754_v51, 3  ;;  %v5208_v1 = vrot.slane %v4751_v24, 3 }
 0x201   : > { %v1417_v43 = vmax.f32 %v1233_v61, 0.0  ;;  %v3518_v32 = vsel %vm3456_vm12, %v16901_v57, %v17037_v4  ;;  %v1885_v59 = vld [vmem:[#allocation2 + $0x1f8] ss:$2 sm:$0xff]  ;;  %v1889_v61 = vld [vmem:[#allocation2 + $0x1f9] ss:$2 sm:$0xff]  ;;  %v21618_v62 = vrot.slane %v17044_v39, 2 }
 0x202   : > { %v1237_v0 = vpop.f32.mrf.mxu0  ;;  %14246 = vmatmul.mubr.msk.bf16.gmra.mxu0 %vm1446_vm2, %v3518_v32  ;;  %v5209_v32 = vrot.slane %v4754_v51, 4  ;;  %v1892_v47 = vmax.f32 %v1885_v59, %v1889_v61  ;;  %v21619_v27 = vrot.slane %v17048_v58, 3  ;;  %v1887_v10 = vld [vmem:[#allocation2 + $0x208] ss:$2 sm:$0x3f] }
 0x203   : > { %1516 = vst.msk [vmem:[#allocation2 + $0x228] sm:$0xff] %vm1446_vm2, %v1417_v43  ;;  %v1238_v57 = vadd.f32 %v16831_v7, %v1237_v0  ;;  %14249 = vmatprep.mubr.msk.bf16.mxu0 %vm15930_vm0, %v21708_v35  ;;  %v17063_v43 = vor.u32 %v4756_v19, %v4753_v50  ;;  %v21617_v0 = vrot.slane %v17044_v39, 1 }
 0x204   : > { %v13899_v2 = vpop.f32.mrf.mxu0  ;;  %v17067_v12 = vor.u32 %v5209_v32, %v5208_v1  ;;  %v21747_v1 = vrot.slane %v16959_v54, 1 }
 0x205   : > { %v1418_v36 = vmax.f32 %v1238_v57, 0.0  ;;  %v1891_v57 = vld [vmem:[#allocation2 + $0x209] ss:$2 sm:$0x3f]  ;;  %v17076_v50 = vsel %vm4705_vm14, %v16967_v33, %v17063_v43 }
 0x206   : > { %v1240_v51 = vpop.f32.mrf.mxu0  ;;  %21746 = vst [vmem:[#allocation52_spill] sm:$0xff] %v17076_v50  ;;  %v17083_v59 = vsel %vm2543_vm1, %v21747_v1, %v21617_v0  ;;  %v17088_v32 = vsel %vm3456_vm12, %v16971_v17, %v17067_v12  ;;  %v7590_v0 = vrot.slane %v7588_v63, 1  ;;  %v1893_v44 = vmax.f32 %v1887_v10, %v1891_v57 }
 0x207   : > { %v1895_v24 = vld [vmem:[#allocation2 + $0x214] ss:$2 sm:$0xff]  ;;  %v1899_v2 = vld [vmem:[#allocation2 + $0x215] ss:$2 sm:$0xff]  ;;  %1517 = vst.msk [vmem:[#allocation2 + $0x230] sm:$0xff] %vm1446_vm2, %v1418_v36  ;;  %v1241_v19 = vadd.f32 %v16831_v7, %v1240_v51  ;;  %21748 = vst [vmem:[#allocation53_spill] sm:$0xff] %v17083_v59 }
 0x208   : > { %v1902_v11 = vmax.f32 %v1895_v24, %v1899_v2  ;;  %v13900_v61 = vpop.f32.mrf.mxu0  ;;  %21749 = vst [vmem:[#allocation54_spill] sm:$0xff] %v17088_v32  ;;  %v21750_v36 = vrot.slane %v16959_v54, 2  ;;  %v21752_v24 = vrot.slane %v16962_v6, 3  ;;  %v21620_v51 = vshrl.u32 %v17050_v56, 16 }
 0x209   : > { %v1419_v61 = vmax.f32 %v1241_v19, 0.0  ;;  %v21755_v10 = vshll.u32 %v17050_v56, 16 }
 0x20a   : > { %v17095_v33 = vsel %vm2981_vm9, %v21750_v36, %v21618_v62  ;;  %v17102_v2 = vsel %vm3249_vm6, %v21752_v24, %v21619_v27  ;;  %v1904_v1 = vmax.f32 %v1892_v47, %v1902_v11  ;;  %v1897_v59 = vld [vmem:[#allocation2 + $0x224] ss:$2 sm:$0x3f]  ;;  %v1901_v54 = vld [vmem:[#allocation2 + $0x225] ss:$2 sm:$0x3f]  ;;  %v1245_v32 = vpop.f32.mrf.mxu0 }
 0x20b   : > { %21751 = vst [vmem:[#allocation55_spill] sm:$0xff] %v17095_v33  ;;  %21753 = vst [vmem:[#allocation56_spill] sm:$0xff] %v17102_v2  ;;  %v1903_v62 = vmax.f32 %v1897_v59, %v1901_v54  ;;  %v1246_v6 = vadd.f32 %v16831_v7, %v1245_v32  ;;  %v21621_v24 = vshrl.u32 %v17061_v49, 16  ;;  %v7593_v2 = vrot.slane %v7591_v55, 2 }
 0x20c   : > { %v13217_v36 = vpack.c.bf16 %v1904_v1, %v1904_v1  ;;  %1518 = vst.msk [vmem:[#allocation2 + $0x238] sm:$0xff] %vm1446_vm2, %v1419_v61  ;;  %v13903_v27 = vpop.f32.mrf.mxu0  ;;  %v21754_v11 = vshll.u32 %v17024_v14, 16  ;;  %v7599_v63 = vrot.slane %v21620_v51, 1  ;;  %v7600_v57 = vrot.slane %v21755_v10, 2 }
 0x20d   : > { %v1905_v1 = vmax.f32 %v1893_v44, %v1903_v62  ;;  %v1420_v59 = vmax.f32 %v1246_v6, 0.0  ;;  %v7594_v61 = vor.u32 %v7593_v2, %v7590_v0 }
 0x20e   : > { %v7596_v47 = vrot.slane %v21754_v11, 2  ;;  %v1912_v19 = vrot.slane %v13217_v36, 5  ;;  %v1248_v54 = vpop.f32.mrf.mxu0  ;;  %v7601_v32 = vor.u32 %v7600_v57, %v7599_v63  ;;  %v7603_v11 = vrot.slane %v21621_v24, 1 }
 0x20f   : > { %v13218_v27 = vpack.c.bf16 %v1905_v1, %v1905_v1  ;;  %1519 = vst.msk [vmem:[#allocation2 + $0x240] sm:$0xff] %vm1446_vm2, %v1420_v59  ;;  %v1249_v55 = vadd.f32 %v16831_v7, %v1248_v54 }
 0x210   : > { %v7597_v17 = vor.u32 %v7596_v47, %v7595_v9  ;;  %1920 = vst.msk [vmem:[#allocation3 + $0x3c] sm:$0x8] %vm21756_vm8, %v1912_v19  ;;  %v13904_v51 = vpop.f32.mrf.mxu0  ;;  %v21759_v9 = vshll.u32 %v17061_v49, 16  ;;  %v1913_v44 = vrot.slane %v1912_v19, 4  ;;  %vm21761_vm8 = vcmask 517120  }
 0x211   : > { %v1914_v2 = vrot.slane %v13218_v27, 5  ;;  %v1421_v36 = vmax.f32 %v1249_v55, 0.0 }
 0x212   : > { %v17121_v10 = vsel %vm2748_vm5, %v7594_v61, %v7597_v17  ;;  %v17124_v62 = vsel %vm2748_vm5, %v7597_v17, %v7601_v32  ;;  %v7604_v0 = vrot.slane %v21759_v9, 2  ;;  %v1253_v6 = vpop.f32.mrf.mxu0 }
 0x213   : > { %21757 = vst [vmem:[#allocation57_spill] sm:$0xff] %v17121_v10  ;;  %21758 = vst [vmem:[#allocation58_spill] sm:$0xff] %v17124_v62  ;;  %v1915_v63 = vsel %vm16268_vm7, %v1913_v44, %v1914_v2  ;;  %v1916_v57 = vrot.slane %v1914_v2, 4  ;;  %v1254_v51 = vadd.f32 %v16831_v7, %v1253_v6 }
 0x214   : > { %v17128_v47 = vor.u32 %v7604_v0, %v7603_v11  ;;  %1520 = vst.msk [vmem:[#allocation2 + $0x248] sm:$0xff] %vm1446_vm2, %v1421_v36  ;;  %v13907_v17 = vpop.f32.mrf.mxu0 }
 0x215   : > { %1921 = vst.msk [vmem:[#allocation3 + $0x40] sm:$0xf] %vm1574_vm3, %v1915_v63  ;;  %v1422_v19 = vmax.f32 %v1254_v51, 0.0 }
 0x216   : > { %v17137_v1 = vsel %vm2748_vm5, %v7601_v32, %v17128_v47  ;;  %1922 = vst.msk [vmem:[#allocation3 + $0x44] sm:$0x3] %vm21761_vm8, %v1916_v57  ;;  %v1256_v59 = vpop.f32.mrf.mxu0  ;;  %vm21771_vm8 = vcmask 519170  }
 0x217   : > { %21760 = vst [vmem:[#allocation59_spill] sm:$0xff] %v17137_v1  ;;  %v17140_v54 = vld [vmem:[#allocation3 + $0x38] sm:$0xff]   ;;  %1521 = vst.msk [vmem:[#allocation2 + $0x250] sm:$0xff] %vm1446_vm2, %v1422_v19  ;;  %v1257_v27 = vadd.f32 %v16831_v7, %v1256_v59 }
 0x218   : > { %v3187_v61 = vld [vmem:[#allocation3 + $0x3c] sm:$0xf]  ;;  %v13908_v9 = vpop.f32.mrf.mxu0  ;;  %v2208_v32 = vshll.u32 %v17140_v54, 16  ;;  %v21622_v0 = vshrl.u32 %v17140_v54, 16  ;;  %v17153_v6 = vpop.f32.mrf.mxu1 }
 0x219   : > { %v17145_v55 = vcombine.low %v16988_v34, %v3187_v61  ;;  %v17147_v11 = vld [vmem:[#allocation3 + $0x3c] sm:$0xf]  ;;  %v1423_v44 = vmax.f32 %v1257_v27, 0.0  ;;  %21763 = vst [vmem:[#allocation61_spill] sm:$0xff] %v17153_v6  ;;  %v21764_v34 = vshrl.u32 %v16897_v42, 16 }
 0x21a   : > { %21762 = vst [vmem:[#allocation60_spill] sm:$0xff] %v17147_v11  ;;  %v1261_v36 = vpop.f32.mrf.mxu0  ;;  %v17160_v51 = vrot.slane %v2208_v32, 1  ;;  %v2782_v17 = vrot.slane %v2208_v32, 2  ;;  %v13963_v27 = vpop.f32.mrf.mxu1  ;;  %v2781_v24 = vrot.slane %v21622_v0, 1 }
 0x21b   : > { %1522 = vst.msk [vmem:[#allocation2 + $0x258] sm:$0xff] %vm1446_vm2, %v1423_v44  ;;  %v1262_v63 = vadd.f32 %v16831_v7, %v1261_v36  ;;  %v2206_v57 = vor.u32 %v21764_v34, %v16917_v20  ;;  %v1930_v14 = vld [vmem:[#allocation2 + $0x241] ss:$2 sm:$0x3f] }
 0x21c   : > { %v17162_v19 = vld [vmem:[#allocation3 + $0x40] sm:$0xf]  ;;  %v13911_v59 = vpop.f32.mrf.mxu0  ;;  %v17173_v20 = vpop.f32.mrf.mxu1 }
 0x21d   : > { %v17165_v9 = vcombine.low %v3187_v61, %v17162_v19  ;;  %v1424_v44 = vmax.f32 %v1262_v63, 0.0  ;;  %v2211_v36 = vsel %vm2151_vm15, %v2206_v57, %v17160_v51  ;;  %v17171_v2 = vld [vmem:[#allocation3 + $0x40] sm:$0xf]  ;;  %21766 = vst [vmem:[#allocation63_spill] sm:$0xff] %v17173_v20  ;;  %v17182_v63 = vor.u32 %v2782_v17, %v2781_v24 }
 0x21e   : > { %21765 = vst [vmem:[#allocation62_spill] sm:$0xff] %v17171_v2  ;;  %v1264_v42 = vpop.f32.mrf.mxu0  ;;  %13986 = vmatmul.mubr.msk.bf16.gmra.mxu1 %vm1446_vm2, %v2211_v36  ;;  %v1924_v61 = vld [vmem:[#allocation2 + $0x230] ss:$2 sm:$0xff]  ;;  %v1928_v57 = vld [vmem:[#allocation2 + $0x231] ss:$2 sm:$0xff]  ;;  %v13964_v0 = vpop.f32.mrf.mxu1 }
 0x21f   : > { %v3520_v32 = vshrl.u32 %v17165_v9, 16  ;;  %v3523_v34 = vshll.u32 %v17165_v9, 16  ;;  %1523 = vst.msk [vmem:[#allocation2 + $0x260] sm:$0xff] %vm1446_vm2, %v1424_v44  ;;  %v1265_v59 = vadd.f32 %v16831_v7, %v1264_v42  ;;  %13989 = vmatprep.mubr.msk.bf16.mxu1 %vm15930_vm0, %v21708_v35  ;;  %v21629_v36 = vrot.slane %v17165_v9, 3 }
 0x220   : > { %v13912_v27 = vpop.f32.mrf.mxu0  ;;  %v17188_v49 = vsel %vm2748_vm5, %v16931_v31, %v17182_v63  ;;  %v17192_v44 = vcombine.low %v17147_v11, %v17171_v2  ;;  %v21769_v0 = vrot.slane %v17011_v26, 3  ;;  %v17217_v11 = vld [vmem:[#allocation3 + $0x3c] sm:$0xff]  }
 0x221   : > { %v3522_v1 = vrot.slane %v3520_v32, 3  ;;  %v3525_v62 = vrot.slane %v3523_v34, 4  ;;  %v1425_v10 = vmax.f32 %v1265_v59, 0.0  ;;  %21767 = vst [vmem:[#allocation64_spill] sm:$0xff] %v17188_v49  ;;  %v1931_v34 = vmax.f32 %v1924_v61, %v1928_v57 }
 0x222   : > { %21768 = vst [vmem:[#allocation65_spill] sm:$0xff] %v17192_v44  ;;  %v1934_v42 = vld [vmem:[#allocation2 + $0x24c] ss:$2 sm:$0xff]  ;;  %v1938_v24 = vld [vmem:[#allocation2 + $0x24d] ss:$2 sm:$0xff]  ;;  %v1269_v17 = vpop.f32.mrf.mxu0  ;;  %v17201_v32 = vsel %vm3249_vm6, %v21769_v0, %v21629_v36  ;;  %v4760_v26 = vshrl.u32 %v17192_v44, 16 }
 0x223   : > { %v17194_v56 = vor.u32 %v3525_v62, %v3522_v1  ;;  %21770 = vst [vmem:[#allocation66_spill] sm:$0xff] %v17201_v32  ;;  %v1941_v59 = vmax.f32 %v1934_v42, %v1938_v24  ;;  %1524 = vst.msk [vmem:[#allocation2 + $0x268] sm:$0xff] %vm1446_vm2, %v1425_v10  ;;  %v1270_v31 = vadd.f32 %v16831_v7, %v1269_v17  ;;  %v1926_v27 = vld [vmem:[#allocation2 + $0x240] ss:$2 sm:$0x3f]  ;;  %v17215_v36 = vld [vmem:[#allocation3 + $0x3c] sm:$0xff]  }
 0x224   : > { %v13915_v33 = vpop.f32.mrf.mxu0  ;;  %v1932_v10 = vmax.f32 %v1926_v27, %v1930_v14  ;;  %v4762_v17 = vrot.slane %v4760_v26, 2  ;;  %v5212_v14 = vrot.slane %v4760_v26, 3 }
 0x225   : > { %v3527_v62 = vsel %vm3456_vm12, %v17037_v4, %v17194_v56  ;;  %v1943_v1 = vmax.f32 %v1931_v34, %v1941_v59  ;;  %v1426_v50 = vmax.f32 %v1270_v31, 0.0  ;;  %v4763_v34 = vshll.u32 %v17192_v44, 16 }
 0x226   : > { %14250 = vmatmul.mubr.msk.bf16.gmra.mxu0 %vm1446_vm2, %v3527_v62  ;;  %v1936_v0 = vld [vmem:[#allocation2 + $0x25c] ss:$2 sm:$0x3f]  ;;  %v1940_v61 = vld [vmem:[#allocation2 + $0x25d] ss:$2 sm:$0x3f]  ;;  %v1272_v57 = vpop.f32.mrf.mxu0 }
 0x227   : > { %14253 = vmatprep.mubr.msk.bf16.mxu0 %vm15930_vm0, %v21708_v35  ;;  %v13219_v42 = vpack.c.bf16 %v1943_v1, %v1943_v1  ;;  %v1942_v24 = vmax.f32 %v1936_v0, %v1940_v61  ;;  %1525 = vst.msk [vmem:[#allocation2 + $0x270] sm:$0xff] %vm1446_vm2, %v1426_v50  ;;  %v1273_v33 = vadd.f32 %v16831_v7, %v1272_v57  ;;  %v4765_v13 = vrot.slane %v4763_v34, 3 }
 0x228   : > { %v13916_v4 = vpop.f32.mrf.mxu0  ;;  %v5213_v1 = vrot.slane %v4763_v34, 4 }
 0x229   : > { %v1951_v59 = vrot.slane %v13219_v42, 6  ;;  %v1944_v31 = vmax.f32 %v1932_v10, %v1942_v24  ;;  %v1427_v62 = vmax.f32 %v1273_v33, 0.0  ;;  %v17222_v57 = vor.u32 %v4765_v13, %v4762_v17 }
 0x22a   : > { %v1277_v32 = vpop.f32.mrf.mxu0  ;;  %v17224_v24 = vor.u32 %v5213_v1, %v5212_v14  ;;  %v21634_v33 = vrot.slane %v17215_v36, 1  ;;  %v21776_v14 = vrot.slane %v17044_v39, 2 }
 0x22b   : > { %1959 = vst.msk [vmem:[#allocation3 + $0x44] sm:$0xc] %vm21771_vm8, %v1951_v59  ;;  %v13220_v27 = vpack.c.bf16 %v1944_v31, %v1944_v31  ;;  %v1278_v50 = vadd.f32 %v16831_v7, %v1277_v32  ;;  %v1952_v0 = vrot.slane %v1951_v59, 4  ;;  %v17230_v26 = vsel %vm4705_vm14, %v17063_v43, %v17222_v57 }
 0x22c   : > { %1526 = vst.msk [vmem:[#allocation2 + $0x278] sm:$0xff] %vm1446_vm2, %v1427_v62  ;;  %v13919_v61 = vpop.f32.mrf.mxu0  ;;  %21772 = vst [vmem:[#allocation67_spill] sm:$0xff] %v17230_v26  ;;  %v21633_v31 = vrot.slane %v17215_v36, 2  ;;  %v21632_v32 = vrot.slane %v17217_v11, 3  ;;  %v17242_v43 = vsel %vm3456_vm12, %v17067_v12, %v17224_v24  ;;  %v21774_v62 = vrot.slane %v17044_v39, 1 }
 0x22d   : > { %v1953_v10 = vrot.slane %v13220_v27, 6  ;;  %v1428_v42 = vmax.f32 %v1278_v50, 0.0  ;;  %21773 = vst [vmem:[#allocation68_spill] sm:$0xff] %v17242_v43  ;;  %v21778_v50 = vrot.slane %v17048_v58, 3  ;;  %v17266_v61 = vld [vmem:[#allocation3 + $0x40] sm:$0xf] }
 0x22e   : > { %v1280_v4 = vpop.f32.mrf.mxu0  ;;  %v17249_v22 = vsel %vm2543_vm1, %v21774_v62, %v21634_v33  ;;  %v17256_v27 = vsel %vm2981_vm9, %v21776_v14, %v21633_v31  ;;  %vm21821_vm8 = vcmask 517120  }
 0x22f   : > { %v1954_v13 = vsel %vm16325_vm13, %v1952_v0, %v1953_v10  ;;  %v1955_v17 = vrot.slane %v1953_v10, 4  ;;  %1527 = vst.msk [vmem:[#allocation2 + $0x280] sm:$0xff] %vm1446_vm2, %v1428_v42  ;;  %v1281_v34 = vadd.f32 %v16831_v7, %v1280_v4  ;;  %21775 = vst [vmem:[#allocation69_spill] sm:$0xff] %v17249_v22  ;;  %v17263_v12 = vsel %vm3249_vm6, %v21778_v50, %v21632_v32  ;;  %v1967_v22 = vld [vmem:[#allocation2 + $0x269] ss:$2 sm:$0xff] }
 0x230   : > { %1960 = vst.msk [vmem:[#allocation3 + $0x48] sm:$0xf] %vm1574_vm3, %v1954_v13  ;;  %v13920_v59 = vpop.f32.mrf.mxu0  ;;  %21777 = vst [vmem:[#allocation70_spill] sm:$0xff] %v17256_v27  ;;  %vm21780_vm13 = vcmask 516096  }
 0x231   : > { %21779 = vst [vmem:[#allocation71_spill] sm:$0xff] %v17263_v12  ;;  %1961 = vst.msk [vmem:[#allocation3 + $0x4c] sm:$0x1] %vm21780_vm13, %v1955_v17  ;;  %v1429_v1 = vmax.f32 %v1281_v34, 0.0 }
 0x232   : > { %v1285_v0 = vpop.f32.mrf.mxu0  ;;  %v2096_v10 = vld [vmem:[#allocation3 + $0x44] sm:$0x7] }
 0x233   : > { %v3189_v42 = vld [vmem:[#allocation3 + $0x44] sm:$0xf]  ;;  %1528 = vst.msk [vmem:[#allocation2 + $0x288] sm:$0xff] %vm1446_vm2, %v1429_v1  ;;  %v1286_v39 = vadd.f32 %v16831_v7, %v1285_v0  ;;  %v17271_v4 = vcombine.low %v17266_v61, %v2096_v10  ;;  %v21783_v10 = vshrl.u32 %v17140_v54, 16 }
 0x234   : > { %v17274_v58 = vcombine.low %v17162_v19, %v3189_v42  ;;  %v2735_v13 = vld [vmem:[#allocation3 + $0x44] sm:$0xf]  ;;  %v13923_v17 = vpop.f32.mrf.mxu0  ;;  %v17284_v0 = vpop.f32.mrf.mxu1 }
 0x235   : > { %v17276_v59 = vld [vmem:[#allocation3 + $0x44] sm:$0xf]  ;;  %v17279_v34 = vcombine.low %v17266_v61, %v2735_v13  ;;  %v1430_v14 = vmax.f32 %v1286_v39, 0.0  ;;  %v2216_v50 = vshll.u32 %v17271_v4, 16  ;;  %21782 = vst [vmem:[#allocation73_spill] sm:$0xff] %v17284_v0  ;;  %v2214_v17 = vor.u32 %v21783_v10, %v17160_v51 }
 0x236   : > { %21781 = vst [vmem:[#allocation72_spill] sm:$0xff] %v17276_v59  ;;  %v1288_v1 = vpop.f32.mrf.mxu0  ;;  %v13967_v33 = vpop.f32.mrf.mxu1 }
 0x237   : > { %1529 = vst.msk [vmem:[#allocation2 + $0x290] sm:$0xff] %vm1446_vm2, %v1430_v14  ;;  %v1289_v19 = vadd.f32 %v16831_v7, %v1288_v1  ;;  %v2218_v32 = vrot.slane %v2216_v50, 1  ;;  %v17291_v13 = vld [vmem:[#allocation3 + $0x48] sm:$0xf]  ;;  %v2786_v62 = vshrl.u32 %v17279_v34, 16  ;;  %v2789_v50 = vshll.u32 %v17279_v34, 16 }
 0x238   : > { %v13924_v31 = vpop.f32.mrf.mxu0  ;;  %v17294_v39 = vcombine.low %v3189_v42, %v17291_v13  ;;  %v1963_v14 = vld [vmem:[#allocation2 + $0x268] ss:$2 sm:$0xff]  ;;  %v17298_v43 = vpop.f32.mrf.mxu1 }
 0x239   : > { %v1431_v12 = vmax.f32 %v1289_v19, 0.0  ;;  %v2219_v27 = vsel %vm2151_vm15, %v2214_v17, %v2218_v32  ;;  %21785 = vst [vmem:[#allocation75_spill] sm:$0xff] %v17298_v43  ;;  %v2788_v42 = vrot.slane %v2786_v62, 1  ;;  %v1965_v19 = vld [vmem:[#allocation2 + $0x278] ss:$2 sm:$0x3f] }
 0x23a   : > { %21784 = vst [vmem:[#allocation74_spill] sm:$0xff] %v17294_v39  ;;  %v1293_v1 = vpop.f32.mrf.mxu0  ;;  %13990 = vmatmul.mubr.msk.bf16.gmra.mxu1 %vm1446_vm2, %v2219_v27  ;;  %v3529_v51 = vshrl.u32 %v17294_v39, 16  ;;  %v3532_v31 = vshll.u32 %v17294_v39, 16  ;;  %v13968_v17 = vpop.f32.mrf.mxu1  ;;  %v1970_v27 = vmax.f32 %v1963_v14, %v1967_v22  ;;  %v1969_v43 = vld [vmem:[#allocation2 + $0x279] ss:$2 sm:$0x3f] }
 0x23b   : > { %1530 = vst.msk [vmem:[#allocation2 + $0x298] sm:$0xff] %vm1446_vm2, %v1431_v12  ;;  %v1294_v33 = vadd.f32 %v16831_v7, %v1293_v1  ;;  %13993 = vmatprep.mubr.msk.bf16.mxu1 %vm15930_vm0, %v21708_v35  ;;  %v2791_v20 = vrot.slane %v2789_v50, 2  ;;  %v21638_v6 = vrot.slane %v17294_v39, 3  ;;  %v2220_v62 = vshrl.u32 %v17271_v4, 16  ;;  %v17316_v22 = vld [vmem:[#allocation3 + $0x48] sm:$0xf] }
 0x23c   : > { %v13927_v10 = vpop.f32.mrf.mxu0  ;;  %v3531_v26 = vrot.slane %v3529_v51, 3  ;;  %v3534_v2 = vrot.slane %v3532_v31, 4  ;;  %21786 = vst [vmem:[#allocation76_spill] sm:$0xff] %v17316_v22  ;;  %v21787_v14 = vrot.slane %v17165_v9, 3 }
 0x23d   : > { %v1432_v0 = vmax.f32 %v1294_v33, 0.0  ;;  %v17314_v51 = vor.u32 %v2791_v20, %v2788_v42 }
 0x23e   : > { %v1973_v12 = vld [vmem:[#allocation2 + $0x284] ss:$2 sm:$0xff]  ;;  %v1977_v44 = vld [vmem:[#allocation2 + $0x285] ss:$2 sm:$0xff]  ;;  %v1296_v1 = vpop.f32.mrf.mxu0  ;;  %v17309_v29 = vor.u32 %v3534_v2, %v3531_v26  ;;  %v17323_v31 = vsel %vm3249_vm6, %v21787_v14, %v21638_v6  ;;  %v2222_v26 = vor.u32 %v2220_v62, %v2218_v32 }
 0x23f   : > { %v1980_v49 = vmax.f32 %v1973_v12, %v1977_v44  ;;  %1531 = vst.msk [vmem:[#allocation2 + $0x2a0] sm:$0xff] %vm1446_vm2, %v1432_v0  ;;  %v1297_v10 = vadd.f32 %v16831_v7, %v1296_v1  ;;  %21788 = vst [vmem:[#allocation77_spill] sm:$0xff] %v17323_v31  ;;  %v1971_v0 = vmax.f32 %v1965_v19, %v1969_v43 }
 0x240   : > { %v13928_v2 = vpop.f32.mrf.mxu0  ;;  %v3536_v44 = vsel %vm3456_vm12, %v17194_v56, %v17309_v29  ;;  %v17332_v20 = vsel %vm2748_vm5, %v17182_v63, %v17314_v51  ;;  %v17339_v56 = vcombine.low %v17276_v59, %v17316_v22 }
 0x241   : > { %v1982_v33 = vmax.f32 %v1970_v27, %v1980_v49  ;;  %v1433_v50 = vmax.f32 %v1297_v10, 0.0  ;;  %14254 = vmatmul.mubr.msk.bf16.gmra.mxu0 %vm1446_vm2, %v3536_v44  ;;  %v15194_v44 = vld [vmem:[%s21574_s3 + $0x58] sm:$0xff]  }
 0x242   : > { %v1975_v9 = vld [vmem:[#allocation2 + $0x294] ss:$2 sm:$0x3f]  ;;  %v1979_v42 = vld [vmem:[#allocation2 + $0x295] ss:$2 sm:$0x3f]  ;;  %v1301_v17 = vpop.f32.mrf.mxu0  ;;  %13994 = vmatmul.mubr.msk.bf16.gmra.mxu1 %vm1446_vm2, %v2222_v26  ;;  %14257 = vmatprep.mubr.msk.bf16.mxu0 %vm15930_vm0, %v21708_v35 }
 0x243   : > { %v13221_v49 = vpack.c.bf16 %v1982_v33, %v1982_v33  ;;  %v1981_v32 = vmax.f32 %v1975_v9, %v1979_v42  ;;  %1532 = vst.msk [vmem:[#allocation2 + $0x2a8] sm:$0xff] %vm1446_vm2, %v1433_v50  ;;  %v1302_v43 = vadd.f32 %v16831_v7, %v1301_v17  ;;  %14005 = vmatprep.mubr.msk.bf16.mxu1 %vm15930_vm0, %v21708_v35  ;;  %v4769_v62 = vshrl.u32 %v17339_v56, 16  ;;  %v17352_v26 = vld [vmem:[#allocation3 + $0x44] sm:$0xff]  }
 0x244   : > { %v13931_v63 = vpop.f32.mrf.mxu0  ;;  %v4772_v50 = vshll.u32 %v17339_v56, 16  ;;  %v17355_v17 = vld [vmem:[#allocation3 + $0x44] sm:$0xff]  }
 0x245   : > { %v1990_v19 = vrot.slane %v13221_v49, 7  ;;  %v1983_v27 = vmax.f32 %v1971_v0, %v1981_v32  ;;  %v1434_v12 = vmax.f32 %v1302_v43, 0.0  ;;  %v4771_v0 = vrot.slane %v4769_v62, 2 }
 0x246   : > { %v1304_v1 = vpop.f32.mrf.mxu0  ;;  %v5216_v49 = vrot.slane %v4769_v62, 3  ;;  %v4774_v43 = vrot.slane %v4772_v50, 3  ;;  %v5217_v63 = vrot.slane %v4772_v50, 4 }
 0x247   : > { %v1991_v10 = vrot.slane %v1990_v19, 4  ;;  %1996 = vst.msk [vmem:[#allocation3 + $0x4c] sm:$0xe] %vm1703_vm11, %v1990_v19  ;;  %v13222_v14 = vpack.c.bf16 %v1983_v27, %v1983_v27  ;;  %v1305_v2 = vadd.f32 %v16831_v7, %v1304_v1  ;;  %v21640_v1 = vrot.slane %v17352_v26, 1 }
 0x248   : > { %1533 = vst.msk [vmem:[#allocation2 + $0x2b0] sm:$0xff] %vm1446_vm2, %v1434_v12  ;;  %v13932_v33 = vpop.f32.mrf.mxu0  ;;  %v15199_v12 = vld [vmem:[%s21574_s3 + $0x50] sm:$0xff]   ;;  %v17371_v52 = vor.u32 %v4774_v43, %v4771_v0  ;;  %v17373_v62 = vor.u32 %v5217_v63, %v5216_v49  ;;  %v15201_v0 = vld [vmem:[%s21574_s3 + $0x48] sm:$0xff]   ;;  %v21794_v49 = vrot.slane %v17215_v36, 2  ;;  %v17410_v43 = vld [vmem:[%s21573_s2] ss:$0 sm:$0xff] }
 0x249   : > { %v1992_v9 = vrot.slane %v13222_v14, 7  ;;  %v1435_v42 = vmax.f32 %v1305_v2, 0.0  ;;  %v21789_v14 = vrot.slane %v17215_v36, 1 }
 0x24a   : > { %v1309_v32 = vpop.f32.mrf.mxu0  ;;  %14006 = vmatmul.mubr.msk.bf16.vlgmr.msra.gmra.mxu1 %vm1446_vm2, %v16322_v21 }
 0x24b   : > { %v1993_v19 = vsel %vm16407_vm10, %v1991_v10, %v1992_v9  ;;  %1534 = vst.msk [vmem:[#allocation2 + $0x2b8] sm:$0xff] %vm1446_vm2, %v1435_v42  ;;  %v1310_v27 = vadd.f32 %v16831_v7, %v1309_v32  ;;  %14042 = vmatpush3.bf16.msra.mxu1 %v15194_v44  ;;  %14009 = vmatprep.mubr.msk.bf16.mxu1 %vm15930_vm0, %v21708_v35  ;;  %v21639_v7 = vrot.slane %v17352_v26, 2  ;;  %v21641_v44 = vrot.slane %v17355_v17, 3 }
 0x24c   : > { %1997 = vst.msk [vmem:[#allocation3 + $0x50] sm:$0xf] %vm1574_vm3, %v1993_v19  ;;  %v13935_v21 = vpop.f32.mrf.mxu0  ;;  %14043 = vmatprep.subr.bf16.mxu1 %v21708_v35  ;;  %v17381_v2 = vsel %vm2543_vm1, %v21789_v14, %v21640_v1  ;;  %v17392_v9 = vsel %vm4705_vm14, %v17222_v57, %v17371_v52  ;;  %v17397_v42 = vsel %vm3456_vm12, %v17224_v24, %v17373_v62  ;;  %v17431_v1 = vld [vmem:[#allocation3 + $0x8] sm:$0xff]   ;;  %vm21820_vm10 = vcmask 519171  }
 0x24d   : > { %v1436_v10 = vmax.f32 %v1310_v27, 0.0  ;;  %21790 = vst [vmem:[#allocation78_spill] sm:$0xff] %v17381_v2  ;;  %21792 = vst [vmem:[#allocation80_spill] sm:$0xff] %v17392_v9  ;;  %v17404_v32 = vsel %vm2981_vm9, %v21794_v49, %v21639_v7 }
 0x24e   : > { %v1312_v33 = vpop.f32.mrf.mxu0  ;;  %v17384_v50 = vld [vmem:[#allocation3 + $0x4c] sm:$0x3]  ;;  %21793 = vst [vmem:[#allocation81_spill] sm:$0xff] %v17397_v42  ;;  %21795 = vst [vmem:[#allocation82_spill] sm:$0xff] %v17404_v32  ;;  %v17413_v63 = vpop.f32.mrf.mxu1  ;;  %v3931_v42 = vshll.u32 %v16425_v8, 16 }
 0x24f   : > { %21791 = vst [vmem:[#allocation79_spill] sm:$0xff] %v17384_v50  ;;  %1535 = vst.msk [vmem:[#allocation2 + $0x2c0] sm:$0xff] %vm1446_vm2, %v1436_v10  ;;  %v1313_v57 = vadd.f32 %v17410_v43, %v1312_v33  ;;  %v12327_v24 = vcombine.low %v17384_v50, %v17384_v50  ;;  %14044 = vmatpush3.bf16.msra.mxu1 %v15199_v12  ;;  %v17417_v19 = vld [vmem:[#allocation3 + $0x4c] sm:$0xf]  ;;  %v21798_v10 = vrot.slane %v17217_v11, 3  ;;  %v3935_v50 = vshrl.u32 %v16425_v8, 16 }
 0x250   : > { %21796 = vst [vmem:[#allocation83_spill] sm:$0xff] %v17413_v63  ;;  %21797 = vst [vmem:[#allocation84_spill] sm:$0xff] %v17417_v19  ;;  %v13936_v27 = vpop.f32.mrf.mxu0  ;;  %14045 = vmatprep.subr.bf16.mxu1 %v21708_v35  ;;  %v13971_v12 = vpop.f32.mrf.mxu1 }
 0x251   : > { %v17429_v14 = vsel %vm3249_vm6, %v21798_v10, %v21641_v44  ;;  %v1437_v33 = vmax.f32 %v1313_v57, 0.0  ;;  %v3538_v49 = vshrl.u32 %v12327_v24, 16  ;;  %v3541_v6 = vshll.u32 %v12327_v24, 16  ;;  %v15202_v24 = vld [vmem:[%s21574_s3 + $0x40] sm:$0xff]  }
 0x252   : > { %21799 = vst [vmem:[#allocation85_spill] sm:$0xff] %v17429_v14  ;;  %v1317_v7 = vpop.f32.mrf.mxu0  ;;  %14010 = vmatmul.mubr.msk.bf16.gmra.mxu1 %vm1446_vm2, %v17431_v1  ;;  %v17437_v36 = vpop.f32.mrf.mxu1  ;;  %v3927_v57 = vshll.u32 %v16348_v46, 16  ;;  %v2003_v14 = vld [vmem:[#allocation2 + $0x2a1] ss:$2 sm:$0xff] }
 0x253   : > { %1536 = vst.msk [vmem:[#allocation2 + $0x2c8] sm:$0xff] %vm1446_vm2, %v1437_v33  ;;  %v1318_v27 = vadd.f32 %v17410_v43, %v1317_v7  ;;  %21800 = vst [vmem:[#allocation86_spill] sm:$0xff] %v17437_v36  ;;  %v3540_v11 = vrot.slane %v3538_v49, 3  ;;  %v3543_v21 = vrot.slane %v3541_v6, 4  ;;  %14013 = vmatprep.mubr.msk.bf16.mxu1 %vm15930_vm0, %v21708_v35  ;;  %14046 = vmatpush3.bf16.msra.mxu1 %v15201_v0  ;;  %v4646_v33 = vld [vmem:[#allocation3 + $0x50] sm:$0xf] }
 0x254   : > { %v13939_v10 = vpop.f32.mrf.mxu0  ;;  %14047 = vmatprep.subr.bf16.mxu1 %v21708_v35  ;;  %v13972_v7 = vpop.f32.mrf.mxu1  ;;  %v17447_v49 = vcombine.low %v17417_v19, %v4646_v33  ;;  %v1999_v6 = vld [vmem:[#allocation2 + $0x2a0] ss:$2 sm:$0xff] }
 0x255   : > { %v1438_v12 = vmax.f32 %v1318_v27, 0.0  ;;  %v3544_v44 = vor.u32 %v3543_v21, %v3540_v11  ;;  %v3929_v10 = vrot.slane %v3927_v57, 1  ;;  %v2001_v27 = vld [vmem:[#allocation2 + $0x2b0] ss:$2 sm:$0x3f]  ;;  %v2006_v21 = vmax.f32 %v1999_v6, %v2003_v14  ;;  %v17470_v39 = vld [vmem:[#allocation3 + $0x4c] sm:$0xff]  }
 0x256   : > { %v1320_v32 = vpop.f32.mrf.mxu0  ;;  %v2005_v11 = vld [vmem:[#allocation2 + $0x2b1] ss:$2 sm:$0x3f]  ;;  %v4781_v31 = vshll.u32 %v17447_v49, 16 }
 0x257   : > { %1537 = vst.msk [vmem:[#allocation2 + $0x2d0] sm:$0xff] %vm1446_vm2, %v1438_v12  ;;  %v1321_v0 = vadd.f32 %v17410_v43, %v1320_v32  ;;  %v3545_v2 = vsel %vm3456_vm12, %v17309_v29, %v3544_v44  ;;  %14048 = vmatpush3.bf16.msra.mxu1 %v15202_v24  ;;  %v3925_v32 = vshrl.u32 %v16348_v46, 16  ;;  %v4778_v29 = vshrl.u32 %v17447_v49, 16  ;;  %v17460_v24 = vld [vmem:[#allocation3 + $0x10] sm:$0xff]  }
 0x258   : > { %v13940_v7 = vpop.f32.mrf.mxu0  ;;  %14258 = vmatmul.mubr.msk.bf16.gmra.mxu0 %vm1446_vm2, %v3545_v2  ;;  %14085 = vmatprep.subr.bf16.mxu1 %v21708_v35  ;;  %v3938_v46 = vshll.u32 %v16525_v23, 16  ;;  %v4783_v59 = vrot.slane %v4781_v31, 3  ;;  %v5221_v36 = vrot.slane %v4781_v31, 4 }
 0x259   : > { %v1439_v33 = vmax.f32 %v1321_v0, 0.0  ;;  %14313 = vmatprep.mubr.msk.bf16.mxu0 %vm15930_vm0, %v21708_v35  ;;  %v3930_v6 = vor.u32 %v3929_v10, %v3925_v32  ;;  %v3933_v0 = vrot.slane %v3931_v42, 1  ;;  %v2007_v7 = vmax.f32 %v2001_v27, %v2005_v11  ;;  %v15204_v10 = vld [vmem:[%s21574_s3 + $0x158] sm:$0xff]  }
 0x25a   : > { %v2009_v44 = vld [vmem:[#allocation2 + $0x2bc] ss:$2 sm:$0xff]  ;;  %v2013_v57 = vld [vmem:[#allocation2 + $0x2bd] ss:$2 sm:$0xff]  ;;  %v1325_v12 = vpop.f32.mrf.mxu0  ;;  %14014 = vmatmul.mubr.msk.bf16.gmra.mxu1 %vm1446_vm2, %v17460_v24  ;;  %v4780_v27 = vrot.slane %v4778_v29, 2  ;;  %v17484_v22 = vrot.slane %v3938_v46, 1 }
 0x25b   : > { %v2016_v2 = vmax.f32 %v2009_v44, %v2013_v57  ;;  %1538 = vst.msk [vmem:[#allocation2 + $0x2d8] sm:$0xff] %vm1446_vm2, %v1439_v33  ;;  %v1326_v14 = vadd.f32 %v17410_v43, %v1325_v12  ;;  %14017 = vmatprep.mubr.msk.bf16.mxu1 %vm15930_vm0, %v21708_v35  ;;  %v17476_v42 = vld [vmem:[#allocation3 + $0x4c] sm:$0xff]   ;;  %v17478_v33 = vld [vmem:[#allocation3 + $0x3c] sm:$0xff]   ;;  %v21650_v46 = vrot.slane %v17470_v39, 2 }
 0x25c   : > { %v13943_v9 = vpop.f32.mrf.mxu0  ;;  %21801 = vst [vmem:[#allocation87_spill] sm:$0xff] %v17478_v33  ;;  %v21651_v31 = vrot.slane %v17476_v42, 3 }
 0x25d   : > { %v2018_v44 = vmax.f32 %v2006_v21, %v2016_v2  ;;  %v1440_v57 = vmax.f32 %v1326_v14, 0.0  ;;  %v5220_v9 = vrot.slane %v4778_v29, 3  ;;  %v3934_v2 = vsel %vm2151_vm15, %v3930_v6, %v3933_v0  ;;  %v15205_v6 = vld [vmem:[%s21574_s3 + $0x150] sm:$0xff]  }
 0x25e   : > { %v2011_v11 = vld [vmem:[#allocation2 + $0x2cc] ss:$2 sm:$0x3f]  ;;  %v2015_v32 = vld [vmem:[#allocation2 + $0x2cd] ss:$2 sm:$0x3f]  ;;  %v1328_v12 = vpop.f32.mrf.mxu0 }
 0x25f   : > { %v13223_v8 = vpack.c.bf16 %v2018_v44, %v2018_v44  ;;  %v2017_v19 = vmax.f32 %v2011_v11, %v2015_v32  ;;  %1539 = vst.msk [vmem:[#allocation2 + $0x2e0] sm:$0xff] %vm1446_vm2, %v1440_v57  ;;  %v1329_v21 = vadd.f32 %v17410_v43, %v1328_v12  ;;  %v21652_v29 = vrot.slane %v17470_v39, 1  ;;  %v17493_v57 = vld [vmem:[#allocation3 + $0x44] sm:$0xff]   ;;  %v17497_v32 = vld [vmem:[#allocation3 + $0x18] sm:$0xff]  }
 0x260   : > { %v13944_v14 = vpop.f32.mrf.mxu0  ;;  %14314 = vmatmul.mubr.msk.bf16.vlgmr.msra.gmra.mxu0 %vm1446_vm2, %v3934_v2  ;;  %21802 = vst [vmem:[#allocation88_spill] sm:$0xff] %v17493_v57  ;;  %v17512_v2 = vld [vmem:[#allocation3 + $0x4c] sm:$0xff]  }
 0x261   : > { %2028 = vst.msk [vmem:[#allocation3 + $0x54] sm:$0xf] %vm1574_vm3, %v13223_v8  ;;  %v2019_v63 = vmax.f32 %v2007_v7, %v2017_v19  ;;  %v1441_v44 = vmax.f32 %v1329_v21, 0.0  ;;  %14317 = vmatprep.mubr.msk.bf16.mxu0 %vm15930_vm0, %v21708_v35  ;;  %14394 = vmatpush3.bf16.msra.mxu0 %v15204_v10  ;;  %v17502_v8 = vor.u32 %v4783_v59, %v4780_v27  ;;  %v21654_v7 = vshll.u32 %v17478_v33, 16 }
 0x262   : > { %v1333_v11 = vpop.f32.mrf.mxu0  ;;  %14018 = vmatmul.mubr.msk.bf16.gmra.mxu1 %vm1446_vm2, %v17497_v32  ;;  %14395 = vmatprep.subr.bf16.mxu0 %v21708_v35  ;;  %v17504_v19 = vor.u32 %v5221_v36, %v5220_v9  ;;  %v21653_v10 = vshrl.u32 %v17478_v33, 16  ;;  %21804 = vst [vmem:[#allocation90_spill] sm:$0xff] %v17512_v2  ;;  %v21805_v59 = vrot.slane %v17352_v26, 1  ;;  %v3937_v14 = vor.u32 %v3935_v50, %v3933_v0 }
 0x263   : > { %v13224_v12 = vpack.c.bf16 %v2019_v63, %v2019_v63  ;;  %1540 = vst.msk [vmem:[#allocation2 + $0x2e8] sm:$0xff] %vm1446_vm2, %v1441_v44  ;;  %v1334_v21 = vadd.f32 %v17410_v43, %v1333_v11  ;;  %14021 = vmatprep.mubr.msk.bf16.mxu1 %vm15930_vm0, %v21708_v35  ;;  %v21807_v63 = vrot.slane %v17352_v26, 2  ;;  %v17531_v44 = vsel %vm4705_vm14, %v17371_v52, %v17502_v8  ;;  %v15206_v52 = vld [vmem:[%s21574_s3 + $0x148] sm:$0xff]  }
 0x264   : > { %21803 = vst [vmem:[#allocation89_spill] sm:$0xff] %v17504_v19  ;;  %v17519_v36 = vsel %vm2543_vm1, %v21805_v59, %v21652_v29  ;;  %v13947_v9 = vpop.f32.mrf.mxu0  ;;  %v17536_v11 = vsel %vm3456_vm12, %v17373_v62, %v17504_v19  ;;  %v21810_v59 = vrot.slane %v17355_v17, 3  ;;  %v21655_v0 = vshrl.u32 %v17493_v57, 16 }
 0x265   : > { %21806 = vst [vmem:[#allocation91_spill] sm:$0xff] %v17519_v36  ;;  %v17526_v27 = vsel %vm2981_vm9, %v21807_v63, %v21650_v46  ;;  %21809 = vst [vmem:[#allocation93_spill] sm:$0xff] %v17536_v11  ;;  %v1442_v50 = vmax.f32 %v1334_v21, 0.0  ;;  %14396 = vmatpush3.bf16.msra.mxu0 %v15205_v6  ;;  %v3941_v62 = vsel %vm2151_vm15, %v3937_v14, %v17484_v22  ;;  %v3945_v9 = vshll.u32 %v16620_v30, 16 }
 0x266   : > { %21808 = vst [vmem:[#allocation92_spill] sm:$0xff] %v17526_v27  ;;  %v17543_v26 = vsel %vm3249_vm6, %v21810_v59, %v21651_v31  ;;  %2029 = vst.msk [vmem:[#allocation3 + $0x58] sm:$0x7] %vm1576_vm4, %v13224_v12  ;;  %v1336_v63 = vpop.f32.mrf.mxu0  ;;  %14397 = vmatprep.subr.bf16.mxu0 %v21708_v35  ;;  %v7607_v17 = vrot.slane %v21653_v10, 1  ;;  %v7608_v6 = vrot.slane %v21654_v7, 2  ;;  %v21662_v21 = vshll.u32 %v17493_v57, 16 }
 0x267   : > { %21811 = vst [vmem:[#allocation94_spill] sm:$0xff] %v17543_v26  ;;  %1541 = vst.msk [vmem:[#allocation2 + $0x2f0] sm:$0xff] %vm1446_vm2, %v1442_v50  ;;  %v1337_v12 = vadd.f32 %v17410_v43, %v1336_v63  ;;  %v21661_v14 = vshrl.u32 %v17512_v2, 16  ;;  %v3942_v50 = vshrl.u32 %v16525_v23, 16  ;;  %v15208_v63 = vld [vmem:[%s21574_s3 + $0x140] sm:$0xff]   ;;  %v17576_v59 = vld [vmem:[#allocation3 + $0x20] sm:$0xff]  }
 0x268   : > { %v13948_v46 = vpop.f32.mrf.mxu0  ;;  %14318 = vmatmul.mubr.msk.bf16.gmra.mxu0 %vm1446_vm2, %v3941_v62  ;;  %v17564_v31 = vld [vmem:[#allocation3 + $0x54] ss:$0 sps:$4 sm:$0x11]   ;;  %v7609_v29 = vor.u32 %v7608_v6, %v7607_v17  ;;  %v3947_v17 = vrot.slane %v3945_v9, 1  ;;  %v21813_v33 = vshll.u32 %v17512_v2, 16 }
 0x269   : > { %v1443_v10 = vmax.f32 %v1337_v12, 0.0  ;;  %14321 = vmatprep.mubr.msk.bf16.mxu0 %vm15930_vm0, %v21708_v35  ;;  %14398 = vmatpush3.bf16.msra.mxu0 %v15206_v52  ;;  %v17572_v7 = vld [vmem:[#allocation3 + $0x54] sm:$0xf]  ;;  %v7611_v46 = vrot.slane %v21655_v0, 1  ;;  %v4787_v52 = vshll.u32 %v17564_v31, 16  ;;  %v7612_v0 = vrot.slane %v21662_v21, 2 }
 0x26a   : > { %v1341_v62 = vpop.f32.mrf.mxu0  ;;  %14022 = vmatmul.mubr.msk.bf16.gmra.mxu1 %vm1446_vm2, %v17576_v59  ;;  %14399 = vmatprep.subr.bf16.mxu0 %v21708_v35  ;;  %v17584_v6 = vsel %vm2748_vm5, %v17128_v47, %v7609_v29  ;;  %v7615_v9 = vrot.slane %v21661_v14, 1  ;;  %v7616_v26 = vrot.slane %v21813_v33, 2  ;;  %v3944_v47 = vor.u32 %v3942_v50, %v17484_v22 }
 0x26b   : > { %21812 = vst [vmem:[#allocation95_spill] sm:$0xff] %v17584_v6  ;;  %1542 = vst.msk [vmem:[#allocation2 + $0x2f8] sm:$0xff] %vm1446_vm2, %v1443_v10  ;;  %v1342_v12 = vadd.f32 %v17410_v43, %v1341_v62  ;;  %14025 = vmatprep.mubr.msk.bf16.mxu1 %vm15930_vm0, %v21708_v35  ;;  %v4789_v6 = vrot.slane %v4787_v52, 3  ;;  %v7613_v19 = vor.u32 %v7612_v0, %v7611_v46 }
 0x26c   : > { %v13951_v27 = vpop.f32.mrf.mxu0  ;;  %v17598_v11 = vor.u32 %v7616_v26, %v7615_v9  ;;  %v3948_v33 = vsel %vm2151_vm15, %v3944_v47, %v3947_v17 }
 0x26d   : > { %v5616_v36 = vld [vmem:[#allocation3 + $0x58] sm:$0x7]  ;;  %v1444_v10 = vmax.f32 %v1342_v12, 0.0  ;;  %14400 = vmatpush3.bf16.msra.mxu0 %v15208_v63  ;;  %v17603_v14 = vsel %vm4705_vm14, %v17502_v8, %v4789_v6  ;;  %v3952_v27 = vshll.u32 %v16767_v5, 16  ;;  %v17613_v26 = vsel %vm2748_vm5, %v7609_v29, %v7613_v19  ;;  %v17621_v63 = vld [vmem:[#allocation3 + $0x28] sm:$0xff]  }
 0x26e   : > { %v12566_v62 = vcombine.low %v17572_v7, %v5616_v36  ;;  %v1344_v57 = vpop.f32.mrf.mxu0  ;;  %14481 = vmatprep.subr.bf16.mxu0 %v21708_v35  ;;  %21814 = vst [vmem:[#allocation96_spill] sm:$0xff] %v17603_v14  ;;  %21816 = vst [vmem:[#allocation98_spill] sm:$0xff] %v17613_v26  ;;  %v17617_v8 = vsel %vm2748_vm5, %v7613_v19, %v17598_v11  ;;  %v21818_v29 = vrot.slane %v17470_v39, 1  ;;  %v3949_v6 = vshrl.u32 %v16620_v30, 16 }
 0x26f   : > { %1543 = vst.msk [vmem:[#allocation2 + $0x300] sm:$0xff] %vm1446_vm2, %v1444_v10  ;;  %v1345_v22 = vadd.f32 %v17410_v43, %v1344_v57  ;;  %21817 = vst [vmem:[#allocation99_spill] sm:$0xff] %v17617_v8  ;;  %v2031_v43 = vld [vmem:[#allocation2 + $0x2d8] ss:$2 sm:$0xff]  ;;  %v2035_v57 = vld [vmem:[#allocation2 + $0x2d9] ss:$2 sm:$0xff] }
 0x270   : > { %v13952_v50 = vpop.f32.mrf.mxu0  ;;  %14322 = vmatmul.mubr.msk.bf16.gmra.mxu0 %vm1446_vm2, %v3948_v33  ;;  %v17610_v36 = vrot.slane %v12566_v62, 1  ;;  %v3954_v12 = vrot.slane %v3952_v27, 1  ;;  %v2038_v10 = vmax.f32 %v2031_v43, %v2035_v57  ;;  %v2033_v62 = vld [vmem:[#allocation2 + $0x2e8] ss:$2 sm:$0x3f]  ;;  %v3951_v33 = vor.u32 %v3949_v6, %v3947_v17  ;;  %v17648_v6 = vld [vmem:[#allocation3 + $0x30] sm:$0xff]  }
 0x271   : > { %v1445_v0 = vmax.f32 %v1345_v22, 0.0  ;;  %14325 = vmatprep.mubr.msk.bf16.mxu0 %vm15930_vm0, %v21708_v35  ;;  %v17627_v52 = vpop.f32.mrf.mxu1  ;;  %v2037_v22 = vld [vmem:[#allocation2 + $0x2e9] ss:$2 sm:$0x3f]  ;;  %v3959_v27 = vshll.u32 %v16909_v37, 16 }
 0x272   : > { %21815 = vst [vmem:[#allocation97_spill] sm:$0xff] %v17610_v36  ;;  %14026 = vmatmul.mubr.msk.bf16.gmra.mxu1 %vm1446_vm2, %v17621_v63  ;;  %v17625_v46 = vpop.f32.mrf.mxu0  ;;  %v17633_v19 = vsel %vm2543_vm1, %v21818_v29, %v17610_v36 }
 0x273   : > { %21819 = vst [vmem:[#allocation100_spill] sm:$0xff] %v17633_v19  ;;  %1544 = vst.msk [vmem:[#allocation2 + $0x308] sm:$0xff] %vm1446_vm2, %v1445_v0  ;;  %14029 = vmatprep.mubr.msk.bf16.mxu1 %vm15930_vm0, %v21708_v35  ;;  %v13975_v47 = vpop.f32.mrf.mxu1  ;;  %v3955_v0 = vsel %vm2151_vm15, %v3951_v33, %v3954_v12 }
 0x274   : > { %v14227_v9 = vpop.f32.mrf.mxu0  ;;  %v2039_v47 = vmax.f32 %v2033_v62, %v2037_v22 }
 0x275   : > { %v17641_v29 = vpop.f32.mrf.mxu1 }
 0x276   : > { %v2041_v50 = vld [vmem:[#allocation2 + $0x2f4] ss:$2 sm:$0xff]  ;;  %v2045_v21 = vld [vmem:[#allocation2 + $0x2f5] ss:$2 sm:$0xff]  ;;  %v17639_v8 = vpop.f32.mrf.mxu0 }
 0x277   : > { %v2048_v26 = vmax.f32 %v2041_v50, %v2045_v21  ;;  %v13976_v9 = vpop.f32.mrf.mxu1 }
 0x278   : > { %v14228_v2 = vpop.f32.mrf.mxu0  ;;  %14326 = vmatmul.mubr.msk.bf16.gmra.mxu0 %vm1446_vm2, %v3955_v0  ;;  %v3961_v0 = vrot.slane %v3959_v27, 1 }
 0x279   : > { %v2050_v43 = vmax.f32 %v2038_v10, %v2048_v26  ;;  %14329 = vmatprep.mubr.msk.bf16.mxu0 %vm15930_vm0, %v21708_v35  ;;  %v3956_v2 = vshrl.u32 %v16767_v5, 16 }
 0x27a   : > { %v2043_v17 = vld [vmem:[#allocation2 + $0x304] ss:$2 sm:$0x3f]  ;;  %v2047_v57 = vld [vmem:[#allocation2 + $0x305] ss:$2 sm:$0x3f]  ;;  %14030 = vmatmul.mubr.msk.bf16.gmra.mxu1 %vm1446_vm2, %v17648_v6  ;;  %v17652_v21 = vpop.f32.mrf.mxu0 }
 0x27b   : > { %v13225_v33 = vpack.c.bf16 %v2050_v43, %v2050_v43  ;;  %v2049_v50 = vmax.f32 %v2043_v17, %v2047_v57  ;;  %14033 = vmatprep.mubr.msk.bf16.mxu1 %vm15930_vm0, %v21708_v35  ;;  %v3958_v22 = vor.u32 %v3956_v2, %v3954_v12  ;;  %v3966_v43 = vshll.u32 %v17145_v55, 16  ;;  %v2087_v2 = vld [vmem:[#allocation3 + $0x44] sm:$0x3] }
 0x27c   : > { %v14231_v26 = vpop.f32.mrf.mxu0 }
 0x27d   : > { %v2058_v10 = vrot.slane %v13225_v33, 5  ;;  %v2051_v62 = vmax.f32 %v2039_v47, %v2049_v50  ;;  %v3962_v14 = vsel %vm2151_vm15, %v3958_v22, %v3961_v0  ;;  %v3963_v33 = vshrl.u32 %v16909_v37, 16 }
 0x27e   : > { %v17657_v9 = vpop.f32.mrf.mxu0  ;;  %v3968_v50 = vrot.slane %v3966_v43, 1  ;;  %v12208_v43 = vcombine.low %v17266_v61, %v2087_v2  ;;  %v3970_v61 = vshrl.u32 %v17145_v55, 16  ;;  %v21826_v2 = vrot.slane %v17470_v39, 2 }
 0x27f   : > { %v2059_v36 = vrot.slane %v2058_v10, 4  ;;  %2066 = vst.msk [vmem:[#allocation3 + $0x58] sm:$0x8] %vm21820_vm10, %v2058_v10  ;;  %v13226_v19 = vpack.c.bf16 %v2051_v62, %v2051_v62 }
 0x280   : > { %v14232_v17 = vpop.f32.mrf.mxu0  ;;  %14330 = vmatmul.mubr.msk.bf16.gmra.mxu0 %vm1446_vm2, %v3962_v14 }
 0x281   : > { %v2060_v27 = vrot.slane %v13226_v19, 5  ;;  %14333 = vmatprep.mubr.msk.bf16.mxu0 %vm15930_vm0, %v21708_v35  ;;  %v3965_v19 = vor.u32 %v3963_v33, %v3961_v0  ;;  %v3912_v17 = vld [vmem:[#allocation3 + $0x4c] sm:$0x7] }
 0x282   : > { %14034 = vmatmul.mubr.msk.bf16.gmra.mxu1 %vm1446_vm2, %v17140_v54  ;;  %v17667_v12 = vpop.f32.mrf.mxu0 }
 0x283   : > { %v2061_v47 = vsel %vm16268_vm7, %v2059_v36, %v2060_v27  ;;  %v2062_v57 = vrot.slane %v2060_v27, 4  ;;  %14037 = vmatprep.mubr.msk.bf16.mxu1 %vm15930_vm0, %v21708_v35  ;;  %v3969_v16 = vsel %vm2151_vm15, %v3965_v19, %v3968_v50  ;;  %v3973_v36 = vshll.u32 %v17274_v58, 16 }
 0x284   : > { %2067 = vst.msk [vmem:[#allocation3 + $0x5c] sm:$0xf] %vm1574_vm3, %v2061_v47  ;;  %v14235_v14 = vpop.f32.mrf.mxu0  ;;  %vm21901_vm3 = vcmask 519170   ;;  %vm8083_vm7 = vsmask.f32 2304 }
 0x285   : > { %2068 = vst.msk [vmem:[#allocation3 + $0x60] sm:$0x3] %vm21821_vm8, %v2062_v57  ;;  %v3975_v33 = vrot.slane %v3973_v36, 1  ;;  %v17705_v14 = vcombine.low %v17291_v13, %v3912_v17  ;;  %v3972_v36 = vor.u32 %v3970_v61, %v3968_v50  ;;  %vm22207_vm8 = vcmask 519171  }
 0x286   : > { %v17676_v54 = vpop.f32.mrf.mxu0  ;;  %v5862_v26 = vld [vmem:[#allocation3 + $0x58] sm:$0xf] }
 0x287   : > { %v17678_v10 = vld [vmem:[#allocation3 + $0x54] sm:$0xff]   ;;  %v17683_v62 = vcombine.low %v17572_v7, %v5862_v26  ;;  %v21824_v7 = vrot.slane %v17476_v42, 3  ;;  %v3976_v39 = vsel %vm2151_vm15, %v3972_v36, %v3975_v33  ;;  %v3981_v50 = vshll.u32 %v17705_v14, 16 }
 0x288   : > { %v14236_v22 = vpop.f32.mrf.mxu0  ;;  %14334 = vmatmul.mubr.msk.bf16.gmra.mxu0 %vm1446_vm2, %v3969_v16  ;;  %v17687_v0 = vld [vmem:[#allocation3 + $0x54] sm:$0xff]   ;;  %v21666_v27 = vrot.slane %v17678_v10, 3 }
 0x289   : > { %21822 = vst [vmem:[#allocation101_spill] sm:$0xff] %v17683_v62  ;;  %21823 = vst [vmem:[#allocation102_spill] sm:$0xff] %v17687_v0  ;;  %14337 = vmatprep.mubr.msk.bf16.mxu0 %vm15930_vm0, %v21708_v35  ;;  %v21667_v47 = vrot.slane %v17683_v62, 2  ;;  %v21669_v26 = vshll.u32 %v17687_v0, 16  ;;  %v21668_v16 = vshrl.u32 %v17687_v0, 16  ;;  %v2545_v22 = vrot.slane %v17431_v1, 1 }
 0x28a   : > { %14038 = vmatmul.mubr.msk.bf16.gmra.mxu1 %vm1446_vm2, %v12208_v43  ;;  %v17699_v57 = vsel %vm3249_vm6, %v21824_v7, %v21666_v27 }
 0x28b   : > { %21825 = vst [vmem:[#allocation103_spill] sm:$0xff] %v17699_v57  ;;  %14049 = vmatprep.mubr.msk.bf16.mxu1 %vm15930_vm0, %v21708_v35  ;;  %v17714_v42 = vsel %vm2981_vm9, %v21826_v2, %v21667_v47  ;;  %v7619_v17 = vrot.slane %v21668_v16, 1  ;;  %v7620_v27 = vrot.slane %v21669_v26, 2  ;;  %v2544_v2 = vrot.slane %v16329_v28, 1  ;;  %v15203_v47 = vld [vmem:[%s21574_s3 + $0x78] sm:$0xff]  }
 0x28c   : > { %v17707_v19 = vpop.f32.mrf.mxu0  ;;  %21827 = vst [vmem:[#allocation104_spill] sm:$0xff] %v17714_v42  ;;  %v2559_v42 = vrot.slane %v17271_v4, 1 }
 0x28d   : > { %v17719_v7 = vpop.f32.mrf.mxu1  ;;  %v17734_v57 = vor.u32 %v7620_v27, %v7619_v17  ;;  %v2546_v16 = vsel %vm2543_vm1, %v2544_v2, %v2545_v22  ;;  %v3983_v27 = vrot.slane %v3981_v50, 1  ;;  %v15207_v17 = vld [vmem:[%s21574_s3 + $0x70] sm:$0xff]  }
 0x28e   : > { %v14239_v43 = vpop.f32.mrf.mxu0 }
 0x28f   : > { %v13979_v43 = vpop.f32.mrf.mxu1  ;;  %21828 = vst [vmem:[#allocation105_spill] sm:$0xff] %v17734_v57  ;;  %v17745_v26 = vsel %vm2748_vm5, %v17598_v11, %v17734_v57  ;;  %v15223_v57 = vld [vmem:[%s21574_s3 + $0x188] sm:$0xff]  }
 0x290   : > { %v17731_v61 = vpop.f32.mrf.mxu0  ;;  %14338 = vmatmul.mubr.msk.bf16.gmra.mxu0 %vm1446_vm2, %v3976_v39  ;;  %21829 = vst [vmem:[#allocation106_spill] sm:$0xff] %v17745_v26  ;;  %v3977_v39 = vshrl.u32 %v17274_v58, 16  ;;  %v2547_v43 = vrot.slane %v17460_v24, 1  ;;  %v15213_v26 = vld [vmem:[#allocation3 + $0x24] sm:$0xff]  }
 0x291   : > { %14341 = vmatprep.mubr.msk.bf16.mxu0 %vm15930_vm0, %v21708_v35  ;;  %v17740_v36 = vpop.f32.mrf.mxu1 }
 0x292   : > { %14050 = vmatmul.mubr.msk.bf16.vlgmr.msra.gmra.mxu1 %vm1446_vm2, %v2546_v16  ;;  %v14240_v28 = vpop.f32.mrf.mxu0  ;;  %v3979_v2 = vor.u32 %v3977_v39, %v3975_v33  ;;  %v2548_v50 = vsel %vm2543_vm1, %v2545_v22, %v2547_v43  ;;  %v15215_v33 = vld [vmem:[%s21574_s3 + $0x60] sm:$0xff]   ;;  %v2549_v39 = vrot.slane %v17497_v32, 1 }
 0x293   : > { %14086 = vmatpush3.bf16.msra.mxu1 %v15203_v47  ;;  %14053 = vmatprep.mubr.msk.bf16.mxu1 %vm15930_vm0, %v21708_v35  ;;  %v13980_v16 = vpop.f32.mrf.mxu1  ;;  %v15212_v47 = vld [vmem:[%s21574_s3 + $0x68] sm:$0xff]   ;;  %v3985_v28 = vshrl.u32 %v17705_v14, 16 }
 0x294   : > { %14087 = vmatprep.subr.bf16.mxu1 %v21708_v35  ;;  %v3984_v11 = vsel %vm2151_vm15, %v3979_v2, %v3983_v27  ;;  %v2550_v16 = vsel %vm2543_vm1, %v2547_v43, %v2549_v39  ;;  %v15209_v2 = vld [vmem:[#allocation3 + $0xc] sm:$0xfc]   ;;  %v15211_v43 = vld [vmem:[#allocation3 + $0x1c] sm:$0xff]  }
 0x295   : > { %v3987_v22 = vor.u32 %v3985_v28, %v3983_v27  ;;  %v2551_v27 = vrot.slane %v17576_v59, 1 }
 0x297   : > { %14088 = vmatpush3.bf16.msra.mxu1 %v15207_v17  ;;  %v15210_v17 = vld [vmem:[#allocation3 + $0x14] sm:$0xff]  }
 0x298   : > { %14342 = vmatmul.mubr.msk.bf16.gmra.mxu0 %vm1446_vm2, %v3984_v11  ;;  %14089 = vmatprep.subr.bf16.mxu1 %v21708_v35  ;;  %v4439_v11 = vrot.slane %v15210_v17, 2  ;;  %v15222_v17 = vld [vmem:[%s21574_s3 + $0x190] sm:$0xff]  }
 0x299   : > { %14345 = vmatprep.mubr.msk.bf16.mxu0 %vm15930_vm0, %v21708_v35 }
 0x29a   : > { %14054 = vmatmul.mubr.msk.bf16.gmra.mxu1 %vm1446_vm2, %v2548_v50  ;;  %v15221_v50 = vld [vmem:[%s21574_s3 + $0x198] sm:$0xff]  }
 0x29b   : > { %14057 = vmatprep.mubr.msk.bf16.mxu1 %vm15930_vm0, %v21708_v35  ;;  %14090 = vmatpush3.bf16.msra.mxu1 %v15212_v47  ;;  %v4438_v47 = vrot.slane %v15209_v2, 2 }
 0x29c   : > { %14091 = vmatprep.subr.bf16.mxu1 %v21708_v35 }
 0x29f   : > { %14092 = vmatpush3.bf16.msra.mxu1 %v15215_v33  ;;  %v4440_v33 = vsel %vm2981_vm9, %v4438_v47, %v4439_v11  ;;  %v4441_v47 = vrot.slane %v15211_v43, 2 }
 0x2a0   : > { %14346 = vmatmul.mubr.msk.bf16.gmra.mxu0 %vm1446_vm2, %v3987_v22  ;;  %14129 = vmatprep.subr.bf16.mxu1 %v21708_v35  ;;  %v2552_v22 = vsel %vm2543_vm1, %v2549_v39, %v2551_v27 }
 0x2a1   : > { %14401 = vmatprep.mubr.msk.bf16.mxu0 %vm15930_vm0, %v21708_v35  ;;  %v4442_v43 = vsel %vm2981_vm9, %v4439_v11, %v4441_v47 }
 0x2a2   : > { %14058 = vmatmul.mubr.msk.bf16.gmra.mxu1 %vm1446_vm2, %v2550_v16 }
 0x2a3   : > { %14061 = vmatprep.mubr.msk.bf16.mxu1 %vm15930_vm0, %v21708_v35 }
 0x2a8   : > { %v17786_v28 = vpop.f32.mrf.mxu0  ;;  %14402 = vmatmul.mubr.msk.bf16.vlgmr.msra.gmra.mxu0 %vm1446_vm2, %v4440_v33 }
 0x2a9   : > { %21830 = vst [vmem:[#allocation107_spill] sm:$0xff] %v17786_v28  ;;  %14405 = vmatprep.mubr.msk.bf16.mxu0 %vm15930_vm0, %v21708_v35  ;;  %14482 = vmatpush3.bf16.msra.mxu0 %v15221_v50  ;;  %v17796_v2 = vpop.f32.mrf.mxu1  ;;  %v2553_v50 = vrot.slane %v17621_v63, 1 }
 0x2aa   : > { %14062 = vmatmul.mubr.msk.bf16.gmra.mxu1 %vm1446_vm2, %v2552_v22  ;;  %v14243_v16 = vpop.f32.mrf.mxu0  ;;  %14483 = vmatprep.subr.bf16.mxu0 %v21708_v35 }
 0x2ab   : > { %14065 = vmatprep.mubr.msk.bf16.mxu1 %vm15930_vm0, %v21708_v35  ;;  %v13983_v33 = vpop.f32.mrf.mxu1 }
 0x2ac   : > { %v17801_v39 = vpop.f32.mrf.mxu0  ;;  %v2554_v33 = vsel %vm2543_vm1, %v2551_v27, %v2553_v50 }
 0x2ad   : > { %21831 = vst [vmem:[#allocation108_spill] sm:$0xff] %v17801_v39  ;;  %14484 = vmatpush3.bf16.msra.mxu0 %v15222_v17  ;;  %v17807_v16 = vpop.f32.mrf.mxu1  ;;  %v15225_v17 = vld [vmem:[%s21574_s3 + $0x180] sm:$0xff]   ;;  %v15217_v39 = vld [vmem:[#allocation3 + $0x3c] sm:$0xff]  }
 0x2ae   : > { %v14244_v22 = vpop.f32.mrf.mxu0  ;;  %14485 = vmatprep.subr.bf16.mxu0 %v21708_v35 }
 0x2af   : > { %v13984_v0 = vpop.f32.mrf.mxu1  ;;  %v4443_v22 = vrot.slane %v15213_v26, 2 }
 0x2b0   : > { %14406 = vmatmul.mubr.msk.bf16.gmra.mxu0 %vm1446_vm2, %v4442_v43  ;;  %v2555_v0 = vrot.slane %v17648_v6, 1  ;;  %v17832_v43 = vld [vmem:[#allocation3 + $0x38] sm:$0xff]  }
 0x2b1   : > { %14409 = vmatprep.mubr.msk.bf16.mxu0 %vm15930_vm0, %v21708_v35  ;;  %14486 = vmatpush3.bf16.msra.mxu0 %v15223_v57  ;;  %v4444_v11 = vsel %vm2981_vm9, %v4441_v47, %v4443_v22  ;;  %v15214_v57 = vld [vmem:[#allocation3 + $0x2c] sm:$0xff]  }
 0x2b2   : > { %14066 = vmatmul.mubr.msk.bf16.gmra.mxu1 %vm1446_vm2, %v2554_v33  ;;  %14487 = vmatprep.subr.bf16.mxu0 %v21708_v35  ;;  %v2556_v27 = vsel %vm2543_vm1, %v2553_v50, %v2555_v0  ;;  %v4445_v26 = vrot.slane %v15214_v57, 2  ;;  %v2557_v33 = vrot.slane %v17832_v43, 1 }
 0x2b3   : > { %14069 = vmatprep.mubr.msk.bf16.mxu1 %vm15930_vm0, %v21708_v35 }
 0x2b4   : > { %v4446_v47 = vsel %vm2981_vm9, %v4443_v22, %v4445_v26  ;;  %v2558_v50 = vsel %vm2543_vm1, %v2555_v0, %v2557_v33  ;;  %v2560_v28 = vsel %vm2543_vm1, %v2557_v33, %v2559_v42  ;;  %v15220_v33 = vld [vmem:[#allocation3 + $0x4c] sm:$0xff]  }
 0x2b5   : > { %14488 = vmatpush3.bf16.msra.mxu0 %v15225_v17  ;;  %v15216_v17 = vld [vmem:[#allocation3 + $0x34] sm:$0xff]  }
 0x2b6   : > { %14569 = vmatprep.subr.bf16.mxu0 %v21708_v35  ;;  %v4447_v57 = vrot.slane %v15216_v17, 2  ;;  %v4449_v17 = vrot.slane %v15217_v39, 2  ;;  %v15219_v39 = vld [vmem:[%s21574_s3 + $0x98] sm:$0xff]  }
 0x2b8   : > { %14410 = vmatmul.mubr.msk.bf16.gmra.mxu0 %vm1446_vm2, %v4444_v11  ;;  %v4450_v4 = vsel %vm2981_vm9, %v4447_v57, %v4449_v17 }
 0x2b9   : > { %14413 = vmatprep.mubr.msk.bf16.mxu0 %vm15930_vm0, %v21708_v35 }
 0x2ba   : > { %14070 = vmatmul.mubr.msk.bf16.gmra.mxu1 %vm1446_vm2, %v2556_v27 }
 0x2bb   : > { %14073 = vmatprep.mubr.msk.bf16.mxu1 %vm15930_vm0, %v21708_v35 }
 0x2c0   : > { %14414 = vmatmul.mubr.msk.bf16.gmra.mxu0 %vm1446_vm2, %v4446_v47  ;;  %v4448_v47 = vsel %vm2981_vm9, %v4445_v26, %v4447_v57  ;;  %v15224_v57 = vld [vmem:[%s21574_s3 + $0x90] sm:$0xff]  }
 0x2c1   : > { %14417 = vmatprep.mubr.msk.bf16.mxu0 %vm15930_vm0, %v21708_v35 }
 0x2c2   : > { %14074 = vmatmul.mubr.msk.bf16.gmra.mxu1 %vm1446_vm2, %v2558_v50  ;;  %v17841_v11 = vpop.f32.mrf.mxu0  ;;  %v15218_v50 = vld [vmem:[#allocation3 + $0x44] sm:$0xff]  }
 0x2c3   : > { %21832 = vst [vmem:[#allocation109_spill] sm:$0xff] %v17841_v11  ;;  %14077 = vmatprep.mubr.msk.bf16.mxu1 %vm15930_vm0, %v21708_v35  ;;  %v4451_v26 = vrot.slane %v15218_v50, 2 }
 0x2c4   : > { %v14247_v27 = vpop.f32.mrf.mxu0 }
 0x2c6   : > { %v17846_v22 = vpop.f32.mrf.mxu0 }
 0x2c7   : > { %21833 = vst [vmem:[#allocation110_spill] sm:$0xff] %v17846_v22 }
 0x2c8   : > { %v14248_v0 = vpop.f32.mrf.mxu0  ;;  %14418 = vmatmul.mubr.msk.bf16.gmra.mxu0 %vm1446_vm2, %v4448_v47 }
 0x2c9   : > { %14421 = vmatprep.mubr.msk.bf16.mxu0 %vm15930_vm0, %v21708_v35 }
 0x2ca   : > { %14078 = vmatmul.mubr.msk.bf16.gmra.mxu1 %vm1446_vm2, %v2560_v28  ;;  %v4452_v28 = vsel %vm2981_vm9, %v4449_v17, %v4451_v26 }
 0x2cb   : > { %14081 = vmatprep.mubr.msk.bf16.mxu1 %vm15930_vm0, %v21708_v35 }
 0x2d0   : > { %14422 = vmatmul.mubr.msk.bf16.gmra.mxu0 %vm1446_vm2, %v4450_v4  ;;  %v15233_v4 = vld [vmem:[%s21574_s3 + $0x80] sm:$0xff]  }
 0x2d1   : > { %14425 = vmatprep.mubr.msk.bf16.mxu0 %vm15930_vm0, %v21708_v35 }
 0x2d2   : > { %14082 = vmatmul.mubr.msk.bf16.gmra.mxu1 %vm1446_vm2, %v2559_v42  ;;  %v4453_v42 = vrot.slane %v15220_v33, 2  ;;  %v4979_v33 = vrot.slane %v16488_v3, 3  ;;  %v15240_v3 = vld [vmem:[%s21574_s3 + $0x1d0] sm:$0xff]  }
 0x2d3   : > { %14093 = vmatprep.mubr.msk.bf16.mxu1 %vm15930_vm0, %v21708_v35 }
 0x2d4   : > { %v4454_v47 = vsel %vm2981_vm9, %v4451_v26, %v4453_v42 }
 0x2d8   : > { %14426 = vmatmul.mubr.msk.bf16.gmra.mxu0 %vm1446_vm2, %v4452_v28 }
 0x2d9   : > { %14429 = vmatprep.mubr.msk.bf16.mxu0 %vm15930_vm0, %v21708_v35 }
 0x2da   : > { %14094 = vmatmul.mubr.msk.bf16.vlgmr.msra.gmra.mxu1 %vm1446_vm2, %v16388_v15  ;;  %v15230_v15 = vld [vmem:[%s21574_s3 + $0x88] sm:$0xff]  }
 0x2db   : > { %14130 = vmatpush3.bf16.msra.mxu1 %v15219_v39  ;;  %14097 = vmatprep.mubr.msk.bf16.mxu1 %vm15930_vm0, %v21708_v35 }
 0x2dc   : > { %14131 = vmatprep.subr.bf16.mxu1 %v21708_v35 }
 0x2de   : > { %v17878_v27 = vpop.f32.mrf.mxu1 }
 0x2df   : > { %14132 = vmatpush3.bf16.msra.mxu1 %v15224_v57  ;;  %v4978_v57 = vrot.slane %v16472_v48, 3  ;;  %v4981_v48 = vrot.slane %v16671_v60, 3 }
 0x2e0   : > { %v13987_v0 = vpop.f32.mrf.mxu1  ;;  %14430 = vmatmul.mubr.msk.bf16.gmra.mxu0 %vm1446_vm2, %v4454_v47  ;;  %14133 = vmatprep.subr.bf16.mxu1 %v21708_v35 }
 0x2e1   : > { %14433 = vmatprep.mubr.msk.bf16.mxu0 %vm15930_vm0, %v21708_v35  ;;  %v4980_v47 = vsel %vm3249_vm6, %v4978_v57, %v4979_v33  ;;  %v4983_v0 = vrot.slane %v16811_v53, 3  ;;  %v4985_v57 = vrot.slane %v16953_v40, 3  ;;  %v21839_v40 = vld [vmem:[#allocation46_spill] sm:$0xff] }
 0x2e2   : > { %v17888_v17 = vpop.f32.mrf.mxu1  ;;  %14098 = vmatmul.mubr.msk.bf16.gmra.mxu1 %vm1446_vm2, %v16467_v45 }
 0x2e3   : > { %14101 = vmatprep.mubr.msk.bf16.mxu1 %vm15930_vm0, %v21708_v35  ;;  %14134 = vmatpush3.bf16.msra.mxu1 %v15230_v15  ;;  %v4982_v15 = vsel %vm3249_vm6, %v4979_v33, %v4981_v48 }
 0x2e4   : > { %v13988_v50 = vpop.f32.mrf.mxu1  ;;  %14135 = vmatprep.subr.bf16.mxu1 %v21708_v35 }
 0x2e6   : > { %v17898_v26 = vpop.f32.mrf.mxu0 }
 0x2e7   : > { %21834 = vst [vmem:[#allocation111_spill] sm:$0xff] %v17898_v26  ;;  %14136 = vmatpush3.bf16.msra.mxu1 %v15233_v4  ;;  %v21865_v26 = vld [vmem:[#allocation29_spill] sm:$0xff] }
 0x2e8   : > { %v14251_v28 = vpop.f32.mrf.mxu0  ;;  %14434 = vmatmul.mubr.msk.bf16.gmra.mxu0 %vm1446_vm2, %v4453_v42  ;;  %14173 = vmatprep.subr.bf16.mxu1 %v21708_v35  ;;  %v15239_v42 = vld [vmem:[%s21574_s3 + $0x1d8] sm:$0xff]  }
 0x2e9   : > { %14489 = vmatprep.mubr.msk.bf16.mxu0 %vm15930_vm0, %v21708_v35  ;;  %v4984_v28 = vsel %vm3249_vm6, %v4981_v48, %v4983_v0 }
 0x2ea   : > { %v17902_v45 = vpop.f32.mrf.mxu0  ;;  %14102 = vmatmul.mubr.msk.bf16.gmra.mxu1 %vm1446_vm2, %v16558_v18  ;;  %v15242_v18 = vld [vmem:[%s21574_s3 + $0x1c8] sm:$0xff]  }
 0x2eb   : > { %21835 = vst [vmem:[#allocation112_spill] sm:$0xff] %v17902_v45  ;;  %14105 = vmatprep.mubr.msk.bf16.mxu1 %vm15930_vm0, %v21708_v35 }
 0x2ec   : > { %v14252_v39 = vpop.f32.mrf.mxu0 }
 0x2f0   : > { %14490 = vmatmul.mubr.msk.bf16.vlgmr.msra.gmra.mxu0 %vm1446_vm2, %v4980_v47 }
 0x2f1   : > { %14493 = vmatprep.mubr.msk.bf16.mxu0 %vm15930_vm0, %v21708_v35  ;;  %14570 = vmatpush3.bf16.msra.mxu0 %v15239_v42 }
 0x2f2   : > { %14106 = vmatmul.mubr.msk.bf16.gmra.mxu1 %vm1446_vm2, %v16667_v41  ;;  %14571 = vmatprep.subr.bf16.mxu0 %v21708_v35  ;;  %v15244_v41 = vld [vmem:[%s21574_s3 + $0x1c0] sm:$0xff]  }
 0x2f3   : > { %14109 = vmatprep.mubr.msk.bf16.mxu1 %vm15930_vm0, %v21708_v35 }
 0x2f5   : > { %14572 = vmatpush3.bf16.msra.mxu0 %v15240_v3 }
 0x2f6   : > { %14573 = vmatprep.subr.bf16.mxu0 %v21708_v35 }
 0x2f8   : > { %14494 = vmatmul.mubr.msk.bf16.gmra.mxu0 %vm1446_vm2, %v4982_v15 }
 0x2f9   : > { %14497 = vmatprep.mubr.msk.bf16.mxu0 %vm15930_vm0, %v21708_v35  ;;  %14574 = vmatpush3.bf16.msra.mxu0 %v15242_v18  ;;  %v4986_v18 = vsel %vm3249_vm6, %v4983_v0, %v4985_v57 }
 0x2fa   : > { %v17939_v60 = vpop.f32.mrf.mxu1  ;;  %14110 = vmatmul.mubr.msk.bf16.gmra.mxu1 %vm1446_vm2, %v16807_v25  ;;  %14575 = vmatprep.subr.bf16.mxu0 %v21708_v35 }
 0x2fb   : > { %14113 = vmatprep.mubr.msk.bf16.mxu1 %vm15930_vm0, %v21708_v35 }
 0x2fc   : > { %v13991_v4 = vpop.f32.mrf.mxu1 }
 0x2fd   : > { %14576 = vmatpush3.bf16.msra.mxu0 %v15244_v41  ;;  %v21838_v41 = vld [vmem:[#allocation64_spill] sm:$0xff]  ;;  %v4987_v4 = vrot.slane %v21839_v40, 3 }
 0x2fe   : > { %v17947_v50 = vpop.f32.mrf.mxu1  ;;  %14657 = vmatprep.subr.bf16.mxu0 %v21708_v35 }
 0x2ff   : > { %v4988_v0 = vsel %vm3249_vm6, %v4985_v57, %v4987_v4 }
 0x300   : > { %v13992_v39 = vpop.f32.mrf.mxu1  ;;  %14498 = vmatmul.mubr.msk.bf16.gmra.mxu0 %vm1446_vm2, %v4984_v28 }
 0x301   : > { %v17952_v33 = vpop.f32.mrf.mxu0  ;;  %14501 = vmatprep.mubr.msk.bf16.mxu0 %vm15930_vm0, %v21708_v35 }
 0x302   : > { %21836 = vst [vmem:[#allocation113_spill] sm:$0xff] %v17952_v33  ;;  %v17956_v25 = vpop.f32.mrf.mxu1  ;;  %14114 = vmatmul.mubr.msk.bf16.gmra.mxu1 %vm1446_vm2, %v16949_v38 }
 0x303   : > { %v14255_v53 = vpop.f32.mrf.mxu0  ;;  %14117 = vmatprep.mubr.msk.bf16.mxu1 %vm15930_vm0, %v21708_v35 }
 0x304   : > { %v13995_v42 = vpop.f32.mrf.mxu1 }
 0x305   : > { %v17963_v47 = vpop.f32.mrf.mxu0 }
 0x306   : > { %21837 = vst [vmem:[#allocation114_spill] sm:$0xff] %v17963_v47  ;;  %v2375_v3 = vpop.f32.mrf.mxu1 }
 0x307   : > { %v14256_v48 = vpop.f32.mrf.mxu0  ;;  %v21840_v3 = vld [vmem:[#allocation65_spill] sm:$0xff] }
 0x308   : > { %v13996_v15 = vpop.f32.mrf.mxu1  ;;  %14502 = vmatmul.mubr.msk.bf16.gmra.mxu0 %vm1446_vm2, %v4986_v18  ;;  %v4989_v48 = vrot.slane %v21840_v3, 3 }
 0x309   : > { %14505 = vmatprep.mubr.msk.bf16.mxu0 %vm15930_vm0, %v21708_v35 }
 0x30a   : > { %v17969_v38 = vpop.f32.mrf.mxu1  ;;  %14118 = vmatmul.mubr.msk.bf16.gmra.mxu1 %vm1446_vm2, %v21838_v41  ;;  %v4990_v57 = vsel %vm3249_vm6, %v4987_v4, %v4989_v48  ;;  %v15839_v4 = vld [vmem:[#allocation3 + $0x4] sm:$0xf] }
 0x30b   : > { %14121 = vmatprep.mubr.msk.bf16.mxu1 %vm15930_vm0, %v21708_v35 }
 0x30c   : > { %v14007_v28 = vpop.f32.mrf.mxu1 }
 0x30e   : > { %v17976_v39 = vpop.f32.mrf.mxu1 }
 0x310   : > { %v14008_v53 = vpop.f32.mrf.mxu1  ;;  %14506 = vmatmul.mubr.msk.bf16.gmra.mxu0 %vm1446_vm2, %v4988_v0  ;;  %v2968_v0 = vld [vmem:[#allocation3] sm:$0xc] }
 0x311   : > { %14509 = vmatprep.mubr.msk.bf16.mxu0 %vm15930_vm0, %v21708_v35  ;;  %v4991_v53 = vrot.slane %v17339_v56, 3  ;;  %v12274_v3 = vcombine.low %v2968_v0, %v15839_v4 }
 0x312   : > { %v17982_v42 = vpop.f32.mrf.mxu1  ;;  %14122 = vmatmul.mubr.msk.bf16.gmra.mxu1 %vm1446_vm2, %v17332_v20 }
 0x313   : > { %14125 = vmatprep.mubr.msk.bf16.mxu1 %vm15930_vm0, %v21708_v35  ;;  %v4992_v33 = vsel %vm3249_vm6, %v4989_v48, %v4991_v53  ;;  %v2982_v45 = vrot.slane %v12274_v3, 2  ;;  %v4993_v48 = vrot.slane %v17447_v49, 3  ;;  %v2985_v3 = vrot.slane %v17460_v24, 2  ;;  %v15246_v49 = vld [vmem:[%s21574_s3 + $0xa8] sm:$0xff]  }
 0x314   : > { %v14011_v18 = vpop.f32.mrf.mxu1 }
 0x316   : > { %v17989_v15 = vpop.f32.mrf.mxu1 }
 0x318   : > { %v14012_v41 = vpop.f32.mrf.mxu1  ;;  %v17992_v40 = vpop.f32.mrf.mxu0  ;;  %14510 = vmatmul.mubr.msk.bf16.gmra.mxu0 %vm1446_vm2, %v4990_v57  ;;  %v2983_v57 = vrot.slane %v17431_v1, 2 }
 0x319   : > { %21841 = vst [vmem:[#allocation64_spill] sm:$0xff] %v17992_v40  ;;  %14513 = vmatprep.mubr.msk.bf16.mxu0 %vm15930_vm0, %v21708_v35 }
 0x31a   : > { %v17997_v28 = vpop.f32.mrf.mxu1  ;;  %14126 = vmatmul.mubr.msk.bf16.gmra.mxu1 %vm1446_vm2, %v17314_v51  ;;  %v14259_v20 = vpop.f32.mrf.mxu0  ;;  %v15237_v51 = vld [vmem:[%s21574_s3 + $0xb8] sm:$0xff]   ;;  %v2984_v0 = vsel %vm2981_vm9, %v2982_v45, %v2983_v57 }
 0x31b   : > { %14137 = vmatprep.mubr.msk.bf16.mxu1 %vm15930_vm0, %v21708_v35 }
 0x31c   : > { %v14015_v18 = vpop.f32.mrf.mxu1  ;;  %v3698_v41 = vpop.f32.mrf.mxu0 }
 0x31e   : > { %v18005_v40 = vpop.f32.mrf.mxu1  ;;  %v14260_v47 = vpop.f32.mrf.mxu0 }
 0x320   : > { %v14016_v56 = vpop.f32.mrf.mxu1  ;;  %v18011_v20 = vpop.f32.mrf.mxu0  ;;  %14514 = vmatmul.mubr.msk.bf16.gmra.mxu0 %vm1446_vm2, %v4992_v33  ;;  %v15243_v33 = vld [vmem:[%s21574_s3 + $0xb0] sm:$0xff]  }
 0x321   : > { %21842 = vst [vmem:[#allocation46_spill] sm:$0xff] %v18011_v20  ;;  %14517 = vmatprep.mubr.msk.bf16.mxu0 %vm15930_vm0, %v21708_v35 }
 0x322   : > { %v18017_v1 = vpop.f32.mrf.mxu1  ;;  %14138 = vmatmul.mubr.msk.bf16.vlgmr.msra.gmra.mxu1 %vm1446_vm2, %v2984_v0  ;;  %v14315_v47 = vpop.f32.mrf.mxu0 }
 0x323   : > { %14174 = vmatpush3.bf16.msra.mxu1 %v15237_v51  ;;  %14141 = vmatprep.mubr.msk.bf16.mxu1 %vm15930_vm0, %v21708_v35  ;;  %v4994_v51 = vsel %vm3249_vm6, %v4991_v53, %v4993_v48  ;;  %v2986_v47 = vsel %vm2981_vm9, %v2983_v57, %v2985_v3 }
 0x324   : > { %v14019_v4 = vpop.f32.mrf.mxu1  ;;  %v18026_v45 = vpop.f32.mrf.mxu0  ;;  %14175 = vmatprep.subr.bf16.mxu1 %v21708_v35 }
 0x325   : > { %21843 = vst [vmem:[#allocation65_spill] sm:$0xff] %v18026_v45  ;;  %v15249_v4 = vld [vmem:[%s21574_s3 + $0xa0] sm:$0xff]   ;;  %v21855_v45 = vld [vmem:[#allocation19_spill] sm:$0xff] }
 0x326   : > { %v18030_v18 = vpop.f32.mrf.mxu1  ;;  %v14316_v41 = vpop.f32.mrf.mxu0 }
 0x327   : > { %14176 = vmatpush3.bf16.msra.mxu1 %v15243_v33  ;;  %v4995_v33 = vrot.slane %v17564_v31, 3 }
 0x328   : > { %v14020_v56 = vpop.f32.mrf.mxu1  ;;  %v18036_v0 = vpop.f32.mrf.mxu0  ;;  %14518 = vmatmul.mubr.msk.bf16.gmra.mxu0 %vm1446_vm2, %v4994_v51  ;;  %14177 = vmatprep.subr.bf16.mxu1 %v21708_v35  ;;  %v2987_v51 = vrot.slane %v17497_v32, 2 }
 0x329   : > { %21844 = vst [vmem:[#allocation115_spill] sm:$0xff] %v18036_v0  ;;  %14521 = vmatprep.mubr.msk.bf16.mxu0 %vm15930_vm0, %v21708_v35  ;;  %v4996_v31 = vsel %vm3249_vm6, %v4993_v48, %v4995_v33 }
 0x32a   : > { %v18043_v24 = vpop.f32.mrf.mxu1  ;;  %14142 = vmatmul.mubr.msk.bf16.gmra.mxu1 %vm1446_vm2, %v2986_v47  ;;  %v14319_v53 = vpop.f32.mrf.mxu0 }
 0x32b   : > { %14145 = vmatprep.mubr.msk.bf16.mxu1 %vm15930_vm0, %v21708_v35  ;;  %14178 = vmatpush3.bf16.msra.mxu1 %v15246_v49  ;;  %v2988_v49 = vsel %vm2981_vm9, %v2985_v3, %v2987_v51  ;;  %v15255_v3 = vld [vmem:[%s21574_s3 + $0x218] sm:$0xff]  }
 0x32c   : > { %v14023_v41 = vpop.f32.mrf.mxu1  ;;  %v18052_v57 = vpop.f32.mrf.mxu0  ;;  %14179 = vmatprep.subr.bf16.mxu1 %v21708_v35 }
 0x32d   : > { %21845 = vst [vmem:[#allocation116_spill] sm:$0xff] %v18052_v57 }
 0x32e   : > { %v18056_v56 = vpop.f32.mrf.mxu1  ;;  %v14320_v47 = vpop.f32.mrf.mxu0 }
 0x32f   : > { %14180 = vmatpush3.bf16.msra.mxu1 %v15249_v4  ;;  %v2989_v4 = vrot.slane %v17576_v59, 2  ;;  %v15256_v59 = vld [vmem:[%s21574_s3 + $0x210] sm:$0xff]  }
 0x330   : > { %v14024_v53 = vpop.f32.mrf.mxu1  ;;  %v18059_v0 = vpop.f32.mrf.mxu0  ;;  %14522 = vmatmul.mubr.msk.bf16.gmra.mxu0 %vm1446_vm2, %v4996_v31  ;;  %14261 = vmatprep.subr.bf16.mxu1 %v21708_v35 }
 0x331   : > { %21846 = vst [vmem:[#allocation117_spill] sm:$0xff] %v18059_v0  ;;  %14577 = vmatprep.mubr.msk.bf16.mxu0 %vm15930_vm0, %v21708_v35 }
 0x332   : > { %v18066_v41 = vpop.f32.mrf.mxu1  ;;  %14146 = vmatmul.mubr.msk.bf16.gmra.mxu1 %vm1446_vm2, %v2988_v49  ;;  %v14323_v32 = vpop.f32.mrf.mxu0  ;;  %v21849_v49 = vld [vmem:[#allocation13_spill] sm:$0xff] }
 0x333   : > { %14149 = vmatprep.mubr.msk.bf16.mxu1 %vm15930_vm0, %v21708_v35  ;;  %v21850_v32 = vld [vmem:[#allocation14_spill] sm:$0xff] }
 0x334   : > { %v14027_v48 = vpop.f32.mrf.mxu1  ;;  %v18071_v33 = vpop.f32.mrf.mxu0  ;;  %v21851_v57 = vcombine.low %v21849_v49, %v21850_v32 }
 0x335   : > { %21847 = vst [vmem:[#allocation118_spill] sm:$0xff] %v18071_v33  ;;  %v2990_v48 = vsel %vm2981_vm9, %v2987_v51, %v2989_v4 }
 0x336   : > { %v18077_v47 = vpop.f32.mrf.mxu1  ;;  %v14324_v31 = vpop.f32.mrf.mxu0 }
 0x338   : > { %v14028_v53 = vpop.f32.mrf.mxu1  ;;  %v18079_v0 = vpop.f32.mrf.mxu0  ;;  %14578 = vmatmul.mubr.msk.bf16.vlgmr.msra.gmra.mxu0 %vm1446_vm2, %v21851_v57 }
 0x339   : > { %21848 = vst [vmem:[#allocation119_spill] sm:$0xff] %v18079_v0  ;;  %14581 = vmatprep.mubr.msk.bf16.mxu0 %vm15930_vm0, %v21708_v35  ;;  %14658 = vmatpush3.bf16.msra.mxu0 %v15255_v3  ;;  %v2991_v53 = vrot.slane %v17621_v63, 2  ;;  %v15259_v3 = vld [vmem:[%s21574_s3 + $0x208] sm:$0xff]  }
 0x33a   : > { %v18091_v33 = vpop.f32.mrf.mxu1  ;;  %14150 = vmatmul.mubr.msk.bf16.gmra.mxu1 %vm1446_vm2, %v2990_v48  ;;  %v14327_v31 = vpop.f32.mrf.mxu0  ;;  %14659 = vmatprep.subr.bf16.mxu0 %v21708_v35  ;;  %v21854_v0 = vld [vmem:[#allocation15_spill] sm:$0xff] }
 0x33b   : > { %14153 = vmatprep.mubr.msk.bf16.mxu1 %vm15930_vm0, %v21708_v35  ;;  %v2992_v63 = vsel %vm2981_vm9, %v2989_v4, %v2991_v53  ;;  %v2993_v4 = vrot.slane %v17648_v6, 2 }
 0x33c   : > { %v14031_v57 = vpop.f32.mrf.mxu1  ;;  %v18097_v51 = vpop.f32.mrf.mxu0 }
 0x33d   : > { %21852 = vst [vmem:[#allocation13_spill] sm:$0xff] %v18097_v51  ;;  %14660 = vmatpush3.bf16.msra.mxu0 %v15256_v59  ;;  %v21856_v57 = vcombine.low %v21854_v0, %v21855_v45  ;;  %v15261_v59 = vld [vmem:[%s21574_s3 + $0x200] sm:$0xff]  }
 0x33e   : > { %v18103_v49 = vpop.f32.mrf.mxu1  ;;  %v14328_v32 = vpop.f32.mrf.mxu0  ;;  %14661 = vmatprep.subr.bf16.mxu0 %v21708_v35 }
 0x340   : > { %v14032_v48 = vpop.f32.mrf.mxu1  ;;  %v18106_v31 = vpop.f32.mrf.mxu0  ;;  %14582 = vmatmul.mubr.msk.bf16.gmra.mxu0 %vm1446_vm2, %v21856_v57 }
 0x341   : > { %21853 = vst [vmem:[#allocation14_spill] sm:$0xff] %v18106_v31  ;;  %14585 = vmatprep.mubr.msk.bf16.mxu0 %vm15930_vm0, %v21708_v35  ;;  %14662 = vmatpush3.bf16.msra.mxu0 %v15259_v3 }
 0x342   : > { %v18118_v32 = vpop.f32.mrf.mxu1  ;;  %14154 = vmatmul.mubr.msk.bf16.gmra.mxu1 %vm1446_vm2, %v2992_v63  ;;  %v14331_v48 = vpop.f32.mrf.mxu0  ;;  %14663 = vmatprep.subr.bf16.mxu0 %v21708_v35  ;;  %v21859_v63 = vld [vmem:[#allocation21_spill] sm:$0xff] }
 0x343   : > { %14157 = vmatprep.mubr.msk.bf16.mxu1 %vm15930_vm0, %v21708_v35  ;;  %v21860_v48 = vld [vmem:[#allocation20_spill] sm:$0xff] }
 0x344   : > { %v14035_v45 = vpop.f32.mrf.mxu1  ;;  %v18124_v0 = vpop.f32.mrf.mxu0  ;;  %v21861_v20 = vcombine.low %v21859_v63, %v21860_v48  ;;  %v2995_v63 = vrot.slane %v17832_v43, 2 }
 0x345   : > { %21857 = vst [vmem:[#allocation15_spill] sm:$0xff] %v18124_v0  ;;  %14664 = vmatpush3.bf16.msra.mxu0 %v15261_v59  ;;  %v2994_v45 = vsel %vm2981_vm9, %v2991_v53, %v2993_v4  ;;  %v21864_v0 = vld [vmem:[#allocation30_spill] sm:$0xff] }
 0x346   : > { %v18127_v3 = vpop.f32.mrf.mxu1  ;;  %v14332_v57 = vpop.f32.mrf.mxu0  ;;  %14745 = vmatprep.subr.bf16.mxu0 %v21708_v35  ;;  %v21866_v22 = vcombine.low %v21864_v0, %v21865_v26  ;;  %v2996_v11 = vsel %vm2981_vm9, %v2993_v4, %v2995_v63  ;;  %v2997_v4 = vrot.slane %v17279_v34, 2 }
 0x348   : > { %v14036_v31 = vpop.f32.mrf.mxu1  ;;  %v18130_v51 = vpop.f32.mrf.mxu0  ;;  %14586 = vmatmul.mubr.msk.bf16.gmra.mxu0 %vm1446_vm2, %v21861_v20 }
 0x349   : > { %21858 = vst [vmem:[#allocation19_spill] sm:$0xff] %v18130_v51  ;;  %14589 = vmatprep.mubr.msk.bf16.mxu0 %vm15930_vm0, %v21708_v35 }
 0x34a   : > { %v18139_v6 = vpop.f32.mrf.mxu1  ;;  %14158 = vmatmul.mubr.msk.bf16.gmra.mxu1 %vm1446_vm2, %v2994_v45  ;;  %v14335_v59 = vpop.f32.mrf.mxu0  ;;  %v21867_v45 = vld [vmem:[#allocation61_spill] sm:$0xff] }
 0x34b   : > { %14161 = vmatprep.mubr.msk.bf16.mxu1 %vm15930_vm0, %v21708_v35  ;;  %v2460_v59 = vadd.f32 %v17969_v38, %v21867_v45 }
 0x34c   : > { %v14039_v31 = vpop.f32.mrf.mxu1  ;;  %v18144_v57 = vpop.f32.mrf.mxu0 }
 0x34d   : > { %21862 = vst [vmem:[#allocation21_spill] sm:$0xff] %v18144_v57  ;;  %v2998_v57 = vsel %vm2981_vm9, %v2995_v63, %v2997_v4 }
 0x34e   : > { %v2526_v48 = vpop.f32.mrf.mxu1  ;;  %v14336_v20 = vpop.f32.mrf.mxu0 }
 0x350   : > { %v14040_v51 = vpop.f32.mrf.mxu1  ;;  %v18147_v53 = vpop.f32.mrf.mxu0  ;;  %14590 = vmatmul.mubr.msk.bf16.gmra.mxu0 %vm1446_vm2, %v21866_v22  ;;  %v21869_v22 = vld [vmem:[#allocation63_spill] sm:$0xff] }
 0x351   : > { %21863 = vst [vmem:[#allocation20_spill] sm:$0xff] %v18147_v53  ;;  %14593 = vmatprep.mubr.msk.bf16.mxu0 %vm15930_vm0, %v21708_v35  ;;  %v2463_v38 = vadd.f32 %v17976_v39, %v21869_v22 }
 0x352   : > { %v2646_v31 = vpop.f32.mrf.mxu1  ;;  %14162 = vmatmul.mubr.msk.bf16.gmra.mxu1 %vm1446_vm2, %v2996_v11  ;;  %v14339_v43 = vpop.f32.mrf.mxu0 }
 0x353   : > { %v18159_v51 = vadd.f32 %v2646_v31, %v2460_v59  ;;  %14165 = vmatprep.mubr.msk.bf16.mxu1 %vm15930_vm0, %v21708_v35  ;;  %v21870_v59 = vld [vmem:[#allocation38_spill] sm:$0xff]  ;;  %v21871_v31 = vld [vmem:[#allocation37_spill] sm:$0xff] }
 0x354   : > { %v14051_v26 = vpop.f32.mrf.mxu1  ;;  %v18163_v0 = vpop.f32.mrf.mxu0  ;;  %v21872_v43 = vcombine.low %v21870_v59, %v21871_v31 }
 0x355   : > { %21868 = vst [vmem:[#allocation30_spill] sm:$0xff] %v18163_v0  ;;  %v21873_v26 = vld [vmem:[#allocation73_spill] sm:$0xff] }
 0x356   : > { %v2649_v48 = vpop.f32.mrf.mxu1  ;;  %v14340_v20 = vpop.f32.mrf.mxu0  ;;  %v2468_v0 = vadd.f32 %v17982_v42, %v21873_v26  ;;  %v21877_v26 = vld [vmem:[#allocation60_spill] sm:$0xff] }
 0x357   : > { %v18168_v45 = vadd.f32 %v2649_v48, %v2463_v38  ;;  %v21874_v48 = vld [vmem:[#allocation75_spill] sm:$0xff] }
 0x358   : > { %v14052_v53 = vpop.f32.mrf.mxu1  ;;  %v18170_v11 = vpop.f32.mrf.mxu0  ;;  %14594 = vmatmul.mubr.msk.bf16.gmra.mxu0 %vm1446_vm2, %v21872_v43  ;;  %v2471_v42 = vadd.f32 %v17989_v15, %v21874_v48 }
 0x359   : > { %14597 = vmatprep.mubr.msk.bf16.mxu0 %vm15930_vm0, %v21708_v35 }
 0x35a   : > { %v2654_v34 = vpop.f32.mrf.mxu1  ;;  %14166 = vmatmul.mubr.msk.bf16.gmra.mxu1 %vm1446_vm2, %v2998_v57  ;;  %v14343_v39 = vpop.f32.mrf.mxu0  ;;  %v21876_v57 = vld [vmem:[#allocation45_spill] sm:$0xff] }
 0x35b   : > { %v18182_v53 = vadd.f32 %v2654_v34, %v2468_v0  ;;  %14169 = vmatprep.mubr.msk.bf16.mxu1 %vm15930_vm0, %v21708_v35  ;;  %v21878_v0 = vcombine.low %v21876_v57, %v21877_v26  ;;  %v21879_v34 = vld [vmem:[#allocation83_spill] sm:$0xff] }
 0x35c   : > { %v14055_v22 = vpop.f32.mrf.mxu1  ;;  %v18186_v38 = vpop.f32.mrf.mxu0  ;;  %v2476_v39 = vadd.f32 %v17997_v28, %v21879_v34 }
 0x35e   : > { %v2657_v20 = vpop.f32.mrf.mxu1  ;;  %v14344_v63 = vpop.f32.mrf.mxu0 }
 0x35f   : > { %v18190_v59 = vadd.f32 %v2657_v20, %v2471_v42  ;;  %v21880_v63 = vld [vmem:[#allocation86_spill] sm:$0xff] }
 0x360   : > { %v14056_v31 = vpop.f32.mrf.mxu1  ;;  %v18192_v43 = vpop.f32.mrf.mxu0  ;;  %14598 = vmatmul.mubr.msk.bf16.gmra.mxu0 %vm1446_vm2, %v21878_v0  ;;  %v15253_v0 = vld [vmem:[%s21574_s3 + $0xf8] sm:$0xff]  }
 0x361   : > { %21875 = vst [vmem:[#allocation29_spill] sm:$0xff] %v18192_v43  ;;  %14601 = vmatprep.mubr.msk.bf16.mxu0 %vm15930_vm0, %v21708_v35  ;;  %v2479_v31 = vadd.f32 %v18005_v40, %v21880_v63 }
 0x362   : > { %v2662_v22 = vpop.f32.mrf.mxu1  ;;  %14170 = vmatmul.mubr.msk.bf16.gmra.mxu1 %vm1446_vm2, %v2997_v4  ;;  %v14347_v15 = vpop.f32.mrf.mxu0 }
 0x363   : > { %v18203_v48 = vadd.f32 %v2662_v22, %v2476_v39  ;;  %14181 = vmatprep.mubr.msk.bf16.mxu1 %vm15930_vm0, %v21708_v35  ;;  %v21882_v39 = vld [vmem:[#allocation62_spill] sm:$0xff]  ;;  %v21883_v22 = vld [vmem:[#allocation72_spill] sm:$0xff] }
 0x364   : > { %v14059_v42 = vpop.f32.mrf.mxu1  ;;  %v4140_v20 = vpop.f32.mrf.mxu0  ;;  %v21884_v15 = vcombine.low %v21882_v39, %v21883_v22 }
 0x365   : > { %v2484_v42 = vadd.f32 %v18017_v1, %v17627_v52  ;;  %v21885_v20 = vld [vmem:[#allocation11_spill] sm:$0xff]  ;;  %v2487_v1 = vadd.f32 %v18030_v18, %v17641_v29  ;;  %v2492_v29 = vadd.f32 %v18043_v24, %v17719_v7  ;;  %v15268_v7 = vld [vmem:[%s21574_s3 + $0xe0] sm:$0xff]  }
 0x366   : > { %v2665_v57 = vpop.f32.mrf.mxu1  ;;  %v14348_v26 = vpop.f32.mrf.mxu0 }
 0x367   : > { %v18209_v28 = vadd.f32 %v2665_v57, %v2479_v31  ;;  %v15260_v57 = vld [vmem:[%s21574_s3 + $0xf0] sm:$0xff]  }
 0x368   : > { %v14060_v4 = vpop.f32.mrf.mxu1  ;;  %v18214_v34 = vpop.f32.mrf.mxu0  ;;  %14602 = vmatmul.mubr.msk.bf16.gmra.mxu0 %vm1446_vm2, %v21884_v15 }
 0x369   : > { %21881 = vst [vmem:[#allocation61_spill] sm:$0xff] %v18214_v34  ;;  %14605 = vmatprep.mubr.msk.bf16.mxu0 %vm15930_vm0, %v21708_v35 }
 0x36a   : > { %v2670_v40 = vpop.f32.mrf.mxu1  ;;  %14182 = vmatmul.mubr.msk.bf16.vlgmr.msra.gmra.mxu1 %vm1446_vm2, %v21885_v20  ;;  %v14403_v63 = vpop.f32.mrf.mxu0  ;;  %v21889_v20 = vld [vmem:[#allocation84_spill] sm:$0xff] }
 0x36b   : > { %v18226_v31 = vadd.f32 %v2670_v40, %v2484_v42  ;;  %14262 = vmatpush3.bf16.msra.mxu1 %v15253_v0  ;;  %14185 = vmatprep.mubr.msk.bf16.mxu1 %vm15930_vm0, %v21708_v35  ;;  %v15265_v0 = vld [vmem:[%s21574_s3 + $0xe8] sm:$0xff]   ;;  %v21888_v40 = vld [vmem:[#allocation76_spill] sm:$0xff] }
 0x36c   : > { %v14063_v26 = vpop.f32.mrf.mxu1  ;;  %v18233_v52 = vpop.f32.mrf.mxu0  ;;  %14263 = vmatprep.subr.bf16.mxu1 %v21708_v35  ;;  %v21890_v63 = vcombine.low %v21888_v40, %v21889_v20 }
 0x36d   : > { %21886 = vst [vmem:[#allocation63_spill] sm:$0xff] %v18233_v52 }
 0x36e   : > { %v2673_v4 = vpop.f32.mrf.mxu1  ;;  %v14404_v39 = vpop.f32.mrf.mxu0 }
 0x36f   : > { %v18238_v22 = vadd.f32 %v2673_v4, %v2487_v1  ;;  %14264 = vmatpush3.bf16.msra.mxu1 %v15260_v57  ;;  %v21891_v57 = vld [vmem:[#allocation16_spill] sm:$0xff]  ;;  %v5171_v4 = vld [vmem:[#allocation3 + $0x54] sm:$0x3] }
 0x370   : > { %v14064_v15 = vpop.f32.mrf.mxu1  ;;  %v18243_v42 = vpop.f32.mrf.mxu0  ;;  %14606 = vmatmul.mubr.msk.bf16.gmra.mxu0 %vm1446_vm2, %v21890_v63  ;;  %14265 = vmatprep.subr.bf16.mxu1 %v21708_v35  ;;  %v15840_v39 = vld [vmem:[#allocation3 + $0x1c] sm:$0xff]   ;;  %v15841_v63 = vld [vmem:[#allocation3 + $0x50] sm:$0xf] }
 0x371   : > { %21887 = vst [vmem:[#allocation38_spill] sm:$0xff] %v18243_v42  ;;  %14609 = vmatprep.mubr.msk.bf16.mxu0 %vm15930_vm0, %v21708_v35  ;;  %v5884_v15 = vshrl.u32 %v15840_v39, 16  ;;  %v5887_v40 = vshll.u32 %v15840_v39, 16 }
 0x372   : > { %v2678_v18 = vpop.f32.mrf.mxu1  ;;  %14186 = vmatmul.mubr.msk.bf16.gmra.mxu1 %vm1446_vm2, %v21891_v57  ;;  %v14407_v26 = vpop.f32.mrf.mxu0  ;;  %v12536_v57 = vcombine.low %v15841_v63, %v5171_v4 }
 0x373   : > { %v18256_v1 = vadd.f32 %v2678_v18, %v2492_v29  ;;  %14189 = vmatprep.mubr.msk.bf16.mxu1 %vm15930_vm0, %v21708_v35  ;;  %14266 = vmatpush3.bf16.msra.mxu1 %v15265_v0  ;;  %v2495_v29 = vadd.f32 %v18056_v56, %v17740_v36  ;;  %v21893_v18 = vld [vmem:[#allocation23_spill] sm:$0xff]  ;;  %v5886_v34 = vrot.slane %v5884_v15, 1  ;;  %v5889_v43 = vrot.slane %v5887_v40, 2 }
 0x374   : > { %v14067_v24 = vpop.f32.mrf.mxu1  ;;  %v18263_v20 = vpop.f32.mrf.mxu0  ;;  %14267 = vmatprep.subr.bf16.mxu1 %v21708_v35  ;;  %v5876_v26 = vshrl.u32 %v21893_v18, 16  ;;  %v5879_v42 = vshll.u32 %v21893_v18, 16  ;;  %v2500_v36 = vadd.f32 %v18066_v41, %v17796_v2 }
 0x375   : > { %21892 = vst [vmem:[#allocation37_spill] sm:$0xff] %v18263_v20 }
 0x376   : > { %v2681_v39 = vpop.f32.mrf.mxu1  ;;  %v14408_v0 = vpop.f32.mrf.mxu0  ;;  %v5878_v56 = vrot.slane %v5876_v26, 1  ;;  %v5881_v4 = vrot.slane %v5879_v42, 2  ;;  %v2503_v42 = vadd.f32 %v18077_v47, %v17807_v16  ;;  %v2508_v16 = vadd.f32 %v18091_v33, %v17878_v27  ;;  %v15276_v47 = vld [vmem:[%s21574_s3 + $0x250] sm:$0xff]   ;;  %v15843_v27 = vld [vmem:[#allocation3 + $0x2c] sm:$0xff]  }
 0x377   : > { %v18270_v52 = vadd.f32 %v2681_v39, %v2495_v29  ;;  %14268 = vmatpush3.bf16.msra.mxu1 %v15268_v7  ;;  %v21894_v29 = vld [vmem:[#allocation22_spill] sm:$0xff]  ;;  %v5890_v7 = vor.u32 %v5889_v43, %v5886_v34  ;;  %v15275_v0 = vld [vmem:[%s21574_s3 + $0x258] sm:$0xff]   ;;  %v5902_v33 = vshrl.u32 %v15843_v27, 16 }
 0x378   : > { %v14068_v24 = vpop.f32.mrf.mxu1  ;;  %v18272_v20 = vpop.f32.mrf.mxu0  ;;  %14610 = vmatmul.mubr.msk.bf16.gmra.mxu0 %vm1446_vm2, %v12536_v57  ;;  %14349 = vmatprep.subr.bf16.mxu1 %v21708_v35  ;;  %v15842_v57 = vld [vmem:[#allocation3 + $0x24] sm:$0xff]   ;;  %v5882_v26 = vor.u32 %v5881_v4, %v5878_v56  ;;  %v21895_v4 = vld [vmem:[#allocation31_spill] sm:$0xff] }
 0x379   : > { %14665 = vmatprep.mubr.msk.bf16.mxu0 %vm15930_vm0, %v21708_v35  ;;  %v5893_v18 = vshrl.u32 %v15842_v57, 16  ;;  %v5896_v39 = vshll.u32 %v15842_v57, 16 }
 0x37a   : > { %v2686_v63 = vpop.f32.mrf.mxu1  ;;  %14190 = vmatmul.mubr.msk.bf16.gmra.mxu1 %vm1446_vm2, %v21894_v29  ;;  %v14411_v15 = vpop.f32.mrf.mxu0  ;;  %v5891_v34 = vsel %vm2748_vm5, %v5882_v26, %v5890_v7 }
 0x37b   : > { %v18282_v40 = vadd.f32 %v2686_v63, %v2500_v36  ;;  %14193 = vmatprep.mubr.msk.bf16.mxu1 %vm15930_vm0, %v21708_v35  ;;  %v5895_v63 = vrot.slane %v5893_v18, 1  ;;  %v5898_v29 = vrot.slane %v5896_v39, 2 }
 0x37c   : > { %v14071_v2 = vpop.f32.mrf.mxu1  ;;  %v18286_v41 = vpop.f32.mrf.mxu0 }
 0x37d   : > { %v5899_v2 = vor.u32 %v5898_v29, %v5895_v63 }
 0x37e   : > { %v2689_v24 = vpop.f32.mrf.mxu1  ;;  %v14412_v36 = vpop.f32.mrf.mxu0 }
 0x37f   : > { %v18293_v43 = vadd.f32 %v2689_v24, %v2503_v42  ;;  %v5905_v42 = vshll.u32 %v15843_v27, 16  ;;  %v2511_v24 = vadd.f32 %v18103_v49, %v17888_v17  ;;  %v15277_v36 = vld [vmem:[%s21574_s3 + $0x248] sm:$0xff]   ;;  %v5900_v29 = vsel %vm2748_vm5, %v5890_v7, %v5899_v2  ;;  %v15279_v49 = vld [vmem:[%s21574_s3 + $0x240] sm:$0xff]  }
 0x380   : > { %v14072_v15 = vpop.f32.mrf.mxu1  ;;  %v18296_v57 = vpop.f32.mrf.mxu0  ;;  %14666 = vmatmul.mubr.msk.bf16.vlgmr.msra.gmra.mxu0 %vm1446_vm2, %v5891_v34  ;;  %v2516_v17 = vadd.f32 %v18118_v32, %v17939_v60  ;;  %v21896_v7 = vld [vmem:[#allocation39_spill] sm:$0xff] }
 0x381   : > { %14669 = vmatprep.mubr.msk.bf16.mxu0 %vm15930_vm0, %v21708_v35  ;;  %14746 = vmatpush3.bf16.msra.mxu0 %v15275_v0  ;;  %v15844_v60 = vld [vmem:[#allocation3 + $0x34] sm:$0xff]  }
 0x382   : > { %v2694_v56 = vpop.f32.mrf.mxu1  ;;  %14194 = vmatmul.mubr.msk.bf16.gmra.mxu1 %vm1446_vm2, %v21895_v4  ;;  %v14415_v18 = vpop.f32.mrf.mxu0  ;;  %14747 = vmatprep.subr.bf16.mxu0 %v21708_v35  ;;  %v5911_v32 = vshrl.u32 %v15844_v60, 16 }
 0x383   : > { %v18309_v39 = vadd.f32 %v2694_v56, %v2508_v16  ;;  %14197 = vmatprep.mubr.msk.bf16.mxu1 %vm15930_vm0, %v21708_v35  ;;  %v5904_v16 = vrot.slane %v5902_v33, 1  ;;  %v5907_v56 = vrot.slane %v5905_v42, 2 }
 0x384   : > { %v14075_v26 = vpop.f32.mrf.mxu1  ;;  %v18313_v0 = vpop.f32.mrf.mxu0 }
 0x385   : > { %14748 = vmatpush3.bf16.msra.mxu0 %v15276_v47  ;;  %v5908_v42 = vor.u32 %v5907_v56, %v5904_v16  ;;  %v5914_v26 = vshll.u32 %v15844_v60, 16  ;;  %v5913_v56 = vrot.slane %v5911_v32, 1  ;;  %v15845_v32 = vld [vmem:[#allocation3 + $0x3c] sm:$0xff]  }
 0x386   : > { %v2697_v34 = vpop.f32.mrf.mxu1  ;;  %v14416_v15 = vpop.f32.mrf.mxu0  ;;  %14749 = vmatprep.subr.bf16.mxu0 %v21708_v35 }
 0x387   : > { %v18321_v63 = vadd.f32 %v2697_v34, %v2511_v24  ;;  %v2519_v34 = vadd.f32 %v18127_v3, %v17947_v50  ;;  %v5909_v16 = vsel %vm2748_vm5, %v5899_v2, %v5908_v42  ;;  %v21898_v3 = vld [vmem:[#allocation48_spill] sm:$0xff] }
 0x388   : > { %v14076_v4 = vpop.f32.mrf.mxu1  ;;  %v18324_v18 = vpop.f32.mrf.mxu0  ;;  %14670 = vmatmul.mubr.msk.bf16.gmra.mxu0 %vm1446_vm2, %v5900_v29 }
 0x389   : > { %14673 = vmatprep.mubr.msk.bf16.mxu0 %vm15930_vm0, %v21708_v35  ;;  %14750 = vmatpush3.bf16.msra.mxu0 %v15277_v36 }
 0x38a   : > { %v2702_v47 = vpop.f32.mrf.mxu1  ;;  %14198 = vmatmul.mubr.msk.bf16.gmra.mxu1 %vm1446_vm2, %v21896_v7  ;;  %v14419_v27 = vpop.f32.mrf.mxu0  ;;  %14751 = vmatprep.subr.bf16.mxu0 %v21708_v35 }
 0x38b   : > { %v18337_v33 = vadd.f32 %v2702_v47, %v2516_v17  ;;  %14201 = vmatprep.mubr.msk.bf16.mxu1 %vm15930_vm0, %v21708_v35  ;;  %v5916_v17 = vrot.slane %v5914_v26, 2  ;;  %v2524_v27 = vadd.f32 %v18139_v6, %v17956_v25  ;;  %v5920_v26 = vshrl.u32 %v15845_v32, 16 }
 0x38c   : > { %v14079_v24 = vpop.f32.mrf.mxu1  ;;  %v18341_v36 = vpop.f32.mrf.mxu0 }
 0x38d   : > { %14752 = vmatpush3.bf16.msra.mxu0 %v15279_v49  ;;  %v5917_v2 = vor.u32 %v5916_v17, %v5913_v56  ;;  %v5923_v24 = vshll.u32 %v15845_v32, 16  ;;  %v21673_v56 = vmov 0  }
 0x38e   : > { %v2705_v15 = vpop.f32.mrf.mxu1  ;;  %v14420_v29 = vpop.f32.mrf.mxu0  ;;  %14833 = vmatprep.subr.bf16.mxu0 %v21708_v35  ;;  %2069 = vst.msk [vmem:[#allocation3 + $0x60] sm:$0xc] %vm21901_vm3, %v21673_v56 }
 0x38f   : > { %v18346_v4 = vadd.f32 %v2705_v15, %v2519_v34  ;;  %v5918_v29 = vsel %vm2748_vm5, %v5908_v42, %v5917_v2 }
 0x390   : > { %v14080_v47 = vpop.f32.mrf.mxu1  ;;  %v18349_v7 = vpop.f32.mrf.mxu0  ;;  %14674 = vmatmul.mubr.msk.bf16.gmra.mxu0 %vm1446_vm2, %v5909_v16  ;;  %v5922_v16 = vrot.slane %v5920_v26, 1  ;;  %v15846_v26 = vld [vmem:[#allocation3 + $0x44] sm:$0xff]  }
 0x391   : > { %21897 = vst [vmem:[#allocation73_spill] sm:$0xff] %v18349_v7  ;;  %14677 = vmatprep.mubr.msk.bf16.mxu0 %vm15930_vm0, %v21708_v35  ;;  %v5925_v47 = vrot.slane %v5923_v24, 2  ;;  %v5929_v24 = vshrl.u32 %v15846_v26, 16 }
 0x392   : > { %v2710_v50 = vpop.f32.mrf.mxu1  ;;  %14202 = vmatmul.mubr.msk.bf16.gmra.mxu1 %vm1446_vm2, %v21898_v3  ;;  %v14423_v49 = vpop.f32.mrf.mxu0 }
 0x393   : > { %v18358_v60 = vadd.f32 %v2710_v50, %v2524_v27  ;;  %14205 = vmatprep.mubr.msk.bf16.mxu1 %vm15930_vm0, %v21708_v35  ;;  %v21902_v27 = vld [vmem:[#allocation66_spill] sm:$0xff]  ;;  %v5926_v32 = vor.u32 %v5925_v47, %v5922_v16  ;;  %v15271_v47 = vld [vmem:[#allocation3 + $0x4c] ss:$0 sps:$4 sm:$0x11]  }
 0x394   : > { %v14083_v34 = vpop.f32.mrf.mxu1  ;;  %v18362_v15 = vpop.f32.mrf.mxu0 }
 0x395   : > { %21899 = vst [vmem:[#allocation75_spill] sm:$0xff] %v18362_v15  ;;  %v5932_v34 = vshll.u32 %v15846_v26, 16 }
 0x396   : > { %v2713_v25 = vpop.f32.mrf.mxu1  ;;  %v14424_v6 = vpop.f32.mrf.mxu0 }
 0x398   : > { %v14084_v3 = vpop.f32.mrf.mxu1  ;;  %v18365_v49 = vpop.f32.mrf.mxu0  ;;  %14678 = vmatmul.mubr.msk.bf16.gmra.mxu0 %vm1446_vm2, %v5918_v29 }
 0x399   : > { %21900 = vst [vmem:[#allocation45_spill] sm:$0xff] %v18365_v49  ;;  %14681 = vmatprep.mubr.msk.bf16.mxu0 %vm15930_vm0, %v21708_v35 }
 0x39a   : > { %v2879_v17 = vpop.f32.mrf.mxu1  ;;  %14206 = vmatmul.mubr.msk.bf16.gmra.mxu1 %vm1446_vm2, %v21902_v27  ;;  %v14427_v50 = vpop.f32.mrf.mxu0  ;;  %v5927_v27 = vsel %vm2748_vm5, %v5917_v2, %v5926_v32 }
 0x39b   : > { %v18375_v42 = vadd.f32 %v2879_v17, %v18159_v51  ;;  %14209 = vmatprep.mubr.msk.bf16.mxu1 %vm15930_vm0, %v21708_v35  ;;  %v5931_v50 = vrot.slane %v5929_v24, 1  ;;  %v5934_v51 = vrot.slane %v5932_v34, 2 }
 0x39c   : > { %v14095_v25 = vpop.f32.mrf.mxu1  ;;  %v18379_v6 = vpop.f32.mrf.mxu0 }
 0x39d   : > { %21903 = vst [vmem:[#allocation60_spill] sm:$0xff] %v18379_v6  ;;  %v21905_v25 = vld [vmem:[#allocation77_spill] sm:$0xff]  ;;  %v5935_v24 = vor.u32 %v5934_v51, %v5931_v50  ;;  %v21907_v51 = vld [vmem:[#allocation74_spill] sm:$0xff] }
 0x39e   : > { %v2882_v29 = vpop.f32.mrf.mxu1  ;;  %v14428_v3 = vpop.f32.mrf.mxu0 }
 0x39f   : > { %v18382_v56 = vadd.f32 %v2882_v29, %v18168_v45  ;;  %v15847_v45 = vld [vmem:[#allocation3 + $0x4c] sm:$0xff]  }
 0x3a0   : > { %v14096_v17 = vpop.f32.mrf.mxu1  ;;  %v18385_v16 = vpop.f32.mrf.mxu0  ;;  %14682 = vmatmul.mubr.msk.bf16.gmra.mxu0 %vm1446_vm2, %v5927_v27  ;;  %v5938_v29 = vshrl.u32 %v15847_v45, 16  ;;  %v5941_v6 = vshll.u32 %v15847_v45, 16  ;;  %v18403_v45 = vld [vmem:[#allocation3 + $0x5c] ss:$0 sps:$4 sm:$0x11]  }
 0x3a1   : > { %21904 = vst [vmem:[#allocation83_spill] sm:$0xff] %v18385_v16  ;;  %14685 = vmatprep.mubr.msk.bf16.mxu0 %vm15930_vm0, %v21708_v35  ;;  %v3267_v17 = vrot.slane %v15271_v47, 3 }
 0x3a2   : > { %v2887_v26 = vpop.f32.mrf.mxu1  ;;  %14210 = vmatmul.mubr.msk.bf16.gmra.mxu1 %vm1446_vm2, %v21905_v25  ;;  %v14431_v3 = vpop.f32.mrf.mxu0  ;;  %v5940_v15 = vrot.slane %v5938_v29, 1  ;;  %v5943_v7 = vrot.slane %v5941_v6, 2  ;;  %v5947_v29 = vshrl.u32 %v17683_v62, 16 }
 0x3a3   : > { %v18393_v2 = vadd.f32 %v2887_v26, %v18182_v53  ;;  %14213 = vmatprep.mubr.msk.bf16.mxu1 %vm15930_vm0, %v21708_v35  ;;  %v5936_v3 = vsel %vm2748_vm5, %v5926_v32, %v5935_v24  ;;  %v21908_v26 = vrot.slane %v21907_v51, 3 }
 0x3a4   : > { %v14099_v34 = vpop.f32.mrf.mxu1  ;;  %v18397_v27 = vpop.f32.mrf.mxu0  ;;  %v5944_v6 = vor.u32 %v5943_v7, %v5940_v15  ;;  %v15273_v15 = vld [vmem:[%s21574_s3 + $0x138] sm:$0xff]  }
 0x3a5   : > { %v3268_v47 = vsel %vm3249_vm6, %v21908_v26, %v3267_v17  ;;  %v5950_v34 = vshll.u32 %v17683_v62, 16  ;;  %v21909_v17 = vrot.slane %v17678_v10, 3 }
 0x3a6   : > { %v2890_v16 = vpop.f32.mrf.mxu1  ;;  %v14432_v49 = vpop.f32.mrf.mxu0 }
 0x3a7   : > { %v18400_v25 = vadd.f32 %v2890_v16, %v18190_v59  ;;  %v6698_v49 = vrot.slane %v18403_v45, 3 }
 0x3a8   : > { %v14100_v53 = vpop.f32.mrf.mxu1  ;;  %v18405_v50 = vpop.f32.mrf.mxu0  ;;  %14686 = vmatmul.mubr.msk.bf16.gmra.mxu0 %vm1446_vm2, %v5936_v3 }
 0x3a9   : > { %21906 = vst [vmem:[#allocation86_spill] sm:$0xff] %v18405_v50  ;;  %14689 = vmatprep.mubr.msk.bf16.mxu0 %vm15930_vm0, %v21708_v35  ;;  %v18425_v3 = vsel %vm3249_vm6, %v21909_v17, %v6698_v49  ;;  %v21912_v17 = vld [vmem:[#allocation10_spill] sm:$0xff] }
 0x3aa   : > { %v2895_v59 = vpop.f32.mrf.mxu1  ;;  %14214 = vmatmul.mubr.msk.bf16.gmra.mxu1 %vm1446_vm2, %v3268_v47  ;;  %v14435_v32 = vpop.f32.mrf.mxu0  ;;  %21910 = vst [vmem:[#allocation62_spill] sm:$0xff] %v18425_v3 }
 0x3ab   : > { %v18416_v16 = vadd.f32 %v2895_v59, %v18203_v48  ;;  %14269 = vmatprep.mubr.msk.bf16.mxu1 %vm15930_vm0, %v21708_v35  ;;  %v5945_v48 = vsel %vm2748_vm5, %v5935_v24, %v5944_v6  ;;  %v5949_v59 = vrot.slane %v5947_v29, 1  ;;  %v5952_v32 = vrot.slane %v5950_v34, 2 }
 0x3ac   : > { %v14103_v53 = vpop.f32.mrf.mxu1  ;;  %v4607_v51 = vpop.f32.mrf.mxu0 }
 0x3ad   : > { %v5953_v53 = vor.u32 %v5952_v32, %v5949_v59  ;;  %v6333_v32 = vld [vmem:[#allocation3 + $0x14] sm:$0xc] }
 0x3ae   : > { %v2898_v26 = vpop.f32.mrf.mxu1  ;;  %v14436_v47 = vpop.f32.mrf.mxu0 }
 0x3af   : > { %v18428_v7 = vadd.f32 %v2898_v26, %v18209_v28 }
 0x3b0   : > { %v14104_v62 = vpop.f32.mrf.mxu1  ;;  %v18434_v10 = vpop.f32.mrf.mxu0  ;;  %14690 = vmatmul.mubr.msk.bf16.gmra.mxu0 %vm1446_vm2, %v5945_v48  ;;  %v15283_v48 = vld [vmem:[%s21574_s3 + $0x128] sm:$0xff]  }
 0x3b1   : > { %21911 = vst [vmem:[#allocation72_spill] sm:$0xff] %v18434_v10  ;;  %14693 = vmatprep.mubr.msk.bf16.mxu0 %vm15930_vm0, %v21708_v35  ;;  %v15278_v62 = vld [vmem:[%s21574_s3 + $0x130] sm:$0xff]  }
 0x3b2   : > { %v2903_v49 = vpop.f32.mrf.mxu1  ;;  %14270 = vmatmul.mubr.msk.bf16.vlgmr.msra.gmra.mxu1 %vm1446_vm2, %v21912_v17  ;;  %v14491_v28 = vpop.f32.mrf.mxu0 }
 0x3b3   : > { %v18442_v24 = vadd.f32 %v2903_v49, %v18226_v31  ;;  %14350 = vmatpush3.bf16.msra.mxu1 %v15273_v15  ;;  %14273 = vmatprep.mubr.msk.bf16.mxu1 %vm15930_vm0, %v21708_v35  ;;  %v5954_v31 = vsel %vm2748_vm5, %v5944_v6, %v5953_v53  ;;  %v21915_v6 = vld [vmem:[#allocation12_spill] sm:$0xff] }
 0x3b4   : > { %v14107_v29 = vpop.f32.mrf.mxu1  ;;  %v18449_v34 = vpop.f32.mrf.mxu0  ;;  %14351 = vmatprep.subr.bf16.mxu1 %v21708_v35 }
 0x3b5   : > { %21913 = vst [vmem:[#allocation11_spill] sm:$0xff] %v18449_v34  ;;  %v15849_v29 = vld [vmem:[#allocation3 + $0x1c] sm:$0xff]  }
 0x3b6   : > { %v2906_v51 = vpop.f32.mrf.mxu1  ;;  %v14492_v26 = vpop.f32.mrf.mxu0 }
 0x3b7   : > { %v18453_v47 = vadd.f32 %v2906_v51, %v18238_v22  ;;  %14352 = vmatpush3.bf16.msra.mxu1 %v15278_v62  ;;  %v15848_v22 = vld [vmem:[#allocation3 + $0x18] sm:$0xf]  ;;  %v6418_v51 = vshrl.u32 %v15849_v29, 16  ;;  %v6421_v26 = vshll.u32 %v15849_v29, 16 }
 0x3b8   : > { %v14108_v15 = vpop.f32.mrf.mxu1  ;;  %v18459_v59 = vpop.f32.mrf.mxu0  ;;  %14694 = vmatmul.mubr.msk.bf16.gmra.mxu0 %vm1446_vm2, %v5954_v31  ;;  %14353 = vmatprep.subr.bf16.mxu1 %v21708_v35  ;;  %v12632_v49 = vcombine.low %v6333_v32, %v15848_v22  ;;  %v15286_v31 = vld [vmem:[%s21574_s3 + $0x120] sm:$0xff]  }
 0x3b9   : > { %21914 = vst [vmem:[#allocation76_spill] sm:$0xff] %v18459_v59  ;;  %14697 = vmatprep.mubr.msk.bf16.mxu0 %vm15930_vm0, %v21708_v35  ;;  %v6420_v59 = vrot.slane %v6418_v51, 2  ;;  %v6423_v34 = vrot.slane %v6421_v26, 3 }
 0x3ba   : > { %v2911_v17 = vpop.f32.mrf.mxu1  ;;  %14274 = vmatmul.mubr.msk.bf16.gmra.mxu1 %vm1446_vm2, %v21915_v6  ;;  %v14495_v28 = vpop.f32.mrf.mxu0  ;;  %v6410_v22 = vshrl.u32 %v12632_v49, 16 }
 0x3bb   : > { %v18468_v62 = vadd.f32 %v2911_v17, %v18256_v1  ;;  %14277 = vmatprep.mubr.msk.bf16.mxu1 %vm15930_vm0, %v21708_v35  ;;  %14354 = vmatpush3.bf16.msra.mxu1 %v15283_v48  ;;  %v6413_v28 = vshll.u32 %v12632_v49, 16  ;;  %v6424_v26 = vor.u32 %v6423_v34, %v6420_v59 }
 0x3bc   : > { %v14111_v15 = vpop.f32.mrf.mxu1  ;;  %v18475_v32 = vpop.f32.mrf.mxu0  ;;  %14355 = vmatprep.subr.bf16.mxu1 %v21708_v35 }
 0x3bd   : > { %21916 = vst [vmem:[#allocation84_spill] sm:$0xff] %v18475_v32  ;;  %v6412_v15 = vrot.slane %v6410_v22, 2  ;;  %v6415_v49 = vrot.slane %v6413_v28, 3  ;;  %v15292_v28 = vld [vmem:[%s21574_s3 + $0x298] sm:$0xff]  }
 0x3be   : > { %v2914_v1 = vpop.f32.mrf.mxu1  ;;  %v14496_v17 = vpop.f32.mrf.mxu0 }
 0x3bf   : > { %v18479_v3 = vadd.f32 %v2914_v1, %v18270_v52  ;;  %14356 = vmatpush3.bf16.msra.mxu1 %v15286_v31  ;;  %v6416_v22 = vor.u32 %v6415_v49, %v6412_v15  ;;  %v15293_v15 = vld [vmem:[%s21574_s3 + $0x290] sm:$0xff]  }
 0x3c0   : > { %v14112_v48 = vpop.f32.mrf.mxu1  ;;  %v18481_v29 = vpop.f32.mrf.mxu0  ;;  %14698 = vmatmul.mubr.msk.bf16.gmra.mxu0 %vm1446_vm2, %v5953_v53  ;;  %14437 = vmatprep.subr.bf16.mxu1 %v21708_v35  ;;  %v15850_v53 = vld [vmem:[#allocation3 + $0x24] sm:$0xff]  }
 0x3c1   : > { %21917 = vst [vmem:[#allocation16_spill] sm:$0xff] %v18481_v29  ;;  %14753 = vmatprep.mubr.msk.bf16.mxu0 %vm15930_vm0, %v21708_v35  ;;  %v6427_v31 = vshrl.u32 %v15850_v53, 16  ;;  %v6430_v1 = vshll.u32 %v15850_v53, 16  ;;  %v6425_v34 = vsel %vm4705_vm14, %v6416_v22, %v6424_v26  ;;  %v15851_v53 = vld [vmem:[#allocation3 + $0x2c] sm:$0xff]  }
 0x3c2   : > { %v2919_v32 = vpop.f32.mrf.mxu1  ;;  %14278 = vmatmul.mubr.msk.bf16.gmra.mxu1 %vm1446_vm2, %v16525_v23  ;;  %v14499_v52 = vpop.f32.mrf.mxu0 }
 0x3c3   : > { %v18490_v51 = vadd.f32 %v2919_v32, %v18282_v40  ;;  %14281 = vmatprep.mubr.msk.bf16.mxu1 %vm15930_vm0, %v21708_v35  ;;  %v6429_v59 = vrot.slane %v6427_v31, 2  ;;  %v6432_v32 = vrot.slane %v6430_v1, 3  ;;  %v6436_v31 = vshrl.u32 %v15851_v53, 16 }
 0x3c4   : > { %v14115_v17 = vpop.f32.mrf.mxu1  ;;  %v18494_v48 = vpop.f32.mrf.mxu0  ;;  %v6439_v1 = vshll.u32 %v15851_v53, 16 }
 0x3c5   : > { %21918 = vst [vmem:[#allocation23_spill] sm:$0xff] %v18494_v48 }
 0x3c6   : > { %v2922_v29 = vpop.f32.mrf.mxu1  ;;  %v14500_v52 = vpop.f32.mrf.mxu0 }
 0x3c7   : > { %v18500_v40 = vadd.f32 %v2922_v29, %v18293_v43  ;;  %v6433_v29 = vor.u32 %v6432_v32, %v6429_v59  ;;  %v6438_v32 = vrot.slane %v6436_v31, 2 }
 0x3c8   : > { %v14116_v10 = vpop.f32.mrf.mxu1  ;;  %v18503_v50 = vpop.f32.mrf.mxu0  ;;  %14754 = vmatmul.mubr.msk.bf16.vlgmr.msra.gmra.mxu0 %vm1446_vm2, %v6425_v34 }
 0x3c9   : > { %21919 = vst [vmem:[#allocation22_spill] sm:$0xff] %v18503_v50  ;;  %14757 = vmatprep.mubr.msk.bf16.mxu0 %vm15930_vm0, %v21708_v35  ;;  %14834 = vmatpush3.bf16.msra.mxu0 %v15292_v28  ;;  %v15295_v28 = vld [vmem:[%s21574_s3 + $0x288] sm:$0xff]   ;;  %v6434_v59 = vsel %vm4705_vm14, %v6424_v26, %v6433_v29 }
 0x3ca   : > { %v2927_v49 = vpop.f32.mrf.mxu1  ;;  %14282 = vmatmul.mubr.msk.bf16.gmra.mxu1 %vm1446_vm2, %v16620_v30  ;;  %v14503_v43 = vpop.f32.mrf.mxu0  ;;  %14835 = vmatprep.subr.bf16.mxu0 %v21708_v35 }
 0x3cb   : > { %v18515_v10 = vadd.f32 %v2927_v49, %v18309_v39  ;;  %14285 = vmatprep.mubr.msk.bf16.mxu1 %vm15930_vm0, %v21708_v35  ;;  %v6441_v49 = vrot.slane %v6439_v1, 3  ;;  %v15852_v1 = vld [vmem:[#allocation3 + $0x34] sm:$0xff]  }
 0x3cc   : > { %v14119_v17 = vpop.f32.mrf.mxu1  ;;  %v18519_v22 = vpop.f32.mrf.mxu0 }
 0x3cd   : > { %21920 = vst [vmem:[#allocation31_spill] sm:$0xff] %v18519_v22  ;;  %14836 = vmatpush3.bf16.msra.mxu0 %v15293_v15  ;;  %v15297_v15 = vld [vmem:[%s21574_s3 + $0x280] sm:$0xff]   ;;  %v6442_v31 = vor.u32 %v6441_v49, %v6438_v32 }
 0x3ce   : > { %v2930_v52 = vpop.f32.mrf.mxu1  ;;  %v14504_v34 = vpop.f32.mrf.mxu0  ;;  %14837 = vmatprep.subr.bf16.mxu0 %v21708_v35 }
 0x3cf   : > { %v18526_v39 = vadd.f32 %v2930_v52, %v18321_v63  ;;  %v6448_v52 = vshll.u32 %v15852_v1, 16 }
 0x3d0   : > { %v14120_v43 = vpop.f32.mrf.mxu1  ;;  %v18529_v53 = vpop.f32.mrf.mxu0  ;;  %14758 = vmatmul.mubr.msk.bf16.gmra.mxu0 %vm1446_vm2, %v6434_v59 }
 0x3d1   : > { %21921 = vst [vmem:[#allocation39_spill] sm:$0xff] %v18529_v53  ;;  %14761 = vmatprep.mubr.msk.bf16.mxu0 %vm15930_vm0, %v21708_v35  ;;  %14838 = vmatpush3.bf16.msra.mxu0 %v15295_v28  ;;  %v6445_v28 = vshrl.u32 %v15852_v1, 16  ;;  %v6450_v49 = vrot.slane %v6448_v52, 3 }
 0x3d2   : > { %v2935_v17 = vpop.f32.mrf.mxu1  ;;  %14286 = vmatmul.mubr.msk.bf16.gmra.mxu1 %vm1446_vm2, %v16767_v5  ;;  %v14507_v63 = vpop.f32.mrf.mxu0  ;;  %14839 = vmatprep.subr.bf16.mxu0 %v21708_v35 }
 0x3d3   : > { %v18541_v26 = vadd.f32 %v2935_v17, %v18337_v33  ;;  %14289 = vmatprep.mubr.msk.bf16.mxu1 %vm15930_vm0, %v21708_v35  ;;  %v6443_v33 = vsel %vm4705_vm14, %v6433_v29, %v6442_v31  ;;  %v6447_v32 = vrot.slane %v6445_v28, 2  ;;  %v15853_v29 = vld [vmem:[#allocation3 + $0x3c] sm:$0xff]  }
 0x3d4   : > { %v14123_v34 = vpop.f32.mrf.mxu1  ;;  %v18545_v59 = vpop.f32.mrf.mxu0  ;;  %v6454_v28 = vshrl.u32 %v15853_v29, 16  ;;  %v6457_v52 = vshll.u32 %v15853_v29, 16 }
 0x3d5   : > { %21922 = vst [vmem:[#allocation48_spill] sm:$0xff] %v18545_v59  ;;  %14840 = vmatpush3.bf16.msra.mxu0 %v15297_v15  ;;  %v6451_v1 = vor.u32 %v6450_v49, %v6447_v32 }
 0x3d6   : > { %v2938_v43 = vpop.f32.mrf.mxu1  ;;  %v14508_v53 = vpop.f32.mrf.mxu0  ;;  %14921 = vmatprep.subr.bf16.mxu0 %v21708_v35  ;;  %v6456_v59 = vrot.slane %v6454_v28, 2  ;;  %v6459_v50 = vrot.slane %v6457_v52, 3 }
 0x3d7   : > { %v18549_v63 = vadd.f32 %v2938_v43, %v18346_v4 }
 0x3d8   : > { %v14124_v17 = vpop.f32.mrf.mxu1  ;;  %v18552_v22 = vpop.f32.mrf.mxu0  ;;  %14762 = vmatmul.mubr.msk.bf16.gmra.mxu0 %vm1446_vm2, %v6443_v33 }
 0x3d9   : > { %21923 = vst [vmem:[#allocation66_spill] sm:$0xff] %v18552_v22  ;;  %14765 = vmatprep.mubr.msk.bf16.mxu0 %vm15930_vm0, %v21708_v35  ;;  %v6452_v22 = vsel %vm4705_vm14, %v6442_v31, %v6451_v1  ;;  %v15854_v31 = vld [vmem:[#allocation3 + $0x44] sm:$0xff]  }
 0x3da   : > { %v2943_v15 = vpop.f32.mrf.mxu1  ;;  %14290 = vmatmul.mubr.msk.bf16.gmra.mxu1 %vm1446_vm2, %v16909_v37  ;;  %v14511_v53 = vpop.f32.mrf.mxu0  ;;  %v6463_v29 = vshrl.u32 %v15854_v31, 16  ;;  %v6466_v28 = vshll.u32 %v15854_v31, 16 }
 0x3db   : > { %v18560_v4 = vadd.f32 %v2943_v15, %v18358_v60  ;;  %14293 = vmatprep.mubr.msk.bf16.mxu1 %vm15930_vm0, %v21708_v35  ;;  %v6460_v15 = vor.u32 %v6459_v50, %v6456_v59 }
 0x3dc   : > { %v14127_v34 = vpop.f32.mrf.mxu1  ;;  %v18564_v43 = vpop.f32.mrf.mxu0 }
 0x3dd   : > { %21924 = vst [vmem:[#allocation77_spill] sm:$0xff] %v18564_v43  ;;  %v4176_v43 = vrot.slane %v21915_v6, 1 }
 0x3de   : > { %v2946_v33 = vpop.f32.mrf.mxu1  ;;  %v14512_v17 = vpop.f32.mrf.mxu0 }
 0x3e0   : > { %v14128_v53 = vpop.f32.mrf.mxu1  ;;  %v18567_v48 = vpop.f32.mrf.mxu0  ;;  %14766 = vmatmul.mubr.msk.bf16.gmra.mxu0 %vm1446_vm2, %v6452_v22 }
 0x3e1   : > { %21925 = vst [vmem:[#allocation74_spill] sm:$0xff] %v18567_v48  ;;  %14769 = vmatprep.mubr.msk.bf16.mxu0 %vm15930_vm0, %v21708_v35  ;;  %v6461_v53 = vsel %vm4705_vm14, %v6451_v1, %v6460_v15  ;;  %v15855_v1 = vld [vmem:[#allocation3 + $0x4c] sm:$0xff]  }
 0x3e2   : > { %v3084_v60 = vpop.f32.mrf.mxu1  ;;  %14294 = vmatmul.mubr.msk.bf16.gmra.mxu1 %vm1446_vm2, %v17145_v55  ;;  %v14515_v32 = vpop.f32.mrf.mxu0 }
 0x3e3   : > { %v18575_v49 = vadd.f32 %v3084_v60, %v18375_v42  ;;  %14297 = vmatprep.mubr.msk.bf16.mxu1 %vm15930_vm0, %v21708_v35  ;;  %v6465_v32 = vrot.slane %v6463_v29, 2  ;;  %v6468_v42 = vrot.slane %v6466_v28, 3  ;;  %v6472_v29 = vshrl.u32 %v15855_v1, 16 }
 0x3e4   : > { %v14139_v52 = vpop.f32.mrf.mxu1  ;;  %v18579_v22 = vpop.f32.mrf.mxu0  ;;  %v6475_v28 = vshll.u32 %v15855_v1, 16 }
 0x3e5   : > { %21926 = vst [vmem:[#allocation10_spill] sm:$0xff] %v18579_v22  ;;  %v6469_v52 = vor.u32 %v6468_v42, %v6465_v32  ;;  %v6474_v22 = vrot.slane %v6472_v29, 2  ;;  %v4162_v42 = vld [vmem:[#allocation3 + $0x8] sm:$0xe] }
 0x3e6   : > { %v3087_v34 = vpop.f32.mrf.mxu1  ;;  %v14516_v33 = vpop.f32.mrf.mxu0 }
 0x3e7   : > { %v18582_v17 = vadd.f32 %v3087_v34, %v18382_v56 }
 0x3e8   : > { %v14140_v60 = vpop.f32.mrf.mxu1  ;;  %v18585_v50 = vpop.f32.mrf.mxu0  ;;  %14770 = vmatmul.mubr.msk.bf16.gmra.mxu0 %vm1446_vm2, %v6461_v53 }
 0x3e9   : > { %21927 = vst [vmem:[#allocation12_spill] sm:$0xff] %v18585_v50  ;;  %14773 = vmatprep.mubr.msk.bf16.mxu0 %vm15930_vm0, %v21708_v35 }
 0x3ea   : > { %v3092_v59 = vpop.f32.mrf.mxu1  ;;  %14298 = vmatmul.mubr.msk.bf16.gmra.mxu1 %vm1446_vm2, %v17274_v58  ;;  %v14519_v31 = vpop.f32.mrf.mxu0 }
 0x3eb   : > { %v18593_v56 = vadd.f32 %v3092_v59, %v18393_v2  ;;  %14301 = vmatprep.mubr.msk.bf16.mxu1 %vm15930_vm0, %v21708_v35  ;;  %v6470_v31 = vsel %vm4705_vm14, %v6460_v15, %v6469_v52  ;;  %v6477_v2 = vrot.slane %v6475_v28, 3 }
 0x3ec   : > { %v14143_v34 = vpop.f32.mrf.mxu1  ;;  %v18597_v33 = vpop.f32.mrf.mxu0 }
 0x3ed   : > { %21928 = vst [vmem:[#allocation120_spill] sm:$0xff] %v18597_v33  ;;  %v21930_v34 = vld [vmem:[#allocation79_spill] sm:$0xff]  ;;  %v6478_v28 = vor.u32 %v6477_v2, %v6474_v22  ;;  %v15290_v22 = vld [vmem:[%s21574_s3 + $0x178] sm:$0xff]  }
 0x3ee   : > { %v3095_v53 = vpop.f32.mrf.mxu1  ;;  %v14520_v60 = vpop.f32.mrf.mxu0 }
 0x3ef   : > { %v18600_v50 = vadd.f32 %v3095_v53, %v18400_v25  ;;  %v21931_v60 = vcombine.low %v17291_v13, %v21930_v34  ;;  %v15856_v53 = vld [vmem:[#allocation3 + $0xc] sm:$0xf] }
 0x3f0   : > { %v14144_v59 = vpop.f32.mrf.mxu1  ;;  %v18603_v32 = vpop.f32.mrf.mxu0  ;;  %14774 = vmatmul.mubr.msk.bf16.gmra.mxu0 %vm1446_vm2, %v6470_v31  ;;  %v12401_v15 = vcombine.low %v4162_v42, %v15856_v53  ;;  %v15857_v31 = vld [vmem:[#allocation3 + $0x54] sm:$0xff]  }
 0x3f1   : > { %21929 = vst [vmem:[#allocation121_spill] sm:$0xff] %v18603_v32  ;;  %14777 = vmatprep.mubr.msk.bf16.mxu0 %vm15930_vm0, %v21708_v35  ;;  %v6481_v59 = vshrl.u32 %v15857_v31, 16  ;;  %v6484_v32 = vshll.u32 %v15857_v31, 16 }
 0x3f2   : > { %v3100_v1 = vpop.f32.mrf.mxu1  ;;  %14302 = vmatmul.mubr.msk.bf16.gmra.mxu1 %vm1446_vm2, %v21931_v60  ;;  %v14523_v25 = vpop.f32.mrf.mxu0  ;;  %v4175_v60 = vrot.slane %v12401_v15, 1 }
 0x3f3   : > { %v18613_v29 = vadd.f32 %v3100_v1, %v18416_v16  ;;  %14357 = vmatprep.mubr.msk.bf16.mxu1 %vm15930_vm0, %v21708_v35  ;;  %v6479_v16 = vsel %vm4705_vm14, %v6469_v52, %v6478_v28  ;;  %v6483_v2 = vrot.slane %v6481_v59, 2  ;;  %v6486_v42 = vrot.slane %v6484_v32, 3  ;;  %v15296_v32 = vld [vmem:[%s21574_s3 + $0x170] sm:$0xff]  }
 0x3f4   : > { %v14147_v33 = vpop.f32.mrf.mxu1  ;;  %v5149_v48 = vpop.f32.mrf.mxu0  ;;  %v4177_v6 = vsel %vm2543_vm1, %v4175_v60, %v4176_v43  ;;  %v4178_v59 = vrot.slane %v16525_v23, 1 }
 0x3f5   : > { %v6487_v33 = vor.u32 %v6486_v42, %v6483_v2 }
 0x3f6   : > { %v3103_v13 = vpop.f32.mrf.mxu1  ;;  %v14524_v34 = vpop.f32.mrf.mxu0  ;;  %v4179_v23 = vsel %vm2543_vm1, %v4176_v43, %v4178_v59 }
 0x3f7   : > { %v18619_v25 = vadd.f32 %v3103_v13, %v18428_v7  ;;  %v6490_v13 = vshll.u32 %v18403_v45, 16 }
 0x3f8   : > { %v14148_v1 = vpop.f32.mrf.mxu1  ;;  %v18625_v53 = vpop.f32.mrf.mxu0  ;;  %14778 = vmatmul.mubr.msk.bf16.gmra.mxu0 %vm1446_vm2, %v6479_v16  ;;  %v6488_v16 = vsel %vm4705_vm14, %v6478_v28, %v6487_v33 }
 0x3f9   : > { %14781 = vmatprep.mubr.msk.bf16.mxu0 %vm15930_vm0, %v21708_v35  ;;  %v6492_v45 = vrot.slane %v6490_v13, 3 }
 0x3fa   : > { %v3108_v7 = vpop.f32.mrf.mxu1  ;;  %14358 = vmatmul.mubr.msk.bf16.vlgmr.msra.gmra.mxu1 %vm1446_vm2, %v4177_v6  ;;  %v14579_v48 = vpop.f32.mrf.mxu0  ;;  %v15303_v6 = vld [vmem:[%s21574_s3 + $0x160] sm:$0xff]  }
 0x3fb   : > { %v18633_v52 = vadd.f32 %v3108_v7, %v18442_v24  ;;  %14438 = vmatpush3.bf16.msra.mxu1 %v15290_v22  ;;  %14361 = vmatprep.mubr.msk.bf16.mxu1 %vm15930_vm0, %v21708_v35  ;;  %v15300_v22 = vld [vmem:[%s21574_s3 + $0x168] sm:$0xff]   ;;  %v6493_v48 = vsel %vm4705_vm14, %v6487_v33, %v6492_v45  ;;  %v4182_v45 = vrot.slane %v16767_v5, 1  ;;  %vm8115_vm14 = vsmask.f32 7946 }
 0x3fc   : > { %v14151_v15 = vpop.f32.mrf.mxu1  ;;  %v18640_v31 = vpop.f32.mrf.mxu0  ;;  %14439 = vmatprep.subr.bf16.mxu1 %v21708_v35 }
 0x3fe   : > { %v3111_v24 = vpop.f32.mrf.mxu1  ;;  %v14580_v34 = vpop.f32.mrf.mxu0 }
 0x3ff   : > { %v18646_v60 = vadd.f32 %v3111_v24, %v18453_v47  ;;  %14440 = vmatpush3.bf16.msra.mxu1 %v15296_v32  ;;  %v4180_v32 = vrot.slane %v16620_v30, 1 }
 0x400   : > { %v14152_v2 = vpop.f32.mrf.mxu1  ;;  %v18652_v42 = vpop.f32.mrf.mxu0  ;;  %14782 = vmatmul.mubr.msk.bf16.gmra.mxu0 %vm1446_vm2, %v6488_v16  ;;  %14441 = vmatprep.subr.bf16.mxu1 %v21708_v35 }
 0x401   : > { %14785 = vmatprep.mubr.msk.bf16.mxu0 %vm15930_vm0, %v21708_v35  ;;  %v4181_v16 = vsel %vm2543_vm1, %v4178_v59, %v4180_v32  ;;  %v15310_v59 = vld [vmem:[%s21574_s3 + $0x2d8] sm:$0xff]   ;;  %v4183_v5 = vsel %vm2543_vm1, %v4180_v32, %v4182_v45 }
 0x402   : > { %v3116_v47 = vpop.f32.mrf.mxu1  ;;  %14362 = vmatmul.mubr.msk.bf16.gmra.mxu1 %vm1446_vm2, %v4179_v23  ;;  %v14583_v28 = vpop.f32.mrf.mxu0  ;;  %v6874_v23 = vld [vmem:[#allocation3 + $0x1c] sm:$0xf] }
 0x403   : > { %v18661_v1 = vadd.f32 %v3116_v47, %v18468_v62  ;;  %14365 = vmatprep.mubr.msk.bf16.mxu1 %vm15930_vm0, %v21708_v35  ;;  %14442 = vmatpush3.bf16.msra.mxu1 %v15300_v22 }
 0x404   : > { %v14155_v43 = vpop.f32.mrf.mxu1  ;;  %v18668_v7 = vpop.f32.mrf.mxu0  ;;  %14443 = vmatprep.subr.bf16.mxu1 %v21708_v35 }
 0x406   : > { %v3119_v15 = vpop.f32.mrf.mxu1  ;;  %v14584_v62 = vpop.f32.mrf.mxu0 }
 0x407   : > { %v18674_v13 = vadd.f32 %v3119_v15, %v18479_v3  ;;  %14444 = vmatpush3.bf16.msra.mxu1 %v15303_v6  ;;  %v18695_v6 = vld [vmem:[#allocation3 + $0x20] sm:$0xf] }
 0x408   : > { %v14156_v24 = vpop.f32.mrf.mxu1  ;;  %v18676_v34 = vpop.f32.mrf.mxu0  ;;  %14786 = vmatmul.mubr.msk.bf16.gmra.mxu0 %vm1446_vm2, %v6493_v48  ;;  %14525 = vmatprep.subr.bf16.mxu1 %v21708_v35  ;;  %v15311_v62 = vld [vmem:[%s21574_s3 + $0x2d0] sm:$0xff]  }
 0x409   : > { %14841 = vmatprep.mubr.msk.bf16.mxu0 %vm15930_vm0, %v21708_v35 }
 0x40a   : > { %v3124_v33 = vpop.f32.mrf.mxu1  ;;  %14366 = vmatmul.mubr.msk.bf16.gmra.mxu1 %vm1446_vm2, %v4181_v16  ;;  %v14587_v30 = vpop.f32.mrf.mxu0 }
 0x40b   : > { %v18685_v3 = vadd.f32 %v3124_v33, %v18490_v51  ;;  %14369 = vmatprep.mubr.msk.bf16.mxu1 %vm15930_vm0, %v21708_v35  ;;  %v18698_v51 = vcombine.low %v6874_v23, %v18695_v6  ;;  %v4184_v30 = vrot.slane %v16909_v37, 1 }
 0x40c   : > { %v14159_v22 = vpop.f32.mrf.mxu1  ;;  %v18689_v2 = vpop.f32.mrf.mxu0 }
 0x40d   : > { %21932 = vst [vmem:[#allocation79_spill] sm:$0xff] %v18689_v2  ;;  %v15313_v22 = vld [vmem:[%s21574_s3 + $0x2c8] sm:$0xff]   ;;  %v4185_v37 = vsel %vm2543_vm1, %v4182_v45, %v4184_v30 }
 0x40e   : > { %v3127_v47 = vpop.f32.mrf.mxu1  ;;  %v14588_v28 = vpop.f32.mrf.mxu0 }
 0x40f   : > { %v18701_v43 = vadd.f32 %v3127_v47, %v18500_v40 }
 0x410   : > { %v14160_v48 = vpop.f32.mrf.mxu1  ;;  %v18703_v15 = vpop.f32.mrf.mxu0  ;;  %14842 = vmatmul.mubr.msk.bf16.vlgmr.msra.gmra.mxu0 %vm1446_vm2, %v18698_v51 }
 0x411   : > { %21933 = vst [vmem:[#allocation122_spill] sm:$0xff] %v18703_v15  ;;  %14845 = vmatprep.mubr.msk.bf16.mxu0 %vm15930_vm0, %v21708_v35  ;;  %14922 = vmatpush3.bf16.msra.mxu0 %v15310_v59  ;;  %v18732_v48 = vld [vmem:[#allocation3 + $0x24] sm:$0xff]  }
 0x412   : > { %v3132_v24 = vpop.f32.mrf.mxu1  ;;  %14370 = vmatmul.mubr.msk.bf16.gmra.mxu1 %vm1446_vm2, %v4183_v5  ;;  %v14591_v40 = vpop.f32.mrf.mxu0  ;;  %14923 = vmatprep.subr.bf16.mxu0 %v21708_v35  ;;  %v15315_v5 = vld [vmem:[%s21574_s3 + $0x2c0] sm:$0xff]  }
 0x413   : > { %v18716_v16 = vadd.f32 %v3132_v24, %v18515_v10  ;;  %14373 = vmatprep.mubr.msk.bf16.mxu1 %vm15930_vm0, %v21708_v35 }
 0x414   : > { %v14163_v32 = vpop.f32.mrf.mxu1  ;;  %v18720_v33 = vpop.f32.mrf.mxu0 }
 0x415   : > { %21934 = vst [vmem:[#allocation123_spill] sm:$0xff] %v18720_v33  ;;  %14924 = vmatpush3.bf16.msra.mxu0 %v15311_v62  ;;  %v4186_v32 = vrot.slane %v17145_v55, 1 }
 0x416   : > { %v3135_v23 = vpop.f32.mrf.mxu1  ;;  %v14592_v59 = vpop.f32.mrf.mxu0  ;;  %14925 = vmatprep.subr.bf16.mxu0 %v21708_v35 }
 0x417   : > { %v18728_v10 = vadd.f32 %v3135_v23, %v18526_v39 }
 0x418   : > { %v14164_v47 = vpop.f32.mrf.mxu1  ;;  %v18730_v28 = vpop.f32.mrf.mxu0  ;;  %14846 = vmatmul.mubr.msk.bf16.gmra.mxu0 %vm1446_vm2, %v18732_v48 }
 0x419   : > { %21935 = vst [vmem:[#allocation124_spill] sm:$0xff] %v18730_v28  ;;  %14849 = vmatprep.mubr.msk.bf16.mxu0 %vm15930_vm0, %v21708_v35  ;;  %14926 = vmatpush3.bf16.msra.mxu0 %v15313_v22 }
 0x41a   : > { %v3140_v39 = vpop.f32.mrf.mxu1  ;;  %14374 = vmatmul.mubr.msk.bf16.gmra.mxu1 %vm1446_vm2, %v4185_v37  ;;  %v14595_v62 = vpop.f32.mrf.mxu0  ;;  %14927 = vmatprep.subr.bf16.mxu0 %v21708_v35 }
 0x41b   : > { %v18745_v24 = vadd.f32 %v3140_v39, %v18541_v26  ;;  %14377 = vmatprep.mubr.msk.bf16.mxu1 %vm15930_vm0, %v21708_v35  ;;  %v18758_v26 = vld [vmem:[#allocation3 + $0x2c] sm:$0xff]   ;;  %v4187_v39 = vsel %vm2543_vm1, %v4184_v30, %v4186_v32 }
 0x41c   : > { %v14167_v45 = vpop.f32.mrf.mxu1  ;;  %v18749_v40 = vpop.f32.mrf.mxu0 }
 0x41d   : > { %21936 = vst [vmem:[#allocation125_spill] sm:$0xff] %v18749_v40  ;;  %14928 = vmatpush3.bf16.msra.mxu0 %v15315_v5  ;;  %v18776_v40 = vld [vmem:[#allocation3 + $0x34] sm:$0xff]  }
 0x41e   : > { %v3143_v22 = vpop.f32.mrf.mxu1  ;;  %v14596_v23 = vpop.f32.mrf.mxu0  ;;  %15009 = vmatprep.subr.bf16.mxu0 %v21708_v35 }
 0x41f   : > { %v18754_v59 = vadd.f32 %v3143_v22, %v18549_v63  ;;  %v4188_v22 = vrot.slane %v17274_v58, 1 }
 0x420   : > { %v14168_v47 = vpop.f32.mrf.mxu1  ;;  %v18756_v37 = vpop.f32.mrf.mxu0  ;;  %14850 = vmatmul.mubr.msk.bf16.gmra.mxu0 %vm1446_vm2, %v18758_v26 }
 0x421   : > { %21937 = vst [vmem:[#allocation126_spill] sm:$0xff] %v18756_v37  ;;  %14853 = vmatprep.mubr.msk.bf16.mxu0 %vm15930_vm0, %v21708_v35 }
 0x422   : > { %v3148_v55 = vpop.f32.mrf.mxu1  ;;  %14378 = vmatmul.mubr.msk.bf16.gmra.mxu1 %vm1446_vm2, %v4187_v39  ;;  %v14599_v5 = vpop.f32.mrf.mxu0 }
 0x423   : > { %v18767_v63 = vadd.f32 %v3148_v55, %v18560_v4  ;;  %14381 = vmatprep.mubr.msk.bf16.mxu1 %vm15930_vm0, %v21708_v35  ;;  %v4189_v4 = vsel %vm2543_vm1, %v4186_v32, %v4188_v22 }
 0x424   : > { %v14171_v62 = vpop.f32.mrf.mxu1  ;;  %v18771_v45 = vpop.f32.mrf.mxu0 }
 0x425   : > { %21938 = vst [vmem:[#allocation127_spill] sm:$0xff] %v18771_v45 }
 0x426   : > { %v3151_v23 = vpop.f32.mrf.mxu1  ;;  %v14600_v30 = vpop.f32.mrf.mxu0 }
 0x427   : > { %v4190_v23 = vrot.slane %v17705_v14, 1 }
 0x428   : > { %v14172_v47 = vpop.f32.mrf.mxu1  ;;  %v18774_v37 = vpop.f32.mrf.mxu0  ;;  %14854 = vmatmul.mubr.msk.bf16.gmra.mxu0 %vm1446_vm2, %v18776_v40 }
 0x429   : > { %21939 = vst [vmem:[#allocation128_spill] sm:$0xff] %v18774_v37  ;;  %14857 = vmatprep.mubr.msk.bf16.mxu0 %vm15930_vm0, %v21708_v35 }
 0x42a   : > { %v3354_v39 = vpop.f32.mrf.mxu1  ;;  %14382 = vmatmul.mubr.msk.bf16.gmra.mxu1 %vm1446_vm2, %v4189_v4  ;;  %v14603_v55 = vpop.f32.mrf.mxu0  ;;  %v18797_v4 = vld [vmem:[#allocation3 + $0x3c] sm:$0xff]  }
 0x42b   : > { %v18785_v58 = vadd.f32 %v3354_v39, %v18575_v49  ;;  %14385 = vmatprep.mubr.msk.bf16.mxu1 %vm15930_vm0, %v21708_v35  ;;  %v4191_v49 = vsel %vm2543_vm1, %v4188_v22, %v4190_v23 }
 0x42c   : > { %v14183_v5 = vpop.f32.mrf.mxu1  ;;  %v18789_v62 = vpop.f32.mrf.mxu0 }
 0x42d   : > { %21940 = vst [vmem:[#allocation129_spill] sm:$0xff] %v18789_v62  ;;  %v18817_v62 = vld [vmem:[#allocation3 + $0x44] sm:$0xff]  }
 0x42e   : > { %v3357_v30 = vpop.f32.mrf.mxu1  ;;  %v14604_v32 = vpop.f32.mrf.mxu0 }
 0x42f   : > { %v18793_v47 = vadd.f32 %v3357_v30, %v18582_v17 }
 0x430   : > { %v14184_v37 = vpop.f32.mrf.mxu1  ;;  %v18795_v45 = vpop.f32.mrf.mxu0  ;;  %14858 = vmatmul.mubr.msk.bf16.gmra.mxu0 %vm1446_vm2, %v18797_v4 }
 0x431   : > { %21941 = vst [vmem:[#allocation130_spill] sm:$0xff] %v18795_v45  ;;  %14861 = vmatprep.mubr.msk.bf16.mxu0 %vm15930_vm0, %v21708_v35 }
 0x432   : > { %v3362_v39 = vpop.f32.mrf.mxu1  ;;  %14386 = vmatmul.mubr.msk.bf16.gmra.mxu1 %vm1446_vm2, %v4191_v49  ;;  %v14607_v14 = vpop.f32.mrf.mxu0 }
 0x433   : > { %v18806_v17 = vadd.f32 %v3362_v39, %v18593_v56  ;;  %14389 = vmatprep.mubr.msk.bf16.mxu1 %vm15930_vm0, %v21708_v35 }
 0x434   : > { %v14187_v37 = vpop.f32.mrf.mxu1  ;;  %v18810_v55 = vpop.f32.mrf.mxu0 }
 0x435   : > { %21942 = vst [vmem:[#allocation131_spill] sm:$0xff] %v18810_v55  ;;  %v18884_v55 = vld [vmem:[#allocation3 + $0x5c] sm:$0xf] }
 0x436   : > { %v3365_v5 = vpop.f32.mrf.mxu1  ;;  %v14608_v30 = vpop.f32.mrf.mxu0 }
 0x437   : > { %v18813_v22 = vadd.f32 %v3365_v5, %v18600_v50 }
 0x438   : > { %v14188_v32 = vpop.f32.mrf.mxu1  ;;  %v18815_v45 = vpop.f32.mrf.mxu0  ;;  %14862 = vmatmul.mubr.msk.bf16.gmra.mxu0 %vm1446_vm2, %v18817_v62 }
 0x439   : > { %21943 = vst [vmem:[#allocation132_spill] sm:$0xff] %v18815_v45  ;;  %14865 = vmatprep.mubr.msk.bf16.mxu0 %vm15930_vm0, %v21708_v35  ;;  %v15308_v32 = vld [vmem:[%s21574_s3 + $0x1b8] sm:$0xff]  }
 0x43a   : > { %v3370_v56 = vpop.f32.mrf.mxu1  ;;  %14390 = vmatmul.mubr.msk.bf16.gmra.mxu1 %vm1446_vm2, %v4190_v23  ;;  %v14611_v49 = vpop.f32.mrf.mxu0 }
 0x43b   : > { %v18825_v39 = vadd.f32 %v3370_v56, %v18613_v29  ;;  %14445 = vmatprep.mubr.msk.bf16.mxu1 %vm15930_vm0, %v21708_v35  ;;  %v18837_v49 = vld [vmem:[#allocation3 + $0x4c] sm:$0xff]  }
 0x43c   : > { %v14191_v50 = vpop.f32.mrf.mxu1  ;;  %v5577_v14 = vpop.f32.mrf.mxu0  ;;  %v21945_v56 = vld [vmem:[#allocation17_spill] sm:$0xff] }
 0x43e   : > { %v3373_v37 = vpop.f32.mrf.mxu1  ;;  %v14612_v5 = vpop.f32.mrf.mxu0 }
 0x43f   : > { %v18830_v30 = vadd.f32 %v3373_v37, %v18619_v25 }
 0x440   : > { %v14192_v45 = vpop.f32.mrf.mxu1  ;;  %v18835_v23 = vpop.f32.mrf.mxu0  ;;  %14866 = vmatmul.mubr.msk.bf16.gmra.mxu0 %vm1446_vm2, %v18837_v49 }
 0x441   : > { %21944 = vst [vmem:[#allocation133_spill] sm:$0xff] %v18835_v23  ;;  %14869 = vmatprep.mubr.msk.bf16.mxu0 %vm15930_vm0, %v21708_v35  ;;  %v15314_v45 = vld [vmem:[%s21574_s3 + $0x1b0] sm:$0xff]  }
 0x442   : > { %v3378_v29 = vpop.f32.mrf.mxu1  ;;  %14446 = vmatmul.mubr.msk.bf16.vlgmr.msra.gmra.mxu1 %vm1446_vm2, %v21945_v56  ;;  %v14667_v25 = vpop.f32.mrf.mxu0 }
 0x443   : > { %v18846_v50 = vadd.f32 %v3378_v29, %v18633_v52  ;;  %14526 = vmatpush3.bf16.msra.mxu1 %v15308_v32  ;;  %14449 = vmatprep.mubr.msk.bf16.mxu1 %vm15930_vm0, %v21708_v35  ;;  %v15317_v52 = vld [vmem:[%s21574_s3 + $0x1a8] sm:$0xff]  }
 0x444   : > { %v14195_v14 = vpop.f32.mrf.mxu1  ;;  %v18853_v37 = vpop.f32.mrf.mxu0  ;;  %14527 = vmatprep.subr.bf16.mxu1 %v21708_v35  ;;  %v18864_v25 = vld [vmem:[#allocation3 + $0x54] sm:$0xff]  }
 0x445   : > { %21946 = vst [vmem:[#allocation17_spill] sm:$0xff] %v18853_v37 }
 0x446   : > { %v3381_v5 = vpop.f32.mrf.mxu1  ;;  %v14668_v23 = vpop.f32.mrf.mxu0 }
 0x447   : > { %v18857_v56 = vadd.f32 %v3381_v5, %v18646_v60  ;;  %14528 = vmatpush3.bf16.msra.mxu1 %v15314_v45  ;;  %v21948_v23 = vld [vmem:[#allocation24_spill] sm:$0xff]  ;;  %v6891_v5 = vld [vmem:[#allocation3 + $0x60] sm:$0x3] }
 0x448   : > { %v14196_v32 = vpop.f32.mrf.mxu1  ;;  %v18862_v29 = vpop.f32.mrf.mxu0  ;;  %14870 = vmatmul.mubr.msk.bf16.gmra.mxu0 %vm1446_vm2, %v18864_v25  ;;  %14529 = vmatprep.subr.bf16.mxu1 %v21708_v35 }
 0x449   : > { %21947 = vst [vmem:[#allocation134_spill] sm:$0xff] %v18862_v29  ;;  %14873 = vmatprep.mubr.msk.bf16.mxu0 %vm15930_vm0, %v21708_v35  ;;  %v15318_v32 = vld [vmem:[%s21574_s3 + $0x1a0] sm:$0xff]  }
 0x44a   : > { %v3386_v60 = vpop.f32.mrf.mxu1  ;;  %14450 = vmatmul.mubr.msk.bf16.gmra.mxu1 %vm1446_vm2, %v21948_v23  ;;  %v14671_v45 = vpop.f32.mrf.mxu0 }
 0x44b   : > { %v18874_v14 = vadd.f32 %v3386_v60, %v18661_v1  ;;  %14453 = vmatprep.mubr.msk.bf16.mxu1 %vm15930_vm0, %v21708_v35  ;;  %14530 = vmatpush3.bf16.msra.mxu1 %v15317_v52  ;;  %v12693_v1 = vcombine.low %v18884_v55, %v6891_v5 }
 0x44c   : > { %v14199_v29 = vpop.f32.mrf.mxu1  ;;  %v18881_v37 = vpop.f32.mrf.mxu0  ;;  %14531 = vmatprep.subr.bf16.mxu1 %v21708_v35 }
 0x44d   : > { %21949 = vst [vmem:[#allocation24_spill] sm:$0xff] %v18881_v37  ;;  %v21951_v37 = vld [vmem:[#allocation32_spill] sm:$0xff] }
 0x44e   : > { %v3389_v23 = vpop.f32.mrf.mxu1  ;;  %v14672_v45 = vpop.f32.mrf.mxu0 }
 0x44f   : > { %v18888_v60 = vadd.f32 %v3389_v23, %v18674_v13  ;;  %14532 = vmatpush3.bf16.msra.mxu1 %v15318_v32  ;;  %v7384_v13 = vrot.slane %v18732_v48, 1 }
 0x450   : > { %v14200_v52 = vpop.f32.mrf.mxu1  ;;  %v18890_v28 = vpop.f32.mrf.mxu0  ;;  %14874 = vmatmul.mubr.msk.bf16.gmra.mxu0 %vm1446_vm2, %v12693_v1  ;;  %14613 = vmatprep.subr.bf16.mxu1 %v21708_v35  ;;  %v21953_v1 = vld [vmem:[#allocation49_spill] sm:$0xff] }
 0x451   : > { %21950 = vst [vmem:[#allocation135_spill] sm:$0xff] %v18890_v28  ;;  %14929 = vmatprep.mubr.msk.bf16.mxu0 %vm15930_vm0, %v21708_v35  ;;  %v7383_v52 = vrot.slane %v21953_v1, 1  ;;  %v15320_v28 = vld [vmem:[%s21574_s3 + $0x318] sm:$0xff]  }
 0x452   : > { %v3394_v29 = vpop.f32.mrf.mxu1  ;;  %14454 = vmatmul.mubr.msk.bf16.gmra.mxu1 %vm1446_vm2, %v21951_v37  ;;  %v14675_v45 = vpop.f32.mrf.mxu0 }
 0x453   : > { %v18899_v5 = vadd.f32 %v3394_v29, %v18685_v3  ;;  %14457 = vmatprep.mubr.msk.bf16.mxu1 %vm15930_vm0, %v21708_v35  ;;  %v7385_v3 = vsel %vm2543_vm1, %v7383_v52, %v7384_v13  ;;  %v7386_v52 = vrot.slane %v18758_v26, 1 }
 0x454   : > { %v14203_v32 = vpop.f32.mrf.mxu1  ;;  %v18904_v23 = vpop.f32.mrf.mxu0 }
 0x455   : > { %21952 = vst [vmem:[#allocation32_spill] sm:$0xff] %v18904_v23  ;;  %v15321_v32 = vld [vmem:[%s21574_s3 + $0x310] sm:$0xff]  }
 0x456   : > { %v3397_v33 = vpop.f32.mrf.mxu1  ;;  %v14676_v37 = vpop.f32.mrf.mxu0 }
 0x457   : > { %v18911_v45 = vadd.f32 %v3397_v33, %v18701_v43  ;;  %v21955_v37 = vld [vmem:[#allocation40_spill] sm:$0xff] }
 0x458   : > { %v14204_v29 = vpop.f32.mrf.mxu1  ;;  %v18914_v15 = vpop.f32.mrf.mxu0  ;;  %14930 = vmatmul.mubr.msk.bf16.vlgmr.msra.gmra.mxu0 %vm1446_vm2, %v7385_v3 }
 0x459   : > { %21954 = vst [vmem:[#allocation49_spill] sm:$0xff] %v18914_v15  ;;  %14933 = vmatprep.mubr.msk.bf16.mxu0 %vm15930_vm0, %v21708_v35  ;;  %15010 = vmatpush3.bf16.msra.mxu0 %v15320_v28  ;;  %v15322_v29 = vld [vmem:[%s21574_s3 + $0x308] sm:$0xff]  }
 0x45a   : > { %v3402_v1 = vpop.f32.mrf.mxu1  ;;  %14458 = vmatmul.mubr.msk.bf16.gmra.mxu1 %vm1446_vm2, %v21955_v37  ;;  %v14679_v43 = vpop.f32.mrf.mxu0  ;;  %15011 = vmatprep.subr.bf16.mxu0 %v21708_v35 }
 0x45b   : > { %v18926_v33 = vadd.f32 %v3402_v1, %v18716_v16  ;;  %14461 = vmatprep.mubr.msk.bf16.mxu1 %vm15930_vm0, %v21708_v35  ;;  %v7387_v1 = vsel %vm2543_vm1, %v7384_v13, %v7386_v52  ;;  %v7388_v13 = vrot.slane %v18776_v40, 1 }
 0x45c   : > { %v14207_v28 = vpop.f32.mrf.mxu1  ;;  %v18931_v3 = vpop.f32.mrf.mxu0 }
 0x45d   : > { %21956 = vst [vmem:[#allocation40_spill] sm:$0xff] %v18931_v3  ;;  %15012 = vmatpush3.bf16.msra.mxu0 %v15321_v32  ;;  %v15324_v32 = vld [vmem:[%s21574_s3 + $0x300] sm:$0xff]  }
 0x45e   : > { %v3405_v37 = vpop.f32.mrf.mxu1  ;;  %v14680_v43 = vpop.f32.mrf.mxu0  ;;  %15013 = vmatprep.subr.bf16.mxu0 %v21708_v35 }
 0x45f   : > { %v18938_v16 = vadd.f32 %v3405_v37, %v18728_v10  ;;  %v21958_v43 = vld [vmem:[#allocation52_spill] sm:$0xff] }
 0x460   : > { %v14208_v15 = vpop.f32.mrf.mxu1  ;;  %v18941_v23 = vpop.f32.mrf.mxu0  ;;  %14934 = vmatmul.mubr.msk.bf16.gmra.mxu0 %vm1446_vm2, %v7387_v1 }
 0x461   : > { %21957 = vst [vmem:[#allocation136_spill] sm:$0xff] %v18941_v23  ;;  %14937 = vmatprep.mubr.msk.bf16.mxu0 %vm15930_vm0, %v21708_v35  ;;  %15014 = vmatpush3.bf16.msra.mxu0 %v15322_v29 }
 0x462   : > { %v3410_v28 = vpop.f32.mrf.mxu1  ;;  %14462 = vmatmul.mubr.msk.bf16.gmra.mxu1 %vm1446_vm2, %v21958_v43  ;;  %v14683_v10 = vpop.f32.mrf.mxu0  ;;  %15015 = vmatprep.subr.bf16.mxu0 %v21708_v35  ;;  %v7389_v43 = vsel %vm2543_vm1, %v7386_v52, %v7388_v13 }
 0x463   : > { %v18953_v15 = vadd.f32 %v3410_v28, %v18745_v24  ;;  %14465 = vmatprep.mubr.msk.bf16.mxu1 %vm15930_vm0, %v21708_v35  ;;  %v21961_v28 = vld [vmem:[#allocation67_spill] sm:$0xff] }
 0x464   : > { %v14211_v29 = vpop.f32.mrf.mxu1  ;;  %v18958_v37 = vpop.f32.mrf.mxu0 }
 0x465   : > { %21959 = vst [vmem:[#allocation52_spill] sm:$0xff] %v18958_v37  ;;  %15016 = vmatpush3.bf16.msra.mxu0 %v15324_v32 }
 0x466   : > { %v3413_v1 = vpop.f32.mrf.mxu1  ;;  %v14684_v23 = vpop.f32.mrf.mxu0 }
 0x467   : > { %v18961_v3 = vadd.f32 %v3413_v1, %v18754_v59  ;;  %v7390_v59 = vrot.slane %v18797_v4, 1 }
 0x468   : > { %v14212_v10 = vpop.f32.mrf.mxu1  ;;  %v18964_v2 = vpop.f32.mrf.mxu0  ;;  %14938 = vmatmul.mubr.msk.bf16.gmra.mxu0 %vm1446_vm2, %v7389_v43 }
 0x469   : > { %21960 = vst [vmem:[#allocation137_spill] sm:$0xff] %v18964_v2  ;;  %14941 = vmatprep.mubr.msk.bf16.mxu0 %vm15930_vm0, %v21708_v35  ;;  %v7391_v10 = vsel %vm2543_vm1, %v7388_v13, %v7390_v59  ;;  %v7392_v13 = vrot.slane %v18817_v62, 1 }
 0x46a   : > { %v3418_v24 = vpop.f32.mrf.mxu1  ;;  %14466 = vmatmul.mubr.msk.bf16.gmra.mxu1 %vm1446_vm2, %v21961_v28  ;;  %v14687_v32 = vpop.f32.mrf.mxu0  ;;  %v21962_v28 = vld [vmem:[#allocation80_spill] sm:$0xff] }
 0x46b   : > { %v18972_v23 = vadd.f32 %v3418_v24, %v18767_v63  ;;  %14469 = vmatprep.mubr.msk.bf16.mxu1 %vm15930_vm0, %v21708_v35  ;;  %v3702_v63 = vadd.f32 %v17625_v46, %v18785_v58  ;;  %v3703_v46 = vadd.f32 %v17639_v8, %v18793_v47 }
 0x46c   : > { %v14215_v52 = vpop.f32.mrf.mxu1  ;;  %v18977_v29 = vpop.f32.mrf.mxu0 }
 0x46e   : > { %v3421_v1 = vpop.f32.mrf.mxu1  ;;  %v14688_v43 = vpop.f32.mrf.mxu0 }
 0x470   : > { %v14216_v2 = vpop.f32.mrf.mxu1  ;;  %v18980_v37 = vpop.f32.mrf.mxu0  ;;  %14942 = vmatmul.mubr.msk.bf16.gmra.mxu0 %vm1446_vm2, %v7391_v10 }
 0x471   : > { %14945 = vmatprep.mubr.msk.bf16.mxu0 %vm15930_vm0, %v21708_v35 }
 0x472   : > { %v3823_v24 = vpop.f32.mrf.mxu1  ;;  %14470 = vmatmul.mubr.msk.bf16.gmra.mxu1 %vm1446_vm2, %v21962_v28  ;;  %v14691_v32 = vpop.f32.mrf.mxu0  ;;  %v7393_v28 = vsel %vm2543_vm1, %v7390_v59, %v7392_v13  ;;  %v7394_v59 = vrot.slane %v18837_v49, 1 }
 0x473   : > { %v18989_v52 = vadd.f32 %v3823_v24, %v3702_v63  ;;  %14473 = vmatprep.mubr.msk.bf16.mxu1 %vm15930_vm0, %v21708_v35  ;;  %v3704_v24 = vadd.f32 %v17652_v21, %v18806_v17  ;;  %v3705_v21 = vadd.f32 %v17657_v9, %v18813_v22 }
 0x474   : > { %v14271_v2 = vpop.f32.mrf.mxu1  ;;  %v18994_v1 = vpop.f32.mrf.mxu0 }
 0x476   : > { %v3826_v58 = vpop.f32.mrf.mxu1  ;;  %v14692_v43 = vpop.f32.mrf.mxu0 }
 0x477   : > { %v18998_v10 = vadd.f32 %v3826_v58, %v3703_v46 }
 0x478   : > { %v14272_v32 = vpop.f32.mrf.mxu1  ;;  %v19001_v63 = vpop.f32.mrf.mxu0  ;;  %14946 = vmatmul.mubr.msk.bf16.gmra.mxu0 %vm1446_vm2, %v7393_v28 }
 0x479   : > { %14949 = vmatprep.mubr.msk.bf16.mxu0 %vm15930_vm0, %v21708_v35 }
 0x47a   : > { %v3831_v2 = vpop.f32.mrf.mxu1  ;;  %14474 = vmatmul.mubr.msk.bf16.gmra.mxu1 %vm1446_vm2, %v17531_v44  ;;  %v14695_v8 = vpop.f32.mrf.mxu0  ;;  %v7395_v44 = vsel %vm2543_vm1, %v7392_v13, %v7394_v59  ;;  %v7396_v13 = vrot.slane %v18864_v25, 1 }
 0x47b   : > { %v19010_v47 = vadd.f32 %v3831_v2, %v3704_v24  ;;  %14477 = vmatprep.mubr.msk.bf16.mxu1 %vm15930_vm0, %v21708_v35  ;;  %v3706_v2 = vadd.f32 %v17667_v12, %v18825_v39  ;;  %v3707_v12 = vadd.f32 %v17676_v54, %v18830_v30  ;;  %v3708_v54 = vadd.f32 %v17707_v19, %v18846_v50  ;;  %v15323_v19 = vld [vmem:[%s21574_s3 + $0x1f0] sm:$0xff]  }
 0x47c   : > { %v14275_v46 = vpop.f32.mrf.mxu1  ;;  %v19015_v58 = vpop.f32.mrf.mxu0 }
 0x47d   : > { %v21963_v46 = vld [vmem:[#allocation96_spill] sm:$0xff] }
 0x47e   : > { %v3834_v17 = vpop.f32.mrf.mxu1  ;;  %v14696_v43 = vpop.f32.mrf.mxu0 }
 0x47f   : > { %v19019_v28 = vadd.f32 %v3834_v17, %v3705_v21  ;;  %v7120_v43 = vld [vmem:[#allocation3 + $0x60] sm:$0x7] }
 0x480   : > { %v14276_v32 = vpop.f32.mrf.mxu1  ;;  %v19022_v24 = vpop.f32.mrf.mxu0  ;;  %14950 = vmatmul.mubr.msk.bf16.gmra.mxu0 %vm1446_vm2, %v7395_v44 }
 0x481   : > { %14953 = vmatprep.mubr.msk.bf16.mxu0 %vm15930_vm0, %v21708_v35 }
 0x482   : > { %v3839_v8 = vpop.f32.mrf.mxu1  ;;  %14478 = vmatmul.mubr.msk.bf16.gmra.mxu1 %vm1446_vm2, %v21963_v46  ;;  %v14699_v9 = vpop.f32.mrf.mxu0  ;;  %v7397_v46 = vsel %vm2543_vm1, %v7394_v59, %v7396_v13  ;;  %v21964_v59 = vld [vmem:[#allocation18_spill] sm:$0xff] }
 0x483   : > { %v19031_v22 = vadd.f32 %v3839_v8, %v3706_v2  ;;  %14533 = vmatprep.mubr.msk.bf16.mxu1 %vm15930_vm0, %v21708_v35  ;;  %v15319_v2 = vld [vmem:[%s21574_s3 + $0x1f8] sm:$0xff]   ;;  %v19045_v8 = vcombine.low %v18884_v55, %v7120_v43 }
 0x484   : > { %v14279_v21 = vpop.f32.mrf.mxu1  ;;  %v6107_v17 = vpop.f32.mrf.mxu0 }
 0x485   : > { %v7398_v43 = vrot.slane %v19045_v8, 1 }
 0x486   : > { %v3842_v39 = vpop.f32.mrf.mxu1  ;;  %v14700_v44 = vpop.f32.mrf.mxu0 }
 0x487   : > { %v19038_v32 = vadd.f32 %v3842_v39, %v3707_v12  ;;  %v3709_v44 = vadd.f32 %v17731_v61, %v18857_v56  ;;  %v21966_v61 = vld [vmem:[#allocation107_spill] sm:$0xff] }
 0x488   : > { %v14280_v9 = vpop.f32.mrf.mxu1  ;;  %v19047_v21 = vpop.f32.mrf.mxu0  ;;  %14954 = vmatmul.mubr.msk.bf16.gmra.mxu0 %vm1446_vm2, %v7397_v46  ;;  %v3710_v56 = vadd.f32 %v21966_v61, %v18874_v14 }
 0x489   : > { %14957 = vmatprep.mubr.msk.bf16.mxu0 %vm15930_vm0, %v21708_v35 }
 0x48a   : > { %v3847_v30 = vpop.f32.mrf.mxu1  ;;  %14534 = vmatmul.mubr.msk.bf16.vlgmr.msra.gmra.mxu1 %vm1446_vm2, %v21964_v59  ;;  %v14755_v17 = vpop.f32.mrf.mxu0 }
 0x48b   : > { %v19056_v12 = vadd.f32 %v3847_v30, %v3708_v54  ;;  %14614 = vmatpush3.bf16.msra.mxu1 %v15319_v2  ;;  %14537 = vmatprep.mubr.msk.bf16.mxu1 %vm15930_vm0, %v21708_v35  ;;  %v7399_v54 = vsel %vm2543_vm1, %v7396_v13, %v7398_v43  ;;  %v15325_v30 = vld [vmem:[%s21574_s3 + $0x1e8] sm:$0xff]   ;;  %v21967_v13 = vld [vmem:[#allocation25_spill] sm:$0xff] }
 0x48c   : > { %v14283_v50 = vpop.f32.mrf.mxu1  ;;  %v19064_v39 = vpop.f32.mrf.mxu0  ;;  %14615 = vmatprep.subr.bf16.mxu1 %v21708_v35 }
 0x48e   : > { %v3850_v46 = vpop.f32.mrf.mxu1  ;;  %v14756_v9 = vpop.f32.mrf.mxu0 }
 0x48f   : > { %v19069_v2 = vadd.f32 %v3850_v46, %v3709_v44  ;;  %14616 = vmatpush3.bf16.msra.mxu1 %v15323_v19  ;;  %v15326_v46 = vld [vmem:[%s21574_s3 + $0x1e0] sm:$0xff]  }
 0x490   : > { %v14284_v59 = vpop.f32.mrf.mxu1  ;;  %v19075_v17 = vpop.f32.mrf.mxu0  ;;  %14958 = vmatmul.mubr.msk.bf16.gmra.mxu0 %vm1446_vm2, %v7399_v54  ;;  %14617 = vmatprep.subr.bf16.mxu1 %v21708_v35  ;;  %v21969_v54 = vld [vmem:[#allocation108_spill] sm:$0xff] }
 0x491   : > { %21965 = vst [vmem:[#allocation67_spill] sm:$0xff] %v19075_v17  ;;  %14961 = vmatprep.mubr.msk.bf16.mxu0 %vm15930_vm0, %v21708_v35  ;;  %v3711_v59 = vadd.f32 %v21969_v54, %v18888_v60 }
 0x492   : > { %v3855_v50 = vpop.f32.mrf.mxu1  ;;  %14538 = vmatmul.mubr.msk.bf16.gmra.mxu1 %vm1446_vm2, %v21967_v13  ;;  %v14759_v19 = vpop.f32.mrf.mxu0 }
 0x493   : > { %v19085_v44 = vadd.f32 %v3855_v50, %v3710_v56  ;;  %14541 = vmatprep.mubr.msk.bf16.mxu1 %vm15930_vm0, %v21708_v35  ;;  %14618 = vmatpush3.bf16.msra.mxu1 %v15325_v30  ;;  %v7806_v30 = vld [vmem:[#allocation3 + $0x1c] sm:$0xc] }
 0x494   : > { %v14287_v9 = vpop.f32.mrf.mxu1  ;;  %v19092_v14 = vpop.f32.mrf.mxu0  ;;  %14619 = vmatprep.subr.bf16.mxu1 %v21708_v35  ;;  %v12781_v60 = vcombine.low %v7806_v30, %v18695_v6 }
 0x495   : > { %21968 = vst [vmem:[#allocation80_spill] sm:$0xff] %v19092_v14  ;;  %v21971_v9 = vld [vmem:[#allocation109_spill] sm:$0xff] }
 0x496   : > { %v3858_v61 = vpop.f32.mrf.mxu1  ;;  %v14760_v13 = vpop.f32.mrf.mxu0  ;;  %v3712_v14 = vadd.f32 %v21971_v9, %v18899_v5  ;;  %v21973_v5 = vld [vmem:[#allocation110_spill] sm:$0xff] }
 0x497   : > { %v19097_v56 = vadd.f32 %v3858_v61, %v3711_v59  ;;  %14620 = vmatpush3.bf16.msra.mxu1 %v15326_v46  ;;  %v21972_v59 = vld [vmem:[#allocation33_spill] sm:$0xff]  ;;  %v3713_v9 = vadd.f32 %v21973_v5, %v18911_v45  ;;  %v21975_v45 = vld [vmem:[#allocation42_spill] sm:$0xff] }
 0x498   : > { %v14288_v50 = vpop.f32.mrf.mxu1  ;;  %v19099_v19 = vpop.f32.mrf.mxu0  ;;  %14962 = vmatmul.mubr.msk.bf16.gmra.mxu0 %vm1446_vm2, %v7398_v43  ;;  %14701 = vmatprep.subr.bf16.mxu1 %v21708_v35  ;;  %v7820_v43 = vrot.slane %v18732_v48, 2  ;;  %v21974_v48 = vld [vmem:[#allocation111_spill] sm:$0xff] }
 0x499   : > { %21970 = vst [vmem:[#allocation96_spill] sm:$0xff] %v19099_v19  ;;  %15017 = vmatprep.mubr.msk.bf16.mxu0 %vm15930_vm0, %v21708_v35  ;;  %v7819_v19 = vrot.slane %v12781_v60, 2 }
 0x49a   : > { %v3863_v54 = vpop.f32.mrf.mxu1  ;;  %14542 = vmatmul.mubr.msk.bf16.gmra.mxu1 %vm1446_vm2, %v21972_v59  ;;  %v14763_v46 = vpop.f32.mrf.mxu0 }
 0x49b   : > { %v19110_v61 = vadd.f32 %v3863_v54, %v3712_v14  ;;  %14545 = vmatprep.mubr.msk.bf16.mxu1 %vm15930_vm0, %v21708_v35  ;;  %v7821_v59 = vsel %vm2981_vm9, %v7819_v19, %v7820_v43  ;;  %v3714_v46 = vadd.f32 %v21974_v48, %v18926_v33  ;;  %v7822_v19 = vrot.slane %v18758_v26, 2  ;;  %v21977_v33 = vld [vmem:[#allocation112_spill] sm:$0xff]  ;;  %v21979_v26 = vld [vmem:[#allocation113_spill] sm:$0xff] }
 0x49c   : > { %v14291_v13 = vpop.f32.mrf.mxu1  ;;  %v19115_v50 = vpop.f32.mrf.mxu0 }
 0x49e   : > { %v3866_v6 = vpop.f32.mrf.mxu1  ;;  %v14764_v30 = vpop.f32.mrf.mxu0 }
 0x49f   : > { %v19119_v17 = vadd.f32 %v3866_v6, %v3713_v9  ;;  %v3715_v30 = vadd.f32 %v21977_v33, %v18938_v16 }
 0x4a0   : > { %v14292_v14 = vpop.f32.mrf.mxu1  ;;  %v19122_v54 = vpop.f32.mrf.mxu0  ;;  %15018 = vmatmul.mubr.msk.bf16.vlgmr.msra.gmra.mxu0 %vm1446_vm2, %v7821_v59 }
 0x4a1   : > { %15021 = vmatprep.mubr.msk.bf16.mxu0 %vm15930_vm0, %v21708_v35 }
 0x4a2   : > { %v3871_v13 = vpop.f32.mrf.mxu1  ;;  %14546 = vmatmul.mubr.msk.bf16.gmra.mxu1 %vm1446_vm2, %v21975_v45  ;;  %v14767_v60 = vpop.f32.mrf.mxu0  ;;  %v7823_v45 = vsel %vm2981_vm9, %v7820_v43, %v7822_v19  ;;  %v7824_v43 = vrot.slane %v18776_v40, 2  ;;  %v21984_v40 = vld [vmem:[#allocation64_spill] sm:$0xff] }
 0x4a3   : > { %v19131_v5 = vadd.f32 %v3871_v13, %v3714_v46  ;;  %14549 = vmatprep.mubr.msk.bf16.mxu1 %vm15930_vm0, %v21708_v35  ;;  %v3716_v13 = vadd.f32 %v21979_v26, %v18953_v15  ;;  %v21982_v15 = vld [vmem:[#allocation114_spill] sm:$0xff] }
 0x4a4   : > { %v14295_v9 = vpop.f32.mrf.mxu1  ;;  %v19136_v6 = vpop.f32.mrf.mxu0 }
 0x4a5   : > { %21976 = vst [vmem:[#allocation18_spill] sm:$0xff] %v19136_v6  ;;  %v21980_v6 = vld [vmem:[#allocation54_spill] sm:$0xff] }
 0x4a6   : > { %v3874_v59 = vpop.f32.mrf.mxu1  ;;  %v14768_v14 = vpop.f32.mrf.mxu0 }
 0x4a7   : > { %v19140_v48 = vadd.f32 %v3874_v59, %v3715_v30  ;;  %v3717_v14 = vadd.f32 %v21982_v15, %v18961_v3 }
 0x4a8   : > { %v14296_v60 = vpop.f32.mrf.mxu1  ;;  %v19143_v46 = vpop.f32.mrf.mxu0  ;;  %15022 = vmatmul.mubr.msk.bf16.gmra.mxu0 %vm1446_vm2, %v7823_v45 }
 0x4a9   : > { %21978 = vst [vmem:[#allocation107_spill] sm:$0xff] %v19143_v46  ;;  %15025 = vmatprep.mubr.msk.bf16.mxu0 %vm15930_vm0, %v21708_v35 }
 0x4aa   : > { %v3879_v9 = vpop.f32.mrf.mxu1  ;;  %14550 = vmatmul.mubr.msk.bf16.gmra.mxu1 %vm1446_vm2, %v21980_v6  ;;  %v14771_v16 = vpop.f32.mrf.mxu0  ;;  %v7825_v6 = vsel %vm2981_vm9, %v7822_v19, %v7824_v43  ;;  %v7826_v19 = vrot.slane %v18797_v4, 2 }
 0x4ab   : > { %v19152_v33 = vadd.f32 %v3879_v9, %v3716_v13  ;;  %14553 = vmatprep.mubr.msk.bf16.mxu1 %vm15930_vm0, %v21708_v35  ;;  %v3718_v9 = vadd.f32 %v21984_v40, %v18972_v23 }
 0x4ac   : > { %v14299_v30 = vpop.f32.mrf.mxu1  ;;  %v19157_v59 = vpop.f32.mrf.mxu0 }
 0x4ad   : > { %21981 = vst [vmem:[#allocation25_spill] sm:$0xff] %v19157_v59  ;;  %v21985_v59 = vld [vmem:[#allocation68_spill] sm:$0xff] }
 0x4ae   : > { %v3882_v45 = vpop.f32.mrf.mxu1  ;;  %v14772_v60 = vpop.f32.mrf.mxu0 }
 0x4af   : > { %v19161_v26 = vadd.f32 %v3882_v45, %v3717_v14 }
 0x4b0   : > { %v14300_v16 = vpop.f32.mrf.mxu1  ;;  %v19164_v13 = vpop.f32.mrf.mxu0  ;;  %15026 = vmatmul.mubr.msk.bf16.gmra.mxu0 %vm1446_vm2, %v7825_v6  ;;  %v7827_v6 = vsel %vm2981_vm9, %v7824_v43, %v7826_v19  ;;  %v7828_v43 = vrot.slane %v18817_v62, 2  ;;  %v21992_v62 = vld [vmem:[#allocation115_spill] sm:$0xff] }
 0x4b1   : > { %21983 = vst [vmem:[#allocation108_spill] sm:$0xff] %v19164_v13  ;;  %15029 = vmatprep.mubr.msk.bf16.mxu0 %vm15930_vm0, %v21708_v35 }
 0x4b2   : > { %v3887_v30 = vpop.f32.mrf.mxu1  ;;  %14554 = vmatmul.mubr.msk.bf16.gmra.mxu1 %vm1446_vm2, %v21985_v59  ;;  %v14775_v3 = vpop.f32.mrf.mxu0  ;;  %v15866_v59 = vld [vmem:[#allocation3 + $0x54] sm:$0x3] }
 0x4b3   : > { %v19173_v15 = vadd.f32 %v3887_v30, %v3718_v9  ;;  %14557 = vmatprep.mubr.msk.bf16.mxu1 %vm15930_vm0, %v21708_v35  ;;  %v12506_v9 = vcombine.low %v15866_v59, %v15866_v59  ;;  %v21988_v30 = vld [vmem:[#allocation46_spill] sm:$0xff] }
 0x4b4   : > { %v14303_v14 = vpop.f32.mrf.mxu1  ;;  %v19178_v45 = vpop.f32.mrf.mxu0  ;;  %v4144_v4 = vadd.f32 %v21988_v30, %v18989_v52  ;;  %v21990_v52 = vld [vmem:[#allocation65_spill] sm:$0xff] }
 0x4b5   : > { %21986 = vst [vmem:[#allocation109_spill] sm:$0xff] %v19178_v45  ;;  %v21989_v14 = vld [vmem:[#allocation81_spill] sm:$0xff]  ;;  %v4145_v59 = vadd.f32 %v21990_v52, %v18998_v10  ;;  %v5225_v30 = vshrl.u32 %v12506_v9, 16 }
 0x4b6   : > { %v3890_v60 = vpop.f32.mrf.mxu1  ;;  %v14776_v23 = vpop.f32.mrf.mxu0  ;;  %v21993_v52 = vld [vmem:[#allocation93_spill] sm:$0xff] }
 0x4b7   : > { %v5227_v10 = vrot.slane %v5225_v30, 3 }
 0x4b8   : > { %v14304_v16 = vpop.f32.mrf.mxu1  ;;  %v19181_v40 = vpop.f32.mrf.mxu0  ;;  %15030 = vmatmul.mubr.msk.bf16.gmra.mxu0 %vm1446_vm2, %v7827_v6 }
 0x4b9   : > { %21987 = vst [vmem:[#allocation33_spill] sm:$0xff] %v19181_v40  ;;  %15033 = vmatprep.mubr.msk.bf16.mxu0 %vm15930_vm0, %v21708_v35  ;;  %v5228_v40 = vshll.u32 %v12506_v9, 16 }
 0x4ba   : > { %v4277_v3 = vpop.f32.mrf.mxu1  ;;  %14558 = vmatmul.mubr.msk.bf16.gmra.mxu1 %vm1446_vm2, %v21989_v14  ;;  %v14779_v60 = vpop.f32.mrf.mxu0 }
 0x4bb   : > { %v19190_v23 = vadd.f32 %v4277_v3, %v4144_v4  ;;  %14561 = vmatprep.mubr.msk.bf16.mxu1 %vm15930_vm0, %v21708_v35  ;;  %v7829_v4 = vsel %vm2981_vm9, %v7826_v19, %v7828_v43  ;;  %v4146_v60 = vadd.f32 %v21992_v62, %v19010_v47  ;;  %v7830_v19 = vrot.slane %v18837_v49, 2  ;;  %v21995_v47 = vld [vmem:[#allocation116_spill] sm:$0xff]  ;;  %v21996_v49 = vld [vmem:[#allocation117_spill] sm:$0xff] }
 0x4bc   : > { %v14359_v6 = vpop.f32.mrf.mxu1  ;;  %v19195_v16 = vpop.f32.mrf.mxu0 }
 0x4bd   : > { %v5230_v6 = vrot.slane %v5228_v40, 4 }
 0x4be   : > { %v4280_v45 = vpop.f32.mrf.mxu1  ;;  %v14780_v13 = vpop.f32.mrf.mxu0 }
 0x4bf   : > { %v19199_v46 = vadd.f32 %v4280_v45, %v4145_v59  ;;  %v5231_v30 = vor.u32 %v5230_v6, %v5227_v10 }
 0x4c0   : > { %v14360_v3 = vpop.f32.mrf.mxu1  ;;  %v19202_v14 = vpop.f32.mrf.mxu0  ;;  %15034 = vmatmul.mubr.msk.bf16.gmra.mxu0 %vm1446_vm2, %v7829_v4 }
 0x4c1   : > { %21991 = vst [vmem:[#allocation110_spill] sm:$0xff] %v19202_v14  ;;  %15037 = vmatprep.mubr.msk.bf16.mxu0 %vm15930_vm0, %v21708_v35  ;;  %v4147_v3 = vadd.f32 %v21995_v47, %v19019_v28 }
 0x4c2   : > { %v4285_v9 = vpop.f32.mrf.mxu1  ;;  %14562 = vmatmul.mubr.msk.bf16.gmra.mxu1 %vm1446_vm2, %v21993_v52  ;;  %v14783_v13 = vpop.f32.mrf.mxu0  ;;  %v7831_v52 = vsel %vm2981_vm9, %v7828_v43, %v7830_v19  ;;  %v7832_v43 = vrot.slane %v18864_v25, 2 }
 0x4c3   : > { %v19211_v45 = vadd.f32 %v4285_v9, %v4146_v60  ;;  %14565 = vmatprep.mubr.msk.bf16.mxu1 %vm15930_vm0, %v21708_v35  ;;  %v4148_v13 = vadd.f32 %v21996_v49, %v19031_v22  ;;  %v7574_v22 = vld [vmem:[#allocation3 + $0x60] sm:$0xf]  ;;  %v15327_v49 = vld [vmem:[%s21574_s3 + $0x238] sm:$0xff]  }
 0x4c4   : > { %v14363_v59 = vpop.f32.mrf.mxu1  ;;  %v19216_v4 = vpop.f32.mrf.mxu0  ;;  %v19247_v25 = vcombine.low %v18884_v55, %v7574_v22 }
 0x4c5   : > { %21994 = vst [vmem:[#allocation111_spill] sm:$0xff] %v19216_v4  ;;  %v21997_v59 = vld [vmem:[#allocation89_spill] sm:$0xff] }
 0x4c6   : > { %v4288_v40 = vpop.f32.mrf.mxu1  ;;  %v14784_v62 = vpop.f32.mrf.mxu0  ;;  %v5232_v4 = vsel %vm3456_vm12, %v21997_v59, %v5231_v30  ;;  %v7834_v55 = vrot.slane %v19247_v25, 2  ;;  %vm22194_vm12 = vmmov %vm21901_vm3 }
 0x4c7   : > { %v19220_v14 = vadd.f32 %v4288_v40, %v4147_v3  ;;  %v21998_v40 = vld [vmem:[#allocation118_spill] sm:$0xff]  ;;  %vm20242_vm1 = vmand %vm22194_vm12, %vm8115_vm14 }
 0x4c8   : > { %v14364_v60 = vpop.f32.mrf.mxu1  ;;  %v19223_v9 = vpop.f32.mrf.mxu0  ;;  %15038 = vmatmul.mubr.msk.bf16.gmra.mxu0 %vm1446_vm2, %v7831_v52  ;;  %v4149_v30 = vadd.f32 %v21998_v40, %v19038_v32  ;;  %v21999_v32 = vld [vmem:[#allocation119_spill] sm:$0xff] }
 0x4c9   : > { %15041 = vmatprep.mubr.msk.bf16.mxu0 %vm15930_vm0, %v21708_v35 }
 0x4ca   : > { %v4293_v28 = vpop.f32.mrf.mxu1  ;;  %14566 = vmatmul.mubr.msk.bf16.gmra.mxu1 %vm1446_vm2, %v5232_v4  ;;  %v14787_v10 = vpop.f32.mrf.mxu0  ;;  %v7833_v4 = vsel %vm2981_vm9, %v7830_v19, %v7832_v43  ;;  %v22000_v19 = vld [vmem:[#allocation26_spill] sm:$0xff] }
 0x4cb   : > { %v19233_v6 = vadd.f32 %v4293_v28, %v4148_v13  ;;  %14621 = vmatprep.mubr.msk.bf16.mxu1 %vm15930_vm0, %v21708_v35  ;;  %v4150_v28 = vadd.f32 %v21999_v32, %v19056_v12  ;;  %v15328_v12 = vld [vmem:[%s21574_s3 + $0x230] sm:$0xff]   ;;  %v15329_v32 = vld [vmem:[%s21574_s3 + $0x228] sm:$0xff]  }
 0x4cc   : > { %v14367_v47 = vpop.f32.mrf.mxu1  ;;  %v6646_v3 = vpop.f32.mrf.mxu0 }
 0x4ce   : > { %v4296_v62 = vpop.f32.mrf.mxu1  ;;  %v14788_v52 = vpop.f32.mrf.mxu0 }
 0x4cf   : > { %v19240_v60 = vadd.f32 %v4296_v62, %v4149_v30  ;;  %v22001_v30 = vld [vmem:[#allocation13_spill] sm:$0xff] }
 0x4d0   : > { %v14368_v13 = vpop.f32.mrf.mxu1  ;;  %v19249_v59 = vpop.f32.mrf.mxu0  ;;  %15042 = vmatmul.mubr.msk.bf16.gmra.mxu0 %vm1446_vm2, %v7833_v4  ;;  %v4151_v62 = vadd.f32 %v22001_v30, %v19069_v2  ;;  %v22002_v2 = vld [vmem:[#allocation14_spill] sm:$0xff] }
 0x4d1   : > { %15045 = vmatprep.mubr.msk.bf16.mxu0 %vm15930_vm0, %v21708_v35  ;;  %v7835_v13 = vsel %vm2981_vm9, %v7832_v43, %v7834_v55  ;;  %v22003_v43 = vld [vmem:[#allocation34_spill] sm:$0xff]  ;;  %vm8139_vm9 = vsmask.f32 3328 }
 0x4d2   : > { %v4301_v10 = vpop.f32.mrf.mxu1  ;;  %14622 = vmatmul.mubr.msk.bf16.vlgmr.msra.gmra.mxu1 %vm1446_vm2, %v22000_v19  ;;  %v14843_v47 = vpop.f32.mrf.mxu0  ;;  %v4152_v19 = vadd.f32 %v22002_v2, %v19085_v44  ;;  %v15330_v30 = vld [vmem:[%s21574_s3 + $0x220] sm:$0xff]   ;;  %vm20270_vm10 = vmand %vm1703_vm11, %vm8139_vm9  ;;  %vm8171_vm11 = vsmask.f32 7950 }
 0x4d3   : > { %v19258_v3 = vadd.f32 %v4301_v10, %v4150_v28  ;;  %14702 = vmatpush3.bf16.msra.mxu1 %v15327_v49  ;;  %14625 = vmatprep.mubr.msk.bf16.mxu1 %vm15930_vm0, %v21708_v35  ;;  %vm20353_vm3 = vmand %vm22207_vm8, %vm8171_vm11 }
 0x4d4   : > { %v14371_v22 = vpop.f32.mrf.mxu1  ;;  %v19266_v40 = vpop.f32.mrf.mxu0  ;;  %14703 = vmatprep.subr.bf16.mxu1 %v21708_v35 }
 0x4d6   : > { %v4304_v52 = vpop.f32.mrf.mxu1  ;;  %v14844_v4 = vpop.f32.mrf.mxu0 }
 0x4d7   : > { %v19271_v49 = vadd.f32 %v4304_v52, %v4151_v62  ;;  %14704 = vmatpush3.bf16.msra.mxu1 %v15328_v12  ;;  %v22005_v52 = vld [vmem:[#allocation15_spill] sm:$0xff] }
 0x4d8   : > { %v14372_v28 = vpop.f32.mrf.mxu1  ;;  %v19277_v10 = vpop.f32.mrf.mxu0  ;;  %15046 = vmatmul.mubr.msk.bf16.gmra.mxu0 %vm1446_vm2, %v7835_v13  ;;  %14705 = vmatprep.subr.bf16.mxu1 %v21708_v35  ;;  %v4153_v4 = vadd.f32 %v22005_v52, %v19097_v56 }
 0x4d9   : > { %15049 = vmatprep.mubr.msk.bf16.mxu0 %vm15930_vm0, %v21708_v35 }
 0x4da   : > { %v4309_v47 = vpop.f32.mrf.mxu1  ;;  %14626 = vmatmul.mubr.msk.bf16.gmra.mxu1 %vm1446_vm2, %v22003_v43  ;;  %v14847_v12 = vpop.f32.mrf.mxu0 }
 0x4db   : > { %v19287_v22 = vadd.f32 %v4309_v47, %v4152_v19  ;;  %14629 = vmatprep.mubr.msk.bf16.mxu1 %vm15930_vm0, %v21708_v35  ;;  %14706 = vmatpush3.bf16.msra.mxu1 %v15329_v32  ;;  %v22007_v32 = vld [vmem:[#allocation19_spill] sm:$0xff] }
 0x4dc   : > { %v14375_v62 = vpop.f32.mrf.mxu1  ;;  %v19294_v44 = vpop.f32.mrf.mxu0  ;;  %14707 = vmatprep.subr.bf16.mxu1 %v21708_v35  ;;  %v4154_v43 = vadd.f32 %v22007_v32, %v19110_v61 }
 0x4dd   : > { %22004 = vst [vmem:[#allocation42_spill] sm:$0xff] %v19294_v44  ;;  %v22008_v62 = vld [vmem:[#allocation41_spill] sm:$0xff] }
 0x4de   : > { %v4312_v13 = vpop.f32.mrf.mxu1  ;;  %v14848_v28 = vpop.f32.mrf.mxu0 }
 0x4df   : > { %v19299_v2 = vadd.f32 %v4312_v13, %v4153_v4  ;;  %14708 = vmatpush3.bf16.msra.mxu1 %v15330_v30 }
 0x4e0   : > { %v14376_v19 = vpop.f32.mrf.mxu1  ;;  %v19301_v47 = vpop.f32.mrf.mxu0  ;;  %15050 = vmatmul.mubr.msk.bf16.gmra.mxu0 %vm1446_vm2, %v7834_v55  ;;  %14789 = vmatprep.subr.bf16.mxu1 %v21708_v35  ;;  %v22009_v55 = vld [vmem:[#allocation21_spill] sm:$0xff] }
 0x4e1   : > { %22006 = vst [vmem:[#allocation112_spill] sm:$0xff] %v19301_v47  ;;  %v4155_v13 = vadd.f32 %v22009_v55, %v19119_v17 }
 0x4e2   : > { %v4317_v12 = vpop.f32.mrf.mxu1  ;;  %14630 = vmatmul.mubr.msk.bf16.gmra.mxu1 %vm1446_vm2, %v22008_v62  ;;  %v14851_v56 = vpop.f32.mrf.mxu0  ;;  %v22011_v62 = vld [vmem:[#allocation20_spill] sm:$0xff] }
 0x4e3   : > { %v19309_v52 = vadd.f32 %v4317_v12, %v4154_v43  ;;  %14633 = vmatprep.mubr.msk.bf16.mxu1 %vm15930_vm0, %v21708_v35  ;;  %v4156_v43 = vadd.f32 %v22011_v62, %v19131_v5  ;;  %v22012_v56 = vld [vmem:[#allocation53_spill] sm:$0xff] }
 0x4e4   : > { %v14379_v30 = vpop.f32.mrf.mxu1  ;;  %v19313_v4 = vpop.f32.mrf.mxu0 }
 0x4e6   : > { %v4320_v28 = vpop.f32.mrf.mxu1  ;;  %v14852_v19 = vpop.f32.mrf.mxu0 }
 0x4e7   : > { %v19317_v47 = vadd.f32 %v4320_v28, %v4155_v13  ;;  %v22013_v13 = vld [vmem:[#allocation30_spill] sm:$0xff] }
 0x4e8   : > { %v14380_v61 = vpop.f32.mrf.mxu1  ;;  %v19319_v32 = vpop.f32.mrf.mxu0  ;;  %v4157_v28 = vadd.f32 %v22013_v13, %v19140_v48 }
 0x4e9   : > { %22010 = vst [vmem:[#allocation113_spill] sm:$0xff] %v19319_v32 }
 0x4ea   : > { %v4325_v12 = vpop.f32.mrf.mxu1  ;;  %14634 = vmatmul.mubr.msk.bf16.gmra.mxu1 %vm1446_vm2, %v22012_v56  ;;  %v14855_v30 = vpop.f32.mrf.mxu0  ;;  %v22015_v56 = vld [vmem:[#allocation69_spill] sm:$0xff] }
 0x4eb   : > { %v19325_v44 = vadd.f32 %v4325_v12, %v4156_v43  ;;  %14637 = vmatprep.mubr.msk.bf16.mxu1 %vm15930_vm0, %v21708_v35  ;;  %v4158_v43 = vadd.f32 %v18170_v11, %v19152_v33 }
 0x4ec   : > { %v14383_v17 = vpop.f32.mrf.mxu1  ;;  %v19329_v55 = vpop.f32.mrf.mxu0 }
 0x4ee   : > { %v4328_v19 = vpop.f32.mrf.mxu1  ;;  %v14856_v61 = vpop.f32.mrf.mxu0 }
 0x4ef   : > { %v19333_v32 = vadd.f32 %v4328_v19, %v4157_v28  ;;  %v4159_v28 = vadd.f32 %v18186_v38, %v19161_v26 }
 0x4f0   : > { %v14384_v5 = vpop.f32.mrf.mxu1  ;;  %v19335_v62 = vpop.f32.mrf.mxu0 }
 0x4f1   : > { %22014 = vst [vmem:[#allocation54_spill] sm:$0xff] %v19335_v62 }
 0x4f2   : > { %v4333_v12 = vpop.f32.mrf.mxu1  ;;  %14638 = vmatmul.mubr.msk.bf16.gmra.mxu1 %vm1446_vm2, %v22015_v56  ;;  %v14859_v30 = vpop.f32.mrf.mxu0  ;;  %v22018_v56 = vld [vmem:[#allocation29_spill] sm:$0xff] }
 0x4f3   : > { %v19341_v17 = vadd.f32 %v4333_v12, %v4158_v43  ;;  %14641 = vmatprep.mubr.msk.bf16.mxu1 %vm15930_vm0, %v21708_v35  ;;  %v4160_v43 = vadd.f32 %v22018_v56, %v19173_v15  ;;  %v22019_v30 = vld [vmem:[#allocation78_spill] sm:$0xff]  ;;  %v22022_v15 = vld [vmem:[#allocation61_spill] sm:$0xff] }
 0x4f4   : > { %v14387_v48 = vpop.f32.mrf.mxu1  ;;  %v19345_v13 = vpop.f32.mrf.mxu0  ;;  %v4611_v56 = vadd.f32 %v22022_v15, %v19190_v23 }
 0x4f5   : > { %22016 = vst [vmem:[#allocation114_spill] sm:$0xff] %v19345_v13  ;;  %v22023_v13 = vld [vmem:[#allocation91_spill] sm:$0xff] }
 0x4f6   : > { %v4336_v19 = vpop.f32.mrf.mxu1  ;;  %v14860_v61 = vpop.f32.mrf.mxu0 }
 0x4f7   : > { %v19349_v5 = vadd.f32 %v4336_v19, %v4159_v28 }
 0x4f8   : > { %v14388_v11 = vpop.f32.mrf.mxu1  ;;  %v19351_v33 = vpop.f32.mrf.mxu0 }
 0x4f9   : > { %22017 = vst [vmem:[#allocation64_spill] sm:$0xff] %v19351_v33 }
 0x4fa   : > { %v4341_v12 = vpop.f32.mrf.mxu1  ;;  %14642 = vmatmul.mubr.msk.bf16.gmra.mxu1 %vm1446_vm2, %v22019_v30  ;;  %v14863_v48 = vpop.f32.mrf.mxu0 }
 0x4fb   : > { %v19357_v62 = vadd.f32 %v4341_v12, %v4160_v43  ;;  %14645 = vmatprep.mubr.msk.bf16.mxu1 %vm15930_vm0, %v21708_v35 }
 0x4fc   : > { %v14391_v38 = vpop.f32.mrf.mxu1  ;;  %v19361_v26 = vpop.f32.mrf.mxu0 }
 0x4fd   : > { %22020 = vst [vmem:[#allocation68_spill] sm:$0xff] %v19361_v26  ;;  %v22024_v38 = vld [vmem:[#allocation63_spill] sm:$0xff] }
 0x4fe   : > { %v4344_v28 = vpop.f32.mrf.mxu1  ;;  %v14864_v19 = vpop.f32.mrf.mxu0 }
 0x4ff   : > { %v4612_v28 = vadd.f32 %v22024_v38, %v19199_v46 }
 0x500   : > { %v14392_v61 = vpop.f32.mrf.mxu1  ;;  %v19363_v11 = vpop.f32.mrf.mxu0 }
 0x501   : > { %22021 = vst [vmem:[#allocation46_spill] sm:$0xff] %v19363_v11 }
 0x502   : > { %v4876_v33 = vpop.f32.mrf.mxu1  ;;  %14646 = vmatmul.mubr.msk.bf16.gmra.mxu1 %vm1446_vm2, %v22023_v13  ;;  %v14867_v43 = vpop.f32.mrf.mxu0  ;;  %v22026_v13 = vld [vmem:[#allocation38_spill] sm:$0xff] }
 0x503   : > { %v19369_v12 = vadd.f32 %v4876_v33, %v4611_v56  ;;  %14649 = vmatprep.mubr.msk.bf16.mxu1 %vm15930_vm0, %v21708_v35  ;;  %v4613_v33 = vadd.f32 %v22026_v13, %v19211_v45  ;;  %v22027_v43 = vld [vmem:[#allocation100_spill] sm:$0xff] }
 0x504   : > { %v14447_v30 = vpop.f32.mrf.mxu1  ;;  %v19373_v48 = vpop.f32.mrf.mxu0 }
 0x506   : > { %v4879_v19 = vpop.f32.mrf.mxu1  ;;  %v14868_v61 = vpop.f32.mrf.mxu0 }
 0x507   : > { %v19377_v11 = vadd.f32 %v4879_v19, %v4612_v28  ;;  %v22028_v28 = vld [vmem:[#allocation37_spill] sm:$0xff] }
 0x508   : > { %v14448_v23 = vpop.f32.mrf.mxu1  ;;  %v19379_v15 = vpop.f32.mrf.mxu0  ;;  %v4614_v19 = vadd.f32 %v22028_v28, %v19220_v14 }
 0x509   : > { %22025 = vst [vmem:[#allocation81_spill] sm:$0xff] %v19379_v15 }
 0x50a   : > { %v4884_v56 = vpop.f32.mrf.mxu1  ;;  %14650 = vmatmul.mubr.msk.bf16.gmra.mxu1 %vm1446_vm2, %v22027_v43  ;;  %v14871_v30 = vpop.f32.mrf.mxu0  ;;  %v22029_v43 = vld [vmem:[#allocation97_spill] sm:$0xff] }
 0x50b   : > { %v19385_v26 = vadd.f32 %v4884_v56, %v4613_v33  ;;  %14653 = vmatprep.mubr.msk.bf16.mxu1 %vm15930_vm0, %v21708_v35  ;;  %v4615_v33 = vadd.f32 %v18272_v20, %v19233_v6  ;;  %v15331_v20 = vld [vmem:[%s21574_s3 + $0x278] sm:$0xff]  }
 0x50c   : > { %v14451_v46 = vpop.f32.mrf.mxu1  ;;  %v19389_v38 = vpop.f32.mrf.mxu0 }
 0x50e   : > { %v4887_v61 = vpop.f32.mrf.mxu1  ;;  %v14872_v23 = vpop.f32.mrf.mxu0 }
 0x50f   : > { %v19393_v15 = vadd.f32 %v4887_v61, %v4614_v19  ;;  %v4616_v19 = vadd.f32 %v18286_v41, %v19240_v60  ;;  %v15332_v60 = vld [vmem:[%s21574_s3 + $0x270] sm:$0xff]  }
 0x510   : > { %v14452_v45 = vpop.f32.mrf.mxu1  ;;  %v19395_v13 = vpop.f32.mrf.mxu0 }
 0x512   : > { %v4892_v56 = vpop.f32.mrf.mxu1  ;;  %14654 = vmatmul.mubr.msk.bf16.gmra.mxu1 %vm1446_vm2, %v22029_v43  ;;  %v14875_v30 = vpop.f32.mrf.mxu0 }
 0x513   : > { %v19401_v46 = vadd.f32 %v4892_v56, %v4615_v33  ;;  %14709 = vmatprep.mubr.msk.bf16.mxu1 %vm15930_vm0, %v21708_v35  ;;  %v4617_v33 = vadd.f32 %v18296_v57, %v19258_v3  ;;  %v22030_v30 = vld [vmem:[#allocation27_spill] sm:$0xff]  ;;  %v4618_v57 = vadd.f32 %v18313_v0, %v19271_v49 }
 0x514   : > { %v14455_v14 = vpop.f32.mrf.mxu1  ;;  %v7098_v28 = vpop.f32.mrf.mxu0 }
 0x516   : > { %v4895_v61 = vpop.f32.mrf.mxu1  ;;  %v14876_v23 = vpop.f32.mrf.mxu0 }
 0x517   : > { %v19407_v45 = vadd.f32 %v4895_v61, %v4616_v19 }
 0x518   : > { %v14456_v6 = vpop.f32.mrf.mxu1  ;;  %v19412_v43 = vpop.f32.mrf.mxu0 }
 0x51a   : > { %v4900_v56 = vpop.f32.mrf.mxu1  ;;  %14710 = vmatmul.mubr.msk.bf16.vlgmr.msra.gmra.mxu1 %vm1446_vm2, %v22030_v30  ;;  %v14931_v14 = vpop.f32.mrf.mxu0 }
 0x51b   : > { %v19418_v41 = vadd.f32 %v4900_v56, %v4617_v33  ;;  %14790 = vmatpush3.bf16.msra.mxu1 %v15331_v20  ;;  %14713 = vmatprep.mubr.msk.bf16.mxu1 %vm15930_vm0, %v21708_v35  ;;  %v15333_v20 = vld [vmem:[%s21574_s3 + $0x268] sm:$0xff]   ;;  %v4619_v56 = vadd.f32 %v18324_v18, %v19287_v22  ;;  %v4620_v18 = vadd.f32 %v18341_v36, %v19299_v2 }
 0x51c   : > { %v14459_v28 = vpop.f32.mrf.mxu1  ;;  %v19425_v19 = vpop.f32.mrf.mxu0  ;;  %14791 = vmatprep.subr.bf16.mxu1 %v21708_v35  ;;  %v22032_v14 = vld [vmem:[#allocation35_spill] sm:$0xff] }
 0x51e   : > { %v4903_v3 = vpop.f32.mrf.mxu1  ;;  %v14932_v61 = vpop.f32.mrf.mxu0 }
 0x51f   : > { %v19430_v23 = vadd.f32 %v4903_v3, %v4618_v57  ;;  %14792 = vmatpush3.bf16.msra.mxu1 %v15332_v60  ;;  %v15334_v60 = vld [vmem:[%s21574_s3 + $0x260] sm:$0xff]  }
 0x520   : > { %v14460_v6 = vpop.f32.mrf.mxu1  ;;  %v19435_v33 = vpop.f32.mrf.mxu0  ;;  %14793 = vmatprep.subr.bf16.mxu1 %v21708_v35 }
 0x521   : > { %22031 = vst [vmem:[#allocation65_spill] sm:$0xff] %v19435_v33 }
 0x522   : > { %v4908_v30 = vpop.f32.mrf.mxu1  ;;  %14714 = vmatmul.mubr.msk.bf16.gmra.mxu1 %vm1446_vm2, %v22032_v14  ;;  %v14935_v0 = vpop.f32.mrf.mxu0 }
 0x523   : > { %v19442_v49 = vadd.f32 %v4908_v30, %v4619_v56  ;;  %14717 = vmatprep.mubr.msk.bf16.mxu1 %vm15930_vm0, %v21708_v35  ;;  %14794 = vmatpush3.bf16.msra.mxu1 %v15333_v20  ;;  %v22035_v20 = vld [vmem:[#allocation73_spill] sm:$0xff]  ;;  %v22036_v0 = vld [vmem:[#allocation43_spill] sm:$0xff] }
 0x524   : > { %v14463_v28 = vpop.f32.mrf.mxu1  ;;  %v19449_v57 = vpop.f32.mrf.mxu0  ;;  %14795 = vmatprep.subr.bf16.mxu1 %v21708_v35  ;;  %v4621_v30 = vadd.f32 %v22035_v20, %v19309_v52 }
 0x525   : > { %22033 = vst [vmem:[#allocation115_spill] sm:$0xff] %v19449_v57 }
 0x526   : > { %v4911_v22 = vpop.f32.mrf.mxu1  ;;  %v14936_v3 = vpop.f32.mrf.mxu0 }
 0x527   : > { %v19454_v61 = vadd.f32 %v4911_v22, %v4620_v18  ;;  %14796 = vmatpush3.bf16.msra.mxu1 %v15334_v60  ;;  %v22038_v60 = vld [vmem:[#allocation75_spill] sm:$0xff] }
 0x528   : > { %v14464_v6 = vpop.f32.mrf.mxu1  ;;  %v19456_v56 = vpop.f32.mrf.mxu0  ;;  %14877 = vmatprep.subr.bf16.mxu1 %v21708_v35  ;;  %v4622_v18 = vadd.f32 %v22038_v60, %v19317_v47 }
 0x529   : > { %22034 = vst [vmem:[#allocation93_spill] sm:$0xff] %v19456_v56 }
 0x52a   : > { %v4916_v14 = vpop.f32.mrf.mxu1  ;;  %14718 = vmatmul.mubr.msk.bf16.gmra.mxu1 %vm1446_vm2, %v22036_v0  ;;  %v14939_v28 = vpop.f32.mrf.mxu0  ;;  %v22040_v0 = vld [vmem:[#allocation45_spill] sm:$0xff] }
 0x52b   : > { %v19463_v57 = vadd.f32 %v4916_v14, %v4621_v30  ;;  %14721 = vmatprep.mubr.msk.bf16.mxu1 %vm15930_vm0, %v21708_v35  ;;  %v4623_v30 = vadd.f32 %v22040_v0, %v19325_v44  ;;  %v22041_v28 = vld [vmem:[#allocation55_spill] sm:$0xff] }
 0x52c   : > { %v14467_v36 = vpop.f32.mrf.mxu1  ;;  %v19467_v2 = vpop.f32.mrf.mxu0 }
 0x52d   : > { %22037 = vst [vmem:[#allocation116_spill] sm:$0xff] %v19467_v2 }
 0x52e   : > { %v4919_v22 = vpop.f32.mrf.mxu1  ;;  %v14940_v3 = vpop.f32.mrf.mxu0 }
 0x52f   : > { %v19471_v6 = vadd.f32 %v4919_v22, %v4622_v18  ;;  %v22043_v18 = vld [vmem:[#allocation60_spill] sm:$0xff] }
 0x530   : > { %v14468_v52 = vpop.f32.mrf.mxu1  ;;  %v19473_v20 = vpop.f32.mrf.mxu0  ;;  %v4624_v22 = vadd.f32 %v22043_v18, %v19333_v32 }
 0x531   : > { %22039 = vst [vmem:[#allocation117_spill] sm:$0xff] %v19473_v20 }
 0x532   : > { %v4924_v14 = vpop.f32.mrf.mxu1  ;;  %14722 = vmatmul.mubr.msk.bf16.gmra.mxu1 %vm1446_vm2, %v22041_v28  ;;  %v14943_v36 = vpop.f32.mrf.mxu0  ;;  %v22045_v28 = vld [vmem:[#allocation83_spill] sm:$0xff] }
 0x533   : > { %v19479_v56 = vadd.f32 %v4924_v14, %v4623_v30  ;;  %14725 = vmatprep.mubr.msk.bf16.mxu1 %vm15930_vm0, %v21708_v35  ;;  %v4625_v30 = vadd.f32 %v22045_v28, %v19341_v17  ;;  %v22046_v36 = vld [vmem:[#allocation70_spill] sm:$0xff] }
 0x534   : > { %v14471_v47 = vpop.f32.mrf.mxu1  ;;  %v19483_v60 = vpop.f32.mrf.mxu0 }
 0x535   : > { %22042 = vst [vmem:[#allocation89_spill] sm:$0xff] %v19483_v60  ;;  %v22072_v60 = vld [vmem:[#allocation36_spill] sm:$0xff] }
 0x536   : > { %v4927_v3 = vpop.f32.mrf.mxu1  ;;  %v14944_v52 = vpop.f32.mrf.mxu0 }
 0x537   : > { %v19487_v20 = vadd.f32 %v4927_v3, %v4624_v22  ;;  %v4626_v22 = vadd.f32 %v18397_v27, %v19349_v5 }
 0x538   : > { %v14472_v44 = vpop.f32.mrf.mxu1  ;;  %v19489_v0 = vpop.f32.mrf.mxu0 }
 0x539   : > { %22044 = vst [vmem:[#allocation118_spill] sm:$0xff] %v19489_v0 }
 0x53a   : > { %v4932_v14 = vpop.f32.mrf.mxu1  ;;  %14726 = vmatmul.mubr.msk.bf16.gmra.mxu1 %vm1446_vm2, %v22046_v36  ;;  %v14947_v47 = vpop.f32.mrf.mxu0  ;;  %v22049_v36 = vld [vmem:[#allocation86_spill] sm:$0xff] }
 0x53b   : > { %v19495_v2 = vadd.f32 %v4932_v14, %v4625_v30  ;;  %14729 = vmatprep.mubr.msk.bf16.mxu1 %vm15930_vm0, %v21708_v35  ;;  %v4627_v30 = vadd.f32 %v22049_v36, %v19357_v62  ;;  %v22050_v47 = vld [vmem:[#allocation82_spill] sm:$0xff]  ;;  %v22053_v62 = vld [vmem:[#allocation72_spill] sm:$0xff] }
 0x53c   : > { %v14475_v32 = vpop.f32.mrf.mxu1  ;;  %v19499_v18 = vpop.f32.mrf.mxu0  ;;  %v5153_v36 = vadd.f32 %v22053_v62, %v19369_v12 }
 0x53d   : > { %22047 = vst [vmem:[#allocation119_spill] sm:$0xff] %v19499_v18  ;;  %v22054_v18 = vld [vmem:[#allocation92_spill] sm:$0xff] }
 0x53e   : > { %v4935_v3 = vpop.f32.mrf.mxu1  ;;  %v14948_v52 = vpop.f32.mrf.mxu0 }
 0x53f   : > { %v19503_v44 = vadd.f32 %v4935_v3, %v4626_v22 }
 0x540   : > { %v14476_v17 = vpop.f32.mrf.mxu1  ;;  %v19505_v28 = vpop.f32.mrf.mxu0 }
 0x541   : > { %22048 = vst [vmem:[#allocation26_spill] sm:$0xff] %v19505_v28 }
 0x542   : > { %v4940_v14 = vpop.f32.mrf.mxu1  ;;  %14730 = vmatmul.mubr.msk.bf16.gmra.mxu1 %vm1446_vm2, %v22050_v47  ;;  %v14951_v32 = vpop.f32.mrf.mxu0 }
 0x543   : > { %v19511_v0 = vadd.f32 %v4940_v14, %v4627_v30  ;;  %14733 = vmatprep.mubr.msk.bf16.mxu1 %vm15930_vm0, %v21708_v35 }
 0x544   : > { %v14479_v27 = vpop.f32.mrf.mxu1  ;;  %v19515_v5 = vpop.f32.mrf.mxu0 }
 0x545   : > { %22051 = vst [vmem:[#allocation13_spill] sm:$0xff] %v19515_v5  ;;  %v22056_v27 = vld [vmem:[#allocation11_spill] sm:$0xff] }
 0x546   : > { %v4943_v22 = vpop.f32.mrf.mxu1  ;;  %v14952_v3 = vpop.f32.mrf.mxu0 }
 0x547   : > { %v5154_v22 = vadd.f32 %v22056_v27, %v19377_v11 }
 0x548   : > { %v14480_v52 = vpop.f32.mrf.mxu1  ;;  %v19517_v17 = vpop.f32.mrf.mxu0 }
 0x549   : > { %22052 = vst [vmem:[#allocation14_spill] sm:$0xff] %v19517_v17 }
 0x54a   : > { %v5318_v28 = vpop.f32.mrf.mxu1  ;;  %14734 = vmatmul.mubr.msk.bf16.gmra.mxu1 %vm1446_vm2, %v22054_v18  ;;  %v14955_v30 = vpop.f32.mrf.mxu0  ;;  %v22058_v18 = vld [vmem:[#allocation76_spill] sm:$0xff] }
 0x54b   : > { %v19523_v14 = vadd.f32 %v5318_v28, %v5153_v36  ;;  %14737 = vmatprep.mubr.msk.bf16.mxu1 %vm15930_vm0, %v21708_v35  ;;  %v5155_v28 = vadd.f32 %v22058_v18, %v19385_v26  ;;  %v22059_v30 = vld [vmem:[#allocation104_spill] sm:$0xff] }
 0x54c   : > { %v14535_v47 = vpop.f32.mrf.mxu1  ;;  %v19527_v32 = vpop.f32.mrf.mxu0 }
 0x54d   : > { %22055 = vst [vmem:[#allocation34_spill] sm:$0xff] %v19527_v32 }
 0x54e   : > { %v5321_v3 = vpop.f32.mrf.mxu1  ;;  %v14956_v52 = vpop.f32.mrf.mxu0 }
 0x54f   : > { %v19531_v17 = vadd.f32 %v5321_v3, %v5154_v22  ;;  %v22061_v22 = vld [vmem:[#allocation84_spill] sm:$0xff] }
 0x550   : > { %v14536_v12 = vpop.f32.mrf.mxu1  ;;  %v19533_v62 = vpop.f32.mrf.mxu0  ;;  %v5156_v3 = vadd.f32 %v22061_v22, %v19393_v15 }
 0x551   : > { %22057 = vst [vmem:[#allocation15_spill] sm:$0xff] %v19533_v62 }
 0x552   : > { %v5326_v36 = vpop.f32.mrf.mxu1  ;;  %14738 = vmatmul.mubr.msk.bf16.gmra.mxu1 %vm1446_vm2, %v22059_v30  ;;  %v14959_v47 = vpop.f32.mrf.mxu0  ;;  %v22063_v30 = vld [vmem:[#allocation16_spill] sm:$0xff] }
 0x553   : > { %v19539_v5 = vadd.f32 %v5326_v36, %v5155_v28  ;;  %14741 = vmatprep.mubr.msk.bf16.mxu1 %vm15930_vm0, %v21708_v35  ;;  %v5157_v28 = vadd.f32 %v22063_v30, %v19401_v46  ;;  %v22064_v47 = vld [vmem:[#allocation101_spill] sm:$0xff] }
 0x554   : > { %v14539_v11 = vpop.f32.mrf.mxu1  ;;  %v19543_v27 = vpop.f32.mrf.mxu0  ;;  %v22065_v32 = vrot.slane %v22064_v47, 2  ;;  %v15335_v46 = vld [vmem:[%s21574_s3 + $0x2b8] sm:$0xff]  }
 0x555   : > { %22060 = vst [vmem:[#allocation19_spill] sm:$0xff] %v19543_v27 }
 0x556   : > { %v5329_v52 = vpop.f32.mrf.mxu1  ;;  %v14960_v12 = vpop.f32.mrf.mxu0 }
 0x557   : > { %v19547_v62 = vadd.f32 %v5329_v52, %v5156_v3  ;;  %v22066_v3 = vld [vmem:[#allocation23_spill] sm:$0xff] }
 0x558   : > { %v14540_v26 = vpop.f32.mrf.mxu1  ;;  %v19549_v18 = vpop.f32.mrf.mxu0  ;;  %v5158_v52 = vadd.f32 %v22066_v3, %v19407_v45 }
 0x559   : > { %22062 = vst [vmem:[#allocation41_spill] sm:$0xff] %v19549_v18 }
 0x55a   : > { %v5334_v36 = vpop.f32.mrf.mxu1  ;;  %14742 = vmatmul.mubr.msk.bf16.gmra.mxu1 %vm1446_vm2, %v22065_v32  ;;  %v14963_v11 = vpop.f32.mrf.mxu0 }
 0x55b   : > { %v19556_v27 = vadd.f32 %v5334_v36, %v5157_v28  ;;  %14797 = vmatprep.mubr.msk.bf16.mxu1 %vm15930_vm0, %v21708_v35  ;;  %v22067_v28 = vld [vmem:[#allocation22_spill] sm:$0xff]  ;;  %v22068_v11 = vld [vmem:[#allocation28_spill] sm:$0xff] }
 0x55c   : > { %v14543_v15 = vpop.f32.mrf.mxu1  ;;  %v7552_v22 = vpop.f32.mrf.mxu0  ;;  %v5159_v36 = vadd.f32 %v22067_v28, %v19418_v41  ;;  %v22069_v41 = vld [vmem:[#allocation31_spill] sm:$0xff] }
 0x55d   : > { %v15336_v22 = vld [vmem:[%s21574_s3 + $0x2b0] sm:$0xff]  }
 0x55e   : > { %v5337_v12 = vpop.f32.mrf.mxu1  ;;  %v14964_v26 = vpop.f32.mrf.mxu0 }
 0x55f   : > { %v19562_v18 = vadd.f32 %v5337_v12, %v5158_v52  ;;  %v5160_v12 = vadd.f32 %v22069_v41, %v19430_v23 }
 0x560   : > { %v14544_v32 = vpop.f32.mrf.mxu1  ;;  %v19567_v30 = vpop.f32.mrf.mxu0 }
 0x562   : > { %v5342_v47 = vpop.f32.mrf.mxu1  ;;  %14798 = vmatmul.mubr.msk.bf16.vlgmr.msra.gmra.mxu1 %vm1446_vm2, %v22068_v11  ;;  %v15019_v15 = vpop.f32.mrf.mxu0  ;;  %v22071_v11 = vld [vmem:[#allocation39_spill] sm:$0xff] }
 0x563   : > { %v19573_v45 = vadd.f32 %v5342_v47, %v5159_v36  ;;  %14878 = vmatpush3.bf16.msra.mxu1 %v15335_v46  ;;  %14801 = vmatprep.mubr.msk.bf16.mxu1 %vm15930_vm0, %v21708_v35  ;;  %v15337_v46 = vld [vmem:[%s21574_s3 + $0x2a8] sm:$0xff]   ;;  %v5161_v15 = vadd.f32 %v22071_v11, %v19442_v49  ;;  %v22074_v49 = vld [vmem:[#allocation48_spill] sm:$0xff] }
 0x564   : > { %v14547_v3 = vpop.f32.mrf.mxu1  ;;  %v19580_v52 = vpop.f32.mrf.mxu0  ;;  %14879 = vmatprep.subr.bf16.mxu1 %v21708_v35 }
 0x566   : > { %v5345_v26 = vpop.f32.mrf.mxu1  ;;  %v15020_v32 = vpop.f32.mrf.mxu0 }
 0x567   : > { %v19585_v28 = vadd.f32 %v5345_v26, %v5160_v12  ;;  %14880 = vmatpush3.bf16.msra.mxu1 %v15336_v22  ;;  %v15338_v22 = vld [vmem:[%s21574_s3 + $0x2a0] sm:$0xff]   ;;  %v5162_v32 = vadd.f32 %v22074_v49, %v19454_v61 }
 0x568   : > { %v14548_v36 = vpop.f32.mrf.mxu1  ;;  %v19590_v47 = vpop.f32.mrf.mxu0  ;;  %14881 = vmatprep.subr.bf16.mxu1 %v21708_v35  ;;  %v22079_v49 = vld [vmem:[#allocation77_spill] sm:$0xff] }
 0x569   : > { %22070 = vst [vmem:[#allocation21_spill] sm:$0xff] %v19590_v47 }
 0x56a   : > { %v5350_v3 = vpop.f32.mrf.mxu1  ;;  %14802 = vmatmul.mubr.msk.bf16.gmra.mxu1 %vm1446_vm2, %v22072_v60  ;;  %v15023_v23 = vpop.f32.mrf.mxu0 }
 0x56b   : > { %v19597_v41 = vadd.f32 %v5350_v3, %v5161_v15  ;;  %14805 = vmatprep.mubr.msk.bf16.mxu1 %vm15930_vm0, %v21708_v35  ;;  %14882 = vmatpush3.bf16.msra.mxu1 %v15337_v46  ;;  %v22076_v46 = vld [vmem:[#allocation66_spill] sm:$0xff] }
 0x56c   : > { %v14551_v12 = vpop.f32.mrf.mxu1  ;;  %v19604_v26 = vpop.f32.mrf.mxu0  ;;  %14883 = vmatprep.subr.bf16.mxu1 %v21708_v35  ;;  %v5163_v23 = vadd.f32 %v22076_v46, %v19463_v57 }
 0x56d   : > { %22073 = vst [vmem:[#allocation20_spill] sm:$0xff] %v19604_v26  ;;  %v22077_v26 = vld [vmem:[#allocation44_spill] sm:$0xff] }
 0x56e   : > { %v5353_v60 = vpop.f32.mrf.mxu1  ;;  %v15024_v36 = vpop.f32.mrf.mxu0 }
 0x56f   : > { %v19609_v11 = vadd.f32 %v5353_v60, %v5162_v32  ;;  %14884 = vmatpush3.bf16.msra.mxu1 %v15338_v22  ;;  %v5164_v32 = vadd.f32 %v22079_v49, %v19471_v6 }
 0x570   : > { %v14552_v15 = vpop.f32.mrf.mxu1  ;;  %v19611_v3 = vpop.f32.mrf.mxu0  ;;  %14965 = vmatprep.subr.bf16.mxu1 %v21708_v35 }
 0x571   : > { %22075 = vst [vmem:[#allocation53_spill] sm:$0xff] %v19611_v3 }
 0x572   : > { %v5358_v12 = vpop.f32.mrf.mxu1  ;;  %14806 = vmatmul.mubr.msk.bf16.gmra.mxu1 %vm1446_vm2, %v22077_v26  ;;  %v15027_v47 = vpop.f32.mrf.mxu0 }
 0x573   : > { %v19618_v33 = vadd.f32 %v5358_v12, %v5163_v23  ;;  %14809 = vmatprep.mubr.msk.bf16.mxu1 %vm15930_vm0, %v21708_v35  ;;  %v22081_v47 = vld [vmem:[#allocation74_spill] sm:$0xff]  ;;  %v22082_v12 = vld [vmem:[#allocation56_spill] sm:$0xff] }
 0x574   : > { %v14555_v61 = vpop.f32.mrf.mxu1  ;;  %v19622_v22 = vpop.f32.mrf.mxu0  ;;  %v5165_v26 = vadd.f32 %v22081_v47, %v19479_v56 }
 0x575   : > { %22078 = vst [vmem:[#allocation30_spill] sm:$0xff] %v19622_v22 }
 0x576   : > { %v5361_v60 = vpop.f32.mrf.mxu1  ;;  %v15028_v36 = vpop.f32.mrf.mxu0 }
 0x577   : > { %v19626_v15 = vadd.f32 %v5361_v60, %v5164_v32  ;;  %v22084_v32 = vld [vmem:[#allocation10_spill] sm:$0xff] }
 0x578   : > { %v14556_v57 = vpop.f32.mrf.mxu1  ;;  %v19628_v46 = vpop.f32.mrf.mxu0  ;;  %v5166_v60 = vadd.f32 %v22084_v32, %v19487_v20 }
 0x579   : > { %22080 = vst [vmem:[#allocation69_spill] sm:$0xff] %v19628_v46 }
 0x57a   : > { %v5366_v23 = vpop.f32.mrf.mxu1  ;;  %14810 = vmatmul.mubr.msk.bf16.gmra.mxu1 %vm1446_vm2, %v22082_v12  ;;  %v15031_v61 = vpop.f32.mrf.mxu0  ;;  %v22086_v12 = vld [vmem:[#allocation12_spill] sm:$0xff] }
 0x57b   : > { %v19634_v3 = vadd.f32 %v5366_v23, %v5165_v26  ;;  %14813 = vmatprep.mubr.msk.bf16.mxu1 %vm15930_vm0, %v21708_v35  ;;  %v5167_v26 = vadd.f32 %v22086_v12, %v19495_v2  ;;  %v22087_v61 = vld [vmem:[#allocation71_spill] sm:$0xff] }
 0x57c   : > { %v14559_v6 = vpop.f32.mrf.mxu1  ;;  %v19638_v49 = vpop.f32.mrf.mxu0 }
 0x57d   : > { %22083 = vst [vmem:[#allocation29_spill] sm:$0xff] %v19638_v49 }
 0x57e   : > { %v5369_v36 = vpop.f32.mrf.mxu1  ;;  %v15032_v57 = vpop.f32.mrf.mxu0 }
 0x57f   : > { %v19642_v46 = vadd.f32 %v5369_v36, %v5166_v60  ;;  %v22088_v60 = vld [vmem:[#allocation120_spill] sm:$0xff] }
 0x580   : > { %v14560_v56 = vpop.f32.mrf.mxu1  ;;  %v19644_v47 = vpop.f32.mrf.mxu0  ;;  %v5168_v36 = vadd.f32 %v22088_v60, %v19503_v44 }
 0x581   : > { %22085 = vst [vmem:[#allocation78_spill] sm:$0xff] %v19644_v47 }
 0x582   : > { %v5374_v23 = vpop.f32.mrf.mxu1  ;;  %14814 = vmatmul.mubr.msk.bf16.gmra.mxu1 %vm1446_vm2, %v22087_v61  ;;  %v15035_v6 = vpop.f32.mrf.mxu0  ;;  %v22090_v61 = vld [vmem:[#allocation121_spill] sm:$0xff] }
 0x583   : > { %v19650_v22 = vadd.f32 %v5374_v23, %v5167_v26  ;;  %14817 = vmatprep.mubr.msk.bf16.mxu1 %vm15930_vm0, %v21708_v35  ;;  %v5169_v26 = vadd.f32 %v22090_v61, %v19511_v0  ;;  %v22091_v6 = vld [vmem:[#allocation85_spill] sm:$0xff]  ;;  %v5581_v0 = vadd.f32 %v18625_v53, %v19523_v14 }
 0x584   : > { %v14563_v20 = vpop.f32.mrf.mxu1  ;;  %v19654_v32 = vpop.f32.mrf.mxu0 }
 0x586   : > { %v5377_v57 = vpop.f32.mrf.mxu1  ;;  %v15036_v56 = vpop.f32.mrf.mxu0 }
 0x587   : > { %v19658_v47 = vadd.f32 %v5377_v57, %v5168_v36 }
 0x588   : > { %v14564_v2 = vpop.f32.mrf.mxu1  ;;  %v19660_v12 = vpop.f32.mrf.mxu0 }
 0x589   : > { %22089 = vst [vmem:[#allocation61_spill] sm:$0xff] %v19660_v12  ;;  %v22092_v12 = vld [vmem:[#allocation94_spill] sm:$0xff] }
 0x58a   : > { %v5382_v23 = vpop.f32.mrf.mxu1  ;;  %14818 = vmatmul.mubr.msk.bf16.gmra.mxu1 %vm1446_vm2, %v22091_v6  ;;  %v15039_v20 = vpop.f32.mrf.mxu0 }
 0x58b   : > { %v19666_v49 = vadd.f32 %v5382_v23, %v5169_v26  ;;  %14821 = vmatprep.mubr.msk.bf16.mxu1 %vm15930_vm0, %v21708_v35 }
 0x58c   : > { %v14567_v44 = vpop.f32.mrf.mxu1  ;;  %v19670_v60 = vpop.f32.mrf.mxu0 }
 0x58d   : > { %v5582_v44 = vadd.f32 %v18640_v31, %v19531_v17 }
 0x58e   : > { %v5385_v36 = vpop.f32.mrf.mxu1  ;;  %v15040_v57 = vpop.f32.mrf.mxu0 }
 0x590   : > { %v14568_v56 = vpop.f32.mrf.mxu1  ;;  %v19672_v2 = vpop.f32.mrf.mxu0 }
 0x592   : > { %v5773_v61 = vpop.f32.mrf.mxu1  ;;  %14822 = vmatmul.mubr.msk.bf16.gmra.mxu1 %vm1446_vm2, %v22092_v12  ;;  %v15043_v26 = vpop.f32.mrf.mxu0  ;;  %v5583_v12 = vadd.f32 %v18652_v42, %v19539_v5  ;;  %v7135_v42 = vshll.u32 %v18698_v51, 16 }
 0x593   : > { %v19678_v23 = vadd.f32 %v5773_v61, %v5581_v0  ;;  %14825 = vmatprep.mubr.msk.bf16.mxu1 %vm15930_vm0, %v21708_v35  ;;  %v22095_v61 = vld [vmem:[#allocation103_spill] sm:$0xff] }
 0x594   : > { %v14623_v6 = vpop.f32.mrf.mxu1  ;;  %v19682_v20 = vpop.f32.mrf.mxu0 }
 0x595   : > { %22093 = vst [vmem:[#allocation91_spill] sm:$0xff] %v19682_v20 }
 0x596   : > { %v5776_v36 = vpop.f32.mrf.mxu1  ;;  %v15044_v57 = vpop.f32.mrf.mxu0 }
 0x597   : > { %v19686_v56 = vadd.f32 %v5776_v36, %v5582_v44  ;;  %v5584_v44 = vadd.f32 %v18668_v7, %v19547_v62  ;;  %v7137_v7 = vrot.slane %v7135_v42, 1 }
 0x598   : > { %v14624_v53 = vpop.f32.mrf.mxu1  ;;  %v19688_v14 = vpop.f32.mrf.mxu0 }
 0x599   : > { %22094 = vst [vmem:[#allocation63_spill] sm:$0xff] %v19688_v14 }
 0x59a   : > { %v5781_v0 = vpop.f32.mrf.mxu1  ;;  %14826 = vmatmul.mubr.msk.bf16.gmra.mxu1 %vm1446_vm2, %v22095_v61  ;;  %v15047_v26 = vpop.f32.mrf.mxu0 }
 0x59b   : > { %v19694_v6 = vadd.f32 %v5781_v0, %v5583_v12  ;;  %14829 = vmatprep.mubr.msk.bf16.mxu1 %vm15930_vm0, %v21708_v35  ;;  %v5585_v12 = vadd.f32 %v18676_v34, %v19556_v27  ;;  %v22098_v26 = vld [vmem:[#allocation62_spill] sm:$0xff] }
 0x59c   : > { %v14627_v31 = vpop.f32.mrf.mxu1  ;;  %v19698_v17 = vpop.f32.mrf.mxu0 }
 0x59d   : > { %22096 = vst [vmem:[#allocation38_spill] sm:$0xff] %v19698_v17 }
 0x59e   : > { %v5784_v36 = vpop.f32.mrf.mxu1  ;;  %v15048_v57 = vpop.f32.mrf.mxu0 }
 0x59f   : > { %v19702_v53 = vadd.f32 %v5784_v36, %v5584_v44  ;;  %v22099_v36 = vld [vmem:[#allocation79_spill] sm:$0xff] }
 0x5a0   : > { %v14628_v5 = vpop.f32.mrf.mxu1  ;;  %v19705_v61 = vpop.f32.mrf.mxu0  ;;  %v5586_v57 = vadd.f32 %v22099_v36, %v19562_v18  ;;  %v22104_v36 = vld [vmem:[#allocation50_spill] sm:$0xff] }
 0x5a1   : > { %22097 = vst [vmem:[#allocation100_spill] sm:$0xff] %v19705_v61  ;;  %v7133_v5 = vshrl.u32 %v18698_v51, 16  ;;  %v22100_v61 = vld [vmem:[#allocation47_spill] sm:$0xff] }
 0x5a2   : > { %v5789_v0 = vpop.f32.mrf.mxu1  ;;  %14830 = vmatmul.mubr.msk.bf16.gmra.mxu1 %vm1446_vm2, %v22098_v26  ;;  %v15051_v31 = vpop.f32.mrf.mxu0  ;;  %v22101_v34 = vshll.u32 %v22100_v61, 16 }
 0x5a3   : > { %v19711_v17 = vadd.f32 %v5789_v0, %v5585_v12  ;;  %14885 = vmatprep.mubr.msk.bf16.mxu1 %vm15930_vm0, %v21708_v35  ;;  %v7138_v12 = vor.u32 %v7137_v7, %v7133_v5  ;;  %v15339_v0 = vld [vmem:[%s21574_s3 + $0x2f8] sm:$0xff]   ;;  %v22102_v31 = vld [vmem:[#allocation122_spill] sm:$0xff] }
 0x5a4   : > { %v14631_v62 = vpop.f32.mrf.mxu1  ;;  %v7988_v44 = vpop.f32.mrf.mxu0  ;;  %v7141_v27 = vrot.slane %v22101_v34, 1 }
 0x5a5   : > { %v5587_v62 = vadd.f32 %v22102_v31, %v19573_v45  ;;  %v22103_v45 = vld [vmem:[#allocation123_spill] sm:$0xff] }
 0x5a6   : > { %v5792_v14 = vpop.f32.mrf.mxu1  ;;  %v15052_v20 = vpop.f32.mrf.mxu0  ;;  %v7142_v18 = vsel %vm2151_vm15, %v7138_v12, %v7141_v27  ;;  %v5588_v7 = vadd.f32 %v22103_v45, %v19585_v28  ;;  %v15341_v31 = vld [vmem:[%s21574_s3 + $0x2e8] sm:$0xff]  }
 0x5a7   : > { %v19720_v26 = vadd.f32 %v5792_v14, %v5586_v57  ;;  %v15340_v20 = vld [vmem:[%s21574_s3 + $0x2f0] sm:$0xff]   ;;  %v22105_v57 = vshll.u32 %v22104_v36, 16 }
 0x5a8   : > { %v14632_v42 = vpop.f32.mrf.mxu1 }
 0x5a9   : > { %v7148_v5 = vrot.slane %v22105_v57, 1 }
 0x5aa   : > { %v5797_v44 = vpop.f32.mrf.mxu1  ;;  %14886 = vmatmul.mubr.msk.bf16.vlgmr.msra.gmra.mxu1 %vm1446_vm2, %v7142_v18  ;;  %v22107_v18 = vld [vmem:[#allocation124_spill] sm:$0xff] }
 0x5ab   : > { %v19729_v51 = vadd.f32 %v5797_v44, %v5587_v62  ;;  %14966 = vmatpush3.bf16.msra.mxu1 %v15339_v0  ;;  %14889 = vmatprep.mubr.msk.bf16.mxu1 %vm15930_vm0, %v21708_v35  ;;  %v22106_v0 = vshrl.u32 %v22100_v61, 16  ;;  %v5589_v28 = vadd.f32 %v22107_v18, %v19597_v41  ;;  %v15342_v61 = vld [vmem:[%s21574_s3 + $0x2e0] sm:$0xff]  }
 0x5ac   : > { %v14635_v14 = vpop.f32.mrf.mxu1  ;;  %14967 = vmatprep.subr.bf16.mxu1 %v21708_v35  ;;  %v22108_v41 = vld [vmem:[#allocation125_spill] sm:$0xff] }
 0x5ad   : > { %v7145_v42 = vor.u32 %v22106_v0, %v7141_v27 }
 0x5ae   : > { %v5800_v34 = vpop.f32.mrf.mxu1 }
 0x5af   : > { %v19741_v12 = vadd.f32 %v5800_v34, %v5588_v7  ;;  %14968 = vmatpush3.bf16.msra.mxu1 %v15340_v20  ;;  %v7149_v44 = vsel %vm2151_vm15, %v7145_v42, %v7148_v5  ;;  %v5590_v20 = vadd.f32 %v22108_v41, %v19609_v11  ;;  %v22109_v7 = vld [vmem:[#allocation51_spill] sm:$0xff] }
 0x5b0   : > { %v14636_v62 = vpop.f32.mrf.mxu1  ;;  %14969 = vmatprep.subr.bf16.mxu1 %v21708_v35  ;;  %v22110_v57 = vshll.u32 %v22109_v7, 16 }
 0x5b1   : > { %v22111_v62 = vshrl.u32 %v22104_v36, 16 }
 0x5b2   : > { %v5805_v14 = vpop.f32.mrf.mxu1  ;;  %14890 = vmatmul.mubr.msk.bf16.gmra.mxu1 %vm1446_vm2, %v7149_v44  ;;  %v7155_v34 = vrot.slane %v22110_v57, 1 }
 0x5b3   : > { %v19753_v45 = vadd.f32 %v5805_v14, %v5589_v28  ;;  %14893 = vmatprep.mubr.msk.bf16.mxu1 %vm15930_vm0, %v21708_v35  ;;  %14970 = vmatpush3.bf16.msra.mxu1 %v15341_v31  ;;  %v7152_v18 = vor.u32 %v22111_v62, %v7148_v5  ;;  %v22112_v28 = vld [vmem:[#allocation126_spill] sm:$0xff]  ;;  %v22114_v5 = vld [vmem:[#allocation87_spill] sm:$0xff] }
 0x5b4   : > { %v14639_v27 = vpop.f32.mrf.mxu1  ;;  %14971 = vmatprep.subr.bf16.mxu1 %v21708_v35  ;;  %v5591_v44 = vadd.f32 %v22112_v28, %v19618_v33  ;;  %v22116_v33 = vshrl.u32 %v22109_v7, 16  ;;  %v22117_v28 = vld [vmem:[#allocation128_spill] sm:$0xff] }
 0x5b5   : > { %v7156_v14 = vsel %vm2151_vm15, %v7152_v18, %v7155_v34  ;;  %v22119_v7 = vld [vmem:[#allocation88_spill] sm:$0xff] }
 0x5b6   : > { %v5808_v0 = vpop.f32.mrf.mxu1  ;;  %v7159_v18 = vor.u32 %v22116_v33, %v7155_v34  ;;  %v22120_v34 = vshll.u32 %v22119_v7, 16 }
 0x5b7   : > { %v19765_v42 = vadd.f32 %v5808_v0, %v5590_v20  ;;  %14972 = vmatpush3.bf16.msra.mxu1 %v15342_v61  ;;  %v22113_v20 = vld [vmem:[#allocation127_spill] sm:$0xff]  ;;  %v22115_v61 = vshll.u32 %v22114_v5, 16 }
 0x5b8   : > { %v14640_v31 = vpop.f32.mrf.mxu1  ;;  %v5592_v36 = vadd.f32 %v22113_v20, %v19626_v15  ;;  %v22118_v20 = vld [vmem:[#allocation129_spill] sm:$0xff] }
 0x5b9   : > { %v7162_v57 = vrot.slane %v22115_v61, 1  ;;  %v7169_v61 = vrot.slane %v22120_v34, 1 }
 0x5ba   : > { %v5813_v27 = vpop.f32.mrf.mxu1  ;;  %14894 = vmatmul.mubr.msk.bf16.gmra.mxu1 %vm1446_vm2, %v7156_v14 }
 0x5bb   : > { %v19773_v11 = vadd.f32 %v5813_v27, %v5591_v44  ;;  %14897 = vmatprep.mubr.msk.bf16.mxu1 %vm15930_vm0, %v21708_v35  ;;  %v5593_v44 = vadd.f32 %v22117_v28, %v19634_v3  ;;  %v7163_v14 = vsel %vm2151_vm15, %v7159_v18, %v7162_v57  ;;  %v22121_v3 = vshrl.u32 %v22114_v5, 16  ;;  %v22122_v28 = vld [vmem:[#allocation130_spill] sm:$0xff] }
 0x5bc   : > { %v14643_v41 = vpop.f32.mrf.mxu1  ;;  %v22124_v5 = vld [vmem:[#allocation90_spill] sm:$0xff] }
 0x5bd   : > { %v7166_v18 = vor.u32 %v22121_v3, %v7162_v57  ;;  %v22125_v57 = vshll.u32 %v22124_v5, 16 }
 0x5be   : > { %v5816_v0 = vpop.f32.mrf.mxu1 }
 0x5bf   : > { %v19781_v62 = vadd.f32 %v5816_v0, %v5592_v36  ;;  %v5594_v36 = vadd.f32 %v22118_v20, %v19642_v46  ;;  %v22123_v20 = vld [vmem:[#allocation131_spill] sm:$0xff]  ;;  %v7176_v34 = vrot.slane %v22125_v57, 1 }
 0x5c0   : > { %v14644_v31 = vpop.f32.mrf.mxu1 }
 0x5c2   : > { %v5821_v27 = vpop.f32.mrf.mxu1  ;;  %14898 = vmatmul.mubr.msk.bf16.gmra.mxu1 %vm1446_vm2, %v7163_v14  ;;  %v7170_v14 = vsel %vm2151_vm15, %v7166_v18, %v7169_v61 }
 0x5c3   : > { %v19789_v41 = vadd.f32 %v5821_v27, %v5593_v44  ;;  %14901 = vmatprep.mubr.msk.bf16.mxu1 %vm15930_vm0, %v21708_v35  ;;  %v5595_v44 = vadd.f32 %v22122_v28, %v19650_v22  ;;  %v22126_v22 = vshrl.u32 %v22119_v7, 16  ;;  %v22127_v28 = vld [vmem:[#allocation132_spill] sm:$0xff] }
 0x5c4   : > { %v14647_v15 = vpop.f32.mrf.mxu1 }
 0x5c5   : > { %v7173_v18 = vor.u32 %v22126_v22, %v7169_v61  ;;  %v22130_v61 = vshrl.u32 %v22124_v5, 16  ;;  %v22132_v5 = vld [vmem:[#allocation17_spill] sm:$0xff] }
 0x5c6   : > { %v5824_v0 = vpop.f32.mrf.mxu1 }
 0x5c7   : > { %v19797_v33 = vadd.f32 %v5824_v0, %v5594_v36  ;;  %v5596_v36 = vadd.f32 %v22123_v20, %v19658_v47  ;;  %v22128_v20 = vld [vmem:[#allocation102_spill] sm:$0xff] }
 0x5c8   : > { %v14648_v31 = vpop.f32.mrf.mxu1 }
 0x5ca   : > { %v5829_v27 = vpop.f32.mrf.mxu1  ;;  %14902 = vmatmul.mubr.msk.bf16.gmra.mxu1 %vm1446_vm2, %v7170_v14  ;;  %v7177_v14 = vsel %vm2151_vm15, %v7173_v18, %v7176_v34 }
 0x5cb   : > { %v19805_v15 = vadd.f32 %v5829_v27, %v5595_v44  ;;  %14905 = vmatprep.mubr.msk.bf16.mxu1 %vm15930_vm0, %v21708_v35  ;;  %v5597_v44 = vadd.f32 %v22127_v28, %v19666_v49  ;;  %v22131_v49 = vld [vmem:[#allocation133_spill] sm:$0xff]  ;;  %v7189_v28 = vshll.u32 %v19045_v8, 16 }
 0x5cc   : > { %v14651_v46 = vpop.f32.mrf.mxu1  ;;  %v6111_v18 = vadd.f32 %v22131_v49, %v19678_v23 }
 0x5cd   : > { %v7191_v23 = vrot.slane %v7189_v28, 1 }
 0x5ce   : > { %v5832_v0 = vpop.f32.mrf.mxu1 }
 0x5cf   : > { %v19813_v3 = vadd.f32 %v5832_v0, %v5596_v36  ;;  %v22129_v36 = vshll.u32 %v22128_v20, 16  ;;  %v7180_v0 = vor.u32 %v22130_v61, %v7176_v34  ;;  %v6112_v34 = vadd.f32 %v22132_v5, %v19686_v56 }
 0x5d0   : > { %v14652_v31 = vpop.f32.mrf.mxu1 }
 0x5d1   : > { %v7183_v57 = vrot.slane %v22129_v36, 1 }
 0x5d2   : > { %v5837_v27 = vpop.f32.mrf.mxu1  ;;  %14906 = vmatmul.mubr.msk.bf16.gmra.mxu1 %vm1446_vm2, %v7177_v14 }
 0x5d3   : > { %v19821_v46 = vadd.f32 %v5837_v27, %v5597_v44  ;;  %14909 = vmatprep.mubr.msk.bf16.mxu1 %vm15930_vm0, %v21708_v35  ;;  %v7184_v31 = vsel %vm2151_vm15, %v7180_v0, %v7183_v57 }
 0x5d4   : > { %v14655_v47 = vpop.f32.mrf.mxu1 }
 0x5d5   : > { %v22133_v47 = vshrl.u32 %v22128_v20, 16  ;;  %v7193_v20 = vshrl.u32 %v19045_v8, 16 }
 0x5d6   : > { %v5840_v7 = vpop.f32.mrf.mxu1 }
 0x5d7   : > { %v7187_v36 = vor.u32 %v22133_v47, %v7183_v57  ;;  %v22135_v57 = vld [vmem:[#allocation24_spill] sm:$0xff]  ;;  %v22136_v47 = vld [vmem:[#allocation135_spill] sm:$0xff] }
 0x5d8   : > { %v14656_v22 = vpop.f32.mrf.mxu1  ;;  %v6114_v28 = vadd.f32 %v22135_v57, %v19702_v53 }
 0x5d9   : > { %v22134_v22 = vld [vmem:[#allocation134_spill] sm:$0xff] }
 0x5da   : > { %v6244_v44 = vpop.f32.mrf.mxu1  ;;  %14910 = vmatmul.mubr.msk.bf16.gmra.mxu1 %vm1446_vm2, %v7184_v31  ;;  %v6113_v49 = vadd.f32 %v22134_v22, %v19694_v6  ;;  %v22137_v22 = vld [vmem:[#allocation32_spill] sm:$0xff] }
 0x5db   : > { %v19834_v14 = vadd.f32 %v6244_v44, %v6111_v18  ;;  %14913 = vmatprep.mubr.msk.bf16.mxu1 %vm15930_vm0, %v21708_v35  ;;  %v7192_v18 = vsel %vm2151_vm15, %v7187_v36, %v7191_v23  ;;  %v6115_v36 = vadd.f32 %v22136_v47, %v19711_v17  ;;  %v6116_v53 = vadd.f32 %v22137_v22, %v19720_v26  ;;  %vm8084_vm15 = vmand %vm1576_vm4, %vm8083_vm7 }
 0x5dc   : > { %v14711_v27 = vpop.f32.mrf.mxu1  ;;  %vm8198_vm4 = vsmask.f32 256  ;;  %vm22210_vm7 = vcmask 517120  }
 0x5de   : > { %v6247_v7 = vpop.f32.mrf.mxu1 }
 0x5df   : > { %v19842_v61 = vadd.f32 %v6247_v7, %v6112_v34  ;;  %v7195_v34 = vor.u32 %v7193_v20, %v7191_v23  ;;  %v22138_v23 = vld [vmem:[#allocation49_spill] sm:$0xff] }
 0x5e0   : > { %v14712_v0 = vpop.f32.mrf.mxu1  ;;  %v22139_v20 = vld [vmem:[#allocation57_spill] sm:$0xff] }
 0x5e2   : > { %v6252_v31 = vpop.f32.mrf.mxu1  ;;  %14914 = vmatmul.mubr.msk.bf16.gmra.mxu1 %vm1446_vm2, %v7192_v18 }
 0x5e3   : > { %v19848_v44 = vadd.f32 %v6252_v31, %v6113_v49  ;;  %14917 = vmatprep.mubr.msk.bf16.mxu1 %vm15930_vm0, %v21708_v35 }
 0x5e4   : > { %v14715_v56 = vpop.f32.mrf.mxu1 }
 0x5e5   : > { %v6117_v56 = vadd.f32 %v22138_v23, %v19729_v51 }
 0x5e6   : > { %v6255_v27 = vpop.f32.mrf.mxu1 }
 0x5e7   : > { %v19855_v5 = vadd.f32 %v6255_v27, %v6114_v28  ;;  %v22140_v27 = vld [vmem:[#allocation40_spill] sm:$0xff] }
 0x5e8   : > { %v14716_v6 = vpop.f32.mrf.mxu1  ;;  %v6118_v26 = vadd.f32 %v22140_v27, %v19741_v12 }
 0x5ea   : > { %v6260_v7 = vpop.f32.mrf.mxu1  ;;  %14918 = vmatmul.mubr.msk.bf16.gmra.mxu1 %vm1446_vm2, %v7195_v34 }
 0x5eb   : > { %v19860_v0 = vadd.f32 %v6260_v7, %v6115_v36  ;;  %14973 = vmatprep.mubr.msk.bf16.mxu1 %vm15930_vm0, %v21708_v35  ;;  %v22141_v36 = vld [vmem:[#allocation136_spill] sm:$0xff] }
 0x5ec   : > { %v14719_v8 = vpop.f32.mrf.mxu1  ;;  %v6119_v51 = vadd.f32 %v22141_v36, %v19753_v45 }
 0x5ed   : > { %v22142_v8 = vld [vmem:[#allocation58_spill] sm:$0xff] }
 0x5ee   : > { %v6263_v49 = vpop.f32.mrf.mxu1 }
 0x5ef   : > { %v19866_v18 = vadd.f32 %v6263_v49, %v6116_v53  ;;  %v22143_v49 = vld [vmem:[#allocation52_spill] sm:$0xff] }
 0x5f0   : > { %v14720_v31 = vpop.f32.mrf.mxu1  ;;  %v6120_v12 = vadd.f32 %v22143_v49, %v19765_v42  ;;  %v6122_v42 = vadd.f32 %v18977_v29, %v19781_v62  ;;  %v6124_v29 = vadd.f32 %v18994_v1, %v19797_v33  ;;  %v6126_v1 = vadd.f32 %v19015_v58, %v19813_v3 }
 0x5f1   : > { %v7627_v58 = vshll.u32 %v19247_v25, 16 }
 0x5f2   : > { %v6268_v17 = vpop.f32.mrf.mxu1  ;;  %14974 = vmatmul.mubr.msk.bf16.vlgmr.msra.gmra.mxu1 %vm1446_vm2, %v22139_v20 }
 0x5f3   : > { %v19872_v57 = vadd.f32 %v6268_v17, %v6117_v56  ;;  %14977 = vmatprep.mubr.msk.bf16.mxu1 %vm15930_vm0, %v21708_v35  ;;  %v22144_v17 = vld [vmem:[#allocation137_spill] sm:$0xff] }
 0x5f4   : > { %v14723_v28 = vpop.f32.mrf.mxu1  ;;  %v6121_v45 = vadd.f32 %v22144_v17, %v19773_v11  ;;  %v6123_v11 = vadd.f32 %v18980_v37, %v19789_v41  ;;  %v6125_v37 = vadd.f32 %v19001_v63, %v19805_v15  ;;  %v6127_v63 = vadd.f32 %v19022_v24, %v19821_v46 }
 0x5f5   : > { %v22145_v28 = vld [vmem:[#allocation59_spill] sm:$0xff]  ;;  %v7629_v46 = vrot.slane %v7627_v58, 2 }
 0x5f6   : > { %v6271_v6 = vpop.f32.mrf.mxu1 }
 0x5f7   : > { %v19878_v34 = vadd.f32 %v6271_v6, %v6118_v26 }
 0x5f8   : > { %v14724_v47 = vpop.f32.mrf.mxu1 }
 0x5fa   : > { %v6276_v7 = vpop.f32.mrf.mxu1  ;;  %14978 = vmatmul.mubr.msk.bf16.gmra.mxu1 %vm1446_vm2, %v22142_v8 }
 0x5fb   : > { %v19884_v22 = vadd.f32 %v6276_v7, %v6119_v51  ;;  %14981 = vmatprep.mubr.msk.bf16.mxu1 %vm15930_vm0, %v21708_v35  ;;  %v22146_v7 = vld [vmem:[#allocation95_spill] sm:$0xff] }
 0x5fc   : > { %v14727_v53 = vpop.f32.mrf.mxu1 }
 0x5fe   : > { %v6279_v31 = vpop.f32.mrf.mxu1 }
 0x5ff   : > { %v19890_v23 = vadd.f32 %v6279_v31, %v6120_v12  ;;  %v22147_v31 = vld [vmem:[#allocation98_spill] sm:$0xff] }
 0x600   : > { %v14728_v56 = vpop.f32.mrf.mxu1 }
 0x602   : > { %v6284_v20 = vpop.f32.mrf.mxu1  ;;  %14982 = vmatmul.mubr.msk.bf16.gmra.mxu1 %vm1446_vm2, %v22145_v28  ;;  %v22148_v28 = vld [vmem:[#allocation99_spill] sm:$0xff] }
 0x603   : > { %v19896_v27 = vadd.f32 %v6284_v20, %v6121_v45  ;;  %14985 = vmatprep.mubr.msk.bf16.mxu1 %vm15930_vm0, %v21708_v35 }
 0x604   : > { %v14731_v26 = vpop.f32.mrf.mxu1 }
 0x606   : > { %v6287_v6 = vpop.f32.mrf.mxu1 }
 0x607   : > { %v19902_v47 = vadd.f32 %v6287_v6, %v6122_v42  ;;  %v7624_v6 = vshrl.u32 %v19247_v25, 16  ;;  %v6651_v25 = vadd.f32 %v19064_v39, %v19842_v61  ;;  %v22152_v61 = vld [vmem:[#allocation80_spill] sm:$0xff] }
 0x608   : > { %v14732_v36 = vpop.f32.mrf.mxu1 }
 0x609   : > { %v7626_v24 = vrot.slane %v7624_v6, 1 }
 0x60a   : > { %v6292_v51 = vpop.f32.mrf.mxu1  ;;  %14986 = vmatmul.mubr.msk.bf16.gmra.mxu1 %vm1446_vm2, %v22146_v7  ;;  %v22149_v7 = vld [vmem:[#allocation106_spill] sm:$0xff] }
 0x60b   : > { %v19908_v8 = vadd.f32 %v6292_v51, %v6123_v11  ;;  %14989 = vmatprep.mubr.msk.bf16.mxu1 %vm15930_vm0, %v21708_v35  ;;  %v6650_v11 = vadd.f32 %v19047_v21, %v19834_v14  ;;  %v22150_v14 = vld [vmem:[#allocation67_spill] sm:$0xff] }
 0x60c   : > { %v14735_v53 = vpop.f32.mrf.mxu1 }
 0x60e   : > { %v6295_v62 = vpop.f32.mrf.mxu1 }
 0x60f   : > { %v19914_v49 = vadd.f32 %v6295_v62, %v6124_v29  ;;  %v7630_v62 = vor.u32 %v7629_v46, %v7626_v24  ;;  %v6656_v46 = vadd.f32 %v19122_v54, %v19872_v57  ;;  %v22156_v54 = vld [vmem:[#allocation25_spill] sm:$0xff] }
 0x610   : > { %v14736_v12 = vpop.f32.mrf.mxu1  ;;  %v6659_v57 = vadd.f32 %v22156_v54, %v19890_v23  ;;  %v22159_v23 = vld [vmem:[#allocation33_spill] sm:$0xff] }
 0x612   : > { %v6300_v41 = vpop.f32.mrf.mxu1  ;;  %14990 = vmatmul.mubr.msk.bf16.gmra.mxu1 %vm1446_vm2, %v22147_v31  ;;  %v22151_v31 = vld [vmem:[#allocation105_spill] sm:$0xff] }
 0x613   : > { %v19920_v56 = vadd.f32 %v6300_v41, %v6125_v37  ;;  %14993 = vmatprep.mubr.msk.bf16.mxu1 %vm15930_vm0, %v21708_v35  ;;  %v6652_v41 = vadd.f32 %v22150_v14, %v19848_v44  ;;  %v22153_v44 = vld [vmem:[#allocation96_spill] sm:$0xff] }
 0x614   : > { %v14739_v17 = vpop.f32.mrf.mxu1 }
 0x615   : > { %v7631_v17 = vsel %vm2748_vm5, %v22151_v31, %v7630_v62  ;;  %vm22187_vm5 = vmmov %vm21780_vm13 }
 0x616   : > { %v6303_v33 = vpop.f32.mrf.mxu1  ;;  %vm20181_vm6 = vmand %vm22187_vm5, %vm8198_vm4 }
 0x617   : > { %v19926_v45 = vadd.f32 %v6303_v33, %v6126_v1  ;;  %vm22199_vm13 = vmmov %vm22187_vm5  ;;  %vm8231_vm5 = vcmask 1040896  }
 0x618   : > { %v14740_v20 = vpop.f32.mrf.mxu1  ;;  %vm20465_vm14 = vmand %vm8231_vm5, %vm8198_vm4 }
 0x619   : > { %v6653_v20 = vadd.f32 %v22152_v61, %v19855_v5 }
 0x61a   : > { %v6308_v15 = vpop.f32.mrf.mxu1  ;;  %14994 = vmatmul.mubr.msk.bf16.gmra.mxu1 %vm1446_vm2, %v22148_v28 }
 0x61b   : > { %v19932_v26 = vadd.f32 %v6308_v15, %v6127_v63  ;;  %14997 = vmatprep.mubr.msk.bf16.mxu1 %vm15930_vm0, %v21708_v35 }
 0x61c   : > { %v14743_v42 = vpop.f32.mrf.mxu1 }
 0x61d   : > { %v6654_v42 = vadd.f32 %v22153_v44, %v19860_v0 }
 0x61e   : > { %v6311_v3 = vpop.f32.mrf.mxu1 }
 0x620   : > { %v14744_v36 = vpop.f32.mrf.mxu1 }
 0x621   : > { %v6655_v36 = vadd.f32 %v19115_v50, %v19866_v18  ;;  %v22155_v50 = vld [vmem:[#allocation107_spill] sm:$0xff] }
 0x622   : > { %v6785_v51 = vpop.f32.mrf.mxu1  ;;  %14998 = vmatmul.mubr.msk.bf16.gmra.mxu1 %vm1446_vm2, %v22149_v7  ;;  %v6658_v18 = vadd.f32 %v22155_v50, %v19884_v22  ;;  %v22158_v22 = vld [vmem:[#allocation109_spill] sm:$0xff] }
 0x623   : > { %v19942_v53 = vadd.f32 %v6785_v51, %v6650_v11  ;;  %15001 = vmatprep.mubr.msk.bf16.mxu1 %vm15930_vm0, %v21708_v35  ;;  %v6661_v44 = vadd.f32 %v22158_v22, %v19902_v47  ;;  %v22160_v47 = vld [vmem:[#allocation110_spill] sm:$0xff] }
 0x624   : > { %v14799_v29 = vpop.f32.mrf.mxu1 }
 0x625   : > { %v22154_v29 = vld [vmem:[#allocation18_spill] sm:$0xff] }
 0x626   : > { %v6788_v12 = vpop.f32.mrf.mxu1 }
 0x627   : > { %v19948_v37 = vadd.f32 %v6788_v12, %v6651_v25  ;;  %v6657_v25 = vadd.f32 %v22154_v29, %v19878_v34  ;;  %v22157_v34 = vld [vmem:[#allocation108_spill] sm:$0xff] }
 0x628   : > { %v14800_v21 = vpop.f32.mrf.mxu1  ;;  %v6660_v61 = vadd.f32 %v22157_v34, %v19896_v27  ;;  %v6663_v27 = vadd.f32 %v19195_v16, %v19914_v49  ;;  %v6666_v16 = vadd.f32 %v19223_v9, %v19932_v26  ;;  %v7102_v34 = vadd.f32 %v19249_v59, %v19942_v53  ;;  %v22162_v59 = vld [vmem:[#allocation42_spill] sm:$0xff] }
 0x62a   : > { %v6793_v1 = vpop.f32.mrf.mxu1  ;;  %15002 = vmatmul.mubr.msk.bf16.gmra.mxu1 %vm1446_vm2, %v7631_v17 }
 0x62b   : > { %v19955_v33 = vadd.f32 %v6793_v1, %v6652_v41  ;;  %15005 = vmatprep.mubr.msk.bf16.mxu1 %vm15930_vm0, %v21708_v35 }
 0x62c   : > { %v14803_v39 = vpop.f32.mrf.mxu1 }
 0x62d   : > { %v7104_v26 = vadd.f32 %v19277_v10, %v19955_v33 }
 0x62e   : > { %v6796_v63 = vpop.f32.mrf.mxu1 }
 0x62f   : > { %v19961_v15 = vadd.f32 %v6796_v63, %v6653_v20 }
 0x630   : > { %v14804_v28 = vpop.f32.mrf.mxu1 }
 0x631   : > { %v7105_v53 = vadd.f32 %v22162_v59, %v19961_v15  ;;  %v22164_v15 = vld [vmem:[#allocation113_spill] sm:$0xff] }
 0x632   : > { %v6801_v6 = vpop.f32.mrf.mxu1  ;;  %15006 = vmatmul.mubr.msk.bf16.gmra.mxu1 %vm1446_vm2, %v7630_v62 }
 0x633   : > { %v19966_v58 = vadd.f32 %v6801_v6, %v6654_v42 }
 0x634   : > { %v14807_v3 = vpop.f32.mrf.mxu1 }
 0x636   : > { %v6804_v11 = vpop.f32.mrf.mxu1 }
 0x637   : > { %v19970_v24 = vadd.f32 %v6804_v11, %v6655_v36  ;;  %v6662_v36 = vadd.f32 %v22159_v23, %v19908_v8  ;;  %v22161_v8 = vld [vmem:[#allocation111_spill] sm:$0xff] }
 0x638   : > { %v14808_v5 = vpop.f32.mrf.mxu1 }
 0x639   : > { %v7107_v10 = vadd.f32 %v19313_v4, %v19970_v24  ;;  %v22165_v4 = vld [vmem:[#allocation54_spill] sm:$0xff] }
 0x63a   : > { %v6809_v51 = vpop.f32.mrf.mxu1 }
 0x63b   : > { %v19974_v7 = vadd.f32 %v6809_v51, %v6656_v46 }
 0x63c   : > { %v14811_v0 = vpop.f32.mrf.mxu1 }
 0x63e   : > { %v6812_v62 = vpop.f32.mrf.mxu1 }
 0x63f   : > { %v19978_v12 = vadd.f32 %v6812_v62, %v6657_v25  ;;  %v6664_v25 = vadd.f32 %v22160_v47, %v19920_v56 }
 0x640   : > { %v14812_v21 = vpop.f32.mrf.mxu1 }
 0x642   : > { %v6817_v14 = vpop.f32.mrf.mxu1 }
 0x643   : > { %v19982_v41 = vadd.f32 %v6817_v14, %v6658_v18  ;;  %v6665_v18 = vadd.f32 %v22161_v8, %v19926_v45 }
 0x644   : > { %v14815_v31 = vpop.f32.mrf.mxu1 }
 0x645   : > { %v7110_v24 = vadd.f32 %v22165_v4, %v19982_v41  ;;  %v22168_v41 = vld [vmem:[#allocation68_spill] sm:$0xff] }
 0x646   : > { %v6820_v17 = vpop.f32.mrf.mxu1 }
 0x647   : > { %v19986_v1 = vadd.f32 %v6820_v17, %v6659_v57 }
 0x648   : > { %v14816_v39 = vpop.f32.mrf.mxu1 }
 0x64a   : > { %v6825_v20 = vpop.f32.mrf.mxu1 }
 0x64b   : > { %v19990_v63 = vadd.f32 %v6825_v20, %v6660_v61 }
 0x64c   : > { %v14819_v28 = vpop.f32.mrf.mxu1 }
 0x64d   : > { %v7103_v28 = vadd.f32 %v19266_v40, %v19948_v37  ;;  %v22163_v40 = vld [vmem:[#allocation112_spill] sm:$0xff] }
 0x64e   : > { %v6828_v42 = vpop.f32.mrf.mxu1  ;;  %v7106_v37 = vadd.f32 %v22163_v40, %v19966_v58  ;;  %v7109_v58 = vadd.f32 %v19329_v55, %v19978_v12  ;;  %v22167_v55 = vld [vmem:[#allocation64_spill] sm:$0xff] }
 0x64f   : > { %v19994_v6 = vadd.f32 %v6828_v42, %v6661_v44  ;;  %v7112_v12 = vadd.f32 %v22167_v55, %v19990_v63  ;;  %v15343_v63 = vld [vmem:[%s21576_s5 + $0xa8] ss:$12 sps:$4 sm:$0xff]  }
 0x650   : > { %v14820_v3 = vpop.f32.mrf.mxu1 }
 0x652   : > { %v6833_v11 = vpop.f32.mrf.mxu1 }
 0x653   : > { %v19998_v5 = vadd.f32 %v6833_v11, %v6662_v36 }
 0x654   : > { %v14823_v46 = vpop.f32.mrf.mxu1 }
 0x656   : > { %v6836_v51 = vpop.f32.mrf.mxu1 }
 0x657   : > { %v20002_v0 = vadd.f32 %v6836_v51, %v6663_v27 }
 0x658   : > { %v14824_v29 = vpop.f32.mrf.mxu1 }
 0x65a   : > { %v6841_v62 = vpop.f32.mrf.mxu1 }
 0x65b   : > { %v20006_v21 = vadd.f32 %v6841_v62, %v6664_v25  ;;  %v7108_v62 = vadd.f32 %v22164_v15, %v19974_v7  ;;  %v22166_v7 = vld [vmem:[#allocation114_spill] sm:$0xff] }
 0x65c   : > { %v14827_v50 = vpop.f32.mrf.mxu1 }
 0x65e   : > { %v6844_v14 = vpop.f32.mrf.mxu1 }
 0x65f   : > { %v20010_v31 = vadd.f32 %v6844_v14, %v6665_v18 }
 0x660   : > { %v14828_v54 = vpop.f32.mrf.mxu1 }
 0x662   : > { %v6849_v49 = vpop.f32.mrf.mxu1 }
 0x663   : > { %v20014_v57 = vadd.f32 %v6849_v49, %v6666_v16 }
 0x664   : > { %v14831_v17 = vpop.f32.mrf.mxu1 }
 0x666   : > { %v6852_v39 = vpop.f32.mrf.mxu1 }
 0x668   : > { %v14832_v56 = vpop.f32.mrf.mxu1 }
 0x669   : > { %v7111_v56 = vadd.f32 %v22166_v7, %v19986_v1  ;;  %v22169_v1 = vld [vmem:[#allocation46_spill] sm:$0xff] }
 0x66a   : > { %v7281_v61 = vpop.f32.mrf.mxu1 }
 0x66b   : > { %v20018_v20 = vadd.f32 %v7281_v61, %v7102_v34 }
 0x66c   : > { %v14887_v45 = vpop.f32.mrf.mxu1 }
 0x66e   : > { %v7284_v22 = vpop.f32.mrf.mxu1 }
 0x66f   : > { %v20022_v44 = vadd.f32 %v7284_v22, %v7103_v28 }
 0x670   : > { %v14888_v9 = vpop.f32.mrf.mxu1 }
 0x672   : > { %v7289_v42 = vpop.f32.mrf.mxu1 }
 0x673   : > { %v20026_v3 = vadd.f32 %v7289_v42, %v7104_v26  ;;  %v7113_v26 = vadd.f32 %v22168_v41, %v19994_v6  ;;  %v7115_v6 = vadd.f32 %v19373_v48, %v20002_v0  ;;  %v7118_v0 = vadd.f32 %v19395_v13, %v20014_v57 }
 0x674   : > { %v14891_v23 = vpop.f32.mrf.mxu1  ;;  %v7557_v13 = vadd.f32 %v19425_v19, %v20022_v44  ;;  %v22172_v19 = vld [vmem:[#allocation21_spill] sm:$0xff] }
 0x676   : > { %v7292_v36 = vpop.f32.mrf.mxu1 }
 0x677   : > { %v20030_v11 = vadd.f32 %v7292_v36, %v7105_v53  ;;  %v7114_v53 = vadd.f32 %v22169_v1, %v19998_v5 }
 0x678   : > { %v14892_v46 = vpop.f32.mrf.mxu1 }
 0x67a   : > { %v7297_v27 = vpop.f32.mrf.mxu1 }
 0x67b   : > { %v20034_v51 = vadd.f32 %v7297_v27, %v7106_v37  ;;  %v15345_v37 = vld [vmem:[%s21576_s5 + $0xac] ss:$12 sps:$4 sm:$0xff]  }
 0x67c   : > { %v14895_v29 = vpop.f32.mrf.mxu1  ;;  %10873 = vmatprep.subr.bf16.mxu1 %v15345_v37 }
 0x67d   : > { %10874 = vmatpush1.bf16.msra.mxu1 %v15343_v63  ;;  %v22174_v63 = vld [vmem:[#allocation20_spill] sm:$0xff] }
 0x67e   : > { %v7300_v33 = vpop.f32.mrf.mxu1 }
 0x67f   : > { %v20038_v47 = vadd.f32 %v7300_v33, %v7107_v10  ;;  %v22170_v10 = vld [vmem:[#allocation81_spill] sm:$0xff] }
 0x680   : > { %v14896_v25 = vpop.f32.mrf.mxu1  ;;  %v7116_v33 = vadd.f32 %v22170_v10, %v20006_v21 }
 0x682   : > { %v7305_v50 = vpop.f32.mrf.mxu1 }
 0x683   : > { %v20042_v8 = vadd.f32 %v7305_v50, %v7108_v62  ;;  %v7117_v50 = vadd.f32 %v19389_v38, %v20010_v31  ;;  %v20095_v38 = vld [vmem:[%s21575_s4] ss:$0 sm:$0xff] }
 0x684   : > { %v14899_v18 = vpop.f32.mrf.mxu1 }
 0x686   : > { %v7308_v14 = vpop.f32.mrf.mxu1 }
 0x687   : > { %v20046_v54 = vadd.f32 %v7308_v14, %v7109_v58 }
 0x688   : > { %v14900_v16 = vpop.f32.mrf.mxu1 }
 0x68a   : > { %v7313_v49 = vpop.f32.mrf.mxu1 }
 0x68b   : > { %v20050_v17 = vadd.f32 %v7313_v49, %v7110_v24  ;;  %v7556_v49 = vadd.f32 %v19412_v43, %v20018_v20  ;;  %v22171_v20 = vld [vmem:[#allocation65_spill] sm:$0xff] }
 0x68c   : > { %v14903_v39 = vpop.f32.mrf.mxu1 }
 0x68e   : > { %v7316_v34 = vpop.f32.mrf.mxu1 }
 0x68f   : > { %v20054_v61 = vadd.f32 %v7316_v34, %v7111_v56 }
 0x690   : > { %v14904_v45 = vpop.f32.mrf.mxu1 }
 0x692   : > { %v7321_v28 = vpop.f32.mrf.mxu1 }
 0x693   : > { %v20058_v22 = vadd.f32 %v7321_v28, %v7112_v12  ;;  %v7558_v28 = vadd.f32 %v22171_v20, %v20026_v3 }
 0x694   : > { %v14907_v9 = vpop.f32.mrf.mxu1 }
 0x696   : > { %v7324_v42 = vpop.f32.mrf.mxu1 }
 0x697   : > { %v20062_v23 = vadd.f32 %v7324_v42, %v7113_v26 }
 0x698   : > { %v14908_v59 = vpop.f32.mrf.mxu1 }
 0x699   : > { %v22173_v59 = vld [vmem:[#allocation115_spill] sm:$0xff] }
 0x69a   : > { %v7329_v36 = vpop.f32.mrf.mxu1  ;;  %v7559_v1 = vadd.f32 %v22173_v59, %v20030_v11  ;;  %v8219_v59 = vlaneseq }
 0x69b   : > { %v20066_v46 = vadd.f32 %v7329_v36, %v7114_v53 }
 0x69c   : > { %v14911_v40 = vpop.f32.mrf.mxu1 }
 0x69e   : > { %v7332_v27 = vpop.f32.mrf.mxu1 }
 0x69f   : > { %v20076_v29 = vadd.f32 %v7332_v27, %v7115_v6  ;;  %v22175_v6 = vld [vmem:[#allocation93_spill] sm:$0xff] }
 0x6a0   : > { %v14912_v5 = vpop.f32.mrf.mxu1  ;;  %v7560_v27 = vadd.f32 %v22175_v6, %v20034_v51 }
 0x6a2   : > { %v7337_v25 = vpop.f32.mrf.mxu1 }
 0x6a3   : > { %v20080_v15 = vadd.f32 %v7337_v25, %v7116_v33 }
 0x6a4   : > { %v14915_v62 = vpop.f32.mrf.mxu1 }
 0x6a5   : > { %v22176_v62 = vld [vmem:[#allocation53_spill] sm:$0xff] }
 0x6a6   : > { %v7340_v18 = vpop.f32.mrf.mxu1 }
 0x6a7   : > { %v20084_v58 = vadd.f32 %v7340_v18, %v7117_v50  ;;  %v22177_v18 = vld [vmem:[#allocation116_spill] sm:$0xff] }
 0x6a8   : > { %v14916_v48 = vpop.f32.mrf.mxu1 }
 0x6a9   : > { %v7561_v48 = vadd.f32 %v22177_v18, %v20038_v47 }
 0x6aa   : > { %v7345_v14 = vpop.f32.mrf.mxu1 }
 0x6ab   : > { %v20088_v16 = vadd.f32 %v7345_v14, %v7118_v0 }
 0x6ac   : > { %v14919_v4 = vpop.f32.mrf.mxu1 }
 0x6ae   : > { %v7348_v24 = vpop.f32.mrf.mxu1 }
 0x6b0   : > { %v14920_v21 = vpop.f32.mrf.mxu1 }
 0x6b2   : > { %v7717_v39 = vpop.f32.mrf.mxu1 }
 0x6b3   : > { %v7788_v7 = vadd.f32 %v7717_v39, %v7556_v49  ;;  %v22178_v39 = vld [vmem:[#allocation30_spill] sm:$0xff] }
 0x6b4   : > { %v14975_v31 = vpop.f32.mrf.mxu1 }
 0x6b5   : > { %v7992_v56 = vadd.f32 %v19567_v30, %v7788_v7  ;;  %v22179_v31 = vld [vmem:[#allocation117_spill] sm:$0xff] }
 0x6b6   : > { %v7720_v57 = vpop.f32.mrf.mxu1 }
 0x6b7   : > { %v8017_v34 = vadd.f32 %v20095_v38, %v7992_v56  ;;  %v7789_v45 = vadd.f32 %v7720_v57, %v7557_v13  ;;  %v7562_v56 = vadd.f32 %v22179_v31, %v20042_v8  ;;  %v8085_v8 = vld [vmem:[#allocation5] sm:$0x7] }
 0x6b8   : > { %v14976_v55 = vpop.f32.mrf.mxu1 }
 0x6b9   : > { %v8035_v12 = vmax.f32 %v8017_v34, 0.0  ;;  %v7993_v43 = vadd.f32 %v19580_v52, %v7789_v45 }
 0x6ba   : > { %v7725_v9 = vpop.f32.mrf.mxu1 }
 0x6bb   : > { %8053 = vst.msk [vmem:[#allocation4] sm:$0xff] %vm1446_vm2, %v8035_v12  ;;  %v8018_v41 = vadd.f32 %v20095_v38, %v7993_v43  ;;  %v7790_v30 = vadd.f32 %v7725_v9, %v7558_v28  ;;  %v22180_v28 = vld [vmem:[#allocation69_spill] sm:$0xff] }
 0x6bc   : > { %v14979_v26 = vpop.f32.mrf.mxu1 }
 0x6bd   : > { %v8036_v42 = vmax.f32 %v8018_v41, 0.0  ;;  %v7994_v44 = vadd.f32 %v22172_v19, %v7790_v30  ;;  %v22181_v41 = vld [vmem:[#allocation89_spill] sm:$0xff]  ;;  %v15932_v19 = vmov 1966171168  }
 0x6be   : > { %v7728_v53 = vpop.f32.mrf.mxu1  ;;  %v7563_v30 = vadd.f32 %v22181_v41, %v20046_v54  ;;  %v22183_v54 = vld [vmem:[#allocation118_spill] sm:$0xff] }
 0x6bf   : > { %8054 = vst.msk [vmem:[#allocation4 + $0x8] sm:$0xff] %vm1446_vm2, %v8036_v42  ;;  %v8019_v52 = vadd.f32 %v20095_v38, %v7994_v44  ;;  %v7791_v36 = vadd.f32 %v7728_v53, %v7559_v1  ;;  %v8217_v44 = vunpack.c.l.s4 %v15932_v19 }
 0x6c0   : > { %v14980_v3 = vpop.f32.mrf.mxu1 }
 0x6c1   : > { %v8037_v40 = vmax.f32 %v8019_v52, 0.0  ;;  %v7995_v37 = vadd.f32 %v22174_v63, %v7791_v36 }
 0x6c2   : > { %v7733_v5 = vpop.f32.mrf.mxu1 }
 0x6c3   : > { %8055 = vst.msk [vmem:[#allocation4 + $0x10] sm:$0xff] %vm1446_vm2, %v8037_v40  ;;  %v8020_v10 = vadd.f32 %v20095_v38, %v7995_v37  ;;  %v7792_v33 = vadd.f32 %v7733_v5, %v7560_v27  ;;  %v22182_v40 = vld [vmem:[#allocation29_spill] sm:$0xff]  ;;  %v7564_v37 = vadd.f32 %v22183_v54, %v20050_v17  ;;  %v8218_v5 = vunpack.c.0.s8 %v8217_v44 }
 0x6c4   : > { %v14983_v11 = vpop.f32.mrf.mxu1 }
 0x6c5   : > { %v8038_v25 = vmax.f32 %v8020_v10, 0.0  ;;  %v7996_v50 = vadd.f32 %v22176_v62, %v7792_v33  ;;  %v20136_v10 = vshrl.u32 %v8219_v59, 7  ;;  %v15348_v62 = vld [vmem:[%s21576_s5 + $0x94] ss:$12 sps:$4 sm:$0xff]   ;;  %v15358_v59 = vld [vmem:[%s21576_s5 + $0x210] ss:$12 sps:$4 sm:$0xff]  }
 0x6c6   : > { %v7736_v0 = vpop.f32.mrf.mxu1  ;;  %v8071_v51 = vld [vmem:[#allocation4] ss:$2 sm:$0x1f]  ;;  %v8073_v24 = vld [vmem:[#allocation4 + $0x1] ss:$2 sm:$0x1f]  ;;  %10875 = vmatprep.subr.bf16.mxu1 %v15348_v62 }
 0x6c7   : > { %8056 = vst.msk [vmem:[#allocation4 + $0x18] sm:$0xff] %vm1446_vm2, %v8038_v25  ;;  %v8021_v14 = vadd.f32 %v20095_v38, %v7996_v50  ;;  %v7793_v4 = vadd.f32 %v7736_v0, %v7561_v48  ;;  %v8074_v47 = vmax.f32 %v8071_v51, %v8073_v24  ;;  %v15346_v25 = vld [vmem:[%s21576_s5 + $0x90] ss:$12 sps:$4 sm:$0xff]   ;;  %v22184_v0 = vld [vmem:[#allocation78_spill] sm:$0xff] }
 0x6c8   : > { %v14984_v21 = vpop.f32.mrf.mxu1  ;;  %10876 = vmatpush1.bf16.msra.mxu1 %v15346_v25  ;;  %v15361_v62 = vld [vmem:[%s21576_s5 + $0x48] ss:$12 sps:$4 sm:$0xff]  }
 0x6c9   : > { %v8039_v49 = vmax.f32 %v8021_v14, 0.0  ;;  %v7997_v7 = vadd.f32 %v22178_v39, %v7793_v4  ;;  %v22185_v4 = vld [vmem:[#allocation119_spill] sm:$0xff]  ;;  %v20150_v21 = vsub.s32 %v8218_v5, %v20136_v10 }
 0x6ca   : > { %v8076_v13 = vld [vmem:[#allocation4 + $0xe] ss:$2 sm:$0x1f]  ;;  %v8078_v57 = vld [vmem:[#allocation4 + $0xf] ss:$2 sm:$0x1f]  ;;  %v7741_v34 = vpop.f32.mrf.mxu1  ;;  %v7565_v51 = vadd.f32 %v22185_v4, %v20054_v61 }
 0x6cb   : > { %v8079_v45 = vmax.f32 %v8076_v13, %v8078_v57  ;;  %8057 = vst.msk [vmem:[#allocation4 + $0x20] sm:$0xff] %vm1446_vm2, %v8039_v49  ;;  %v8022_v55 = vadd.f32 %v20095_v38, %v7997_v7  ;;  %v7794_v12 = vadd.f32 %v7741_v34, %v7562_v56  ;;  %v15349_v49 = vld [vmem:[%s21576_s5 + $0x78] ss:$12 sps:$4 sm:$0xff]   ;;  %v15351_v39 = vld [vmem:[%s21576_s5 + $0x7c] ss:$12 sps:$4 sm:$0xff]  }
 0x6cc   : > { %v14987_v43 = vpop.f32.mrf.mxu1  ;;  %v15352_v7 = vld [vmem:[%s21576_s5 + $0x228] ss:$12 sps:$4 sm:$0xff]   ;;  %v15354_v56 = vld [vmem:[%s21576_s5 + $0x22c] ss:$12 sps:$4 sm:$0xff]   ;;  %v15357_v13 = vld [vmem:[%s21576_s5 + $0x64] ss:$12 sps:$4 sm:$0xff]   ;;  %10877 = vmatprep.subr.bf16.mxu1 %v15351_v39 }
 0x6cd   : > { %v8040_v20 = vmax.f32 %v8022_v55, 0.0  ;;  %v7998_v9 = vadd.f32 %v22180_v28, %v7794_v12  ;;  %v8080_v26 = vmax.f32 %v8074_v47, %v8079_v45  ;;  %v8204_v34 = vld [vmem:[#allocation6] sm:$0x1]  ;;  %v15355_v47 = vld [vmem:[%s21576_s5 + $0x60] ss:$12 sps:$4 sm:$0xff]   ;;  %10914 = vmatprep.subr.bf16.mxu0 %v15354_v56  ;;  %10878 = vmatpush1.bf16.msra.mxu1 %v15349_v49 }
 0x6ce   : > { %v7744_v42 = vpop.f32.mrf.mxu1  ;;  %v15360_v45 = vld [vmem:[%s21576_s5 + $0x214] ss:$12 sps:$4 sm:$0xff]   ;;  %10915 = vmatpush1.bf16.msra.mxu0 %v15352_v7  ;;  %10879 = vmatprep.subr.bf16.mxu1 %v15357_v13  ;;  %v15369_v39 = vld [vmem:[%s21576_s5 + $0x1e4] ss:$12 sps:$4 sm:$0xff]  }
 0x6cf   : > { %8058 = vst.msk [vmem:[#allocation4 + $0x28] sm:$0xff] %vm1446_vm2, %v8040_v20  ;;  %v8023_v1 = vadd.f32 %v20095_v38, %v7998_v9  ;;  %v7795_v53 = vadd.f32 %v7744_v42, %v7563_v30  ;;  %v8081_v52 = vpack.c.bf16 %v8080_v26, %v8080_v26  ;;  %v22186_v43 = vld [vmem:[#allocation26_spill] sm:$0xff]  ;;  %10916 = vmatprep.subr.bf16.mxu0 %v15360_v45 }
 0x6d0   : > { %v14988_v36 = vpop.f32.mrf.mxu1  ;;  %v7566_v20 = vadd.f32 %v22186_v43, %v20058_v22  ;;  %v22192_v4 = vld [vmem:[#allocation14_spill] sm:$0xff] }
 0x6d1   : > { %v8041_v3 = vmax.f32 %v8023_v1, 0.0  ;;  %v7999_v63 = vadd.f32 %v22182_v40, %v7795_v53  ;;  %v8086_v6 = vsel %vm8084_vm15, %v8081_v52, %v8085_v8  ;;  %v22190_v53 = vld [vmem:[#allocation13_spill] sm:$0xff]  ;;  %10880 = vmatpush1.bf16.msra.mxu1 %v15355_v47  ;;  %vm22211_vm15 = vmmov %vm22194_vm12 }
 0x6d2   : > { %v7749_v27 = vpop.f32.mrf.mxu1  ;;  %8087 = vst [vmem:[#allocation5] sm:$0x7] %v8086_v6  ;;  %v8089_v50 = vld [vmem:[#allocation4 + $0x1c] ss:$2 sm:$0x1f]  ;;  %v7567_v52 = vadd.f32 %v22190_v53, %v20062_v23  ;;  %v22191_v6 = vld [vmem:[#allocation61_spill] sm:$0xff]  ;;  %10917 = vmatpush1.bf16.msra.mxu0 %v15358_v59 }
 0x6d3   : > { %8059 = vst.msk [vmem:[#allocation4 + $0x30] sm:$0xff] %vm1446_vm2, %v8041_v3  ;;  %v8024_v33 = vadd.f32 %v20095_v38, %v7999_v63  ;;  %v7796_v11 = vadd.f32 %v7749_v27, %v7564_v37  ;;  %v8091_v18 = vld [vmem:[#allocation4 + $0x1d] ss:$2 sm:$0x1f] }
 0x6d4   : > { %v14991_v17 = vpop.f32.mrf.mxu1  ;;  %v8092_v9 = vmax.f32 %v8089_v50, %v8091_v18  ;;  %v15363_v63 = vld [vmem:[%s21576_s5 + $0x4c] ss:$12 sps:$4 sm:$0xff]  }
 0x6d5   : > { %v8042_v48 = vmax.f32 %v8024_v33, 0.0  ;;  %v8000_v14 = vadd.f32 %v22184_v0, %v7796_v11  ;;  %v8254_v33 = vld [vmem:[#allocation6 + $0x1] sm:$0x1]  ;;  %v15366_v11 = vld [vmem:[%s21576_s5 + $0x1fc] ss:$12 sps:$4 sm:$0xff]   ;;  %10881 = vmatprep.subr.bf16.mxu1 %v15363_v63 }
 0x6d6   : > { %v7752_v24 = vpop.f32.mrf.mxu1  ;;  %v15372_v0 = vld [vmem:[%s21576_s5 + $0x34] ss:$12 sps:$4 sm:$0xff]   ;;  %10918 = vmatprep.subr.bf16.mxu0 %v15366_v11  ;;  %10882 = vmatpush1.bf16.msra.mxu1 %v15361_v62 }
 0x6d7   : > { %8060 = vst.msk [vmem:[#allocation4 + $0x38] sm:$0xff] %vm1446_vm2, %v8042_v48  ;;  %v8025_v61 = vadd.f32 %v20095_v38, %v8000_v14  ;;  %v7797_v31 = vadd.f32 %v7752_v24, %v7565_v51  ;;  %v15364_v48 = vld [vmem:[%s21576_s5 + $0x1f8] ss:$12 sps:$4 sm:$0xff]   ;;  %v7568_v51 = vadd.f32 %v22192_v4, %v20066_v46  ;;  %v15367_v46 = vld [vmem:[%s21576_s5 + $0x1e0] ss:$12 sps:$4 sm:$0xff]   ;;  %10883 = vmatprep.subr.bf16.mxu1 %v15372_v0 }
 0x6d8   : > { %v14992_v57 = vpop.f32.mrf.mxu1  ;;  %10919 = vmatpush1.bf16.msra.mxu0 %v15364_v48  ;;  %v15382_v0 = vld [vmem:[%s21576_s5] ss:$12 sps:$4 sm:$0xff]  }
 0x6d9   : > { %v8043_v55 = vmax.f32 %v8025_v61, 0.0  ;;  %v8001_v12 = vadd.f32 %v19654_v32, %v7797_v31  ;;  %v12800_v28 = vld.sshfl [vmem:[#allocation5] sm:$0x1 pattern:$0x75316420]  ;;  %10920 = vmatprep.subr.bf16.mxu0 %v15369_v39  ;;  %v22203_v39 = vld [vmem:[#allocation19_spill] sm:$0xff] }
 0x6da   : > { %v8094_v41 = vld [vmem:[#allocation4 + $0x2a] ss:$2 sm:$0x1f]  ;;  %v8096_v30 = vld [vmem:[#allocation4 + $0x2b] ss:$2 sm:$0x1f]  ;;  %v7757_v26 = vpop.f32.mrf.mxu1  ;;  %v8222_v42 = vrot.slane %v12800_v28, %v20150_v21 }
 0x6db   : > { %v8097_v32 = vmax.f32 %v8094_v41, %v8096_v30  ;;  %8061 = vst.msk [vmem:[#allocation4 + $0x40] sm:$0xff] %vm1446_vm2, %v8043_v55  ;;  %v8026_v22 = vadd.f32 %v20095_v38, %v8001_v12  ;;  %v7798_v19 = vadd.f32 %v7757_v26, %v7566_v20  ;;  %v12803_v44 = vld.sshfl [vmem:[#allocation5] sm:$0x10 pattern:$0x75316420] }
 0x6dc   : > { %v14995_v1 = vpop.f32.mrf.mxu1  ;;  %v8224_v36 = vshrl.u32 %v8222_v42, 16  ;;  %v8266_v3 = vcombine.high %v12803_v44, %v12803_v44  ;;  %v8203_v40 = vld [vmem:[#allocation5] sm:$0x1]  ;;  %v15378_v12 = vld [vmem:[%s21576_s5 + $0x1c] ss:$12 sps:$4 sm:$0xff]   ;;  %10921 = vmatpush1.bf16.msra.mxu0 %v15367_v46 }
 0x6dd   : > { %v8098_v54 = vmax.f32 %v8092_v9, %v8097_v32  ;;  %v8044_v37 = vmax.f32 %v8026_v22, 0.0  ;;  %v8002_v27 = vadd.f32 %v22191_v6, %v7798_v19  ;;  %v8205_v5 = vsel %vm20181_vm6, %v8203_v40, %v8204_v34  ;;  %v15370_v34 = vld [vmem:[%s21576_s5 + $0x30] ss:$12 sps:$4 sm:$0xff]   ;;  %v15375_v28 = vld [vmem:[%s21576_s5 + $0x1cc] ss:$12 sps:$4 sm:$0xff]   ;;  %v22193_v30 = vld [vmem:[#allocation34_spill] sm:$0xff] }
 0x6de   : > { %v7760_v23 = vpop.f32.mrf.mxu1  ;;  %8228 = vrot.lane.b32.xlu0 %v8224_v36, %s21676_s15  ;;  %v8273_v25 = vrot.slane %v8266_v3, %v20150_v21  ;;  %8206 = vst [vmem:[#allocation6] sm:$0x1] %v8205_v5  ;;  %v7569_v26 = vadd.f32 %v22193_v30, %v20076_v29  ;;  %v15376_v32 = vld [vmem:[%s21576_s5 + $0x18] ss:$12 sps:$4 sm:$0xff]   ;;  %10884 = vmatpush1.bf16.msra.mxu1 %v15370_v34  ;;  %v15373_v36 = vld [vmem:[%s21576_s5 + $0x1c8] ss:$12 sps:$4 sm:$0xff]  }
 0x6df   : > { %v13227_v17 = vpack.c.bf16 %v8098_v54, %v8098_v54  ;;  %8062 = vst.msk [vmem:[#allocation4 + $0x48] sm:$0xff] %vm1446_vm2, %v8044_v37  ;;  %v8027_v50 = vadd.f32 %v20095_v38, %v8002_v27  ;;  %v7799_v18 = vadd.f32 %v7760_v23, %v7567_v52  ;;  %v8117_v52 = vld [vmem:[#allocation5] sm:$0xc]  ;;  %10885 = vmatprep.subr.bf16.mxu1 %v15378_v12  ;;  %v22197_v6 = vld [vmem:[#allocation91_spill] sm:$0xff]  ;;  %v8303_v30 = vld [vmem:[#allocation6 + $0x2] sm:$0x1] }
 0x6e0   : > { %v14996_v14 = vpop.f32.mrf.mxu1  ;;  %v8275_v24 = vshrl.u32 %v8273_v25, 16  ;;  %v8255_v49 = vsel %vm20181_vm6, %v8273_v25, %v8254_v33  ;;  %10922 = vmatprep.subr.bf16.mxu0 %v15375_v28  ;;  %v22198_v5 = vld [vmem:[#allocation15_spill] sm:$0xff]  ;;  %v22204_v12 = vld [vmem:[#allocation38_spill] sm:$0xff] }
 0x6e1   : > { %v8045_v7 = vmax.f32 %v8027_v50, 0.0  ;;  %v8003_v61 = vadd.f32 %v19670_v60, %v7799_v18  ;;  %v8104_v31 = vshrl.u32 %v13227_v17, 16  ;;  %v8107_v56 = vshll.u32 %v13227_v17, 16  ;;  %8256 = vst [vmem:[#allocation6 + $0x1] sm:$0x1] %v8255_v49  ;;  %10923 = vmatpush1.bf16.msra.mxu0 %v15373_v36 }
 0x6e2   : > { %v8122_v13 = vld [vmem:[#allocation4 + $0x38] ss:$2 sm:$0x1f]  ;;  %v7765_v57 = vpop.f32.mrf.mxu1  ;;  %8279 = vrot.lane.b32.xlu0 %v8275_v24, %s21676_s15  ;;  %v8124_v47 = vld [vmem:[#allocation4 + $0x39] ss:$2 sm:$0x1f]  ;;  %v7570_v33 = vadd.f32 %v22198_v5, %v20080_v15  ;;  %10886 = vmatpush1.bf16.msra.mxu1 %v15376_v32 }
 0x6e3   : > { %8063 = vst.msk [vmem:[#allocation4 + $0x50] sm:$0xff] %vm1446_vm2, %v8045_v7  ;;  %v8028_v60 = vadd.f32 %v20095_v38, %v8003_v61  ;;  %v7800_v45 = vadd.f32 %v7765_v57, %v7568_v51  ;;  %v8106_v55 = vrot.slane %v8104_v31, 5  ;;  %v8109_v20 = vrot.slane %v8107_v56, 6  ;;  %v8141_v17 = vld [vmem:[#allocation5 + $0x4] sm:$0xe] }
 0x6e4   : > { %v14999_v43 = vpop.f32.mrf.mxu1  ;;  %v8125_v22 = vmax.f32 %v8122_v13, %v8124_v47  ;;  %v15379_v50 = vld [vmem:[%s21576_s5 + $0x1b0] ss:$12 sps:$4 sm:$0xff]   ;;  %v15381_v15 = vld [vmem:[%s21576_s5 + $0x1b4] ss:$12 sps:$4 sm:$0xff]   ;;  %v7571_v7 = vadd.f32 %v22203_v39, %v20084_v58  ;;  %v8386_v13 = vld [vmem:[#allocation6 + $0x4] sm:$0x1] }
 0x6e5   : > { %v8046_v9 = vmax.f32 %v8028_v60, 0.0  ;;  %v8004_v41 = vadd.f32 %v19672_v2, %v7800_v45  ;;  %v8110_v1 = vor.u32 %v8109_v20, %v8106_v55  ;;  %v15384_v14 = vld [vmem:[%s21576_s5 + $0x4] ss:$12 sps:$4 sm:$0xff]   ;;  %10924 = vmatprep.subr.bf16.mxu0 %v15381_v15  ;;  %v15387_v58 = vld [vmem:[%s21576_s5 + $0x19c] ss:$12 sps:$4 sm:$0xff]  }
 0x6e6   : > { %v8127_v19 = vld [vmem:[#allocation4 + $0x46] ss:$2 sm:$0x1f]  ;;  %v8129_v44 = vld [vmem:[#allocation4 + $0x47] ss:$2 sm:$0x1f]  ;;  %v7768_v59 = vpop.f32.mrf.mxu1  ;;  %10887 = vmatprep.subr.bf16.mxu1 %v15384_v14  ;;  %10925 = vmatpush1.bf16.msra.mxu0 %v15379_v50 }
 0x6e7   : > { %v8130_v2 = vmax.f32 %v8127_v19, %v8129_v44  ;;  %8064 = vst.msk [vmem:[#allocation4 + $0x58] sm:$0xff] %vm1446_vm2, %v8046_v9  ;;  %v8029_v29 = vadd.f32 %v20095_v38, %v8004_v41  ;;  %v7801_v53 = vadd.f32 %v7768_v59, %v7569_v26  ;;  %v8111_v40 = vrot.slane %v8110_v1, 4  ;;  %v22202_v24 = vld [vmem:[#allocation63_spill] sm:$0xff]  ;;  %v15385_v57 = vld [vmem:[%s21576_s5 + $0x198] ss:$12 sps:$4 sm:$0xff]   ;;  %10888 = vmatpush1.bf16.msra.mxu1 %v15382_v0 }
 0x6e8   : > { %v15000_v3 = vpop.f32.mrf.mxu1  ;;  %v8118_v63 = vsel %vm20242_vm1, %v8110_v1, %v8117_v52  ;;  %v15388_v34 = vld [vmem:[%s21576_s5 + $0x168] ss:$12 sps:$4 sm:$0xff]   ;;  %v15390_v45 = vld [vmem:[%s21576_s5 + $0x16c] ss:$12 sps:$4 sm:$0xff]   ;;  %10926 = vmatprep.subr.bf16.mxu0 %v15387_v58 }
 0x6e9   : > { %v8131_v54 = vmax.f32 %v8125_v22, %v8130_v2  ;;  %v8047_v37 = vmax.f32 %v8029_v29, 0.0  ;;  %v8005_v27 = vadd.f32 %v22197_v6, %v7801_v53  ;;  %8119 = vst [vmem:[#allocation5] sm:$0xc] %v8118_v63  ;;  %8120 = vst.msk [vmem:[#allocation5 + $0x4] sm:$0x1] %vm22199_vm13, %v8111_v40  ;;  %v22205_v20 = vld [vmem:[#allocation41_spill] sm:$0xff]  ;;  %10889 = vmatprep.subr.bf16.mxu1 %v15390_v45 }
 0x6ea   : > { %v7773_v11 = vpop.f32.mrf.mxu1  ;;  %v7572_v28 = vadd.f32 %v22205_v20, %v20088_v16  ;;  %10927 = vmatpush1.bf16.msra.mxu0 %v15385_v57  ;;  %v22206_v3 = vld [vmem:[#allocation100_spill] sm:$0xff]  ;;  %v15391_v6 = vld [vmem:[%s21576_s5 + $0x180] ss:$12 sps:$4 sm:$0xff]  }
 0x6eb   : > { %v13228_v23 = vpack.c.bf16 %v8131_v54, %v8131_v54  ;;  %8065 = vst.msk [vmem:[#allocation4 + $0x60] sm:$0xff] %vm1446_vm2, %v8047_v37  ;;  %v8030_v25 = vadd.f32 %v20095_v38, %v8005_v27  ;;  %v7802_v62 = vadd.f32 %v7773_v11, %v7570_v33  ;;  %10890 = vmatpush2.bf16.msra.mxu1 %v15388_v34  ;;  %v8353_v37 = vld [vmem:[#allocation6 + $0x3] sm:$0x1]  ;;  %v15393_v27 = vld [vmem:[%s21576_s5 + $0x184] ss:$12 sps:$4 sm:$0xff]  }
 0x6ec   : > { %v15003_v18 = vpop.f32.mrf.mxu1  ;;  %10928 = vmatprep.subr.bf16.mxu0 %v15393_v27  ;;  %v15397_v39 = vld [vmem:[%s21576_s5 + $0x2e8] ss:$12 sps:$4 sm:$0xff]   ;;  %v8434_v57 = vld [vmem:[#allocation6 + $0x5] sm:$0x1]  ;;  %v15403_v20 = vld [vmem:[%s21576_s5 + $0x2d0] ss:$12 sps:$4 sm:$0xff]  }
 0x6ed   : > { %v8136_v4 = vrot.slane %v13228_v23, 7  ;;  %v8048_v51 = vmax.f32 %v8030_v25, 0.0  ;;  %v8006_v49 = vadd.f32 %v22202_v24, %v7802_v62  ;;  %v8483_v18 = vld [vmem:[#allocation6 + $0x6] sm:$0x1]  ;;  %v15405_v58 = vld [vmem:[%s21576_s5 + $0x2d4] ss:$12 sps:$4 sm:$0xff]  }
 0x6ee   : > { %v7776_v61 = vpop.f32.mrf.mxu1  ;;  %v8145_v19 = vld [vmem:[#allocation4 + $0x54] ss:$2 sm:$0x1f]  ;;  %v8147_v44 = vld [vmem:[#allocation4 + $0x55] ss:$2 sm:$0x1f]  ;;  %10929 = vmatpush1.bf16.msra.mxu0 %v15391_v6 }
 0x6ef   : > { %8066 = vst.msk [vmem:[#allocation4 + $0x68] sm:$0xff] %vm1446_vm2, %v8048_v51  ;;  %v8031_v31 = vadd.f32 %v20095_v38, %v8006_v49  ;;  %v7803_v56 = vadd.f32 %v7776_v61, %v7571_v7  ;;  %v8142_v46 = vsel %vm20270_vm10, %v8136_v4, %v8141_v17  ;;  %v8148_v5 = vmax.f32 %v8145_v19, %v8147_v44  ;;  %v15394_v4 = vld [vmem:[%s21576_s5 + $0x150] ss:$12 sps:$4 sm:$0xff]   ;;  %v15400_v45 = vld [vmem:[%s21576_s5 + $0x138] ss:$12 sps:$4 sm:$0xff]  }
 0x6f0   : > { %v15004_v47 = vpop.f32.mrf.mxu1  ;;  %v12806_v60 = vld.sshfl [vmem:[#allocation5] sm:$0x2 pattern:$0x75316420]  ;;  %8143 = vst [vmem:[#allocation5 + $0x4] sm:$0xe] %v8142_v46 }
 0x6f1   : > { %v8049_v55 = vmax.f32 %v8031_v31, 0.0  ;;  %v8007_v43 = vadd.f32 %v22204_v12, %v7803_v56  ;;  %v12811_v9 = vld.sshfl [vmem:[#allocation5 + $0x4] sm:$0x1 pattern:$0x75316420]  ;;  %v8321_v41 = vrot.slane %v12806_v60, %v20150_v21 }
 0x6f2   : > { %v7781_v26 = vpop.f32.mrf.mxu1  ;;  %v8404_v42 = vrot.slane %v12811_v9, %v20150_v21  ;;  %v12809_v32 = vld.sshfl [vmem:[#allocation5] sm:$0x20 pattern:$0x75316420]  ;;  %v8385_v22 = vld [vmem:[#allocation5 + $0x4] sm:$0x1] }
 0x6f3   : > { %8067 = vst.msk [vmem:[#allocation4 + $0x70] sm:$0xff] %vm1446_vm2, %v8049_v55  ;;  %v8032_v59 = vadd.f32 %v20095_v38, %v8007_v43  ;;  %v7804_v1 = vadd.f32 %v7781_v26, %v7572_v28  ;;  %v8322_v2 = vcombine.high %v8321_v41, %v8321_v41  ;;  %v8365_v16 = vcombine.high %v12809_v32, %v12809_v32  ;;  %v15399_v56 = vld [vmem:[%s21576_s5 + $0x2ec] ss:$12 sps:$4 sm:$0xff]   ;;  %v15402_v46 = vld [vmem:[%s21576_s5 + $0x13c] ss:$12 sps:$4 sm:$0xff]  }
 0x6f4   : > { %v15007_v29 = vpop.f32.mrf.mxu1  ;;  %v8406_v53 = vshrl.u32 %v8404_v42, 16  ;;  %v8387_v52 = vsel %vm20181_vm6, %v8385_v22, %v8386_v13  ;;  %10930 = vmatprep.subr.bf16.mxu0 %v15399_v56  ;;  %v15406_v41 = vld [vmem:[%s21576_s5 + $0x120] ss:$12 sps:$4 sm:$0xff]   ;;  %v15411_v44 = vld [vmem:[%s21576_s5 + $0x2bc] ss:$12 sps:$4 sm:$0xff]  }
 0x6f5   : > { %v8050_v36 = vmax.f32 %v8032_v59, 0.0  ;;  %v8008_v40 = vadd.f32 %v22206_v3, %v7804_v1  ;;  %v8324_v63 = vshrl.u32 %v8322_v2, 16  ;;  %v8372_v54 = vrot.slane %v8365_v16, %v20150_v21  ;;  %8388 = vst [vmem:[#allocation6 + $0x4] sm:$0x1] %v8387_v52  ;;  %10931 = vmatpush2.bf16.msra.mxu0 %v15397_v39  ;;  %v15414_v16 = vld [vmem:[%s21576_s5 + $0x10c] ss:$12 sps:$4 sm:$0xff]  }
 0x6f6   : > { %v8150_v33 = vld [vmem:[#allocation4 + $0x62] ss:$2 sm:$0x1f]  ;;  %v8152_v11 = vld [vmem:[#allocation4 + $0x63] ss:$2 sm:$0x1f]  ;;  %8410 = vrot.lane.b32.xlu0 %v8406_v53, %s21676_s15  ;;  %v7784_v23 = vpop.f32.mrf.mxu1  ;;  %v8304_v25 = vsel %vm20181_vm6, %v8322_v2, %v8303_v30  ;;  %10932 = vmatprep.subr.bf16.mxu0 %v15405_v58 }
 0x6f7   : > { %v8153_v62 = vmax.f32 %v8150_v33, %v8152_v11  ;;  %8068 = vst.msk [vmem:[#allocation4 + $0x78] sm:$0xff] %vm1446_vm2, %v8050_v36  ;;  %v8033_v17 = vadd.f32 %v20095_v38, %v8008_v40  ;;  %8328 = vrot.lane.b32.xlu1 %v8324_v63, %s21676_s15  ;;  %v8373_v50 = vcombine.high %v8372_v54, %v8372_v54  ;;  %v12817_v15 = vld.sshfl [vmem:[#allocation5 + $0x4] sm:$0x2 pattern:$0x75316420] }
 0x6f8   : > { %8305 = vst [vmem:[#allocation6 + $0x2] sm:$0x1] %v8304_v25  ;;  %v15008_v48 = vpop.f32.mrf.mxu1  ;;  %v8501_v0 = vrot.slane %v12817_v15, %v20150_v21  ;;  %v12814_v14 = vld.sshfl [vmem:[#allocation5 + $0x4] sm:$0x10 pattern:$0x75316420] }
 0x6f9   : > { %v8154_v51 = vmax.f32 %v8148_v5, %v8153_v62  ;;  %v8051_v24 = vmax.f32 %v8033_v17, 0.0  ;;  %v8375_v49 = vshrl.u32 %v8373_v50, 16  ;;  %v15396_v38 = vld [vmem:[%s21576_s5 + $0x154] ss:$12 sps:$4 sm:$0xff]   ;;  %v8446_v61 = vcombine.high %v12814_v14, %v12814_v14  ;;  %v8173_v28 = vld [vmem:[#allocation5 + $0x4] sm:$0x8]  ;;  %10933 = vmatpush2.bf16.msra.mxu0 %v15403_v20 }
 0x6fa   : > { %v8502_v7 = vcombine.high %v8501_v0, %v8501_v0  ;;  %v8354_v31 = vsel %vm20181_vm6, %v8373_v50, %v8353_v37  ;;  %10891 = vmatprep.subr.bf16.mxu1 %v15396_v38  ;;  %v15408_v30 = vld [vmem:[%s21576_s5 + $0x124] ss:$12 sps:$4 sm:$0xff]   ;;  %10934 = vmatprep.subr.bf16.mxu0 %v15411_v44  ;;  %v15412_v63 = vld [vmem:[%s21576_s5 + $0x108] ss:$12 sps:$4 sm:$0xff]   ;;  %v15415_v37 = vld [vmem:[%s21576_s5 + $0x2a0] ss:$12 sps:$4 sm:$0xff]  }
 0x6fb   : > { %v13229_v13 = vpack.c.bf16 %v8154_v51, %v8154_v51  ;;  %8069 = vst.msk [vmem:[#allocation4 + $0x80] sm:$0xff] %vm1446_vm2, %v8051_v24  ;;  %8379 = vrot.lane.b32.xlu1 %v8375_v49, %s21676_s15  ;;  %8355 = vst [vmem:[#allocation6 + $0x3] sm:$0x1] %v8354_v31  ;;  %v8453_v47 = vrot.slane %v8446_v61, %v20150_v21  ;;  %10892 = vmatpush2.bf16.msra.mxu1 %v15394_v4  ;;  %v15409_v2 = vld [vmem:[%s21576_s5 + $0x2b8] ss:$12 sps:$4 sm:$0xff]  }
 0x6fc   : > { %v8504_v34 = vshrl.u32 %v8502_v7, 16  ;;  %v8484_v60 = vsel %vm20181_vm6, %v8502_v7, %v8483_v18  ;;  %10893 = vmatprep.subr.bf16.mxu1 %v15402_v46  ;;  %v15417_v29 = vld [vmem:[%s21576_s5 + $0x2a4] ss:$12 sps:$4 sm:$0xff]   ;;  %v15420_v6 = vld [vmem:[%s21576_s5 + $0x28c] ss:$12 sps:$4 sm:$0xff]  }
 0x6fd   : > { %v8160_v55 = vshll.u32 %v13229_v13, 16  ;;  %v8163_v12 = vshrl.u32 %v13229_v13, 16  ;;  %8485 = vst [vmem:[#allocation6 + $0x6] sm:$0x1] %v8484_v60  ;;  %v8435_v9 = vsel %vm20181_vm6, %v8453_v47, %v8434_v57  ;;  %v8455_v42 = vshrl.u32 %v8453_v47, 16  ;;  %10935 = vmatpush2.bf16.msra.mxu0 %v15409_v2 }
 0x6fe   : > { %8508 = vrot.lane.b32.xlu0 %v8504_v34, %s21676_s15  ;;  %v8178_v26 = vld [vmem:[#allocation4 + $0x70] ss:$2 sm:$0x1f]  ;;  %8436 = vst [vmem:[#allocation6 + $0x5] sm:$0x1] %v8435_v9  ;;  %10936 = vmatprep.subr.bf16.mxu0 %v15417_v29 }
 0x6ff   : > { %v8162_v32 = vrot.slane %v8160_v55, 5  ;;  %v8165_v22 = vrot.slane %v8163_v12, 4  ;;  %v8180_v19 = vld [vmem:[#allocation4 + $0x71] ss:$2 sm:$0x1f]  ;;  %10894 = vmatpush2.bf16.msra.mxu1 %v15400_v45  ;;  %8459 = vrot.lane.b32.xlu1 %v8455_v42, %s21676_s15  ;;  %s15873_s15 = scalar_lea.vmem %s15872_s12, 32 }
 0x700   : > { %10895 = vmatprep.subr.bf16.mxu1 %v15408_v30  ;;  %v8181_v36 = vmax.f32 %v8178_v26, %v8180_v19  ;;  %v15423_v5 = vld [vmem:[%s21576_s5 + $0xf4] ss:$12 sps:$4 sm:$0xff]   ;;  %v15421_v11 = vld [vmem:[%s21576_s5 + $0xf0] ss:$12 sps:$4 sm:$0xff]   ;;  %v8533_v48 = vld [vmem:[#allocation6 + $0x7] sm:$0x1]  ;;  %p15875_p1 = scmp.lt.s32.totalorder %s15873_s15, %s15867_s29 }
 0x701   : > { %v8166_v59 = vor.u32 %v8165_v22, %v8162_v32  ;;  %v8174_v1 = vsel %vm20353_vm3, %v8162_v32, %v8173_v28  ;;  %v15418_v33 = vld [vmem:[%s21576_s5 + $0x288] ss:$12 sps:$4 sm:$0xff]   ;;  %10937 = vmatpush2.bf16.msra.mxu0 %v15415_v37  ;;  %v8200_v17 = vld [vmem:[#allocation5 + $0xc] sm:$0x1]  ;;  %v8566_v50 = vld [vmem:[#allocation6 + $0x8] sm:$0x1] }
 0x702   : > { %v8183_v53 = vld [vmem:[#allocation4 + $0x7e] ss:$2 sm:$0x1f]  ;;  %v8185_v52 = vld [vmem:[#allocation4 + $0x7f] ss:$2 sm:$0x1f]  ;;  %10938 = vmatprep.subr.bf16.mxu0 %v15420_v6  ;;  %p15876_p2 = por %p15875_p1, %p15874_p0 }
 0x703   : > { %8175 = vst [vmem:[#allocation5 + $0x4] sm:$0x8] %v8174_v1  ;;  %v8186_v3 = vmax.f32 %v8183_v53, %v8185_v52  ;;  %v8167_v40 = vrot.slane %v8166_v59, 4  ;;  %10896 = vmatpush2.bf16.msra.mxu1 %v15406_v41  ;;  %v15426_v15 = vld [vmem:[%s21576_s5 + $0x274] ss:$12 sps:$4 sm:$0xff]  }
 0x704   : > { %10897 = vmatprep.subr.bf16.mxu1 %v15414_v16  ;;  %v15427_v0 = vld [vmem:[%s21576_s5 + $0xd8] ss:$12 sps:$4 sm:$0xff]   ;;  %v15429_v14 = vld [vmem:[%s21576_s5 + $0xdc] ss:$12 sps:$4 sm:$0xff]   ;;  %v15433_v45 = vld [vmem:[%s21576_s5 + $0xc0] ss:$12 sps:$4 sm:$0xff]   ;;  %p15877_p3 = pnand %p15876_p2, %p15870_p13 }
 0x705   : > { %8176 = vst.msk [vmem:[#allocation5 + $0x8] sm:$0x3] %vm22210_vm7, %v8167_v40  ;;  %v8187_v54 = vmax.f32 %v8181_v36, %v8186_v3  ;;  %10939 = vmatpush2.bf16.msra.mxu0 %v15418_v33  ;;  %v15424_v61 = vld [vmem:[%s21576_s5 + $0x270] ss:$12 sps:$4 sm:$0xff]   ;;  %v15430_v60 = vld [vmem:[%s21576_s5 + $0x258] ss:$12 sps:$4 sm:$0xff]  }
 0x706   : > { %10940 = vmatprep.subr.bf16.mxu0 %v15426_v15  ;;  %v8614_v13 = vld [vmem:[#allocation6 + $0x9] sm:$0x1]  ;;  %v15435_v55 = vld [vmem:[%s21576_s5 + $0xc4] ss:$12 sps:$4 sm:$0xff]   ;;  %v8746_v20 = vld [vmem:[#allocation6 + $0xc] sm:$0x1] }
 0x707   : > { %v13230_v27 = vpack.c.bf16 %v8187_v54, %v8187_v54  ;;  %10898 = vmatpush2.bf16.msra.mxu1 %v15412_v63  ;;  %v15432_v47 = vld [vmem:[%s21576_s5 + $0x25c] ss:$12 sps:$4 sm:$0xff]   ;;  %v15438_v41 = vld [vmem:[%s21576_s5 + $0x244] ss:$12 sps:$4 sm:$0xff]   ;;  %v15441_v32 = vld [vmem:[%s21576_s5 + $0x3ac] ss:$12 sps:$4 sm:$0xff]  }
 0x708   : > { %10899 = vmatprep.subr.bf16.mxu1 %v15423_v5  ;;  %v8663_v42 = vld [vmem:[#allocation6 + $0xa] sm:$0x1]  ;;  %v15436_v19 = vld [vmem:[%s21576_s5 + $0x240] ss:$12 sps:$4 sm:$0xff]   ;;  %v8713_v29 = vld [vmem:[#allocation6 + $0xb] sm:$0x1] }
 0x709   : > { %v8192_v25 = vrot.slane %v13230_v27, 6  ;;  %10941 = vmatpush2.bf16.msra.mxu0 %v15424_v61  ;;  %v15445_v53 = vld [vmem:[%s21576_s5 + $0x52c] ss:$12 sps:$4 sm:$0xff]   ;;  %v8233_v54 = vld [vmem:[#allocation6] sm:$0x1] }
 0x70a   : > { %v12820_v23 = vld.sshfl [vmem:[#allocation5 + $0x4] sm:$0x20 pattern:$0x75316420]  ;;  %10942 = vmatprep.subr.bf16.mxu0 %v15432_v47  ;;  %v8282_v6 = vld [vmem:[#allocation6 + $0x1] sm:$0x1] }
 0x70b   : > { %v8545_v62 = vcombine.high %v12820_v23, %v12820_v23  ;;  %8196 = vst.msk [vmem:[#allocation5 + $0x8] sm:$0xc] %vm22211_vm15, %v8192_v25  ;;  %v8193_v18 = vrot.slane %v8192_v25, 4  ;;  %10900 = vmatpush2.bf16.msra.mxu1 %v15421_v11  ;;  %v8413_v33 = vld [vmem:[#allocation6 + $0x4] sm:$0x1] }
 0x70c   : > { %v12822_v4 = vld.sshfl [vmem:[#allocation5 + $0x8] sm:$0x1 pattern:$0x75316420]  ;;  %10901 = vmatprep.subr.bf16.mxu1 %v15429_v14  ;;  %v8331_v25 = vld [vmem:[#allocation6 + $0x2] sm:$0x1] }
 0x70d   : > { %v8552_v51 = vrot.slane %v8545_v62, %v20150_v21  ;;  %v8565_v24 = vld [vmem:[#allocation5 + $0x8] sm:$0x1]  ;;  %v8584_v49 = vrot.slane %v12822_v4, %v20150_v21  ;;  %v12825_v38 = vld.sshfl [vmem:[#allocation5 + $0x8] sm:$0x10 pattern:$0x75316420]  ;;  %v8201_v39 = vsel %vm20181_vm6, %v8193_v18, %v8200_v17  ;;  %10943 = vmatpush2.bf16.msra.mxu0 %v15430_v60 }
 0x70e   : > { %v8567_v7 = vsel %vm20181_vm6, %v8565_v24, %v8566_v50  ;;  %v8626_v56 = vcombine.high %v12825_v38, %v12825_v38  ;;  %8202 = vst [vmem:[#allocation5 + $0xc] sm:$0x1] %v8201_v39  ;;  %10944 = vmatprep.subr.bf16.mxu0 %v15438_v41  ;;  %v8382_v17 = vld [vmem:[#allocation6 + $0x3] sm:$0x1]  ;;  %v8462_v4 = vld [vmem:[#allocation6 + $0x5] sm:$0x1] }
 0x70f   : > { %v8553_v31 = vcombine.high %v8552_v51, %v8552_v51  ;;  %8568 = vst [vmem:[#allocation6 + $0x8] sm:$0x1] %v8567_v7  ;;  %v8586_v46 = vshrl.u32 %v8584_v49, 16  ;;  %10902 = vmatpush2.bf16.msra.mxu1 %v15427_v0  ;;  %v15439_v41 = vld [vmem:[%s21576_s5 + $0x3a8] ss:$12 sps:$4 sm:$0xff]  }
 0x710   : > { %v8633_v58 = vrot.slane %v8626_v56, %v20150_v21  ;;  %10903 = vmatprep.subr.bf16.mxu1 %v15435_v55  ;;  %v15458_v40 = vld [vmem:[%s21576_s5 + $0x360] ss:$12 sps:$4 sm:$0xff]  }
 0x711   : > { %v8555_v57 = vshrl.u32 %v8553_v31, 16  ;;  %v8534_v34 = vsel %vm20181_vm6, %v8553_v31, %v8533_v48  ;;  %8590 = vrot.lane.b32.xlu0 %v8586_v46, %s22212_s13  ;;  %10945 = vmatpush2.bf16.msra.mxu0 %v15436_v19  ;;  %v8511_v48 = vld [vmem:[#allocation6 + $0x6] sm:$0x1] }
 0x712   : > { %8535 = vst [vmem:[#allocation6 + $0x7] sm:$0x1] %v8534_v34  ;;  %v12828_v12 = vld.sshfl [vmem:[#allocation5 + $0x8] sm:$0x2 pattern:$0x75316420]  ;;  %v8615_v43 = vsel %vm20181_vm6, %v8633_v58, %v8614_v13  ;;  %10996 = vmatprep.subr.bf16.mxu0 %v15445_v53 }
 0x713   : > { %8559 = vrot.lane.b32.xlu1 %v8555_v57, %s22212_s13  ;;  %v8681_v28 = vrot.slane %v12828_v12, %v20150_v21  ;;  %v12831_v9 = vld.sshfl [vmem:[#allocation5 + $0x8] sm:$0x20 pattern:$0x75316420]  ;;  %8616 = vst [vmem:[#allocation6 + $0x9] sm:$0x1] %v8615_v43  ;;  %10904 = vmatpush2.bf16.msra.mxu1 %v15433_v45 }
 0x714   : > { %v8635_v30 = vshrl.u32 %v8633_v58, 16  ;;  %v8725_v26 = vcombine.high %v12831_v9, %v12831_v9  ;;  %10955 = vmatprep.subr.bf16.mxu1 %v15441_v32  ;;  %v15443_v32 = vld [vmem:[%s21576_s5 + $0x528] ss:$12 sps:$4 sm:$0xff]   ;;  %v15452_v53 = vld [vmem:[%s21576_s5 + $0x378] ss:$12 sps:$4 sm:$0xff]  }
 0x715   : > { %v8682_v22 = vcombine.high %v8681_v28, %v8681_v28  ;;  %v8745_v44 = vld [vmem:[#allocation5 + $0xc] sm:$0x1] }
 0x716   : > { %v8732_v59 = vrot.slane %v8725_v26, %v20150_v21  ;;  %v8747_v1 = vsel %vm20181_vm6, %v8745_v44, %v8746_v20  ;;  %v8593_v49 = vld [vmem:[#allocation6 + $0x8] sm:$0x1]  ;;  %v15451_v44 = vld [vmem:[%s21576_s5 + $0x514] ss:$12 sps:$4 sm:$0xff]  }
 0x717   : > { %8639 = vrot.lane.b32.xlu1 %v8635_v30, %s22212_s13  ;;  %v8684_v2 = vshrl.u32 %v8682_v22, 16  ;;  %v8664_v16 = vsel %vm20181_vm6, %v8682_v22, %v8663_v42  ;;  %8748 = vst [vmem:[#allocation6 + $0xc] sm:$0x1] %v8747_v1  ;;  %v15448_v22 = vld [vmem:[%s21576_s5 + $0x394] ss:$12 sps:$4 sm:$0xff]  }
 0x718   : > { %v8733_v52 = vcombine.high %v8732_v59, %v8732_v59  ;;  %8665 = vst [vmem:[#allocation6 + $0xa] sm:$0x1] %v8664_v16  ;;  %v15446_v59 = vld [vmem:[%s21576_s5 + $0x390] ss:$12 sps:$4 sm:$0xff]  }
 0x719   : > { %8688 = vrot.lane.b32.xlu0 %v8684_v2, %s22212_s13  ;;  %v8562_v7 = vld [vmem:[#allocation6 + $0x7] sm:$0x1]  ;;  %v15454_v2 = vld [vmem:[%s21576_s5 + $0x37c] ss:$12 sps:$4 sm:$0xff]  }
 0x71a   : > { %v8735_v36 = vshrl.u32 %v8733_v52, 16  ;;  %v8714_v3 = vsel %vm20181_vm6, %v8733_v52, %v8713_v29  ;;  %v8642_v56 = vld [vmem:[#allocation6 + $0x9] sm:$0x1]  ;;  %v15460_v52 = vld [vmem:[%s21576_s5 + $0x364] ss:$12 sps:$4 sm:$0xff]  }
 0x71b   : > { %8715 = vst [vmem:[#allocation6 + $0xb] sm:$0x1] %v8714_v3  ;;  %v15449_v16 = vld [vmem:[%s21576_s5 + $0x510] ss:$12 sps:$4 sm:$0xff]  }
 0x71c   : > { %8739 = vrot.lane.b32.xlu1 %v8735_v36, %s22212_s13  ;;  %v15457_v29 = vld [vmem:[%s21576_s5 + $0x4fc] ss:$12 sps:$4 sm:$0xff]   ;;  %v15455_v36 = vld [vmem:[%s21576_s5 + $0x4f8] ss:$12 sps:$4 sm:$0xff]   ;;  %s21530_s13 = scalar_lea.hbm %s21582_s11, %s13196_s14 }
 0x71d   : > { %v15463_v3 = vld [vmem:[%s21576_s5 + $0x4e4] ss:$12 sps:$4 sm:$0xff]  }
 0x71f   : > { %v8691_v57 = vld [vmem:[#allocation6 + $0xa] sm:$0x1] }
 0x722   : > { %v8742_v60 = vld [vmem:[#allocation6 + $0xb] sm:$0x1] }
 0x750   : > { %v8229_v63 = vpop.permute.xlu0 %8228 }
 0x751   : > { %v8234_v37 = vsel %vm20465_vm14, %v8229_v63, %v8233_v54  ;;  %v15466_v63 = vld [vmem:[%s21576_s5 + $0x34c] ss:$12 sps:$4 sm:$0xff]  }
 0x752   : > { %8235 = vst [vmem:[#allocation6] sm:$0x1] %v8234_v37  ;;  %v15461_v54 = vld [vmem:[%s21576_s5 + $0x4e0] ss:$12 sps:$4 sm:$0xff]  }
 0x753   : > { %v15469_v37 = vld [vmem:[%s21576_s5 + $0x4cc] ss:$12 sps:$4 sm:$0xff]  }
 0x754   : > { %v8280_v27 = vpop.permute.xlu0 %8279 }
 0x755   : > { %v8283_v8 = vsel %vm20465_vm14, %v8280_v27, %v8282_v6  ;;  %v15464_v6 = vld [vmem:[%s21576_s5 + $0x348] ss:$12 sps:$4 sm:$0xff]  }
 0x756   : > { %8284 = vst [vmem:[#allocation6 + $0x1] sm:$0x1] %v8283_v8  ;;  %v15472_v27 = vld [vmem:[%s21576_s5 + $0x334] ss:$12 sps:$4 sm:$0xff]  }
 0x757   : > { %v15467_v8 = vld [vmem:[%s21576_s5 + $0x4c8] ss:$12 sps:$4 sm:$0xff]  }
 0x768   : > { %v8411_v5 = vpop.permute.xlu0 %8410 }
 0x769   : > { %v8414_v11 = vsel %vm20465_vm14, %v8411_v5, %v8413_v33  ;;  %v8329_v23 = vpop.permute.xlu1 %8328  ;;  %v15475_v5 = vld [vmem:[%s21576_s5 + $0x4b4] ss:$12 sps:$4 sm:$0xff]   ;;  %v15470_v33 = vld [vmem:[%s21576_s5 + $0x330] ss:$12 sps:$4 sm:$0xff]  }
 0x76a   : > { %8415 = vst [vmem:[#allocation6 + $0x4] sm:$0x1] %v8414_v11  ;;  %v8332_v62 = vsel %vm20465_vm14, %v8329_v23, %v8331_v25  ;;  %v15478_v11 = vld [vmem:[%s21576_s5 + $0x31c] ss:$12 sps:$4 sm:$0xff]  }
 0x76b   : > { %8333 = vst [vmem:[#allocation6 + $0x2] sm:$0x1] %v8332_v62  ;;  %v15473_v23 = vld [vmem:[%s21576_s5 + $0x4b0] ss:$12 sps:$4 sm:$0xff]   ;;  %v15476_v62 = vld [vmem:[%s21576_s5 + $0x318] ss:$12 sps:$4 sm:$0xff]  }
 0x76c   : > { %v15481_v25 = vld [vmem:[%s21576_s5 + $0x49c] ss:$12 sps:$4 sm:$0xff]  }
 0x76d   : > { %v8380_v50 = vpop.permute.xlu1 %8379 }
 0x76e   : > { %v8383_v15 = vsel %vm20465_vm14, %v8380_v50, %v8382_v17  ;;  %v15484_v17 = vld [vmem:[%s21576_s5 + $0x304] ss:$12 sps:$4 sm:$0xff]  }
 0x76f   : > { %8384 = vst [vmem:[#allocation6 + $0x3] sm:$0x1] %v8383_v15  ;;  %v15479_v50 = vld [vmem:[%s21576_s5 + $0x498] ss:$12 sps:$4 sm:$0xff]  }
 0x770   : > { %v8509_v18 = vpop.permute.xlu0 %8508  ;;  %v15487_v15 = vld [vmem:[%s21576_s5 + $0x484] ss:$12 sps:$4 sm:$0xff]  }
 0x771   : > { %v8512_v0 = vsel %vm20465_vm14, %v8509_v18, %v8511_v48  ;;  %v8460_v14 = vpop.permute.xlu1 %8459  ;;  %v15482_v18 = vld [vmem:[%s21576_s5 + $0x300] ss:$12 sps:$4 sm:$0xff]  }
 0x772   : > { %8513 = vst [vmem:[#allocation6 + $0x6] sm:$0x1] %v8512_v0  ;;  %v8463_v51 = vsel %vm20465_vm14, %v8460_v14, %v8462_v4  ;;  %v15490_v48 = vld [vmem:[%s21576_s5 + $0x46c] ss:$12 sps:$4 sm:$0xff]   ;;  %v15488_v4 = vld [vmem:[%s21576_s5 + $0x468] ss:$12 sps:$4 sm:$0xff]  }
 0x773   : > { %8464 = vst [vmem:[#allocation6 + $0x5] sm:$0x1] %v8463_v51  ;;  %v15485_v0 = vld [vmem:[%s21576_s5 + $0x480] ss:$12 sps:$4 sm:$0xff]  }
 0x774   : > { %v15493_v14 = vld [vmem:[%s21576_s5 + $0x5ec] ss:$12 sps:$4 sm:$0xff]   ;;  %v15496_v51 = vld [vmem:[%s21576_s5 + $0x454] ss:$12 sps:$4 sm:$0xff]  }
 0x783   : > { %v8591_v24 = vpop.permute.xlu0 %8590 }
 0x784   : > { %v8594_v38 = vsel %vm20465_vm14, %v8591_v24, %v8593_v49  ;;  %v15491_v24 = vld [vmem:[%s21576_s5 + $0x5e8] ss:$12 sps:$4 sm:$0xff]  }
 0x785   : > { %v8560_v39 = vpop.permute.xlu1 %8559  ;;  %8595 = vst [vmem:[#allocation6 + $0x8] sm:$0x1] %v8594_v38  ;;  %v15499_v49 = vld [vmem:[%s21576_s5 + $0x5d4] ss:$12 sps:$4 sm:$0xff]   ;;  %v15494_v38 = vld [vmem:[%s21576_s5 + $0x450] ss:$12 sps:$4 sm:$0xff]  }
 0x786   : > { %v8563_v61 = vsel %vm20465_vm14, %v8560_v39, %v8562_v7  ;;  %v15502_v39 = vld [vmem:[%s21576_s5 + $0x43c] ss:$12 sps:$4 sm:$0xff]  }
 0x787   : > { %8564 = vst [vmem:[#allocation6 + $0x7] sm:$0x1] %v8563_v61  ;;  %v15497_v7 = vld [vmem:[%s21576_s5 + $0x5d0] ss:$12 sps:$4 sm:$0xff]  }
 0x788   : > { %v15505_v61 = vld [vmem:[%s21576_s5 + $0x5bc] ss:$12 sps:$4 sm:$0xff]  }
 0x789   : > { %v8640_v31 = vpop.permute.xlu1 %8639 }
 0x78a   : > { %v8643_v46 = vsel %vm20465_vm14, %v8640_v31, %v8642_v56  ;;  %v15500_v31 = vld [vmem:[%s21576_s5 + $0x438] ss:$12 sps:$4 sm:$0xff]  }
 0x78b   : > { %8644 = vst [vmem:[#allocation6 + $0x9] sm:$0x1] %v8643_v46  ;;  %v8689_v13 = vpop.permute.xlu0 %8688  ;;  %v15508_v56 = vld [vmem:[%s21576_s5 + $0x424] ss:$12 sps:$4 sm:$0xff]  }
 0x78c   : > { %v8692_v58 = vsel %vm20465_vm14, %v8689_v13, %v8691_v57  ;;  %v15503_v46 = vld [vmem:[%s21576_s5 + $0x5b8] ss:$12 sps:$4 sm:$0xff]   ;;  %v15506_v57 = vld [vmem:[%s21576_s5 + $0x420] ss:$12 sps:$4 sm:$0xff]  }
 0x78d   : > { %8693 = vst [vmem:[#allocation6 + $0xa] sm:$0x1] %v8692_v58  ;;  %v15511_v13 = vld [vmem:[%s21576_s5 + $0x5a4] ss:$12 sps:$4 sm:$0xff]   ;;  %v15514_v58 = vld [vmem:[%s21576_s5 + $0x40c] ss:$12 sps:$4 sm:$0xff]  }
 0x78e   : > { %v8749_v34 = vld [vmem:[#allocation6] sm:$0xff]  ;;  %v8740_v47 = vpop.permute.xlu1 %8739 }
 0x78f   : > { %v9161_v45 = vrot.slane %v8749_v34, %v20150_v21  ;;  %v9154_v55 = vcombine.high %v8749_v34, %v8749_v34  ;;  %v8743_v12 = vsel %vm20465_vm14, %v8740_v47, %v8742_v60  ;;  %v15509_v34 = vld [vmem:[%s21576_s5 + $0x5a0] ss:$12 sps:$4 sm:$0xff]   ;;  %v15512_v60 = vld [vmem:[%s21576_s5 + $0x408] ss:$12 sps:$4 sm:$0xff]  }
 0x790   : > { %8744 = vst [vmem:[#allocation6 + $0xb] sm:$0x1] %v8743_v12  ;;  %v15517_v47 = vld [vmem:[%s21576_s5 + $0x58c] ss:$12 sps:$4 sm:$0xff]   ;;  %v15523_v12 = vld [vmem:[%s21576_s5 + $0x574] ss:$12 sps:$4 sm:$0xff]  }
 0x791   : > { %v9169_v43 = vcombine.high %v9161_v45, %v9161_v45  ;;  %v20495_v20 = vrot.slane %v9154_v55, %v20150_v21  ;;  %v20498_v28 = vrot.slane %v9161_v45, %v20150_v21  ;;  %v15520_v45 = vld [vmem:[%s21576_s5 + $0x3f4] ss:$12 sps:$4 sm:$0xff]  }
 0x792   : > { %v15515_v55 = vld [vmem:[%s21576_s5 + $0x588] ss:$12 sps:$4 sm:$0xff]  }
 0x793   : > { %v20501_v9 = vrot.slane %v9169_v43, %v20150_v21  ;;  %v9170_v30 = vcombine.high %v20495_v20, %v20495_v20  ;;  %v20524_v19 = vcombine.high %v20498_v28, %v20498_v28  ;;  %v15518_v43 = vld [vmem:[%s21576_s5 + $0x3f0] ss:$12 sps:$4 sm:$0xff]  }
 0x795   : > { %10905 = vmatprep.mubr.bf16.mxu1 %v20501_v9  ;;  %v20511_v26 = vcombine.high %v20501_v9, %v20501_v9  ;;  %v20514_v42 = vrot.slane %v9170_v30, %v20150_v21 }
 0x796   : > { %10906 = vmatmul.mubr.bf16.vlgmr.msra.gmra.mxu1 %v20498_v28 }
 0x797   : > { %10956 = vmatpush1.bf16.msra.mxu1 %v15439_v41  ;;  %10946 = vmatprep.mubr.bf16.mxu0 %v20511_v26  ;;  %v20536_v1 = vcombine.high %v20514_v42, %v20514_v42  ;;  %v15526_v41 = vld [vmem:[%s21576_s5 + $0x3dc] ss:$12 sps:$4 sm:$0xff]  }
 0x798   : > { %10987 = vmatprep.mubr.bf16.mxu1 %v20514_v42  ;;  %10947 = vmatmul.mubr.bf16.vlgmr.msra.gmra.mxu0 %v20524_v19  ;;  %v20688_v30 = vld [vmem:[#allocation6 + $0x8] sm:$0x1f] }
 0x799   : > { %10997 = vmatpush1.bf16.msra.mxu0 %v15443_v32  ;;  %10957 = vmatprep.subr.bf16.mxu1 %v15448_v22  ;;  %v15521_v32 = vld [vmem:[%s21576_s5 + $0x570] ss:$12 sps:$4 sm:$0xff]  }
 0x79a   : > { %11028 = vmatprep.mubr.bf16.mxu0 %v20536_v1  ;;  %10998 = vmatprep.subr.bf16.mxu0 %v15451_v44  ;;  %v15529_v22 = vld [vmem:[%s21576_s5 + $0x55c] ss:$12 sps:$4 sm:$0xff]   ;;  %v15524_v44 = vld [vmem:[%s21576_s5 + $0x3d8] ss:$12 sps:$4 sm:$0xff]  }
 0x79b   : > { %10958 = vmatpush1.bf16.msra.mxu1 %v15446_v59  ;;  %v20701_v59 = vrot.slane %v20688_v30, %v20150_v21 }
 0x79c   : > { %10959 = vmatprep.subr.bf16.mxu1 %v15454_v2  ;;  %v15532_v2 = vld [vmem:[%s21576_s5 + $0x3c4] ss:$12 sps:$4 sm:$0xff]  }
 0x79d   : > { %10999 = vmatpush1.bf16.msra.mxu0 %v15449_v16  ;;  %v15527_v16 = vld [vmem:[%s21576_s5 + $0x558] ss:$12 sps:$4 sm:$0xff]  }
 0x79e   : > { %11000 = vmatprep.subr.bf16.mxu0 %v15457_v29  ;;  %v15535_v29 = vld [vmem:[%s21576_s5 + $0x544] ss:$12 sps:$4 sm:$0xff]  }
 0x79f   : > { %10960 = vmatpush1.bf16.msra.mxu1 %v15452_v53  ;;  %v15530_v53 = vld [vmem:[%s21576_s5 + $0x3c0] ss:$12 sps:$4 sm:$0xff]  }
 0x7a0   : > { %10961 = vmatprep.subr.bf16.mxu1 %v15460_v52  ;;  %v9218_v52 = vcombine.high %v20701_v59, %v20701_v59 }
 0x7a1   : > { %11001 = vmatpush1.bf16.msra.mxu0 %v15455_v36  ;;  %v15538_v36 = vld [vmem:[%s21576_s5 + $0x6ac] ss:$12 sps:$4 sm:$0xff]  }
 0x7a2   : > { %11002 = vmatprep.subr.bf16.mxu0 %v15463_v3  ;;  %v15533_v3 = vld [vmem:[%s21576_s5 + $0x540] ss:$12 sps:$4 sm:$0xff]  }
 0x7a3   : > { %10962 = vmatpush1.bf16.msra.mxu1 %v15458_v40  ;;  %v20725_v40 = vrot.slane %v20495_v20, %v20150_v21  ;;  %v15540_v20 = vld [vmem:[%s21576_s5 + $0x828] ss:$12 sps:$4 sm:$0xff]  }
 0x7a4   : > { %10963 = vmatprep.subr.bf16.mxu1 %v15466_v63  ;;  %v15542_v63 = vld [vmem:[%s21576_s5 + $0x82c] ss:$12 sps:$4 sm:$0xff]  }
 0x7a5   : > { %11003 = vmatpush1.bf16.msra.mxu0 %v15461_v54  ;;  %v15536_v54 = vld [vmem:[%s21576_s5 + $0x6a8] ss:$12 sps:$4 sm:$0xff]  }
 0x7a6   : > { %11004 = vmatprep.subr.bf16.mxu0 %v15469_v37  ;;  %v20734_v37 = vrot.slane %v9218_v52, %v20150_v21  ;;  %v15611_v52 = vld [vmem:[%s21576_s5 + $0x70c] ss:$12 sps:$4 sm:$0xff]  }
 0x7a7   : > { %10964 = vmatpush1.bf16.msra.mxu1 %v15464_v6  ;;  %v15545_v6 = vld [vmem:[%s21576_s5 + $0x694] ss:$12 sps:$4 sm:$0xff]  }
 0x7a8   : > { %10965 = vmatprep.subr.bf16.mxu1 %v15472_v27  ;;  %v20745_v27 = vcombine.high %v20725_v40, %v20725_v40 }
 0x7a9   : > { %11005 = vmatpush1.bf16.msra.mxu0 %v15467_v8  ;;  %v15548_v8 = vld [vmem:[%s21576_s5 + $0x814] ss:$12 sps:$4 sm:$0xff]  }
 0x7aa   : > { %11006 = vmatprep.subr.bf16.mxu0 %v15475_v5  ;;  %v20753_v5 = vcombine.high %v20734_v37, %v20734_v37 }
 0x7ab   : > { %10966 = vmatpush1.bf16.msra.mxu1 %v15470_v33  ;;  %v15543_v33 = vld [vmem:[%s21576_s5 + $0x690] ss:$12 sps:$4 sm:$0xff]  }
 0x7ac   : > { %10967 = vmatprep.subr.bf16.mxu1 %v15478_v11  ;;  %v15551_v11 = vld [vmem:[%s21576_s5 + $0x67c] ss:$12 sps:$4 sm:$0xff]  }
 0x7ad   : > { %11007 = vmatpush1.bf16.msra.mxu0 %v15473_v23  ;;  %v15546_v23 = vld [vmem:[%s21576_s5 + $0x810] ss:$12 sps:$4 sm:$0xff]  }
 0x7ae   : > { %11008 = vmatprep.subr.bf16.mxu0 %v15481_v25  ;;  %v15554_v25 = vld [vmem:[%s21576_s5 + $0x7fc] ss:$12 sps:$4 sm:$0xff]  }
 0x7af   : > { %10968 = vmatpush1.bf16.msra.mxu1 %v15476_v62  ;;  %v15549_v62 = vld [vmem:[%s21576_s5 + $0x678] ss:$12 sps:$4 sm:$0xff]  }
 0x7b0   : > { %10969 = vmatprep.subr.bf16.mxu1 %v15484_v17  ;;  %v15557_v17 = vld [vmem:[%s21576_s5 + $0x664] ss:$12 sps:$4 sm:$0xff]  }
 0x7b1   : > { %11009 = vmatpush1.bf16.msra.mxu0 %v15479_v50  ;;  %v15552_v50 = vld [vmem:[%s21576_s5 + $0x7f8] ss:$12 sps:$4 sm:$0xff]  }
 0x7b2   : > { %11010 = vmatprep.subr.bf16.mxu0 %v15487_v15  ;;  %v15560_v15 = vld [vmem:[%s21576_s5 + $0x7e4] ss:$12 sps:$4 sm:$0xff]  }
 0x7b3   : > { %10970 = vmatpush1.bf16.msra.mxu1 %v15482_v18  ;;  %v15555_v18 = vld [vmem:[%s21576_s5 + $0x660] ss:$12 sps:$4 sm:$0xff]  }
 0x7b4   : > { %10971 = vmatprep.subr.bf16.mxu1 %v15490_v48  ;;  %v15563_v48 = vld [vmem:[%s21576_s5 + $0x64c] ss:$12 sps:$4 sm:$0xff]  }
 0x7b5   : > { %11011 = vmatpush1.bf16.msra.mxu0 %v15485_v0  ;;  %v15558_v0 = vld [vmem:[%s21576_s5 + $0x7e0] ss:$12 sps:$4 sm:$0xff]  }
 0x7b6   : > { %11012 = vmatprep.subr.bf16.mxu0 %v15493_v14  ;;  %v15566_v14 = vld [vmem:[%s21576_s5 + $0x7cc] ss:$12 sps:$4 sm:$0xff]  }
 0x7b7   : > { %10972 = vmatpush2.bf16.msra.mxu1 %v15488_v4  ;;  %v15561_v4 = vld [vmem:[%s21576_s5 + $0x648] ss:$12 sps:$4 sm:$0xff]  }
 0x7b8   : > { %10973 = vmatprep.subr.bf16.mxu1 %v15496_v51  ;;  %v15569_v51 = vld [vmem:[%s21576_s5 + $0x634] ss:$12 sps:$4 sm:$0xff]  }
 0x7b9   : > { %11013 = vmatpush2.bf16.msra.mxu0 %v15491_v24  ;;  %v15564_v24 = vld [vmem:[%s21576_s5 + $0x7c8] ss:$12 sps:$4 sm:$0xff]  }
 0x7ba   : > { %11014 = vmatprep.subr.bf16.mxu0 %v15499_v49  ;;  %v15572_v49 = vld [vmem:[%s21576_s5 + $0x7b4] ss:$12 sps:$4 sm:$0xff]  }
 0x7bb   : > { %10974 = vmatpush2.bf16.msra.mxu1 %v15494_v38  ;;  %v15567_v38 = vld [vmem:[%s21576_s5 + $0x630] ss:$12 sps:$4 sm:$0xff]  }
 0x7bc   : > { %10975 = vmatprep.subr.bf16.mxu1 %v15502_v39  ;;  %v15575_v39 = vld [vmem:[%s21576_s5 + $0x61c] ss:$12 sps:$4 sm:$0xff]  }
 0x7bd   : > { %11015 = vmatpush2.bf16.msra.mxu0 %v15497_v7  ;;  %v15570_v7 = vld [vmem:[%s21576_s5 + $0x7b0] ss:$12 sps:$4 sm:$0xff]  }
 0x7be   : > { %11016 = vmatprep.subr.bf16.mxu0 %v15505_v61  ;;  %v15578_v61 = vld [vmem:[%s21576_s5 + $0x79c] ss:$12 sps:$4 sm:$0xff]  }
 0x7bf   : > { %10976 = vmatpush2.bf16.msra.mxu1 %v15500_v31  ;;  %v15573_v31 = vld [vmem:[%s21576_s5 + $0x618] ss:$12 sps:$4 sm:$0xff]  }
 0x7c0   : > { %10977 = vmatprep.subr.bf16.mxu1 %v15508_v56  ;;  %v15581_v56 = vld [vmem:[%s21576_s5 + $0x604] ss:$12 sps:$4 sm:$0xff]  }
 0x7c1   : > { %11017 = vmatpush2.bf16.msra.mxu0 %v15503_v46  ;;  %v15576_v46 = vld [vmem:[%s21576_s5 + $0x798] ss:$12 sps:$4 sm:$0xff]  }
 0x7c2   : > { %11018 = vmatprep.subr.bf16.mxu0 %v15511_v13  ;;  %v15584_v13 = vld [vmem:[%s21576_s5 + $0x784] ss:$12 sps:$4 sm:$0xff]  }
 0x7c3   : > { %10978 = vmatpush2.bf16.msra.mxu1 %v15506_v57  ;;  %v15579_v57 = vld [vmem:[%s21576_s5 + $0x600] ss:$12 sps:$4 sm:$0xff]  }
 0x7c4   : > { %10979 = vmatprep.subr.bf16.mxu1 %v15514_v58  ;;  %v15587_v58 = vld [vmem:[%s21576_s5 + $0x76c] ss:$12 sps:$4 sm:$0xff]  }
 0x7c5   : > { %11019 = vmatpush2.bf16.msra.mxu0 %v15509_v34  ;;  %v15582_v34 = vld [vmem:[%s21576_s5 + $0x780] ss:$12 sps:$4 sm:$0xff]  }
 0x7c6   : > { %11020 = vmatprep.subr.bf16.mxu0 %v15517_v47  ;;  %v15590_v47 = vld [vmem:[%s21576_s5 + $0x8ec] ss:$12 sps:$4 sm:$0xff]  }
 0x7c7   : > { %10980 = vmatpush2.bf16.msra.mxu1 %v15512_v60  ;;  %v15585_v60 = vld [vmem:[%s21576_s5 + $0x768] ss:$12 sps:$4 sm:$0xff]  }
 0x7c8   : > { %10981 = vmatprep.subr.bf16.mxu1 %v15520_v45  ;;  %v15593_v45 = vld [vmem:[%s21576_s5 + $0x754] ss:$12 sps:$4 sm:$0xff]  }
 0x7c9   : > { %11021 = vmatpush2.bf16.msra.mxu0 %v15515_v55  ;;  %v15588_v55 = vld [vmem:[%s21576_s5 + $0x8e8] ss:$12 sps:$4 sm:$0xff]  }
 0x7ca   : > { %11022 = vmatprep.subr.bf16.mxu0 %v15523_v12  ;;  %v15596_v12 = vld [vmem:[%s21576_s5 + $0x8d4] ss:$12 sps:$4 sm:$0xff]  }
 0x7cb   : > { %10982 = vmatpush2.bf16.msra.mxu1 %v15518_v43  ;;  %v15591_v43 = vld [vmem:[%s21576_s5 + $0x750] ss:$12 sps:$4 sm:$0xff]  }
 0x7cc   : > { %10983 = vmatprep.subr.bf16.mxu1 %v15526_v41  ;;  %v15599_v41 = vld [vmem:[%s21576_s5 + $0x73c] ss:$12 sps:$4 sm:$0xff]  }
 0x7cd   : > { %11023 = vmatpush2.bf16.msra.mxu0 %v15521_v32  ;;  %v15594_v32 = vld [vmem:[%s21576_s5 + $0x8d0] ss:$12 sps:$4 sm:$0xff]  }
 0x7ce   : > { %11024 = vmatprep.subr.bf16.mxu0 %v15529_v22  ;;  %v15602_v22 = vld [vmem:[%s21576_s5 + $0x8bc] ss:$12 sps:$4 sm:$0xff]  }
 0x7cf   : > { %10984 = vmatpush2.bf16.msra.mxu1 %v15524_v44  ;;  %v15597_v44 = vld [vmem:[%s21576_s5 + $0x738] ss:$12 sps:$4 sm:$0xff]  }
 0x7d0   : > { %10985 = vmatprep.subr.bf16.mxu1 %v15532_v2  ;;  %v15605_v2 = vld [vmem:[%s21576_s5 + $0x724] ss:$12 sps:$4 sm:$0xff]  }
 0x7d1   : > { %11025 = vmatpush2.bf16.msra.mxu0 %v15527_v16  ;;  %v15600_v16 = vld [vmem:[%s21576_s5 + $0x8b8] ss:$12 sps:$4 sm:$0xff]  }
 0x7d2   : > { %11026 = vmatprep.subr.bf16.mxu0 %v15535_v29  ;;  %v15608_v29 = vld [vmem:[%s21576_s5 + $0x8a4] ss:$12 sps:$4 sm:$0xff]  }
 0x7d3   : > { %10986 = vmatpush2.bf16.msra.mxu1 %v15530_v53  ;;  %v15603_v53 = vld [vmem:[%s21576_s5 + $0x720] ss:$12 sps:$4 sm:$0xff]  }
 0x7d4   : > { %11037 = vmatprep.subr.bf16.mxu1 %v15538_v36  ;;  %v15606_v36 = vld [vmem:[%s21576_s5 + $0x8a0] ss:$12 sps:$4 sm:$0xff]  }
 0x7d5   : > { %11027 = vmatpush2.bf16.msra.mxu0 %v15533_v3  ;;  %v15614_v3 = vld [vmem:[%s21576_s5 + $0x88c] ss:$12 sps:$4 sm:$0xff]  }
 0x7d6   : > { %10988 = vmatmul.mubr.bf16.vlgmr.msra.gmra.mxu1 %v20725_v40  ;;  %11078 = vmatprep.subr.bf16.mxu0 %v15542_v63  ;;  %v15609_v63 = vld [vmem:[%s21576_s5 + $0x708] ss:$12 sps:$4 sm:$0xff]  }
 0x7d7   : > { %11038 = vmatpush1.bf16.msra.mxu1 %v15536_v54  ;;  %11069 = vmatprep.mubr.bf16.mxu1 %v20734_v37  ;;  %v15617_v54 = vld [vmem:[%s21576_s5 + $0x6f4] ss:$12 sps:$4 sm:$0xff]  }
 0x7d8   : > { %11029 = vmatmul.mubr.bf16.vlgmr.msra.gmra.mxu0 %v20745_v27  ;;  %11039 = vmatprep.subr.bf16.mxu1 %v15545_v6  ;;  %v15612_v6 = vld [vmem:[%s21576_s5 + $0x888] ss:$12 sps:$4 sm:$0xff]  }
 0x7d9   : > { %11079 = vmatpush1.bf16.msra.mxu0 %v15540_v20  ;;  %11110 = vmatprep.mubr.bf16.mxu0 %v20753_v5  ;;  %v15620_v20 = vld [vmem:[%s21576_s5 + $0x874] ss:$12 sps:$4 sm:$0xff]  }
 0x7da   : > { %11080 = vmatprep.subr.bf16.mxu0 %v15548_v8  ;;  %v15615_v8 = vld [vmem:[%s21576_s5 + $0x6f0] ss:$12 sps:$4 sm:$0xff]  }
 0x7db   : > { %11040 = vmatpush1.bf16.msra.mxu1 %v15543_v33  ;;  %v15623_v33 = vld [vmem:[%s21576_s5 + $0x6dc] ss:$12 sps:$4 sm:$0xff]  }
 0x7dc   : > { %11041 = vmatprep.subr.bf16.mxu1 %v15551_v11  ;;  %v15618_v11 = vld [vmem:[%s21576_s5 + $0x870] ss:$12 sps:$4 sm:$0xff]  }
 0x7dd   : > { %11081 = vmatpush1.bf16.msra.mxu0 %v15546_v23  ;;  %v15626_v23 = vld [vmem:[%s21576_s5 + $0x85c] ss:$12 sps:$4 sm:$0xff]  }
 0x7de   : > { %11082 = vmatprep.subr.bf16.mxu0 %v15554_v25  ;;  %v15621_v25 = vld [vmem:[%s21576_s5 + $0x6d8] ss:$12 sps:$4 sm:$0xff]  }
 0x7df   : > { %11042 = vmatpush1.bf16.msra.mxu1 %v15549_v62  ;;  %v15629_v62 = vld [vmem:[%s21576_s5 + $0x6c4] ss:$12 sps:$4 sm:$0xff]  }
 0x7e0   : > { %11043 = vmatprep.subr.bf16.mxu1 %v15557_v17  ;;  %v15624_v17 = vld [vmem:[%s21576_s5 + $0x858] ss:$12 sps:$4 sm:$0xff]  }
 0x7e1   : > { %11083 = vmatpush1.bf16.msra.mxu0 %v15552_v50  ;;  %v15632_v50 = vld [vmem:[%s21576_s5 + $0x844] ss:$12 sps:$4 sm:$0xff]  }
 0x7e2   : > { %11084 = vmatprep.subr.bf16.mxu0 %v15560_v15  ;;  %v15627_v15 = vld [vmem:[%s21576_s5 + $0x6c0] ss:$12 sps:$4 sm:$0xff]  }
 0x7e3   : > { %11044 = vmatpush1.bf16.msra.mxu1 %v15555_v18  ;;  %v15635_v18 = vld [vmem:[%s21576_s5 + $0x94c] ss:$12 sps:$4 sm:$0xff]  }
 0x7e4   : > { %11045 = vmatprep.subr.bf16.mxu1 %v15563_v48  ;;  %v15630_v48 = vld [vmem:[%s21576_s5 + $0x840] ss:$12 sps:$4 sm:$0xff]  }
 0x7e5   : > { %11085 = vmatpush1.bf16.msra.mxu0 %v15558_v0  ;;  %v20936_v0 = vrot.slane %v20701_v59, %v20150_v21  ;;  %v15637_v59 = vld [vmem:[%s21576_s5 + $0x230] ss:$12 sps:$4 sm:$0xff]  }
 0x7e6   : > { %11086 = vmatprep.subr.bf16.mxu0 %v15566_v14  ;;  %v15636_v14 = vld [vmem:[%s21576_s5 + $0x2f0] ss:$12 sps:$4 sm:$0xff]  }
 0x7e7   : > { %11046 = vmatpush1.bf16.msra.mxu1 %v15561_v4  ;;  %v15633_v4 = vld [vmem:[%s21576_s5 + $0x948] ss:$12 sps:$4 sm:$0xff]  }
 0x7e8   : > { %11047 = vmatprep.subr.bf16.mxu1 %v15569_v51  ;;  %v15640_v51 = vld [vmem:[%s21576_s5 + $0x934] ss:$12 sps:$4 sm:$0xff]  }
 0x7e9   : > { %11087 = vmatpush1.bf16.msra.mxu0 %v15564_v24  ;;  %v20953_v24 = vcombine.high %v20936_v0, %v20936_v0 }
 0x7ea   : > { %11088 = vmatprep.subr.bf16.mxu0 %v15572_v49  ;;  %v15641_v49 = vld [vmem:[%s21576_s5 + $0x2d8] ss:$12 sps:$4 sm:$0xff]  }
 0x7eb   : > { %11048 = vmatpush1.bf16.msra.mxu1 %v15567_v38  ;;  %v15638_v38 = vld [vmem:[%s21576_s5 + $0x930] ss:$12 sps:$4 sm:$0xff]  }
 0x7ec   : > { %11049 = vmatprep.subr.bf16.mxu1 %v15575_v39  ;;  %v22215_v39 = vmov 0  }
 0x7ed   : > { %11089 = vmatpush1.bf16.msra.mxu0 %v15570_v7  ;;  %v15645_v7 = vld [vmem:[%s21576_s5 + $0x91c] ss:$12 sps:$4 sm:$0xff]  }
 0x7ee   : > { %11090 = vmatprep.subr.bf16.mxu0 %v15578_v61  ;;  %v15642_v61 = vld [vmem:[%s21576_s5 + $0x218] ss:$12 sps:$4 sm:$0xff]  }
 0x7ef   : > { %11050 = vmatpush1.bf16.msra.mxu1 %v15573_v31  ;;  %v15646_v31 = vld [vmem:[%s21576_s5 + $0x2c0] ss:$12 sps:$4 sm:$0xff]  }
 0x7f0   : > { %11051 = vmatprep.subr.bf16.mxu1 %v15581_v56  ;;  %v15643_v56 = vld [vmem:[%s21576_s5 + $0x918] ss:$12 sps:$4 sm:$0xff]  }
 0x7f1   : > { %11091 = vmatpush1.bf16.msra.mxu0 %v15576_v46  ;;  %v9203_v46 = vcombine.high %v20688_v30, %v20688_v30  ;;  %v15648_v30 = vld [vmem:[%s21576_s5 + $0x900] ss:$12 sps:$4 sm:$0xff]  }
 0x7f2   : > { %11092 = vmatprep.subr.bf16.mxu0 %v15584_v13  ;;  %v15647_v13 = vld [vmem:[%s21576_s5 + $0x200] ss:$12 sps:$4 sm:$0xff]  }
 0x7f3   : > { %11052 = vmatpush1.bf16.msra.mxu1 %v15579_v57  ;;  %v15651_v57 = vld [vmem:[%s21576_s5 + $0x2a8] ss:$12 sps:$4 sm:$0xff]  }
 0x7f4   : > { %11053 = vmatprep.subr.bf16.mxu1 %v15587_v58  ;;  %v9217_v58 = vrot.slane %v9203_v46, %v20150_v21  ;;  %v10857_v46 = vsub.s32 0, %v20136_v10 }
 0x7f5   : > { %11093 = vmatpush1.bf16.msra.mxu0 %v15582_v34  ;;  %v15653_v34 = vld [vmem:[%s21576_s5 + $0x170] ss:$12 sps:$4 sm:$0xff]  }
 0x7f6   : > { %11094 = vmatprep.subr.bf16.mxu0 %v15590_v47  ;;  %v15652_v47 = vld [vmem:[%s21576_s5 + $0x1e8] ss:$12 sps:$4 sm:$0xff]  }
 0x7f7   : > { %11054 = vmatpush2.bf16.msra.mxu1 %v15585_v60  ;;  %v15655_v60 = vld [vmem:[%s21576_s5 + $0x290] ss:$12 sps:$4 sm:$0xff]  }
 0x7f8   : > { %11055 = vmatprep.subr.bf16.mxu1 %v15593_v45  ;;  %v15654_v45 = vld [vmem:[%s21576_s5 + $0xb0] ss:$12 sps:$4 sm:$0xff]  }
 0x7f9   : > { %11095 = vmatpush2.bf16.msra.mxu0 %v15588_v55  ;;  %v21004_v55 = vrot.slane %v9217_v58, %v20150_v21  ;;  %v15658_v21 = vld [vmem:[%s21576_s5 + $0x98] ss:$12 sps:$4 sm:$0xff]   ;;  %v15703_v58 = vld [vmem:[%s21576_s5 + $0x8f0] ss:$12 sps:$4 sm:$0xff]  }
 0x7fa   : > { %11096 = vmatprep.subr.bf16.mxu0 %v15596_v12  ;;  %v15657_v12 = vld [vmem:[%s21576_s5 + $0x158] ss:$12 sps:$4 sm:$0xff]  }
 0x7fb   : > { %11056 = vmatpush2.bf16.msra.mxu1 %v15591_v43  ;;  %v15656_v43 = vld [vmem:[%s21576_s5 + $0x1d0] ss:$12 sps:$4 sm:$0xff]  }
 0x7fc   : > { %11057 = vmatprep.subr.bf16.mxu1 %v15599_v41  ;;  %v15659_v41 = vld [vmem:[%s21576_s5 + $0x278] ss:$12 sps:$4 sm:$0xff]  }
 0x7fd   : > { %11097 = vmatpush2.bf16.msra.mxu0 %v15594_v32  ;;  %v15661_v32 = vld [vmem:[%s21576_s5 + $0x140] ss:$12 sps:$4 sm:$0xff]  }
 0x7fe   : > { %11098 = vmatprep.subr.bf16.mxu0 %v15602_v22  ;;  %v15660_v22 = vld [vmem:[%s21576_s5 + $0x1b8] ss:$12 sps:$4 sm:$0xff]  }
 0x7ff   : > { %11058 = vmatpush2.bf16.msra.mxu1 %v15597_v44  ;;  %v15663_v44 = vld [vmem:[%s21576_s5 + $0x260] ss:$12 sps:$4 sm:$0xff]  }
 0x800   : > { %11059 = vmatprep.subr.bf16.mxu1 %v15605_v2  ;;  %v15665_v2 = vld [vmem:[%s21576_s5 + $0x128] ss:$12 sps:$4 sm:$0xff]  }
 0x801   : > { %11099 = vmatpush2.bf16.msra.mxu0 %v15600_v16  ;;  %v15664_v16 = vld [vmem:[%s21576_s5 + $0x1a0] ss:$12 sps:$4 sm:$0xff]  }
 0x802   : > { %11100 = vmatprep.subr.bf16.mxu0 %v15608_v29  ;;  %v15667_v29 = vld [vmem:[%s21576_s5 + $0x248] ss:$12 sps:$4 sm:$0xff]  }
 0x803   : > { %11060 = vmatpush2.bf16.msra.mxu1 %v15603_v53  ;;  %v15666_v53 = vld [vmem:[%s21576_s5 + $0x68] ss:$12 sps:$4 sm:$0xff]  }
 0x804   : > { %11061 = vmatprep.subr.bf16.mxu1 %v15611_v52  ;;  %v15669_v52 = vld [vmem:[%s21576_s5 + $0x110] ss:$12 sps:$4 sm:$0xff]  }
 0x805   : > { %11101 = vmatpush2.bf16.msra.mxu0 %v15606_v36  ;;  %v15668_v36 = vld [vmem:[%s21576_s5 + $0x188] ss:$12 sps:$4 sm:$0xff]  }
 0x806   : > { %11102 = vmatprep.subr.bf16.mxu0 %v15614_v3  ;;  %v15671_v3 = vld [vmem:[%s21576_s5 + $0x5f0] ss:$12 sps:$4 sm:$0xff]  }
 0x807   : > { %11062 = vmatpush2.bf16.msra.mxu1 %v15609_v63  ;;  %v15670_v63 = vld [vmem:[%s21576_s5 + $0x50] ss:$12 sps:$4 sm:$0xff]  }
 0x808   : > { %11063 = vmatprep.subr.bf16.mxu1 %v15617_v54  ;;  %v15673_v54 = vld [vmem:[%s21576_s5 + $0xf8] ss:$12 sps:$4 sm:$0xff]  }
 0x809   : > { %11103 = vmatpush2.bf16.msra.mxu0 %v15612_v6  ;;  %v15672_v6 = vld [vmem:[%s21576_s5 + $0x530] ss:$12 sps:$4 sm:$0xff]  }
 0x80a   : > { %11104 = vmatprep.subr.bf16.mxu0 %v15620_v20  ;;  %v15675_v20 = vld [vmem:[%s21576_s5 + $0x5d8] ss:$12 sps:$4 sm:$0xff]  }
 0x80b   : > { %11064 = vmatpush2.bf16.msra.mxu1 %v15615_v8  ;;  %v15674_v8 = vld [vmem:[%s21576_s5 + $0x38] ss:$12 sps:$4 sm:$0xff]  }
 0x80c   : > { %11065 = vmatprep.subr.bf16.mxu1 %v15623_v33  ;;  %v15677_v33 = vld [vmem:[%s21576_s5 + $0xe0] ss:$12 sps:$4 sm:$0xff]  }
 0x80d   : > { %11105 = vmatpush2.bf16.msra.mxu0 %v15618_v11  ;;  %v15676_v11 = vld [vmem:[%s21576_s5 + $0x518] ss:$12 sps:$4 sm:$0xff]  }
 0x80e   : > { %11106 = vmatprep.subr.bf16.mxu0 %v15626_v23  ;;  %v15679_v23 = vld [vmem:[%s21576_s5 + $0x5c0] ss:$12 sps:$4 sm:$0xff]  }
 0x80f   : > { %11066 = vmatpush2.bf16.msra.mxu1 %v15621_v25  ;;  %v15681_v25 = vld [vmem:[%s21576_s5 + $0xc8] ss:$12 sps:$4 sm:$0xff]  }
 0x810   : > { %11067 = vmatprep.subr.bf16.mxu1 %v15629_v62  ;;  %v15683_v62 = vld [vmem:[%s21576_s5 + $0x5a8] ss:$12 sps:$4 sm:$0xff]  }
 0x811   : > { %11107 = vmatpush2.bf16.msra.mxu0 %v15624_v17  ;;  %v15682_v17 = vld [vmem:[%s21576_s5 + $0x8] ss:$12 sps:$4 sm:$0xff]  }
 0x812   : > { %11108 = vmatprep.subr.bf16.mxu0 %v15632_v50  ;;  %v15685_v50 = vld [vmem:[%s21576_s5 + $0x470] ss:$12 sps:$4 sm:$0xff]  }
 0x813   : > { %11068 = vmatpush2.bf16.msra.mxu1 %v15627_v15  ;;  %v15684_v15 = vld [vmem:[%s21576_s5 + $0x4e8] ss:$12 sps:$4 sm:$0xff]  }
 0x814   : > { %11127 = vmatprep.subr.bf16.mxu1 %v15635_v18  ;;  %v15687_v18 = vld [vmem:[%s21576_s5 + $0x590] ss:$12 sps:$4 sm:$0xff]  }
 0x815   : > { %11109 = vmatpush2.bf16.msra.mxu0 %v15630_v48  ;;  %v15686_v48 = vld [vmem:[%s21576_s5 + $0x3b0] ss:$12 sps:$4 sm:$0xff]  }
 0x816   : > { %11070 = vmatmul.mubr.bf16.vlgmr.msra.gmra.mxu1 %v20936_v0  ;;  %13632 = vmatprep.subr.bf16.mxu0 %v15636_v14  ;;  %v15689_v14 = vld [vmem:[%s21576_s5 + $0x458] ss:$12 sps:$4 sm:$0xff]  }
 0x817   : > { %11128 = vmatpush1.bf16.msra.mxu1 %v15633_v4  ;;  %11151 = vmatprep.mubr.bf16.mxu1 %v22215_v39  ;;  %v15688_v4 = vld [vmem:[%s21576_s5 + $0x4d0] ss:$12 sps:$4 sm:$0xff]  }
 0x818   : > { %11111 = vmatmul.mubr.bf16.vlgmr.msra.gmra.mxu0 %v20953_v24  ;;  %11129 = vmatprep.subr.bf16.mxu1 %v15640_v51  ;;  %v15691_v51 = vld [vmem:[%s21576_s5 + $0x578] ss:$12 sps:$4 sm:$0xff]  }
 0x819   : > { %13633 = vmatpush3.bf16.msra.mxu0 %v15637_v59  ;;  %11232 = vmatprep.mubr.bf16.mxu0 %v20511_v26  ;;  %v15650_v26 = vld [vmem:[%s21576_s5 + $0x904] ss:$12 sps:$4 sm:$0xff]  }
 0x81a   : > { %13634 = vmatprep.subr.bf16.mxu0 %v15641_v49  ;;  %v15690_v59 = vld [vmem:[%s21576_s5 + $0x398] ss:$12 sps:$4 sm:$0xff]   ;;  %v15693_v49 = vld [vmem:[%s21576_s5 + $0x440] ss:$12 sps:$4 sm:$0xff]  }
 0x81b   : > { %11130 = vmatpush1.bf16.msra.mxu1 %v15638_v38  ;;  %v15695_v38 = vld [vmem:[%s21576_s5 + $0x560] ss:$12 sps:$4 sm:$0xff]  }
 0x81c   : > { %11131 = vmatprep.subr.bf16.mxu1 %v15645_v7  ;;  %v15697_v7 = vld [vmem:[%s21576_s5 + $0x428] ss:$12 sps:$4 sm:$0xff]  }
 0x81d   : > { %13635 = vmatpush3.bf16.msra.mxu0 %v15642_v61  ;;  %v15696_v61 = vld [vmem:[%s21576_s5 + $0x4a0] ss:$12 sps:$4 sm:$0xff]  }
 0x81e   : > { %13636 = vmatprep.subr.bf16.mxu0 %v15646_v31  ;;  %v15699_v31 = vld [vmem:[%s21576_s5 + $0x548] ss:$12 sps:$4 sm:$0xff]  }
 0x81f   : > { %11132 = vmatpush1.bf16.msra.mxu1 %v15643_v56  ;;  %v15698_v56 = vld [vmem:[%s21576_s5 + $0x368] ss:$12 sps:$4 sm:$0xff]  }
 0x820   : > { %11133 = vmatprep.subr.bf16.mxu1 %v15650_v26  ;;  %v15701_v26 = vld [vmem:[%s21576_s5 + $0x410] ss:$12 sps:$4 sm:$0xff]  }
 0x821   : > { %13637 = vmatpush3.bf16.msra.mxu0 %v15647_v13  ;;  %v21152_v13 = vld [vmem:[%s21577_s6] sm:$0x7] }
 0x822   : > { %13638 = vmatprep.subr.bf16.mxu0 %v15651_v57  ;;  %v15700_v57 = vld [vmem:[%s21576_s5 + $0x488] ss:$12 sps:$4 sm:$0xff]  }
 0x823   : > { %11134 = vmatpush1.bf16.msra.mxu1 %v15648_v30  ;;  %v10861_v30 = vsub.s32 1, %v20136_v10 }
 0x824   : > { %13610 = vmatprep.subr.bf16.mxu1 %v15653_v34  ;;  %v10858_v34 = vrot.slane %v21152_v13, %v10857_v46 }
 0x825   : > { %13639 = vmatpush3.bf16.msra.mxu0 %v15652_v47  ;;  %v15702_v47 = vld [vmem:[%s21576_s5 + $0x350] ss:$12 sps:$4 sm:$0xff]  }
 0x826   : > { %13133 = vmatmul.mubr.msk.bf16.vlgmr.msra.gmra.mxu1 %vm1446_vm2, %v21004_v55  ;;  %13640 = vmatprep.subr.bf16.mxu0 %v15655_v60  ;;  %v15705_v60 = vld [vmem:[%s21576_s5 + $0x3f8] ss:$12 sps:$4 sm:$0xff]  }
 0x827   : > { %13611 = vmatpush3.bf16.msra.mxu1 %v15654_v45  ;;  %11192 = vmatprep.mubr.bf16.mxu1 %v20501_v9  ;;  %v15662_v9 = vld [vmem:[%s21576_s5 + $0x80] ss:$12 sps:$4 sm:$0xff]   ;;  %v10862_v45 = vrot.slane %v21152_v13, %v10861_v30 }
 0x828   : > { %13612 = vmatprep.subr.bf16.mxu1 %v15657_v12  ;;  %v15704_v12 = vld [vmem:[%s21576_s5 + $0x830] ss:$12 sps:$4 sm:$0xff]  }
 0x829   : > { %13641 = vmatpush3.bf16.msra.mxu0 %v15656_v43 }
 0x82a   : > { %13642 = vmatprep.subr.bf16.mxu0 %v15659_v41  ;;  %v15707_v41 = vld [vmem:[%s21576_s5 + $0x8d8] ss:$12 sps:$4 sm:$0xff]  }
 0x82b   : > { %13613 = vmatpush3.bf16.msra.mxu1 %v15658_v21 }
 0x82c   : > { %13614 = vmatprep.subr.bf16.mxu1 %v15661_v32  ;;  %v15706_v32 = vld [vmem:[%s21576_s5 + $0x338] ss:$12 sps:$4 sm:$0xff]  }
 0x82d   : > { %13643 = vmatpush3.bf16.msra.mxu0 %v15660_v22 }
 0x82e   : > { %13644 = vmatprep.subr.bf16.mxu0 %v15663_v44 }
 0x82f   : > { %13615 = vmatpush3.bf16.msra.mxu1 %v15662_v9  ;;  %v15709_v9 = vld [vmem:[%s21576_s5 + $0x3e0] ss:$12 sps:$4 sm:$0xff]  }
 0x830   : > { %13616 = vmatprep.subr.bf16.mxu1 %v15665_v2 }
 0x831   : > { %13645 = vmatpush3.bf16.msra.mxu0 %v15664_v16 }
 0x832   : > { %13646 = vmatprep.subr.bf16.mxu0 %v15667_v29  ;;  %v15708_v29 = vld [vmem:[%s21576_s5 + $0x818] ss:$12 sps:$4 sm:$0xff]  }
 0x833   : > { %13617 = vmatpush3.bf16.msra.mxu1 %v15666_v53 }
 0x834   : > { %13618 = vmatprep.subr.bf16.mxu1 %v15669_v52 }
 0x835   : > { %13647 = vmatpush3.bf16.msra.mxu0 %v15668_v36 }
 0x836   : > { %13676 = vmatprep.subr.bf16.mxu0 %v15671_v3  ;;  %v15710_v3 = vld [vmem:[%s21576_s5 + $0x320] ss:$12 sps:$4 sm:$0xff]  }
 0x837   : > { %13619 = vmatpush3.bf16.msra.mxu1 %v15670_v63 }
 0x838   : > { %11233 = vmatmul.mubr.bf16.vlgmr.msra.gmra.mxu0 %v20524_v19  ;;  %13620 = vmatprep.subr.bf16.mxu1 %v15673_v54  ;;  %v15678_v19 = vld [vmem:[%s21576_s5 + $0x20] ss:$12 sps:$4 sm:$0xff]   ;;  %v15713_v54 = vld [vmem:[%s21576_s5 + $0x3c8] ss:$12 sps:$4 sm:$0xff]  }
 0x839   : > { %13677 = vmatpush3.bf16.msra.mxu0 %v15672_v6  ;;  %11312 = vmatprep.mubr.bf16.mxu0 %v20536_v1  ;;  %v15680_v1 = vld [vmem:[%s21576_s5 + $0x500] ss:$12 sps:$4 sm:$0xff]  }
 0x83a   : > { %13678 = vmatprep.subr.bf16.mxu0 %v15675_v20  ;;  %v15712_v6 = vld [vmem:[%s21576_s5 + $0x800] ss:$12 sps:$4 sm:$0xff]  }
 0x83b   : > { %13621 = vmatpush3.bf16.msra.mxu1 %v15674_v8  ;;  %v15715_v8 = vld [vmem:[%s21576_s5 + $0x8a8] ss:$12 sps:$4 sm:$0xff]  }
 0x83c   : > { %13622 = vmatprep.subr.bf16.mxu1 %v15677_v33  ;;  %v15714_v33 = vld [vmem:[%s21576_s5 + $0x308] ss:$12 sps:$4 sm:$0xff]  }
 0x83d   : > { %13679 = vmatpush3.bf16.msra.mxu0 %v15676_v11  ;;  %v15717_v11 = vld [vmem:[%s21576_s5 + $0x770] ss:$12 sps:$4 sm:$0xff]  }
 0x83e   : > { %13680 = vmatprep.subr.bf16.mxu0 %v15679_v23  ;;  %v15716_v23 = vld [vmem:[%s21576_s5 + $0x7e8] ss:$12 sps:$4 sm:$0xff]  }
 0x83f   : > { %13623 = vmatpush3.bf16.msra.mxu1 %v15678_v19  ;;  %v15719_v19 = vld [vmem:[%s21576_s5 + $0x890] ss:$12 sps:$4 sm:$0xff]  }
 0x840   : > { %13624 = vmatprep.subr.bf16.mxu1 %v15681_v25  ;;  %v15718_v25 = vld [vmem:[%s21576_s5 + $0x6b0] ss:$12 sps:$4 sm:$0xff]  }
 0x841   : > { %13681 = vmatpush3.bf16.msra.mxu0 %v15680_v1  ;;  %v15721_v1 = vld [vmem:[%s21576_s5 + $0x758] ss:$12 sps:$4 sm:$0xff]  }
 0x842   : > { %13682 = vmatprep.subr.bf16.mxu0 %v15683_v62  ;;  %v15720_v62 = vld [vmem:[%s21576_s5 + $0x7d0] ss:$12 sps:$4 sm:$0xff]  }
 0x843   : > { %13625 = vmatpush3.bf16.msra.mxu1 %v15682_v17  ;;  %v15723_v17 = vld [vmem:[%s21576_s5 + $0x878] ss:$12 sps:$4 sm:$0xff]  }
 0x844   : > { %13654 = vmatprep.subr.bf16.mxu1 %v15685_v50  ;;  %v15722_v50 = vld [vmem:[%s21576_s5 + $0x698] ss:$12 sps:$4 sm:$0xff]  }
 0x845   : > { %13683 = vmatpush3.bf16.msra.mxu0 %v15684_v15  ;;  %v15725_v15 = vld [vmem:[%s21576_s5 + $0x740] ss:$12 sps:$4 sm:$0xff]  }
 0x846   : > { %11193 = vmatmul.mubr.bf16.vlgmr.msra.gmra.mxu1 %v20498_v28  ;;  %13684 = vmatprep.subr.bf16.mxu0 %v15687_v18  ;;  %v15692_v28 = vld [vmem:[%s21576_s5 + $0x4b8] ss:$12 sps:$4 sm:$0xff]   ;;  %v15727_v18 = vld [vmem:[%s21576_s5 + $0x860] ss:$12 sps:$4 sm:$0xff]  }
 0x847   : > { %13655 = vmatpush3.bf16.msra.mxu1 %v15686_v48  ;;  %11272 = vmatprep.mubr.bf16.mxu1 %v20514_v42  ;;  %v15694_v42 = vld [vmem:[%s21576_s5 + $0x380] ss:$12 sps:$4 sm:$0xff]   ;;  %v15729_v48 = vld [vmem:[%s21576_s5 + $0x728] ss:$12 sps:$4 sm:$0xff]  }
 0x848   : > { %13656 = vmatprep.subr.bf16.mxu1 %v15689_v14  ;;  %v15728_v14 = vld [vmem:[%s21576_s5 + $0x7a0] ss:$12 sps:$4 sm:$0xff]  }
 0x849   : > { %13685 = vmatpush3.bf16.msra.mxu0 %v15688_v4  ;;  %v15731_v4 = vld [vmem:[%s21576_s5 + $0x848] ss:$12 sps:$4 sm:$0xff]  }
 0x84a   : > { %13686 = vmatprep.subr.bf16.mxu0 %v15691_v51  ;;  %v15730_v51 = vld [vmem:[%s21576_s5 + $0x668] ss:$12 sps:$4 sm:$0xff]  }
 0x84b   : > { %13657 = vmatpush3.bf16.msra.mxu1 %v15690_v59  ;;  %v15733_v59 = vld [vmem:[%s21576_s5 + $0x710] ss:$12 sps:$4 sm:$0xff]  }
 0x84c   : > { %13658 = vmatprep.subr.bf16.mxu1 %v15693_v49  ;;  %v15732_v49 = vld [vmem:[%s21576_s5 + $0x788] ss:$12 sps:$4 sm:$0xff]  }
 0x84d   : > { %13687 = vmatpush3.bf16.msra.mxu0 %v15692_v28  ;;  %v15734_v28 = vld [vmem:[%s21576_s5 + $0x650] ss:$12 sps:$4 sm:$0xff]  }
 0x84e   : > { %13688 = vmatprep.subr.bf16.mxu0 %v15695_v38  ;;  %v15735_v38 = vld [vmem:[%s21576_s5 + $0x6f8] ss:$12 sps:$4 sm:$0xff]  }
 0x84f   : > { %13659 = vmatpush3.bf16.msra.mxu1 %v15694_v42  ;;  %v15736_v42 = vld [vmem:[%s21576_s5 + $0x638] ss:$12 sps:$4 sm:$0xff]  }
 0x850   : > { %13660 = vmatprep.subr.bf16.mxu1 %v15697_v7  ;;  %v15737_v7 = vld [vmem:[%s21576_s5 + $0x6e0] ss:$12 sps:$4 sm:$0xff]  }
 0x851   : > { %13689 = vmatpush3.bf16.msra.mxu0 %v15696_v61  ;;  %v15738_v61 = vld [vmem:[%s21576_s5 + $0x620] ss:$12 sps:$4 sm:$0xff]  }
 0x852   : > { %13690 = vmatprep.subr.bf16.mxu0 %v15699_v31  ;;  %v15739_v31 = vld [vmem:[%s21576_s5 + $0x6c8] ss:$12 sps:$4 sm:$0xff]  }
 0x853   : > { %13661 = vmatpush3.bf16.msra.mxu1 %v15698_v56  ;;  %v15741_v56 = vld [vmem:[%s21576_s5 + $0x950] ss:$12 sps:$4 sm:$0xff]  }
 0x854   : > { %13662 = vmatprep.subr.bf16.mxu1 %v15701_v26  ;;  %v15742_v26 = vld [vmem:[%s21576_s5 + $0x938] ss:$12 sps:$4 sm:$0xff]  }
 0x855   : > { %13691 = vmatpush3.bf16.msra.mxu0 %v15700_v57  ;;  %v15743_v57 = vld [vmem:[%s21576_s5 + $0x920] ss:$12 sps:$4 sm:$0xff]  }
 0x856   : > { %v10907_v43 = vpop.f32.mrf.mxu1  ;;  %13720 = vmatprep.subr.bf16.mxu0 %v15703_v58  ;;  %v15747_v58 = vld [vmem:[%s21578_s7 + $0x74] ss:$8 sps:$4 sm:$0xff]  }
 0x857   : > { %v10908_v21 = vadd.f32 %v10907_v43, %v10858_v34  ;;  %13663 = vmatpush3.bf16.msra.mxu1 %v15702_v47  ;;  %v15745_v34 = vld [vmem:[%s21578_s7 + $0x70] ss:$8 sps:$4 sm:$0xff]   ;;  %v15750_v47 = vld [vmem:[%s21578_s7 + $0x64] ss:$8 sps:$4 sm:$0xff]  }
 0x858   : > { %11313 = vmatmul.mubr.bf16.vlgmr.msra.gmra.mxu0 %v20745_v27  ;;  %v10909_v22 = vpop.f32.mrf.mxu1  ;;  %v10948_v44 = vpop.f32.mrf.mxu0  ;;  %13664 = vmatprep.subr.bf16.mxu1 %v15705_v60  ;;  %v15711_v27 = vld [vmem:[%s21576_s5 + $0x8c0] ss:$12 sps:$4 sm:$0xff]  }
 0x859   : > { %v10910_v2 = vadd.f32 %v10909_v22, %v10862_v45  ;;  %v21186_v16 = vadd.f32 %v10948_v44, %v10908_v21  ;;  %13721 = vmatpush3.bf16.msra.mxu0 %v15704_v12  ;;  %11392 = vmatprep.mubr.bf16.mxu0 %v20753_v5  ;;  %v15748_v45 = vld [vmem:[%s21578_s7 + $0x60] ss:$8 sps:$4 sm:$0xff]  }
 0x85a   : > { %v10911_v53 = vpop.f32.mrf.mxu1  ;;  %v10950_v52 = vpop.f32.mrf.mxu0  ;;  %13722 = vmatprep.subr.bf16.mxu0 %v15707_v41  ;;  %v15753_v41 = vld [vmem:[%s21578_s7 + $0x54] ss:$8 sps:$4 sm:$0xff]  }
 0x85b   : > { %v21195_v36 = vadd.f32 %v10950_v52, %v10910_v2  ;;  %13665 = vmatpush3.bf16.msra.mxu1 %v15706_v32  ;;  %v15754_v52 = vld [vmem:[%s21578_s7 + $0x40] ss:$8 sps:$4 sm:$0xff]  }
 0x85c   : > { %v10912_v63 = vpop.f32.mrf.mxu1  ;;  %v10952_v5 = vpop.f32.mrf.mxu0  ;;  %13666 = vmatprep.subr.bf16.mxu1 %v15709_v9  ;;  %v15751_v9 = vld [vmem:[%s21578_s7 + $0x50] ss:$8 sps:$4 sm:$0xff]  }
 0x85d   : > { %13723 = vmatpush3.bf16.msra.mxu0 %v15708_v29  ;;  %v15756_v29 = vld [vmem:[%s21578_s7 + $0x44] ss:$8 sps:$4 sm:$0xff]   ;;  %v15760_v63 = vld [vmem:[%s21578_s7 + $0x20] ss:$8 sps:$4 sm:$0xff]   ;;  %v15765_v5 = vld [vmem:[%s21578_s7 + $0x14] ss:$8 sps:$4 sm:$0xff]  }
 0x85e   : > { %v10953_v20 = vpop.f32.mrf.mxu0  ;;  %13724 = vmatprep.subr.bf16.mxu0 %v15711_v27  ;;  %v15759_v27 = vld [vmem:[%s21578_s7 + $0x34] ss:$8 sps:$4 sm:$0xff]  }
 0x85f   : > { %13667 = vmatpush3.bf16.msra.mxu1 %v15710_v3  ;;  %v15762_v3 = vld [vmem:[%s21578_s7 + $0x24] ss:$8 sps:$4 sm:$0xff]   ;;  %v15766_v20 = vld [vmem:[%s21578_s7] ss:$8 sps:$4 sm:$0xff]  }
 0x860   : > { %13668 = vmatprep.subr.bf16.mxu1 %v15713_v54  ;;  %v15763_v54 = vld [vmem:[%s21578_s7 + $0x10] ss:$8 sps:$4 sm:$0xff]  }
 0x861   : > { %13725 = vmatpush3.bf16.msra.mxu0 %v15712_v6  ;;  %v15768_v6 = vld [vmem:[%s21578_s7 + $0x4] ss:$8 sps:$4 sm:$0xff]  }
 0x862   : > { %13726 = vmatprep.subr.bf16.mxu0 %v15715_v8  ;;  %v15771_v8 = vld [vmem:[%s21578_s7 + $0xf4] ss:$8 sps:$4 sm:$0xff]  }
 0x863   : > { %13669 = vmatpush3.bf16.msra.mxu1 %v15714_v33  ;;  %v15769_v33 = vld [vmem:[%s21578_s7 + $0xf0] ss:$8 sps:$4 sm:$0xff]  }
 0x864   : > { %13698 = vmatprep.subr.bf16.mxu1 %v15717_v11  ;;  %v15774_v11 = vld [vmem:[%s21578_s7 + $0xe4] ss:$8 sps:$4 sm:$0xff]  }
 0x865   : > { %13727 = vmatpush3.bf16.msra.mxu0 %v15716_v23  ;;  %v15772_v23 = vld [vmem:[%s21578_s7 + $0xe0] ss:$8 sps:$4 sm:$0xff]  }
 0x866   : > { %11273 = vmatmul.mubr.bf16.vlgmr.msra.gmra.mxu1 %v20725_v40  ;;  %13728 = vmatprep.subr.bf16.mxu0 %v15719_v19  ;;  %v15724_v40 = vld [vmem:[%s21576_s5 + $0x7b8] ss:$12 sps:$4 sm:$0xff]   ;;  %v15777_v19 = vld [vmem:[%s21578_s7 + $0xd4] ss:$8 sps:$4 sm:$0xff]  }
 0x867   : > { %13699 = vmatpush3.bf16.msra.mxu1 %v15718_v25  ;;  %11352 = vmatprep.mubr.bf16.mxu1 %v20734_v37  ;;  %v15726_v37 = vld [vmem:[%s21576_s5 + $0x680] ss:$12 sps:$4 sm:$0xff]   ;;  %v15775_v25 = vld [vmem:[%s21578_s7 + $0xd0] ss:$8 sps:$4 sm:$0xff]  }
 0x868   : > { %13700 = vmatprep.subr.bf16.mxu1 %v15721_v1  ;;  %v15780_v1 = vld [vmem:[%s21578_s7 + $0xc4] ss:$8 sps:$4 sm:$0xff]  }
 0x869   : > { %13729 = vmatpush3.bf16.msra.mxu0 %v15720_v62  ;;  %v15793_v62 = vld [vmem:[%s21578_s7 + $0x170] ss:$8 sps:$4 sm:$0xff]  }
 0x86a   : > { %13730 = vmatprep.subr.bf16.mxu0 %v15723_v17  ;;  %v15795_v17 = vld [vmem:[%s21578_s7 + $0x174] ss:$8 sps:$4 sm:$0xff]  }
 0x86b   : > { %13701 = vmatpush3.bf16.msra.mxu1 %v15722_v50  ;;  %v15798_v50 = vld [vmem:[%s21578_s7 + $0x164] ss:$8 sps:$4 sm:$0xff]  }
 0x86c   : > { %13702 = vmatprep.subr.bf16.mxu1 %v15725_v15  ;;  %v15778_v15 = vld [vmem:[%s21578_s7 + $0xc0] ss:$8 sps:$4 sm:$0xff]  }
 0x86d   : > { %13731 = vmatpush3.bf16.msra.mxu0 %v15724_v40  ;;  %v15796_v40 = vld [vmem:[%s21578_s7 + $0x160] ss:$8 sps:$4 sm:$0xff]  }
 0x86e   : > { %13732 = vmatprep.subr.bf16.mxu0 %v15727_v18  ;;  %v15783_v18 = vld [vmem:[%s21578_s7 + $0xb4] ss:$8 sps:$4 sm:$0xff]  }
 0x86f   : > { %13703 = vmatpush3.bf16.msra.mxu1 %v15726_v37  ;;  %v15801_v37 = vld [vmem:[%s21578_s7 + $0x154] ss:$8 sps:$4 sm:$0xff]  }
 0x870   : > { %13704 = vmatprep.subr.bf16.mxu1 %v15729_v48  ;;  %v15781_v48 = vld [vmem:[%s21578_s7 + $0xb0] ss:$8 sps:$4 sm:$0xff]  }
 0x871   : > { %13733 = vmatpush3.bf16.msra.mxu0 %v15728_v14  ;;  %v15799_v14 = vld [vmem:[%s21578_s7 + $0x150] ss:$8 sps:$4 sm:$0xff]  }
 0x872   : > { %13734 = vmatprep.subr.bf16.mxu0 %v15731_v4  ;;  %v15786_v4 = vld [vmem:[%s21578_s7 + $0xa4] ss:$8 sps:$4 sm:$0xff]  }
 0x873   : > { %13705 = vmatpush3.bf16.msra.mxu1 %v15730_v51  ;;  %v15784_v51 = vld [vmem:[%s21578_s7 + $0xa0] ss:$8 sps:$4 sm:$0xff]  }
 0x874   : > { %13706 = vmatprep.subr.bf16.mxu1 %v15733_v59  ;;  %v15789_v59 = vld [vmem:[%s21578_s7 + $0x94] ss:$8 sps:$4 sm:$0xff]  }
 0x875   : > { %13735 = vmatpush3.bf16.msra.mxu0 %v15732_v49  ;;  %v15787_v49 = vld [vmem:[%s21578_s7 + $0x90] ss:$8 sps:$4 sm:$0xff]  }
 0x876   : > { %11787 = vmatprep.subr.bf16.mxu0 %v15795_v17 }
 0x877   : > { %13707 = vmatpush3.bf16.msra.mxu1 %v15734_v28  ;;  %v15802_v28 = vld [vmem:[%s21578_s7 + $0x140] ss:$8 sps:$4 sm:$0xff]  }
 0x878   : > { %11393 = vmatmul.mubr.bf16.vlgmr.msra.gmra.mxu0 %v20953_v24  ;;  %13708 = vmatprep.subr.bf16.mxu1 %v15735_v38  ;;  %v15740_v24 = vld [vmem:[%s21576_s5 + $0x608] ss:$12 sps:$4 sm:$0xff]   ;;  %v15804_v38 = vld [vmem:[%s21578_s7 + $0x144] ss:$8 sps:$4 sm:$0xff]  }
 0x879   : > { %11819 = vmatprep.mubr.bf16.mxu0 %v22215_v39  ;;  %11788 = vmatpush1.bf16.msra.mxu0 %v15793_v62 }
 0x87a   : > { %11789 = vmatprep.subr.bf16.mxu0 %v15798_v50 }
 0x87b   : > { %13709 = vmatpush3.bf16.msra.mxu1 %v15736_v42  ;;  %v15792_v42 = vld [vmem:[%s21578_s7 + $0x84] ss:$8 sps:$4 sm:$0xff]  }
 0x87c   : > { %13710 = vmatprep.subr.bf16.mxu1 %v15737_v7  ;;  %v15807_v7 = vld [vmem:[%s21578_s7 + $0x134] ss:$8 sps:$4 sm:$0xff]  }
 0x87d   : > { %11790 = vmatpush1.bf16.msra.mxu0 %v15796_v40 }
 0x87e   : > { %11791 = vmatprep.subr.bf16.mxu0 %v15801_v37 }
 0x87f   : > { %13711 = vmatpush3.bf16.msra.mxu1 %v15738_v61  ;;  %v15805_v61 = vld [vmem:[%s21578_s7 + $0x130] ss:$8 sps:$4 sm:$0xff]  }
 0x880   : > { %13712 = vmatprep.subr.bf16.mxu1 %v15739_v31  ;;  %v15790_v31 = vld [vmem:[%s21578_s7 + $0x80] ss:$8 sps:$4 sm:$0xff]  }
 0x881   : > { %11792 = vmatpush1.bf16.msra.mxu0 %v15799_v14 }
 0x882   : > { %11793 = vmatprep.subr.bf16.mxu0 %v15804_v38 }
 0x883   : > { %13713 = vmatpush3.bf16.msra.mxu1 %v15740_v24  ;;  %v15810_v24 = vld [vmem:[%s21578_s7 + $0x124] ss:$8 sps:$4 sm:$0xff]  }
 0x884   : > { %15053 = vmatprep.subr.bf16.mxu1 %v21708_v35 }
 0x885   : > { %11794 = vmatpush1.bf16.msra.mxu0 %v15802_v28 }
 0x886   : > { %11353 = vmatmul.mubr.bf16.vlgmr.msra.gmra.mxu1 %v20936_v0  ;;  %v15744_v0 = vld [vmem:[%s21576_s5 + $0x908] ss:$12 sps:$4 sm:$0xff]   ;;  %11795 = vmatprep.subr.bf16.mxu0 %v15807_v7 }
 0x887   : > { %15054 = vmatpush3.bf16.msra.mxu1 %v15741_v56  ;;  %15061 = vmatprep.mubr.msk.bf16.mxu1 %vm15930_vm0, %v21708_v35  ;;  %v15808_v56 = vld [vmem:[%s21578_s7 + $0x120] ss:$8 sps:$4 sm:$0xff]  }
 0x888   : > { %15055 = vmatprep.subr.bf16.mxu1 %v21708_v35 }
 0x889   : > { %11796 = vmatpush1.bf16.msra.mxu0 %v15805_v61 }
 0x88a   : > { %11797 = vmatprep.subr.bf16.mxu0 %v15810_v24 }
 0x88b   : > { %15056 = vmatpush3.bf16.msra.mxu1 %v15742_v26  ;;  %v15813_v26 = vld [vmem:[%s21578_s7 + $0x114] ss:$8 sps:$4 sm:$0xff]  }
 0x88c   : > { %15057 = vmatprep.subr.bf16.mxu1 %v21708_v35 }
 0x88d   : > { %11798 = vmatpush1.bf16.msra.mxu0 %v15808_v56 }
 0x88e   : > { %11799 = vmatprep.subr.bf16.mxu0 %v15813_v26 }
 0x88f   : > { %15058 = vmatpush3.bf16.msra.mxu1 %v15743_v57 }
 0x890   : > { %15059 = vmatprep.subr.bf16.mxu1 %v21708_v35 }
 0x893   : > { %15060 = vmatpush3.bf16.msra.mxu1 %v15744_v0  ;;  %v15811_v0 = vld [vmem:[%s21578_s7 + $0x110] ss:$8 sps:$4 sm:$0xff]  }
 0x894   : > { %11746 = vmatprep.subr.bf16.mxu1 %v15747_v58  ;;  %11800 = vmatpush1.bf16.msra.mxu0 %v15811_v0 }
 0x896   : > { %v10989_v60 = vpop.f32.mrf.mxu1  ;;  %15062 = vmatmul.mubr.msk.bf16.vlgmr.msra.gmra.mxu1 %vm1446_vm2, %v21004_v55 }
 0x897   : > { %v10990_v35 = vadd.f32 %v10989_v60, %v21186_v16  ;;  %11747 = vmatpush1.bf16.msra.mxu1 %v15745_v34 }
 0x898   : > { %v10991_v12 = vpop.f32.mrf.mxu1  ;;  %v11030_v43 = vpop.f32.mrf.mxu0  ;;  %11748 = vmatprep.subr.bf16.mxu1 %v15750_v47 }
 0x899   : > { %v10992_v21 = vadd.f32 %v10991_v12, %v21195_v36  ;;  %v21329_v32 = vadd.f32 %v11030_v43, %v10990_v35  ;;  %v15757_v36 = vld [vmem:[%s21578_s7 + $0x30] ss:$8 sps:$4 sm:$0xff]   ;;  %v15814_v35 = vld [vmem:[%s21578_s7 + $0x100] ss:$8 sps:$4 sm:$0xff]  }
 0x89a   : > { %v10993_v22 = vpop.f32.mrf.mxu1  ;;  %v11032_v55 = vpop.f32.mrf.mxu0 }
 0x89b   : > { %v21331_v44 = vadd.f32 %v11032_v55, %v10992_v21  ;;  %11749 = vmatpush1.bf16.msra.mxu1 %v15748_v45  ;;  %v15816_v45 = vld [vmem:[%s21578_s7 + $0x104] ss:$8 sps:$4 sm:$0xff]  }
 0x89c   : > { %v10994_v2 = vpop.f32.mrf.mxu1  ;;  %v11034_v16 = vpop.f32.mrf.mxu0  ;;  %11750 = vmatprep.subr.bf16.mxu1 %v15753_v41  ;;  %11801 = vmatprep.subr.bf16.mxu0 %v15816_v45 }
 0x89d   : > { %11802 = vmatpush1.bf16.msra.mxu0 %v15814_v35 }
 0x89e   : > { %v11035_v53 = vpop.f32.mrf.mxu0  ;;  %11932 = vmatprep.subr.bf16.mxu0 %v22215_v39 }
 0x89f   : > { %11751 = vmatpush1.bf16.msra.mxu1 %v15751_v9 }
 0x8a0   : > { %11752 = vmatprep.subr.bf16.mxu1 %v15756_v29 }
 0x8a3   : > { %11753 = vmatpush1.bf16.msra.mxu1 %v15754_v52 }
 0x8a4   : > { %11754 = vmatprep.subr.bf16.mxu1 %v15759_v27 }
 0x8a7   : > { %11755 = vmatpush1.bf16.msra.mxu1 %v15757_v36 }
 0x8a8   : > { %11756 = vmatprep.subr.bf16.mxu1 %v15762_v3 }
 0x8ab   : > { %11757 = vmatpush1.bf16.msra.mxu1 %v15760_v63 }
 0x8ac   : > { %11758 = vmatprep.subr.bf16.mxu1 %v15765_v5 }
 0x8af   : > { %11759 = vmatpush1.bf16.msra.mxu1 %v15763_v54 }
 0x8b0   : > { %11760 = vmatprep.subr.bf16.mxu1 %v15768_v6 }
 0x8b3   : > { %11761 = vmatpush1.bf16.msra.mxu1 %v15766_v20 }
 0x8b4   : > { %11762 = vmatprep.subr.bf16.mxu1 %v15771_v8 }
 0x8b7   : > { %11763 = vmatpush2.bf16.msra.mxu1 %v15769_v33 }
 0x8b8   : > { %11764 = vmatprep.subr.bf16.mxu1 %v15774_v11 }
 0x8bb   : > { %11765 = vmatpush2.bf16.msra.mxu1 %v15772_v23 }
 0x8bc   : > { %11766 = vmatprep.subr.bf16.mxu1 %v15777_v19 }
 0x8bf   : > { %11767 = vmatpush2.bf16.msra.mxu1 %v15775_v25 }
 0x8c0   : > { %11768 = vmatprep.subr.bf16.mxu1 %v15780_v1 }
 0x8c3   : > { %11769 = vmatpush2.bf16.msra.mxu1 %v15778_v15 }
 0x8c4   : > { %11770 = vmatprep.subr.bf16.mxu1 %v15783_v18 }
 0x8c7   : > { %11771 = vmatpush2.bf16.msra.mxu1 %v15781_v48 }
 0x8c8   : > { %11772 = vmatprep.subr.bf16.mxu1 %v15786_v4 }
 0x8cb   : > { %11773 = vmatpush2.bf16.msra.mxu1 %v15784_v51 }
 0x8cc   : > { %11774 = vmatprep.subr.bf16.mxu1 %v15789_v59 }
 0x8cf   : > { %11775 = vmatpush2.bf16.msra.mxu1 %v15787_v49 }
 0x8d0   : > { %11776 = vmatprep.subr.bf16.mxu1 %v15792_v42 }
 0x8d3   : > { %11777 = vmatpush2.bf16.msra.mxu1 %v15790_v31 }
 0x8d6   : > { %v11071_v57 = vpop.f32.mrf.mxu1 }
 0x8d7   : > { %v11072_v21 = vadd.f32 %v11071_v57, %v21329_v32 }
 0x8d8   : > { %v11073_v58 = vpop.f32.mrf.mxu1  ;;  %v11112_v34 = vpop.f32.mrf.mxu0 }
 0x8d9   : > { %v11074_v22 = vadd.f32 %v11073_v58, %v21331_v44  ;;  %v11113_v55 = vadd.f32 %v11112_v34, %v11072_v21  ;;  %v10865_v44 = vsub.s32 2, %v20136_v10  ;;  %v15818_v21 = vld [vmem:[%s21580_s9 + $0x30] sm:$0xff]   ;;  %v11856_v10 = vld [vmem:[%s21581_s10] sm:$0x1] }
 0x8da   : > { %v11075_v47 = vpop.f32.mrf.mxu1  ;;  %v11114_v60 = vpop.f32.mrf.mxu0 }
 0x8db   : > { %v11115_v2 = vadd.f32 %v11114_v60, %v11074_v22  ;;  %v10866_v11 = vrot.slane %v21152_v13, %v10865_v44  ;;  %v15819_v22 = vld [vmem:[%s21580_s9 + $0x28] sm:$0xff]  }
 0x8dc   : > { %v11076_v12 = vpop.f32.mrf.mxu1  ;;  %v11116_v43 = vpop.f32.mrf.mxu0 }
 0x8dd   : > { %v15817_v12 = vld [vmem:[%s21580_s9 + $0x38] sm:$0xff]  }
 0x8de   : > { %v11117_v41 = vpop.f32.mrf.mxu0 }
 0x8e6   : > { %v11153_v9 = vpop.f32.mrf.mxu1 }
 0x8e7   : > { %v11154_v16 = vadd.f32 %v11153_v9, %v11113_v55  ;;  %v15820_v55 = vld [vmem:[%s21580_s9 + $0x20] sm:$0xff]   ;;  %v15821_v9 = vld [vmem:[%s21580_s9 + $0x18] sm:$0xff]  }
 0x8e8   : > { %v11155_v29 = vpop.f32.mrf.mxu1 }
 0x8e9   : > { %v11156_v53 = vadd.f32 %v11155_v29, %v11115_v2  ;;  %v11440_v52 = vmax.f32 %v11154_v16, 0.0  ;;  %v15822_v2 = vld [vmem:[%s21580_s9 + $0x10] sm:$0xff]   ;;  %v15823_v16 = vld [vmem:[%s21580_s9 + $0x8] sm:$0xff]   ;;  %v15824_v29 = vld [vmem:[%s21580_s9] sm:$0xff]  }
 0x8ea   : > { %v11157_v27 = vpop.f32.mrf.mxu1 }
 0x8eb   : > { %v11441_v36 = vmax.f32 %v11156_v53, 0.0  ;;  %v11443_v5 = vpack.c.bf16 %v11440_v52, %v11440_v52  ;;  %v15825_v53 = vld [vmem:[%s21580_s9 + $0x58] sm:$0xff]   ;;  %v15826_v52 = vld [vmem:[%s21580_s9 + $0x50] sm:$0xff]   ;;  %v15827_v27 = vld [vmem:[%s21580_s9 + $0x48] sm:$0xff]  }
 0x8ec   : > { %v11158_v3 = vpop.f32.mrf.mxu1 }
 0x8ed   : > { %v11444_v63 = vpack.c.bf16 %v11441_v36, %v11441_v36  ;;  %v15828_v36 = vld [vmem:[%s21580_s9 + $0x40] sm:$0xff]  }
 0x8ef   : > { %11778 = vmatprep.mubr.bf16.mxu1 %v11444_v63 }
 0x8f0   : > { %11779 = vmatmul.mubr.bf16.vlgmr.msra.gmra.mxu1 %v11443_v5 }
 0x8f8   : > { %v13648_v54 = vpop.f32.mrf.mxu0 }
 0x8fa   : > { %v13649_v6 = vpop.f32.mrf.mxu0 }
 0x8fb   : > { %v13650_v20 = vadd.f32 %v13649_v6, %v13648_v54  ;;  %v11494_v6 = vld [vmem:[%s21579_s8] sm:$0x3] }
 0x8fc   : > { %v13651_v32 = vpop.f32.mrf.mxu0 }
 0x8fd   : > { %v11743_v32 = vrot.slane %v11494_v6, %v10861_v30 }
 0x8fe   : > { %v13652_v8 = vpop.f32.mrf.mxu0 }
 0x906   : > { %v13626_v33 = vpop.f32.mrf.mxu1 }
 0x908   : > { %v13627_v23 = vpop.f32.mrf.mxu1 }
 0x909   : > { %v13628_v19 = vadd.f32 %v13627_v23, %v13626_v33 }
 0x90a   : > { %v13629_v25 = vpop.f32.mrf.mxu1 }
 0x90b   : > { %v11195_v1 = vadd.f32 %v13628_v19, %v10866_v11 }
 0x90c   : > { %v13630_v62 = vpop.f32.mrf.mxu1 }
 0x90d   : > { %v11235_v17 = vadd.f32 %v13650_v20, %v11195_v1  ;;  %v11739_v20 = vrot.slane %v11494_v6, %v10857_v46 }
 0x918   : > { %v13692_v50 = vpop.f32.mrf.mxu0 }
 0x91a   : > { %v13693_v15 = vpop.f32.mrf.mxu0 }
 0x91b   : > { %v13694_v24 = vadd.f32 %v13693_v15, %v13692_v50 }
 0x91c   : > { %v13695_v40 = vpop.f32.mrf.mxu0 }
 0x91e   : > { %v13696_v18 = vpop.f32.mrf.mxu0 }
 0x926   : > { %v13670_v37 = vpop.f32.mrf.mxu1 }
 0x928   : > { %v13671_v48 = vpop.f32.mrf.mxu1 }
 0x929   : > { %v13672_v13 = vadd.f32 %v13671_v48, %v13670_v37 }
 0x92a   : > { %v13673_v14 = vpop.f32.mrf.mxu1 }
 0x92b   : > { %v11275_v61 = vadd.f32 %v13672_v13, %v11235_v17 }
 0x92c   : > { %v13674_v4 = vpop.f32.mrf.mxu1 }
 0x92d   : > { %v11315_v26 = vadd.f32 %v13694_v24, %v11275_v61 }
 0x938   : > { %v13736_v51 = vpop.f32.mrf.mxu0 }
 0x93a   : > { %v13737_v59 = vpop.f32.mrf.mxu0 }
 0x93b   : > { %v13738_v0 = vadd.f32 %v13737_v59, %v13736_v51 }
 0x93c   : > { %v13739_v49 = vpop.f32.mrf.mxu0 }
 0x93e   : > { %v13740_v28 = vpop.f32.mrf.mxu0 }
 0x946   : > { %v13714_v38 = vpop.f32.mrf.mxu1 }
 0x948   : > { %v13715_v42 = vpop.f32.mrf.mxu1 }
 0x949   : > { %v13716_v56 = vadd.f32 %v13715_v42, %v13714_v38 }
 0x94a   : > { %v13717_v7 = vpop.f32.mrf.mxu1 }
 0x94b   : > { %v11355_v57 = vadd.f32 %v13716_v56, %v11315_v26 }
 0x94c   : > { %v13718_v31 = vpop.f32.mrf.mxu1 }
 0x94d   : > { %v11395_v58 = vadd.f32 %v13738_v0, %v11355_v57 }
 0x956   : > { %v11434_v34 = vpop.f32.mrf.mxu1 }
 0x957   : > { %v11435_v47 = vadd.f32 %v11434_v34, %v11395_v58 }
 0x958   : > { %v15063_v60 = vpop.f32.mrf.mxu1 }
 0x959   : > { %v11442_v35 = vmax.f32 %v11435_v47, 0.0 }
 0x95a   : > { %v11437_v45 = vpop.f32.mrf.mxu1 }
 0x95b   : > { %v11445_v43 = vpack.c.bf16 %v11442_v35, %v11442_v35 }
 0x95c   : > { %v15064_v41 = vpop.f32.mrf.mxu1 }
 0x95d   : > { %11820 = vmatmul.mubr.bf16.vlgmr.msra.gmra.mxu0 %v11445_v43 }
 0x95e   : > { %11933 = vmatpush1.bf16.msra.mxu0 %v15817_v12 }
 0x95f   : > { %11934 = vmatprep.subr.bf16.mxu0 %v22215_v39 }
 0x962   : > { %11935 = vmatpush1.bf16.msra.mxu0 %v15818_v21 }
 0x963   : > { %11936 = vmatprep.subr.bf16.mxu0 %v22215_v39 }
 0x966   : > { %11937 = vmatpush1.bf16.msra.mxu0 %v15819_v22 }
 0x967   : > { %11938 = vmatprep.subr.bf16.mxu0 %v22215_v39 }
 0x96a   : > { %11939 = vmatpush1.bf16.msra.mxu0 %v15820_v55 }
 0x96b   : > { %11940 = vmatprep.subr.bf16.mxu0 %v22215_v39 }
 0x96e   : > { %11941 = vmatpush1.bf16.msra.mxu0 %v15821_v9 }
 0x96f   : > { %11942 = vmatprep.subr.bf16.mxu0 %v22215_v39 }
 0x972   : > { %11943 = vmatpush1.bf16.msra.mxu0 %v15822_v2 }
 0x973   : > { %11944 = vmatprep.subr.bf16.mxu0 %v22215_v39 }
 0x976   : > { %11945 = vmatpush1.bf16.msra.mxu0 %v15823_v16 }
 0x977   : > { %11946 = vmatprep.subr.bf16.mxu0 %v22215_v39 }
 0x97a   : > { %11947 = vmatpush1.bf16.msra.mxu0 %v15824_v29 }
 0x97b   : > { %11956 = vmatprep.subr.bf16.mxu0 %v22215_v39 }
 0x97e   : > { %11957 = vmatpush2.bf16.msra.mxu0 %v15825_v53 }
 0x97f   : > { %11958 = vmatprep.subr.bf16.mxu0 %v22215_v39 }
 0x982   : > { %11959 = vmatpush2.bf16.msra.mxu0 %v15826_v52 }
 0x983   : > { %11960 = vmatprep.subr.bf16.mxu0 %v22215_v39 }
 0x986   : > { %11961 = vmatpush2.bf16.msra.mxu0 %v15827_v27 }
 0x987   : > { %11962 = vmatprep.subr.bf16.mxu0 %v22215_v39 }
 0x98a   : > { %11963 = vmatpush2.bf16.msra.mxu0 %v15828_v36 }
 0x9b0   : > { %v11780_v3 = vpop.f32.mrf.mxu1 }
 0x9b1   : > { %v11781_v8 = vadd.f32 %v11780_v3, %v11739_v20 }
 0x9b2   : > { %v11782_v63 = vpop.f32.mrf.mxu1 }
 0x9b3   : > { %v11783_v39 = vadd.f32 %v11782_v63, %v11743_v32 }
 0x9b4   : > { %v11784_v5 = vpop.f32.mrf.mxu1 }
 0x9b6   : > { %v11785_v54 = vpop.f32.mrf.mxu1 }
 0xa1d   : > { %v11821_v44 = vpop.f32.mrf.mxu0 }
 0xa1e   : > { %v11822_v33 = vadd.f32 %v11821_v44, %v11781_v8 }
 0xa1f   : > { %v11823_v11 = vpop.f32.mrf.mxu0 }
 0xa20   : > { %v11824_v23 = vadd.f32 %v11823_v11, %v11783_v39  ;;  %v11828_v19 = vmax.f32 %v11822_v33, 0.0 }
 0xa21   : > { %v11825_v25 = vpop.f32.mrf.mxu0 }
 0xa22   : > { %v11829_v1 = vmax.f32 %v11824_v23, 0.0  ;;  %v11830_v50 = vpack.c.bf16 %v11828_v19, %v11828_v19 }
 0xa23   : > { %v11826_v62 = vpop.f32.mrf.mxu0 }
 0xa24   : > { %v11831_v17 = vpack.c.bf16 %v11829_v1, %v11829_v1 }
 0xa26   : > { %13195 = vmatprep.mubr.msk.bf16.mxu0 %vm1446_vm2, %v11831_v17 }
 0xa27   : > { %11965 = vmatmul.mubr.bf16.vlgmr.msra.gmra.mxu0 %v11830_v50 }
 0xae7   : > { %v11966_v46 = vpop.f32.mrf.mxu0 }
 0xae8   : > { %v11967_v30 = vadd.f32 %v11966_v46, %v11856_v10 }
 0xae9   : > { %v11968_v15 = vpop.f32.mrf.mxu0 }
 0xaea   : > { %11972 = vst [vmem:[%s378_s16] sm:$0x1] %v11967_v30 }
 0xaeb   : > { %v11969_v40 = vpop.f32.mrf.mxu0 }
 0xaec   : > { %15880 = shalt.err (!%p15877_p3)
}
 0xaed   : > { %s15881_s14 = scalar_lea.hbm %s21530_s13, 16  ;;  %s15885_s24 = scalar_lea.hbm %s21582_s11, 32 }
 0xaee   : > { %p15882_p4 = scmp.ne.s32.totalorder %s21530_s13, %s15881_s14  ;;  %p15886_p9 = scmp.lt.s32.totalorder %s21530_s13, %s21582_s11 }
 0xaef   : > { %p15887_p10 = scmp.lt.s32.totalorder %s15885_s24, %s15881_s14 }
 0xaf0   : > { %p15883_p7 = pnand %p15882_p4, %p16033_p5 }
 0xaf1   : > { %p15888_p11 = por %p15887_p10, %p15886_p9 }
 0xaf2   : > { %p15884_p8 = pneg %p15883_p7 }
 0xaf4   : > { %p15889_p12 = pnand %p15888_p11, %p15884_p8 }
 0xaf6   : > { %15892 = shalt.err (!%p15889_p12)
}
 0xaf7   : > { %15066 = dma.vmem_to_hbm [thread:$0]  (%p16033_p5), %s21532_s22, 16, %s21530_s13, %s11974_s25   ;;  %v11970_v18 = vpop.f32.mrf.mxu0 }
 0xaf8 PF: > { %p15072_p13 = scmp.ge.s32.totalorder %s15927_s20, 2  ;;  %s11998_s29 = sand.u32 1, %s15915_s17  }
 0xaf9   : > { %s11999_s0 = scalar_lea.sflag [#allocation8], %s11998_s29 }
 0xafa   : > { %p15069_p0 = pnand %p15072_p13, %p16037_p6 }
 0xafc   : > { %p15070_p1 = pneg %p15069_p0 }
 0xafe   : > { %15910 = dma.done.wait (%p15070_p1), %s11999_s0, 16  }
 0xaff   : > { %15912 = vsyncadd (%p15070_p1), %s11999_s0, 4294967280  ;;  %p21_p2 = scmp.ge.s32.totalorder %s16020_s23, 4   ;;  %s22216_s17 = smov %s15919_s18 }
 0xb00   : > { %s22217_s18 = smov %s15923_s19  ;;  %s22218_s19 = smov %s16031_s26 }
 0xb01   : > { %s22219_s20 = smov %s16020_s23  ;;  %23 = sbr.rel (!%p21_p2) target bundleno = 5 (0x5), region = 253 }
 0xb06   :  { %12003 = vsyncpa [#allocation8], 1 }
 0xb07   :  { %12005 = vsyncpa [#allocation8 + $0x1], 1 }

</bundles_post_ra>
